<compile_context>
chip_gen: v6e
topology: v6e:2x2x1
jax: 0.10.0
libtpu: 0.0.40
codegen_flags: <defaults>
</compile_context>

<pallas_src>
import functools

import jax
import jax.numpy as jnp
from jax.experimental import pallas as pl
from jax.experimental.pallas import tpu as pltpu

NZ = 8             # latent size used for the demo (module arg `nz`)
HIDDEN = 1000      # hard-coded in the PyTorch constructor
HIDDEN_PAD = 1024  # lane-dense padding of the hidden dim (done once at init)
OUT_PAD = 128      # lane-dense padding of the output head (done once at init)


# ------------------------------ Pallas kernel -------------------------------

def _aux_kernel(z_ref, w1_ref, b1_ref, w2_ref, b2_ref, w3_ref, b3_ref, o_ref,
                *, num_labels):
    """Fused 3-layer MLP forward. bf16 weights, f32 accumulation/epilogue."""
    # layer 1: (TM, nz) @ (nz, Hpad) -> lane-dense (TM, Hpad)
    h = jnp.dot(z_ref[...].astype(jnp.bfloat16), w1_ref[...],
                preferred_element_type=jnp.float32)
    h = jnp.maximum(h + b1_ref[...], 0.0)
    # layer 2: (TM, Hpad) @ (Hpad, Hpad)
    h = jnp.dot(h.astype(jnp.bfloat16), w2_ref[...],
                preferred_element_type=jnp.float32)
    h = jnp.maximum(h + b2_ref[...], 0.0)
    # layer 3 (128 lane-dense output columns) + output nonlinearity (f32)
    y = jnp.dot(h.astype(jnp.bfloat16), w3_ref[...],
                preferred_element_type=jnp.float32) + b3_ref[...]
    if num_labels == 1:
        o_ref[...] = jax.nn.sigmoid(y)          # F.sigmoid; padded lanes -> 0
    else:
        m = jnp.max(y, axis=-1, keepdims=True)  # F.softmax(dim=1)
        e = jnp.exp(y - m)                      # padded lanes (-1e30) -> exactly 0
        o_ref[...] = e / jnp.sum(e, axis=-1, keepdims=True)  # exact divide


# --------------------------------- wrapper -----------------------------------

def aux_forward(params, z, num_labels, *, block_m=512):
    """Runs the whole AUX forward in one pallas_call. z: (B, nz) float32."""
    w1, b1 = params["w1"], params["b1"]
    w2, b2 = params["w2"], params["b2"]
    w3, b3 = params["w3"], params["b3"]
    hpad = w1.shape[1]
    out_pad = w3.shape[1]

    z = z.astype(jnp.float32)
    B, nz = z.shape

    # Tile the batch (rows) dimension; weights are re-used by every tile.
    if B <= block_m:
        tm, b_pad = B, B
    else:
        tm = block_m
        b_pad = pl.cdiv(B, tm) * tm
        if b_pad != B:
            z = jnp.pad(z, ((0, b_pad - B), (0, 0)))
    num_tiles = b_pad // tm

    # Only megacore-split the row grid when compute dominates the constant
    # weight DMA; otherwise a v7x split doubles the w2 HBM read for no gain.
    semantics = ("parallel",) if num_tiles >= 8 else ("arbitrary",)

    kernel = functools.partial(_aux_kernel, num_labels=num_labels)

    def run(single_buffer_weights):
        if single_buffer_weights:
            # Grid-invariant blocks: one VMEM buffer is enough.
            def const_spec(shape):
                return pl.BlockSpec(shape, lambda i: (0, 0),
                                    pipeline_mode=pl.Buffered(1))
        else:
            def const_spec(shape):
                return pl.BlockSpec(shape, lambda i: (0, 0))
        return pl.pallas_call(
            kernel,
            grid=(num_tiles,),
            in_specs=[
                pl.BlockSpec((tm, nz), lambda i: (i, 0)),  # z rows
                const_spec((nz, hpad)),                    # w1 (bf16)
                const_spec((1, hpad)),                     # b1 (f32)
                const_spec((hpad, hpad)),                  # w2 (bf16)
                const_spec((1, hpad)),                     # b2 (f32)
                const_spec((hpad, out_pad)),               # w3 (bf16)
                const_spec((1, out_pad)),                  # b3 (f32)
            ],
            out_specs=pl.BlockSpec((tm, out_pad), lambda i: (i, 0)),
            out_shape=jax.ShapeDtypeStruct((b_pad, out_pad), jnp.float32),
            compiler_params=pltpu.CompilerParams(
                dimension_semantics=semantics),
        )(z, w1, b1, w2, b2, w3, b3)

    try:
        out = run(single_buffer_weights=True)
    except Exception:
        # Fallback for jax versions where BlockSpec pipeline_mode is not
        # supported by the TPU pallas_call pipeline.
        out = run(single_buffer_weights=False)
    return out[:B, :num_labels]


# ------------------------------- parameters ---------------------------------

def init_params(key, *, nz=NZ, num_labels=2, hidden=HIDDEN,
                hidden_pad=HIDDEN_PAD, out_pad=OUT_PAD):
    """PyTorch nn.Linear default init: U(-1/sqrt(fan_in), 1/sqrt(fan_in)).

    Weights are stored pre-transposed (in, out), zero-padded along the hidden
    dim (inert: padded units have zero weights/bias, relu(0)=0, zero fan-out),
    padded to 128 output lanes, and cast to bfloat16 once at init.  Padded
    output logits get a -1e30 bias so they vanish under softmax/sigmoid.
    """
    assert num_labels <= out_pad
    ks = jax.random.split(key, 6)

    def u(k, shape, fan_in):
        bound = float(fan_in) ** -0.5
        return jax.random.uniform(k, shape, jnp.float32, -bound, bound)

    w1 = u(ks[0], (nz, hidden), nz)
    b1 = u(ks[1], (hidden,), nz)
    w2 = u(ks[2], (hidden, hidden), hidden)
    b2 = u(ks[3], (hidden,), hidden)
    w3 = u(ks[4], (hidden, num_labels), hidden)
    b3 = u(ks[5], (num_labels,), hidden)

    ph = hidden_pad - hidden
    po = out_pad - num_labels
    return {
        "w1": jnp.pad(w1, ((0, 0), (0, ph))).astype(jnp.bfloat16),
        "b1": jnp.pad(b1, ((0, ph),)).reshape(1, hidden_pad),
        "w2": jnp.pad(w2, ((0, ph), (0, ph))).astype(jnp.bfloat16),
        "b2": jnp.pad(b2, ((0, ph),)).reshape(1, hidden_pad),
        "w3": jnp.pad(w3, ((0, ph), (0, po))).astype(jnp.bfloat16),
        "b3": jnp.pad(b3, ((0, po),), constant_values=-1e30).reshape(1, out_pad),
    }


# TODO(synk): AUX.loss (F.nll_loss) and save_params/load_params (file I/O) are
# training/serialization utilities, not part of the forward pass; not ported.


def _reference(params, z, num_labels):
    """Pure-jnp reference with the same bf16 weight/activation rounding."""
    f32 = jnp.float32
    bf = lambda a: a.astype(jnp.bfloat16).astype(f32)
    h = jnp.maximum(bf(z) @ params["w1"].astype(f32) + params["b1"], 0.0)
    h = jnp.maximum(bf(h) @ params["w2"].astype(f32) + params["b2"], 0.0)
    y = bf(h) @ params["w3"].astype(f32) + params["b3"]
    out = jax.nn.sigmoid(y) if num_labels == 1 else jax.nn.softmax(y, axis=-1)
    return out[:, :num_labels]


if __name__ == "__main__":
    key = jax.random.PRNGKey(0)
    kp_multi, kp_bin, kz = jax.random.split(key, 3)

    B = 2
    z = jax.random.normal(kz, (B, NZ), jnp.float32)

    # numLabels > 1 -> softmax head
    params_multi = init_params(kp_multi, num_labels=2)
    y_multi = aux_forward(params_multi, z, num_labels=2)

    # numLabels == 1 -> sigmoid head (module default)
    params_bin = init_params(kp_bin, num_labels=1)
    y_bin = aux_forward(params_bin, z, num_labels=1)

    jax.block_until_ready((y_multi, y_bin))

    assert y_multi.shape == (B, 2)
    assert y_bin.shape == (B, 1)
    assert bool(jnp.all(jnp.isfinite(y_multi))) and bool(jnp.all(jnp.isfinite(y_bin)))
    # exact-divide softmax: rows sum to ~1 tightly
    assert bool(jnp.all(jnp.abs(jnp.sum(y_multi, axis=1) - 1.0) < 1e-5))
    # sigmoid output in (0, 1)
    assert bool(jnp.all((y_bin > 0.0) & (y_bin < 1.0)))
    # numeric check against a plain-jnp reference using the same bf16 weights
    assert float(jnp.max(jnp.abs(y_multi - _reference(params_multi, z, 2)))) < 1e-3
    assert float(jnp.max(jnp.abs(y_bin - _reference(params_bin, z, 1)))) < 1e-3
    print("KERNEL_OK")
</pallas_src>

<mosaic_0001>
module attributes {stable_mosaic.version = 11 : i64} {
  func.func @_aux_kernel(%arg0: i32, %arg1: memref<2x8xf32, #tpu.memory_space<vmem>>, %arg2: memref<8x1024xbf16, #tpu.memory_space<vmem>>, %arg3: memref<1x1024xf32, #tpu.memory_space<vmem>>, %arg4: memref<1024x1024xbf16, #tpu.memory_space<vmem>>, %arg5: memref<1x1024xf32, #tpu.memory_space<vmem>>, %arg6: memref<1024x128xbf16, #tpu.memory_space<vmem>>, %arg7: memref<1x128xf32, #tpu.memory_space<vmem>>, %arg8: memref<2x128xf32, #tpu.memory_space<vmem>>) attributes {dimension_semantics = [#tpu.dimension_semantics<arbitrary>], iteration_bounds = array<i64: 1>, scalar_prefetch = 0 : i64, scratch_operands = 0 : i64, tpu.core_type = #tpu.core_type<tc>, window_params = [{transform_indices = @transform_0, window_bounds = array<i64: 2, 8>}, {pipeline_mode = #tpu.pipeline_mode<synchronous>, transform_indices = @transform_1, window_bounds = array<i64: 8, 1024>}, {pipeline_mode = #tpu.pipeline_mode<synchronous>, transform_indices = @transform_2, window_bounds = array<i64: 1, 1024>}, {pipeline_mode = #tpu.pipeline_mode<synchronous>, transform_indices = @transform_3, window_bounds = array<i64: 1024, 1024>}, {pipeline_mode = #tpu.pipeline_mode<synchronous>, transform_indices = @transform_4, window_bounds = array<i64: 1, 1024>}, {pipeline_mode = #tpu.pipeline_mode<synchronous>, transform_indices = @transform_5, window_bounds = array<i64: 1024, 128>}, {pipeline_mode = #tpu.pipeline_mode<synchronous>, transform_indices = @transform_6, window_bounds = array<i64: 1, 128>}, {transform_indices = @transform_7, window_bounds = array<i64: 2, 128>}]} {
    %c0 = arith.constant 0 : index
    %c0_0 = arith.constant 0 : index
    %0 = vector.load %arg1[%c0, %c0_0] : memref<2x8xf32, #tpu.memory_space<vmem>>, vector<2x8xf32>
    %1 = arith.truncf %0 : vector<2x8xf32> to vector<2x8xbf16>
    %c0_1 = arith.constant 0 : index
    %c0_2 = arith.constant 0 : index
    %2 = vector.load %arg2[%c0_1, %c0_2] : memref<8x1024xbf16, #tpu.memory_space<vmem>>, vector<8x1024xbf16>
    %cst = arith.constant dense<0.000000e+00> : vector<2x1024xf32>
    %3 = tpu.matmul %1, %2, %cst {dimension_numbers = #tpu.dot_dimension_numbers<[1], [0], [0], [1], [0, 0, 1, 1], [], []>} : vector<2x8xbf16>, vector<8x1024xbf16>, vector<2x1024xf32> -> vector<2x1024xf32>
    %c0_3 = arith.constant 0 : index
    %c0_4 = arith.constant 0 : index
    %4 = vector.load %arg3[%c0_3, %c0_4] : memref<1x1024xf32, #tpu.memory_space<vmem>>, vector<1x1024xf32>
    %5 = vector.broadcast %4 : vector<1x1024xf32> to vector<2x1024xf32>
    %6 = arith.addf %3, %5 : vector<2x1024xf32>
    %cst_5 = arith.constant 0.000000e+00 : f32
    %7 = vector.broadcast %cst_5 : f32 to vector<2x1024xf32>
    %8 = arith.maximumf %6, %7 : vector<2x1024xf32>
    %9 = arith.truncf %8 : vector<2x1024xf32> to vector<2x1024xbf16>
    %c0_6 = arith.constant 0 : index
    %c0_7 = arith.constant 0 : index
    %10 = vector.load %arg4[%c0_6, %c0_7] : memref<1024x1024xbf16, #tpu.memory_space<vmem>>, vector<1024x1024xbf16>
    %cst_8 = arith.constant dense<0.000000e+00> : vector<2x1024xf32>
    %11 = tpu.matmul %9, %10, %cst_8 {dimension_numbers = #tpu.dot_dimension_numbers<[1], [0], [0], [1], [0, 0, 1, 1], [], []>} : vector<2x1024xbf16>, vector<1024x1024xbf16>, vector<2x1024xf32> -> vector<2x1024xf32>
    %c0_9 = arith.constant 0 : index
    %c0_10 = arith.constant 0 : index
    %12 = vector.load %arg5[%c0_9, %c0_10] : memref<1x1024xf32, #tpu.memory_space<vmem>>, vector<1x1024xf32>
    %13 = vector.broadcast %12 : vector<1x1024xf32> to vector<2x1024xf32>
    %14 = arith.addf %11, %13 : vector<2x1024xf32>
    %cst_11 = arith.constant 0.000000e+00 : f32
    %15 = vector.broadcast %cst_11 : f32 to vector<2x1024xf32>
    %16 = arith.maximumf %14, %15 : vector<2x1024xf32>
    %17 = arith.truncf %16 : vector<2x1024xf32> to vector<2x1024xbf16>
    %c0_12 = arith.constant 0 : index
    %c0_13 = arith.constant 0 : index
    %18 = vector.load %arg6[%c0_12, %c0_13] : memref<1024x128xbf16, #tpu.memory_space<vmem>>, vector<1024x128xbf16>
    %cst_14 = arith.constant dense<0.000000e+00> : vector<2x128xf32>
    %19 = tpu.matmul %17, %18, %cst_14 {dimension_numbers = #tpu.dot_dimension_numbers<[1], [0], [0], [1], [0, 0, 1, 1], [], []>} : vector<2x1024xbf16>, vector<1024x128xbf16>, vector<2x128xf32> -> vector<2x128xf32>
    %c0_15 = arith.constant 0 : index
    %c0_16 = arith.constant 0 : index
    %20 = vector.load %arg7[%c0_15, %c0_16] : memref<1x128xf32, #tpu.memory_space<vmem>>, vector<1x128xf32>
    %21 = vector.broadcast %20 : vector<1x128xf32> to vector<2x128xf32>
    %22 = arith.addf %19, %21 : vector<2x128xf32>
    %cst_17 = arith.constant dense<0xFF800000> : vector<2xf32>
    %23 = vector.multi_reduction <maximumf>, %22, %cst_17 [1] : vector<2x128xf32> to vector<2xf32>
    %24 = vector.shape_cast %23 : vector<2xf32> to vector<2x1xf32>
    %25 = vector.broadcast %24 : vector<2x1xf32> to vector<2x128xf32>
    %26 = arith.subf %22, %25 : vector<2x128xf32>
    %27 = math.exp %26 : vector<2x128xf32>
    %cst_18 = arith.constant dense<0.000000e+00> : vector<2xf32>
    %28 = vector.multi_reduction <add>, %27, %cst_18 [1] : vector<2x128xf32> to vector<2xf32>
    %29 = vector.shape_cast %28 : vector<2xf32> to vector<2x1xf32>
    %30 = vector.broadcast %29 : vector<2x1xf32> to vector<2x128xf32>
    %31 = arith.divf %27, %30 : vector<2x128xf32>
    %c0_19 = arith.constant 0 : index
    %c0_20 = arith.constant 0 : index
    %32 = vector.load %arg8[%c0_19, %c0_20] : memref<2x128xf32, #tpu.memory_space<vmem>>, vector<2x128xf32>
    tpu.vector_store %arg8[%c0_19, %c0_20], %31 {strides = array<i32>} : memref<2x128xf32, #tpu.memory_space<vmem>>, vector<2x128xf32>,
    return
  }
  func.func @transform_0(%arg0: i32) -> (i32, i32) {
    %c0_i32 = arith.constant 0 : i32
    %c0_i32_0 = arith.constant 0 : i32
    return %arg0, %c0_i32 : i32, i32
  }
  func.func @transform_1(%arg0: i32) -> (i32, i32) {
    %c0_i32 = arith.constant 0 : i32
    %c0_i32_0 = arith.constant 0 : i32
    %c0_i32_1 = arith.constant 0 : i32
    return %c0_i32, %c0_i32_0 : i32, i32
  }
  func.func @transform_2(%arg0: i32) -> (i32, i32) {
    %c0_i32 = arith.constant 0 : i32
    %c0_i32_0 = arith.constant 0 : i32
    %c0_i32_1 = arith.constant 0 : i32
    return %c0_i32, %c0_i32_0 : i32, i32
  }
  func.func @transform_3(%arg0: i32) -> (i32, i32) {
    %c0_i32 = arith.constant 0 : i32
    %c0_i32_0 = arith.constant 0 : i32
    %c0_i32_1 = arith.constant 0 : i32
    return %c0_i32, %c0_i32_0 : i32, i32
  }
  func.func @transform_4(%arg0: i32) -> (i32, i32) {
    %c0_i32 = arith.constant 0 : i32
    %c0_i32_0 = arith.constant 0 : i32
    %c0_i32_1 = arith.constant 0 : i32
    return %c0_i32, %c0_i32_0 : i32, i32
  }
  func.func @transform_5(%arg0: i32) -> (i32, i32) {
    %c0_i32 = arith.constant 0 : i32
    %c0_i32_0 = arith.constant 0 : i32
    %c0_i32_1 = arith.constant 0 : i32
    return %c0_i32, %c0_i32_0 : i32, i32
  }
  func.func @transform_6(%arg0: i32) -> (i32, i32) {
    %c0_i32 = arith.constant 0 : i32
    %c0_i32_0 = arith.constant 0 : i32
    %c0_i32_1 = arith.constant 0 : i32
    return %c0_i32, %c0_i32_0 : i32, i32
  }
  func.func @transform_7(%arg0: i32) -> (i32, i32) {
    %c0_i32 = arith.constant 0 : i32
    %c0_i32_0 = arith.constant 0 : i32
    return %arg0, %c0_i32 : i32, i32
  }
}

module attributes {stable_mosaic.version = 11 : i64} {
  func.func @_aux_kernel(%arg0: i32, %arg1: memref<2x8xf32, #tpu.memory_space<vmem>>, %arg2: memref<8x1024xbf16, #tpu.memory_space<vmem>>, %arg3: memref<1x1024xf32, #tpu.memory_space<vmem>>, %arg4: memref<1024x1024xbf16, #tpu.memory_space<vmem>>, %arg5: memref<1x1024xf32, #tpu.memory_space<vmem>>, %arg6: memref<1024x128xbf16, #tpu.memory_space<vmem>>, %arg7: memref<1x128xf32, #tpu.memory_space<vmem>>, %arg8: memref<2x128xf32, #tpu.memory_space<vmem>>) attributes {dimension_semantics = [#tpu.dimension_semantics<arbitrary>], iteration_bounds = array<i64: 1>, scalar_prefetch = 0 : i64, scratch_operands = 0 : i64, tpu.core_type = #tpu.core_type<tc>, window_params = [{transform_indices = @transform_0, window_bounds = array<i64: 2, 8>}, {pipeline_mode = #tpu.pipeline_mode<synchronous>, transform_indices = @transform_1, window_bounds = array<i64: 8, 1024>}, {pipeline_mode = #tpu.pipeline_mode<synchronous>, transform_indices = @transform_2, window_bounds = array<i64: 1, 1024>}, {pipeline_mode = #tpu.pipeline_mode<synchronous>, transform_indices = @transform_3, window_bounds = array<i64: 1024, 1024>}, {pipeline_mode = #tpu.pipeline_mode<synchronous>, transform_indices = @transform_4, window_bounds = array<i64: 1, 1024>}, {pipeline_mode = #tpu.pipeline_mode<synchronous>, transform_indices = @transform_5, window_bounds = array<i64: 1024, 128>}, {pipeline_mode = #tpu.pipeline_mode<synchronous>, transform_indices = @transform_6, window_bounds = array<i64: 1, 128>}, {transform_indices = @transform_7, window_bounds = array<i64: 2, 128>}]} {
    %c0 = arith.constant 0 : index
    %c0_0 = arith.constant 0 : index
    %0 = vector.load %arg1[%c0, %c0_0] : memref<2x8xf32, #tpu.memory_space<vmem>>, vector<2x8xf32>
    %1 = arith.truncf %0 : vector<2x8xf32> to vector<2x8xbf16>
    %c0_1 = arith.constant 0 : index
    %c0_2 = arith.constant 0 : index
    %2 = vector.load %arg2[%c0_1, %c0_2] : memref<8x1024xbf16, #tpu.memory_space<vmem>>, vector<8x1024xbf16>
    %cst = arith.constant dense<0.000000e+00> : vector<2x1024xf32>
    %3 = tpu.matmul %1, %2, %cst {dimension_numbers = #tpu.dot_dimension_numbers<[1], [0], [0], [1], [0, 0, 1, 1], [], []>} : vector<2x8xbf16>, vector<8x1024xbf16>, vector<2x1024xf32> -> vector<2x1024xf32>
    %c0_3 = arith.constant 0 : index
    %c0_4 = arith.constant 0 : index
    %4 = vector.load %arg3[%c0_3, %c0_4] : memref<1x1024xf32, #tpu.memory_space<vmem>>, vector<1x1024xf32>
    %5 = vector.broadcast %4 : vector<1x1024xf32> to vector<2x1024xf32>
    %6 = arith.addf %3, %5 : vector<2x1024xf32>
    %cst_5 = arith.constant 0.000000e+00 : f32
    %7 = vector.broadcast %cst_5 : f32 to vector<2x1024xf32>
    %8 = arith.maximumf %6, %7 : vector<2x1024xf32>
    %9 = arith.truncf %8 : vector<2x1024xf32> to vector<2x1024xbf16>
    %c0_6 = arith.constant 0 : index
    %c0_7 = arith.constant 0 : index
    %10 = vector.load %arg4[%c0_6, %c0_7] : memref<1024x1024xbf16, #tpu.memory_space<vmem>>, vector<1024x1024xbf16>
    %cst_8 = arith.constant dense<0.000000e+00> : vector<2x1024xf32>
    %11 = tpu.matmul %9, %10, %cst_8 {dimension_numbers = #tpu.dot_dimension_numbers<[1], [0], [0], [1], [0, 0, 1, 1], [], []>} : vector<2x1024xbf16>, vector<1024x1024xbf16>, vector<2x1024xf32> -> vector<2x1024xf32>
    %c0_9 = arith.constant 0 : index
    %c0_10 = arith.constant 0 : index
    %12 = vector.load %arg5[%c0_9, %c0_10] : memref<1x1024xf32, #tpu.memory_space<vmem>>, vector<1x1024xf32>
    %13 = vector.broadcast %12 : vector<1x1024xf32> to vector<2x1024xf32>
    %14 = arith.addf %11, %13 : vector<2x1024xf32>
    %cst_11 = arith.constant 0.000000e+00 : f32
    %15 = vector.broadcast %cst_11 : f32 to vector<2x1024xf32>
    %16 = arith.maximumf %14, %15 : vector<2x1024xf32>
    %17 = arith.truncf %16 : vector<2x1024xf32> to vector<2x1024xbf16>
    %c0_12 = arith.constant 0 : index
    %c0_13 = arith.constant 0 : index
    %18 = vector.load %arg6[%c0_12, %c0_13] : memref<1024x128xbf16, #tpu.memory_space<vmem>>, vector<1024x128xbf16>
    %cst_14 = arith.constant dense<0.000000e+00> : vector<2x128xf32>
    %19 = tpu.matmul %17, %18, %cst_14 {dimension_numbers = #tpu.dot_dimension_numbers<[1], [0], [0], [1], [0, 0, 1, 1], [], []>} : vector<2x1024xbf16>, vector<1024x128xbf16>, vector<2x128xf32> -> vector<2x128xf32>
    %c0_15 = arith.constant 0 : index
    %c0_16 = arith.constant 0 : index
    %20 = vector.load %arg7[%c0_15, %c0_16] : memref<1x128xf32, #tpu.memory_space<vmem>>, vector<1x128xf32>
    %21 = vector.broadcast %20 : vector<1x128xf32> to vector<2x128xf32>
    %22 = arith.addf %19, %21 : vector<2x128xf32>
    %cst_17 = arith.constant dense<0xFF800000> : vector<2xf32>
    %23 = vector.multi_reduction <maximumf>, %22, %cst_17 [1] : vector<2x128xf32> to vector<2xf32>
    %24 = vector.shape_cast %23 : vector<2xf32> to vector<2x1xf32>
    %25 = vector.broadcast %24 : vector<2x1xf32> to vector<2x128xf32>
    %26 = arith.subf %22, %25 : vector<2x128xf32>
    %27 = math.exp %26 : vector<2x128xf32>
    %cst_18 = arith.constant dense<0.000000e+00> : vector<2xf32>
    %28 = vector.multi_reduction <add>, %27, %cst_18 [1] : vector<2x128xf32> to vector<2xf32>
    %29 = vector.shape_cast %28 : vector<2xf32> to vector<2x1xf32>
    %30 = vector.broadcast %29 : vector<2x1xf32> to vector<2x128xf32>
    %31 = arith.divf %27, %30 : vector<2x128xf32>
    %c0_19 = arith.constant 0 : index
    %c0_20 = arith.constant 0 : index
    %32 = vector.load %arg8[%c0_19, %c0_20] : memref<2x128xf32, #tpu.memory_space<vmem>>, vector<2x128xf32>
    tpu.vector_store %arg8[%c0_19, %c0_20], %31 {strides = array<i32>} : memref<2x128xf32, #tpu.memory_space<vmem>>, vector<2x128xf32>,
    return
  }
  func.func @transform_0(%arg0: i32) -> (i32, i32) {
    %c0_i32 = arith.constant 0 : i32
    %c0_i32_0 = arith.constant 0 : i32
    return %arg0, %c0_i32 : i32, i32
  }
  func.func @transform_1(%arg0: i32) -> (i32, i32) {
    %c0_i32 = arith.constant 0 : i32
    %c0_i32_0 = arith.constant 0 : i32
    %c0_i32_1 = arith.constant 0 : i32
    return %c0_i32, %c0_i32_0 : i32, i32
  }
  func.func @transform_2(%arg0: i32) -> (i32, i32) {
    %c0_i32 = arith.constant 0 : i32
    %c0_i32_0 = arith.constant 0 : i32
    %c0_i32_1 = arith.constant 0 : i32
    return %c0_i32, %c0_i32_0 : i32, i32
  }
  func.func @transform_3(%arg0: i32) -> (i32, i32) {
    %c0_i32 = arith.constant 0 : i32
    %c0_i32_0 = arith.constant 0 : i32
    %c0_i32_1 = arith.constant 0 : i32
    return %c0_i32, %c0_i32_0 : i32, i32
  }
  func.func @transform_4(%arg0: i32) -> (i32, i32) {
    %c0_i32 = arith.constant 0 : i32
    %c0_i32_0 = arith.constant 0 : i32
    %c0_i32_1 = arith.constant 0 : i32
    return %c0_i32, %c0_i32_0 : i32, i32
  }
  func.func @transform_5(%arg0: i32) -> (i32, i32) {
    %c0_i32 = arith.constant 0 : i32
    %c0_i32_0 = arith.constant 0 : i32
    %c0_i32_1 = arith.constant 0 : i32
    return %c0_i32, %c0_i32_0 : i32, i32
  }
  func.func @transform_6(%arg0: i32) -> (i32, i32) {
    %c0_i32 = arith.constant 0 : i32
    %c0_i32_0 = arith.constant 0 : i32
    %c0_i32_1 = arith.constant 0 : i32
    return %c0_i32, %c0_i32_0 : i32, i32
  }
  func.func @transform_7(%arg0: i32) -> (i32, i32) {
    %c0_i32 = arith.constant 0 : i32
    %c0_i32_0 = arith.constant 0 : i32
    return %arg0, %c0_i32 : i32, i32
  }
}

</mosaic_0001>

<bundles_post_ra>
// kernel: tpu_custom_call.1
= control target key start
LH: loop header
LB: loop body
LE: loop exit
PB: predicated region body
PF: predicated region fallthrough
CT: control target
= control target key end

     0   :  { %12 = vsyncpa [#allocation3], 0  ;;  %s6079_s0 = inlined_call_operand.hbm [shape: f32[2,8], index: 0, kind: input, shape index: {}]   ;;  %s6080_s1 = inlined_call_operand.hbm [shape: bf16[8,1024], index: 1, kind: input, shape index: {}]   ;;  %s6081_s2 = inlined_call_operand.hbm [shape: f32[1,1024], index: 2, kind: input, shape index: {}]   ;;  %s6082_s3 = inlined_call_operand.hbm [shape: bf16[1024,1024], index: 3, kind: input, shape index: {}]   ;;  %s6083_s4 = inlined_call_operand.hbm [shape: f32[1,1024], index: 4, kind: input, shape index: {}]   ;;  %s6084_s5 = inlined_call_operand.hbm [shape: bf16[1024,128], index: 5, kind: input, shape index: {}]   ;;  %s6085_s6 = inlined_call_operand.hbm [shape: f32[1,128], index: 6, kind: input, shape index: {}]   ;;  %s6086_s7 = inlined_call_operand.hbm [shape: f32[2,128], index: 7, kind: output, shape index: {}]  }
   0x1   :  { %13 = vsyncpa [#allocation6], 0 }
   0x2   :  { %14 = vsyncpa [#allocation9], 0 }
   0x3   :  { %15 = vsyncpa [#allocation12], 0 }
   0x4   :  { %16 = vsyncpa [#allocation4], 0  ;;  %s5827_s24 = smov [#allocation5]   ;;  %s5828_s26 = smov [#allocation8]  }
   0x5   :  { %s33_s25 = sshll.u32 %s5827_s24, 4  ;;  %s52_s27 = sshll.u32 %s5828_s26, 4  ;;  %s34_s25 = int_to_ptr.vmem [resolvable:$true] %s33_s25  ;;  %s53_s27 = int_to_ptr.vmem [resolvable:$true] %s52_s27 }
   0x6   :  { %s5665_s28 = scalar_lea.vmem %s34_s25, 512  ;;  %p5670_p1 = scmp.lt.s32.totalorder %s34_s25, %s34_s25 }
   0x7   :  { %p5666_p0 = scmp.ne.s32.totalorder %s34_s25, %s5665_s28  ;;  %p5671_p2 = scmp.lt.s32.totalorder %s5665_s28, %s5665_s28 }
   0x9   :  { %p5672_p3 = por %p5671_p2, %p5670_p1 }
   0xb   :  { %p5673_p4 = pnand %p5672_p3, %p5666_p0 }
   0xd   :  { %5676 = shalt.err (!%p5673_p4)
}
   0xe   :  { %36 = dma.hbm_to_vmem [thread:$0]  %s6080_s1, 512, %s34_s25, [#allocation6]  }
   0xf   :  { %s5685_s8 = scalar_lea.vmem %s53_s27, 65536  ;;  %p5690_p6 = scmp.lt.s32.totalorder %s53_s27, %s53_s27 }
  0x10   :  { %p5686_p5 = scmp.ne.s32.totalorder %s53_s27, %s5685_s8  ;;  %p5691_p7 = scmp.lt.s32.totalorder %s5685_s8, %s5685_s8 }
  0x12   :  { %p5692_p8 = por %p5691_p7, %p5690_p6 }
  0x14   :  { %p5693_p9 = pnand %p5692_p8, %p5686_p5 }
  0x16   :  { %5696 = shalt.err (!%p5693_p9)
}
  0x17   :  { %s5829_s9 = smov 512   ;;  %s5830_s10 = smov 32  }
  0x18   :  { %58 = dma.hbm_to_vmem [thread:$0]  %s6082_s3, 65536, %s53_s27, [#allocation9], %s5829_s9, %s5829_s9, %s5830_s10  }
  0x19   :  { %s5831_s13 = smov [#allocation11]  }
  0x1a   :  { %s74_s14 = sshll.u32 %s5831_s13, 4  ;;  %s75_s14 = int_to_ptr.vmem [resolvable:$true] %s74_s14 }
  0x1b   :  { %s5705_s15 = scalar_lea.vmem %s75_s14, 8192  ;;  %p5710_p11 = scmp.lt.s32.totalorder %s75_s14, %s75_s14 }
  0x1c   :  { %p5706_p10 = scmp.ne.s32.totalorder %s75_s14, %s5705_s15  ;;  %p5711_p12 = scmp.lt.s32.totalorder %s5705_s15, %s5705_s15 }
  0x1e   :  { %p5712_p13 = por %p5711_p12, %p5710_p11 }
  0x20   :  { %p5713_p0 = pnand %p5712_p13, %p5706_p10 }
  0x22   :  { %5716 = shalt.err (!%p5713_p0)
}
  0x23   :  { %s5832_s1 = smov 64   ;;  %s5833_s16 = smov 4  }
  0x24   :  { %80 = dma.hbm_to_vmem [thread:$0]  %s6084_s5, 8192, %s75_s14, [#allocation12], %s5832_s1, %s5832_s1, %s5833_s16  }
  0x25   :  { %s5834_s19 = smov [#allocation2]   ;;  %s5835_s3 = smov [#allocation7]  }
  0x26   :  { %s23_s20 = sshll.u32 %s5834_s19, 4  ;;  %s43_s21 = sshll.u32 %s5835_s3, 4  ;;  %s24_s20 = int_to_ptr.vmem [resolvable:$true] %s23_s20  ;;  %s44_s21 = int_to_ptr.vmem [resolvable:$true] %s43_s21 }
  0x27   :  { %s5725_s22 = scalar_lea.vmem %s24_s20, 32  ;;  %p5730_p2 = scmp.lt.s32.totalorder %s24_s20, %s24_s20 }
  0x28   :  { %p5726_p1 = scmp.ne.s32.totalorder %s24_s20, %s5725_s22  ;;  %p5731_p3 = scmp.lt.s32.totalorder %s5725_s22, %s5725_s22 }
  0x2a   :  { %p5732_p4 = por %p5731_p3, %p5730_p2 }
  0x2c   :  { %p5733_p5 = pnand %p5732_p4, %p5726_p1 }
  0x2e   :  { %5736 = shalt.err (!%p5733_p5)
}
  0x2f   :  { %26 = dma.hbm_to_vmem [thread:$0]  %s6079_s0, 32, %s24_s20, [#allocation3]  }
  0x30   :  { %s5745_s25 = scalar_lea.vmem %s44_s21, 128  ;;  %p5750_p7 = scmp.lt.s32.totalorder %s44_s21, %s44_s21 }
  0x31   :  { %p5746_p6 = scmp.ne.s32.totalorder %s44_s21, %s5745_s25  ;;  %p5751_p8 = scmp.lt.s32.totalorder %s5745_s25, %s5745_s25 }
  0x33   :  { %p5752_p9 = por %p5751_p8, %p5750_p7 }
  0x35   :  { %p5753_p10 = pnand %p5752_p9, %p5746_p6 }
  0x37   :  { %5756 = shalt.err (!%p5753_p10)
}
  0x38   :  { %46 = dma.hbm_to_vmem [thread:$0]  %s6081_s2, 128, %s44_s21, [#allocation6]  }
  0x39   :  { %s5836_s27 = smov [#allocation10]   ;;  %s5837_s29 = smov [#allocation13]  }
  0x3a   :  { %s65_s28 = sshll.u32 %s5836_s27, 4  ;;  %s87_s30 = sshll.u32 %s5837_s29, 4  ;;  %s66_s28 = int_to_ptr.vmem [resolvable:$true] %s65_s28  ;;  %s88_s30 = int_to_ptr.vmem [resolvable:$true] %s87_s30 }
  0x3b   :  { %s5765_s8 = scalar_lea.vmem %s66_s28, 128  ;;  %p5770_p12 = scmp.lt.s32.totalorder %s66_s28, %s66_s28 }
  0x3c   :  { %p5766_p11 = scmp.ne.s32.totalorder %s66_s28, %s5765_s8  ;;  %p5771_p13 = scmp.lt.s32.totalorder %s5765_s8, %s5765_s8 }
  0x3e   :  { %p5772_p0 = por %p5771_p13, %p5770_p12 }
  0x40   :  { %p5773_p1 = pnand %p5772_p0, %p5766_p11 }
  0x42   :  { %5776 = shalt.err (!%p5773_p1)
}
  0x43   :  { %68 = dma.hbm_to_vmem [thread:$0]  %s6083_s4, 128, %s66_s28, [#allocation9]  }
  0x44   :  { %s5785_s10 = scalar_lea.vmem %s88_s30, 16  ;;  %s5789_s2 = scalar_lea.vmem %s88_s30, 32 }
  0x45   :  { %p5786_p2 = scmp.ne.s32.totalorder %s88_s30, %s5785_s10  ;;  %p5790_p3 = scmp.lt.s32.totalorder %s88_s30, %s88_s30 }
  0x46   :  { %p5791_p4 = scmp.lt.s32.totalorder %s5789_s2, %s5785_s10 }
  0x48   :  { %p5792_p5 = por %p5791_p4, %p5790_p3 }
  0x4a   :  { %p5793_p6 = pnand %p5792_p5, %p5786_p2 }
  0x4c   :  { %5796 = shalt.err (!%p5793_p6)
}
  0x4d   :  { %90 = dma.hbm_to_vmem [thread:$0]  %s6085_s6, 16, %s88_s30, [#allocation12]  }
  0x4e   :  { %5817 = dma.done.wait [#allocation3], 32  }
  0x4f   :  { %5818 = vsyncadd [#allocation3], 4294967264 }
  0x50   :  { %5819 = dma.done.wait [#allocation6], 640  }
  0x51   :  { %5820 = vsyncadd [#allocation6], 4294966656 }
  0x52   :  { %5821 = dma.done.wait [#allocation9], 65664  }
  0x53   :  { %5822 = vsyncadd [#allocation9], 4294901632 }
  0x54   :  { %5823 = dma.done.wait [#allocation12], 8208  }
  0x55   :  { %5824 = vsyncadd [#allocation12], 4294959088  ;;  %v5838_v0 = vmov 0   ;;  %v115_v1 = vld [vmem:[#allocation5] sm:$0xff]  ;;  %vm185_vm0 = vcmask 1043456   ;;  %v116_v2 = vld [vmem:[#allocation5 + $0x8] sm:$0xff] }
  0x56   :  { %242 = vmatprep.mubr.bf16.mxu0 %v5838_v0  ;;  %283 = vmatprep.mubr.bf16.mxu1 %v5838_v0  ;;  %v113_v3 = vld [vmem:[#allocation2] sm:$0x3]  ;;  %v4887_v4 = vcombine.high %v115_v1, %v115_v1  ;;  %v4889_v5 = vcombine.high %v116_v2, %v116_v2  ;;  %v4886_v6 = vcombine.low %v115_v1, %v115_v1  ;;  %v117_v8 = vld [vmem:[#allocation5 + $0x10] sm:$0xff]  ;;  %v446_v13 = vld [vmem:[#allocation8 + $0x1c0] sm:$0xff]  ;;  %vm181_vm1 = vcmask 64512   ;;  %s5839_s4 = smov [#allocation14]  }
  0x57   :  { %v4888_v7 = vcombine.low %v116_v2, %v116_v2  ;;  %v118_v9 = vld [vmem:[#allocation5 + $0x18] sm:$0xff]  ;;  %v4891_v10 = vcombine.high %v117_v8, %v117_v8  ;;  %v4890_v11 = vcombine.low %v117_v8, %v117_v8  ;;  %v114_v16 = vpack.c.bf16 %v113_v3, %v113_v3  ;;  %v450_v18 = vld [vmem:[#allocation8 + $0x1e0] sm:$0xff]  ;;  %s4874_s6 = sshll.u32 %s5839_s4, 4  ;;  %s4875_s6 = int_to_ptr.vmem [resolvable:$true] %s4874_s6 }
  0x58   :  { %v4893_v12 = vcombine.high %v118_v9, %v118_v9  ;;  %4894 = vmatprep.subr.msk.bf16.mxu0 %vm185_vm0, %v4887_v4  ;;  %4896 = vmatprep.subr.msk.bf16.mxu1 %vm185_vm0, %v4889_v5  ;;  %v187_v14 = vsel %vm185_vm0, %v4886_v6, 0  ;;  %v4892_v17 = vcombine.low %v118_v9, %v118_v9  ;;  %v574_v19 = vld [vmem:[#allocation8 + $0x5c0] sm:$0xff]  ;;  %v4959_v23 = vcombine.high %v446_v13, %v450_v18  ;;  %s5797_s13 = scalar_lea.vmem %s4875_s6, 32  ;;  %p5802_p8 = scmp.lt.s32.totalorder %s4875_s6, %s4875_s6 }
  0x59   :  { %v193_v15 = vsel %vm185_vm0, %v4888_v7, 0  ;;  %v578_v20 = vld [vmem:[#allocation8 + $0x5e0] sm:$0xff]  ;;  %225 = vmatpush1.bf16.msra.mxu0 %v187_v14  ;;  %v199_v21 = vsel %vm185_vm0, %v4890_v11, 0  ;;  %v4958_v29 = vcombine.low %v446_v13, %v450_v18  ;;  %vm4855_vm2 = vcmask 1041408   ;;  %p5798_p7 = scmp.ne.s32.totalorder %s4875_s6, %s5797_s13  ;;  %p5803_p9 = scmp.lt.s32.totalorder %s5797_s13, %s5797_s13 }
  0x5a   :  { %266 = vmatpush1.bf16.msra.mxu1 %v193_v15  ;;  %4898 = vmatprep.subr.msk.bf16.mxu0 %vm185_vm0, %v4891_v10  ;;  %v205_v22 = vsel %vm185_vm0, %v4892_v17, 0  ;;  %v5087_v24 = vcombine.high %v574_v19, %v578_v20  ;;  %v438_v25 = vld [vmem:[#allocation8 + $0x180] sm:$0xff]  ;;  %v5086_v30 = vcombine.low %v574_v19, %v578_v20 }
  0x5b   :  { %4900 = vmatprep.subr.msk.bf16.mxu1 %vm185_vm0, %v4893_v12  ;;  %v442_v26 = vld [vmem:[#allocation8 + $0x1a0] sm:$0xff]  ;;  %p5804_p10 = por %p5803_p9, %p5802_p8 }
  0x5c   :  { %4895 = vmatmul.mubr.msk.bf16.vlgmr.msra.gmra.mxu0 %vm181_vm1, %v114_v16  ;;  %v566_v27 = vld [vmem:[#allocation8 + $0x580] sm:$0xff]  ;;  %v4951_v31 = vcombine.high %v438_v25, %v442_v26  ;;  %v4950_v37 = vcombine.low %v438_v25, %v442_v26 }
  0x5d   :  { %4897 = vmatmul.mubr.msk.bf16.vlgmr.msra.gmra.mxu1 %vm181_vm1, %v114_v16  ;;  %307 = vmatpush1.bf16.msra.mxu0 %v199_v21  ;;  %v570_v28 = vld [vmem:[#allocation8 + $0x5a0] sm:$0xff]  ;;  %p5805_p11 = pnand %p5804_p10, %p5798_p7 }
  0x5e   :  { %324 = vmatprep.mubr.bf16.mxu0 %v5838_v0  ;;  %348 = vmatpush1.bf16.msra.mxu1 %v205_v22  ;;  %v5079_v32 = vcombine.high %v566_v27, %v570_v28  ;;  %v430_v33 = vld [vmem:[#allocation8 + $0x140] sm:$0xff]  ;;  %v5078_v38 = vcombine.low %v566_v27, %v570_v28 }
  0x5f   :  { %365 = vmatprep.mubr.bf16.mxu1 %v5838_v0  ;;  %3504 = vmatprep.subr.bf16.mxu0 %v4959_v23  ;;  %v434_v34 = vld [vmem:[#allocation8 + $0x160] sm:$0xff] }
  0x60   :  { %3545 = vmatprep.subr.bf16.mxu1 %v5087_v24  ;;  %v558_v35 = vld [vmem:[#allocation8 + $0x540] sm:$0xff]  ;;  %v4943_v39 = vcombine.high %v430_v33, %v434_v34  ;;  %v4942_v45 = vcombine.low %v430_v33, %v434_v34 }
  0x61   :  { %v562_v36 = vld [vmem:[#allocation8 + $0x560] sm:$0xff] }
  0x62   :  { %v5071_v40 = vcombine.high %v558_v35, %v562_v36  ;;  %v422_v41 = vld [vmem:[#allocation8 + $0x100] sm:$0xff]  ;;  %v5070_v46 = vcombine.low %v558_v35, %v562_v36 }
  0x63   :  { %v426_v42 = vld [vmem:[#allocation8 + $0x120] sm:$0xff] }
  0x64   :  { %4899 = vmatmul.mubr.msk.bf16.vlgmr.msra.gmra.mxu0 %vm181_vm1, %v114_v16  ;;  %v550_v43 = vld [vmem:[#allocation8 + $0x500] sm:$0xff]  ;;  %v4935_v51 = vcombine.high %v422_v41, %v426_v42  ;;  %v4934_v53 = vcombine.low %v422_v41, %v426_v42 }
  0x65   :  { %4901 = vmatmul.mubr.msk.bf16.vlgmr.msra.gmra.mxu1 %vm181_vm1, %v114_v16  ;;  %3505 = vmatpush1.bf16.msra.mxu0 %v4958_v29  ;;  %v554_v44 = vld [vmem:[#allocation8 + $0x520] sm:$0xff] }
  0x66   :  { %3546 = vmatpush1.bf16.msra.mxu1 %v5086_v30  ;;  %3506 = vmatprep.subr.bf16.mxu0 %v4951_v31  ;;  %v414_v47 = vld [vmem:[#allocation8 + $0xc0] sm:$0xff]  ;;  %v5063_v52 = vcombine.high %v550_v43, %v554_v44  ;;  %v5062_v54 = vcombine.low %v550_v43, %v554_v44 }
  0x67   :  { %3547 = vmatprep.subr.bf16.mxu1 %v5079_v32  ;;  %v418_v48 = vld [vmem:[#allocation8 + $0xe0] sm:$0xff] }
  0x68   :  { %v542_v49 = vld [vmem:[#allocation8 + $0x4c0] sm:$0xff]  ;;  %v4927_v59 = vcombine.high %v414_v47, %v418_v48  ;;  %v4926_v61 = vcombine.low %v414_v47, %v418_v48 }
  0x69   :  { %3507 = vmatpush1.bf16.msra.mxu0 %v4950_v37  ;;  %v546_v50 = vld [vmem:[#allocation8 + $0x4e0] sm:$0xff] }
  0x6a   :  { %3548 = vmatpush1.bf16.msra.mxu1 %v5078_v38  ;;  %3508 = vmatprep.subr.bf16.mxu0 %v4943_v39  ;;  %v406_v55 = vld [vmem:[#allocation8 + $0x80] sm:$0xff]  ;;  %v5055_v60 = vcombine.high %v542_v49, %v546_v50  ;;  %v5054_v62 = vcombine.low %v542_v49, %v546_v50 }
  0x6b   :  { %3549 = vmatprep.subr.bf16.mxu1 %v5071_v40  ;;  %v410_v56 = vld [vmem:[#allocation8 + $0xa0] sm:$0xff] }
  0x6c   :  { %v534_v57 = vld [vmem:[#allocation8 + $0x480] sm:$0xff]  ;;  %v4919_v3 = vcombine.high %v406_v55, %v410_v56  ;;  %v4918_v5 = vcombine.low %v406_v55, %v410_v56 }
  0x6d   :  { %3509 = vmatpush1.bf16.msra.mxu0 %v4942_v45  ;;  %v538_v58 = vld [vmem:[#allocation8 + $0x4a0] sm:$0xff] }
  0x6e   :  { %3550 = vmatpush1.bf16.msra.mxu1 %v5070_v46  ;;  %3510 = vmatprep.subr.bf16.mxu0 %v4935_v51  ;;  %v398_v63 = vld [vmem:[#allocation8 + $0x40] sm:$0xff]  ;;  %v5047_v4 = vcombine.high %v534_v57, %v538_v58  ;;  %v5046_v6 = vcombine.low %v534_v57, %v538_v58 }
  0x6f   :  { %3551 = vmatprep.subr.bf16.mxu1 %v5063_v52  ;;  %v402_v0 = vld [vmem:[#allocation8 + $0x60] sm:$0xff] }
  0x70   :  { %v526_v1 = vld [vmem:[#allocation8 + $0x440] sm:$0xff]  ;;  %v4911_v11 = vcombine.high %v398_v63, %v402_v0  ;;  %v4910_v13 = vcombine.low %v398_v63, %v402_v0 }
  0x71   :  { %3511 = vmatpush1.bf16.msra.mxu0 %v4934_v53  ;;  %v530_v2 = vld [vmem:[#allocation8 + $0x460] sm:$0xff] }
  0x72   :  { %3552 = vmatpush1.bf16.msra.mxu1 %v5062_v54  ;;  %3512 = vmatprep.subr.bf16.mxu0 %v4927_v59  ;;  %v390_v7 = vld [vmem:[#allocation8] sm:$0xff]  ;;  %v5039_v12 = vcombine.high %v526_v1, %v530_v2  ;;  %v5038_v14 = vcombine.low %v526_v1, %v530_v2 }
  0x73   :  { %3553 = vmatprep.subr.bf16.mxu1 %v5055_v60  ;;  %v394_v8 = vld [vmem:[#allocation8 + $0x20] sm:$0xff] }
  0x74   :  { %v518_v9 = vld [vmem:[#allocation8 + $0x400] sm:$0xff]  ;;  %v4903_v19 = vcombine.high %v390_v7, %v394_v8  ;;  %v4902_v21 = vcombine.low %v390_v7, %v394_v8 }
  0x75   :  { %3513 = vmatpush1.bf16.msra.mxu0 %v4926_v61  ;;  %v522_v10 = vld [vmem:[#allocation8 + $0x420] sm:$0xff] }
  0x76   :  { %3554 = vmatpush1.bf16.msra.mxu1 %v5054_v62  ;;  %3514 = vmatprep.subr.bf16.mxu0 %v4919_v3  ;;  %v510_v15 = vld [vmem:[#allocation8 + $0x3c0] sm:$0xff]  ;;  %v5031_v20 = vcombine.high %v518_v9, %v522_v10  ;;  %v5030_v22 = vcombine.low %v518_v9, %v522_v10 }
  0x77   :  { %3555 = vmatprep.subr.bf16.mxu1 %v5047_v4  ;;  %v514_v16 = vld [vmem:[#allocation8 + $0x3e0] sm:$0xff] }
  0x78   :  { %v638_v17 = vld [vmem:[#allocation8 + $0x7c0] sm:$0xff]  ;;  %v5023_v27 = vcombine.high %v510_v15, %v514_v16  ;;  %v5022_v29 = vcombine.low %v510_v15, %v514_v16 }
  0x79   :  { %3515 = vmatpush1.bf16.msra.mxu0 %v4918_v5  ;;  %v642_v18 = vld [vmem:[#allocation8 + $0x7e0] sm:$0xff] }
  0x7a   :  { %3556 = vmatpush1.bf16.msra.mxu1 %v5046_v6  ;;  %3516 = vmatprep.subr.bf16.mxu0 %v4911_v11  ;;  %v502_v23 = vld [vmem:[#allocation8 + $0x380] sm:$0xff]  ;;  %v5151_v28 = vcombine.high %v638_v17, %v642_v18  ;;  %v5150_v30 = vcombine.low %v638_v17, %v642_v18 }
  0x7b   :  { %3557 = vmatprep.subr.bf16.mxu1 %v5039_v12  ;;  %v506_v24 = vld [vmem:[#allocation8 + $0x3a0] sm:$0xff] }
  0x7c   :  { %v630_v25 = vld [vmem:[#allocation8 + $0x780] sm:$0xff]  ;;  %v5015_v35 = vcombine.high %v502_v23, %v506_v24  ;;  %v5014_v37 = vcombine.low %v502_v23, %v506_v24 }
  0x7d   :  { %3517 = vmatpush1.bf16.msra.mxu0 %v4910_v13  ;;  %v634_v26 = vld [vmem:[#allocation8 + $0x7a0] sm:$0xff] }
  0x7e   :  { %3558 = vmatpush1.bf16.msra.mxu1 %v5038_v14  ;;  %3518 = vmatprep.subr.bf16.mxu0 %v4903_v19  ;;  %v494_v31 = vld [vmem:[#allocation8 + $0x340] sm:$0xff]  ;;  %v5143_v36 = vcombine.high %v630_v25, %v634_v26  ;;  %v5142_v38 = vcombine.low %v630_v25, %v634_v26 }
  0x7f   :  { %3559 = vmatprep.subr.bf16.mxu1 %v5031_v20  ;;  %v498_v32 = vld [vmem:[#allocation8 + $0x360] sm:$0xff] }
  0x80   :  { %v622_v33 = vld [vmem:[#allocation8 + $0x740] sm:$0xff]  ;;  %v5007_v43 = vcombine.high %v494_v31, %v498_v32  ;;  %v5006_v45 = vcombine.low %v494_v31, %v498_v32  ;;  %v5929_v31 = vld [vmem:[#allocation7] sm:$0xff] }
  0x81   :  { %3519 = vmatpush1.bf16.msra.mxu0 %v4902_v21  ;;  %v626_v34 = vld [vmem:[#allocation8 + $0x760] sm:$0xff] }
  0x82   :  { %3560 = vmatpush1.bf16.msra.mxu1 %v5030_v22  ;;  %3520 = vmatprep.subr.bf16.mxu0 %v5023_v27  ;;  %v486_v39 = vld [vmem:[#allocation8 + $0x300] sm:$0xff]  ;;  %v5135_v44 = vcombine.high %v622_v33, %v626_v34  ;;  %v5134_v46 = vcombine.low %v622_v33, %v626_v34  ;;  %v121_v27 = vlaneseq }
  0x83   :  { %3561 = vmatprep.subr.bf16.mxu1 %v5151_v28  ;;  %v490_v40 = vld [vmem:[#allocation8 + $0x320] sm:$0xff] }
  0x84   :  { %v614_v41 = vld [vmem:[#allocation8 + $0x700] sm:$0xff]  ;;  %v4999_v51 = vcombine.high %v486_v39, %v490_v40  ;;  %v4998_v53 = vcombine.low %v486_v39, %v490_v40  ;;  %v5925_v28 = vshrl.u32 %v121_v27, 7 }
  0x85   :  { %3521 = vmatpush2.bf16.msra.mxu0 %v5022_v29  ;;  %v618_v42 = vld [vmem:[#allocation8 + $0x720] sm:$0xff] }
  0x86   :  { %3562 = vmatpush2.bf16.msra.mxu1 %v5150_v30  ;;  %3522 = vmatprep.subr.bf16.mxu0 %v5015_v35  ;;  %v478_v47 = vld [vmem:[#allocation8 + $0x2c0] sm:$0xff]  ;;  %v5127_v52 = vcombine.high %v614_v41, %v618_v42  ;;  %v5126_v54 = vcombine.low %v614_v41, %v618_v42  ;;  %v123_v29 = vsub.s32 0, %v5925_v28  ;;  %v131_v30 = vsub.s32 2, %v5925_v28 }
  0x87   :  { %3563 = vmatprep.subr.bf16.mxu1 %v5143_v36  ;;  %v482_v48 = vld [vmem:[#allocation8 + $0x2e0] sm:$0xff]  ;;  %v127_v32 = vsub.s32 1, %v5925_v28  ;;  %v135_v33 = vsub.s32 3, %v5925_v28 }
  0x88   :  { %v606_v49 = vld [vmem:[#allocation8 + $0x6c0] sm:$0xff]  ;;  %v4991_v59 = vcombine.high %v478_v47, %v482_v48  ;;  %v4990_v61 = vcombine.low %v478_v47, %v482_v48  ;;  %v124_v34 = vrot.slane %v5929_v31, %v123_v29  ;;  %v132_v35 = vrot.slane %v5929_v31, %v131_v30 }
  0x89   :  { %3523 = vmatpush2.bf16.msra.mxu0 %v5014_v37  ;;  %v610_v50 = vld [vmem:[#allocation8 + $0x6e0] sm:$0xff]  ;;  %v128_v36 = vrot.slane %v5929_v31, %v127_v32  ;;  %v136_v37 = vrot.slane %v5929_v31, %v135_v33  ;;  %v151_v48 = vsub.s32 7, %v5925_v28 }
  0x8a   :  { %3564 = vmatpush2.bf16.msra.mxu1 %v5142_v38  ;;  %3524 = vmatprep.subr.bf16.mxu0 %v5007_v43  ;;  %v470_v55 = vld [vmem:[#allocation8 + $0x280] sm:$0xff]  ;;  %v5119_v60 = vcombine.high %v606_v49, %v610_v50  ;;  %v5118_v62 = vcombine.low %v606_v49, %v610_v50 }
  0x8b   :  { %3565 = vmatprep.subr.bf16.mxu1 %v5135_v44  ;;  %v474_v56 = vld [vmem:[#allocation8 + $0x2a0] sm:$0xff]  ;;  %v143_v44 = vsub.s32 5, %v5925_v28 }
  0x8c   :  { %v598_v57 = vld [vmem:[#allocation8 + $0x680] sm:$0xff]  ;;  %v4983_v63 = vcombine.high %v470_v55, %v474_v56  ;;  %v4982_v1 = vcombine.low %v470_v55, %v474_v56 }
  0x8d   :  { %3525 = vmatpush2.bf16.msra.mxu0 %v5006_v45  ;;  %v602_v58 = vld [vmem:[#allocation8 + $0x6a0] sm:$0xff] }
  0x8e   :  { %3566 = vmatpush2.bf16.msra.mxu1 %v5134_v46  ;;  %3526 = vmatprep.subr.bf16.mxu0 %v4999_v51  ;;  %v5111_v0 = vcombine.high %v598_v57, %v602_v58  ;;  %v5110_v2 = vcombine.low %v598_v57, %v602_v58  ;;  %v462_v3 = vld [vmem:[#allocation8 + $0x240] sm:$0xff] }
  0x8f   :  { %3567 = vmatprep.subr.bf16.mxu1 %v5127_v52  ;;  %v466_v4 = vld [vmem:[#allocation8 + $0x260] sm:$0xff] }
  0x90   :  { %v590_v5 = vld [vmem:[#allocation8 + $0x640] sm:$0xff]  ;;  %v4975_v6 = vcombine.high %v462_v3, %v466_v4  ;;  %v4974_v8 = vcombine.low %v462_v3, %v466_v4 }
  0x91   :  { %3527 = vmatpush2.bf16.msra.mxu0 %v4998_v53  ;;  %v594_v7 = vld [vmem:[#allocation8 + $0x660] sm:$0xff] }
  0x92   :  { %3568 = vmatpush2.bf16.msra.mxu1 %v5126_v54  ;;  %3528 = vmatprep.subr.bf16.mxu0 %v4991_v59  ;;  %v5102_v9 = vcombine.low %v590_v5, %v594_v7  ;;  %v5103_v10 = vcombine.high %v590_v5, %v594_v7  ;;  %v454_v11 = vld [vmem:[#allocation8 + $0x200] sm:$0xff] }
  0x93   :  { %3569 = vmatprep.subr.bf16.mxu1 %v5119_v60  ;;  %v458_v12 = vld [vmem:[#allocation8 + $0x220] sm:$0xff] }
  0x94   :  { %v582_v13 = vld [vmem:[#allocation8 + $0x600] sm:$0xff]  ;;  %v4967_v14 = vcombine.high %v454_v11, %v458_v12  ;;  %v4966_v16 = vcombine.low %v454_v11, %v458_v12 }
  0x95   :  { %3529 = vmatpush2.bf16.msra.mxu0 %v4990_v61  ;;  %v586_v15 = vld [vmem:[#allocation8 + $0x620] sm:$0xff] }
  0x96   :  { %3570 = vmatpush2.bf16.msra.mxu1 %v5118_v62  ;;  %3530 = vmatprep.subr.bf16.mxu0 %v4983_v63  ;;  %v5094_v17 = vcombine.low %v582_v13, %v586_v15  ;;  %v5095_v18 = vcombine.high %v582_v13, %v586_v15  ;;  %v5913_v19 = vld [vmem:[#allocation8 + $0x9c0] sm:$0xff]  ;;  %v144_v63 = vrot.slane %v5929_v31, %v143_v44 }
  0x97   :  { %3571 = vmatprep.subr.bf16.mxu1 %v5111_v0  ;;  %v5915_v20 = vld [vmem:[#allocation8 + $0x9e0] sm:$0xff]  ;;  %v152_v0 = vrot.slane %v5929_v31, %v151_v48 }
  0x98   :  { %v5917_v21 = vld [vmem:[#allocation8 + $0xdc0] sm:$0xff]  ;;  %v5215_v22 = vcombine.high %v5913_v19, %v5915_v20  ;;  %v5214_v24 = vcombine.low %v5913_v19, %v5915_v20 }
  0x99   :  { %3531 = vmatpush2.bf16.msra.mxu0 %v4982_v1  ;;  %v834_v23 = vld [vmem:[#allocation8 + $0xde0] sm:$0xff] }
  0x9a   :  { %3572 = vmatpush2.bf16.msra.mxu1 %v5110_v2  ;;  %3532 = vmatprep.subr.bf16.mxu0 %v4975_v6  ;;  %v5342_v25 = vcombine.low %v5917_v21, %v834_v23  ;;  %v5343_v26 = vcombine.high %v5917_v21, %v834_v23  ;;  %v694_v52 = vld [vmem:[#allocation8 + $0x980] sm:$0xff] }
  0x9b   :  { %3573 = vmatprep.subr.bf16.mxu1 %v5103_v10  ;;  %v698_v55 = vld [vmem:[#allocation8 + $0x9a0] sm:$0xff] }
  0x9c   :  { %v822_v56 = vld [vmem:[#allocation8 + $0xd80] sm:$0xff]  ;;  %v5207_v2 = vcombine.high %v694_v52, %v698_v55  ;;  %v5206_v10 = vcombine.low %v694_v52, %v698_v55 }
  0x9d   :  { %3533 = vmatpush2.bf16.msra.mxu0 %v4974_v8  ;;  %v826_v57 = vld [vmem:[#allocation8 + $0xda0] sm:$0xff] }
  0x9e   :  { %3574 = vmatpush2.bf16.msra.mxu1 %v5102_v9  ;;  %3534 = vmatprep.subr.bf16.mxu0 %v4967_v14  ;;  %v5335_v3 = vcombine.high %v822_v56, %v826_v57  ;;  %v686_v4 = vld [vmem:[#allocation8 + $0x940] sm:$0xff]  ;;  %v5334_v13 = vcombine.low %v822_v56, %v826_v57 }
  0x9f   :  { %3575 = vmatprep.subr.bf16.mxu1 %v5095_v18  ;;  %v690_v7 = vld [vmem:[#allocation8 + $0x960] sm:$0xff] }
  0xa0   :  { %v814_v8 = vld [vmem:[#allocation8 + $0xd40] sm:$0xff] }
  0xa1   :  { %3535 = vmatpush2.bf16.msra.mxu0 %v4966_v16  ;;  %v818_v9 = vld [vmem:[#allocation8 + $0xd60] sm:$0xff]  ;;  %v5199_v16 = vcombine.high %v686_v4, %v690_v7 }
  0xa2   :  { %3576 = vmatpush2.bf16.msra.mxu1 %v5094_v17  ;;  %3586 = vmatprep.subr.bf16.mxu0 %v5215_v22  ;;  %v5327_v17 = vcombine.high %v814_v8, %v818_v9  ;;  %v678_v18 = vld [vmem:[#allocation8 + $0x900] sm:$0xff] }
  0xa3   :  { %3627 = vmatprep.subr.bf16.mxu1 %v5343_v26  ;;  %v682_v21 = vld [vmem:[#allocation8 + $0x920] sm:$0xff] }
  0xa4   :  { %v806_v22 = vld [vmem:[#allocation8 + $0xd00] sm:$0xff] }
  0xa5   :  { %v810_v23 = vld [vmem:[#allocation8 + $0xd20] sm:$0xff] }
  0xa6   :  { %v790_v52 = vld [vmem:[#allocation8 + $0xc80] sm:$0xff] }
 0x11c   :  { %v244_v38 = vpop.f32.mrf.mxu0 }
 0x11d   :  { %v285_v39 = vpop.f32.mrf.mxu1  ;;  %v245_v40 = vadd.f32 %v244_v38, %v124_v34  ;;  %v5198_v34 = vcombine.low %v686_v4, %v690_v7  ;;  %v5191_v38 = vcombine.high %v678_v18, %v682_v21 }
 0x11e   :  { %v286_v41 = vadd.f32 %v285_v39, %v132_v35  ;;  %v246_v42 = vpop.f32.mrf.mxu0  ;;  %v5319_v39 = vcombine.high %v806_v22, %v810_v23 }
 0x11f   :  { %v287_v43 = vpop.f32.mrf.mxu1  ;;  %v247_v46 = vadd.f32 %v246_v42, %v128_v36  ;;  %v374_v49 = vmax.f32 %v245_v40, 0.0  ;;  %v670_v40 = vld [vmem:[#allocation8 + $0x8c0] sm:$0xff] }
 0x120   :  { %v376_v45 = vmax.f32 %v286_v41, 0.0  ;;  %v288_v47 = vadd.f32 %v287_v43, %v136_v37  ;;  %v248_v50 = vpop.f32.mrf.mxu0  ;;  %v674_v41 = vld [vmem:[#allocation8 + $0x8e0] sm:$0xff] }
 0x121   :  { %v289_v51 = vpop.f32.mrf.mxu1  ;;  %v375_v53 = vmax.f32 %v247_v46, 0.0  ;;  %v5959_v1 = vpack.c.bf16 %v374_v49, %v374_v49  ;;  %v798_v42 = vld [vmem:[#allocation8 + $0xcc0] sm:$0xff]  ;;  %v5318_v46 = vcombine.low %v806_v22, %v810_v23 }
 0x122   :  { %v377_v54 = vmax.f32 %v288_v47, 0.0  ;;  %v5947_v58 = vpack.c.bf16 %v376_v45, %v376_v45  ;;  %v249_v59 = vpop.f32.mrf.mxu0  ;;  %v802_v43 = vld [vmem:[#allocation8 + $0xce0] sm:$0xff]  ;;  %v5190_v45 = vcombine.low %v678_v18, %v682_v21  ;;  %v5183_v47 = vcombine.high %v670_v40, %v674_v41 }
 0x123   :  { %v290_v60 = vpop.f32.mrf.mxu1  ;;  %v5949_v61 = vpack.c.bf16 %v375_v53, %v375_v53  ;;  %v5311_v49 = vcombine.high %v798_v42, %v802_v43  ;;  %v662_v50 = vld [vmem:[#allocation8 + $0x880] sm:$0xff]  ;;  %v5310_v55 = vcombine.low %v798_v42, %v802_v43 }
 0x124   :  { %v5951_v62 = vpack.c.bf16 %v377_v54, %v377_v54  ;;  %v5961_v5 = vpop.f32.mrf.mxu0  ;;  %v666_v51 = vld [vmem:[#allocation8 + $0x8a0] sm:$0xff]  ;;  %v5182_v54 = vcombine.low %v670_v40, %v674_v41 }
 0x125   :  { %v5963_v6 = vpop.f32.mrf.mxu1  ;;  %3536 = vmatprep.mubr.bf16.mxu0 %v5949_v61  ;;  %v794_v53 = vld [vmem:[#allocation8 + $0xca0] sm:$0xff]  ;;  %v5175_v56 = vcombine.high %v662_v50, %v666_v51 }
 0x126   :  { %3577 = vmatprep.mubr.bf16.mxu1 %v5951_v62  ;;  %3537 = vmatmul.mubr.bf16.vlgmr.msra.gmra.mxu0 %v5959_v1  ;;  %v328_v11 = vpop.f32.mrf.mxu0  ;;  %v5303_v57 = vcombine.high %v790_v52, %v794_v53  ;;  %v654_v59 = vld [vmem:[#allocation8 + $0x840] sm:$0xff] }
 0x127   :  { %3578 = vmatmul.mubr.bf16.vlgmr.msra.gmra.mxu1 %v5947_v58  ;;  %v369_v12 = vpop.f32.mrf.mxu1  ;;  %3587 = vmatpush1.bf16.msra.mxu0 %v5214_v24  ;;  %v329_v14 = vadd.f32 %v328_v11, %v144_v63  ;;  %v5326_v24 = vcombine.low %v814_v8, %v818_v9  ;;  %v658_v60 = vld [vmem:[#allocation8 + $0x860] sm:$0xff] }
 0x128   :  { %3628 = vmatpush1.bf16.msra.mxu1 %v5342_v25  ;;  %v370_v15 = vadd.f32 %v369_v12, %v152_v0  ;;  %3588 = vmatprep.subr.bf16.mxu0 %v5207_v2  ;;  %v330_v19 = vpop.f32.mrf.mxu0  ;;  %v782_v63 = vld [vmem:[#allocation8 + $0xc40] sm:$0xff]  ;;  %v5174_v2 = vcombine.low %v662_v50, %v666_v51  ;;  %v5167_v4 = vcombine.high %v654_v59, %v658_v60 }
 0x129   :  { %3629 = vmatprep.subr.bf16.mxu1 %v5335_v3  ;;  %v371_v20 = vpop.f32.mrf.mxu1  ;;  %v379_v26 = vmax.f32 %v329_v14, 0.0  ;;  %v786_v0 = vld [vmem:[#allocation8 + $0xc60] sm:$0xff]  ;;  %v5302_v3 = vcombine.low %v790_v52, %v794_v53  ;;  %v5166_v12 = vcombine.low %v654_v59, %v658_v60 }
 0x12a   :  { %v381_v27 = vmax.f32 %v370_v15, 0.0  ;;  %v331_v35 = vpop.f32.mrf.mxu0  ;;  %v5295_v7 = vcombine.high %v782_v63, %v786_v0  ;;  %v646_v8 = vld [vmem:[#allocation8 + $0x800] sm:$0xff] }
 0x12b   :  { %v372_v36 = vpop.f32.mrf.mxu1  ;;  %3589 = vmatpush1.bf16.msra.mxu0 %v5206_v10  ;;  %v5969_v25 = vpack.c.bf16 %v379_v26, %v379_v26  ;;  %v650_v9 = vld [vmem:[#allocation8 + $0x820] sm:$0xff] }
 0x12c   :  { %3630 = vmatpush1.bf16.msra.mxu1 %v5334_v13  ;;  %v5971_v37 = vpack.c.bf16 %v381_v27, %v381_v27  ;;  %3590 = vmatprep.subr.bf16.mxu0 %v5199_v16  ;;  %v774_v10 = vld [vmem:[#allocation8 + $0xc00] sm:$0xff]  ;;  %v5294_v13 = vcombine.low %v782_v63, %v786_v0  ;;  %v5159_v14 = vcombine.high %v646_v8, %v650_v9 }
 0x12d   :  { %3631 = vmatprep.subr.bf16.mxu1 %v5327_v17  ;;  %3618 = vmatprep.mubr.bf16.mxu0 %v5969_v25  ;;  %v778_v11 = vld [vmem:[#allocation8 + $0xc20] sm:$0xff]  ;;  %v5158_v20 = vcombine.low %v646_v8, %v650_v9 }
 0x12e   :  { %3659 = vmatprep.mubr.bf16.mxu1 %v5971_v37  ;;  %v5287_v15 = vcombine.high %v774_v10, %v778_v11  ;;  %v766_v16 = vld [vmem:[#allocation8 + $0xbc0] sm:$0xff]  ;;  %v5286_v21 = vcombine.low %v774_v10, %v778_v11 }
 0x12f   :  { %3591 = vmatpush1.bf16.msra.mxu0 %v5198_v34  ;;  %v770_v17 = vld [vmem:[#allocation8 + $0xbe0] sm:$0xff] }
 0x130   :  { %3632 = vmatpush1.bf16.msra.mxu1 %v5326_v24  ;;  %3592 = vmatprep.subr.bf16.mxu0 %v5191_v38  ;;  %v894_v18 = vld [vmem:[#allocation8 + $0xfc0] sm:$0xff]  ;;  %v5279_v22 = vcombine.high %v766_v16, %v770_v17  ;;  %v5278_v36 = vcombine.low %v766_v16, %v770_v17 }
 0x131   :  { %3633 = vmatprep.subr.bf16.mxu1 %v5319_v39  ;;  %v898_v19 = vld [vmem:[#allocation8 + $0xfe0] sm:$0xff] }
 0x132   :  { %v5407_v23 = vcombine.high %v894_v18, %v898_v19  ;;  %v758_v26 = vld [vmem:[#allocation8 + $0xb80] sm:$0xff]  ;;  %v5406_v24 = vcombine.low %v894_v18, %v898_v19 }
 0x133   :  { %3593 = vmatpush1.bf16.msra.mxu0 %v5190_v45  ;;  %v762_v27 = vld [vmem:[#allocation8 + $0xba0] sm:$0xff] }
 0x134   :  { %3634 = vmatpush1.bf16.msra.mxu1 %v5318_v46  ;;  %3594 = vmatprep.subr.bf16.mxu0 %v5183_v47  ;;  %v886_v34 = vld [vmem:[#allocation8 + $0xf80] sm:$0xff]  ;;  %v5271_v38 = vcombine.high %v758_v26, %v762_v27  ;;  %v5270_v45 = vcombine.low %v758_v26, %v762_v27 }
 0x135   :  { %3635 = vmatprep.subr.bf16.mxu1 %v5311_v49  ;;  %v890_v35 = vld [vmem:[#allocation8 + $0xfa0] sm:$0xff] }
 0x136   :  { %v5399_v39 = vcombine.high %v886_v34, %v890_v35  ;;  %v750_v40 = vld [vmem:[#allocation8 + $0xb40] sm:$0xff]  ;;  %v5398_v46 = vcombine.low %v886_v34, %v890_v35 }
 0x137   :  { %3595 = vmatpush1.bf16.msra.mxu0 %v5182_v54  ;;  %v754_v41 = vld [vmem:[#allocation8 + $0xb60] sm:$0xff] }
 0x138   :  { %3636 = vmatpush1.bf16.msra.mxu1 %v5310_v55  ;;  %3596 = vmatprep.subr.bf16.mxu0 %v5175_v56  ;;  %v878_v42 = vld [vmem:[#allocation8 + $0xf40] sm:$0xff]  ;;  %v5263_v47 = vcombine.high %v750_v40, %v754_v41  ;;  %v5262_v54 = vcombine.low %v750_v40, %v754_v41 }
 0x139   :  { %3637 = vmatprep.subr.bf16.mxu1 %v5303_v57  ;;  %v882_v43 = vld [vmem:[#allocation8 + $0xf60] sm:$0xff] }
 0x13a   :  { %v5391_v49 = vcombine.high %v878_v42, %v882_v43  ;;  %v742_v50 = vld [vmem:[#allocation8 + $0xb00] sm:$0xff]  ;;  %v5390_v55 = vcombine.low %v878_v42, %v882_v43 }
 0x13b   :  { %3597 = vmatpush1.bf16.msra.mxu0 %v5174_v2  ;;  %v746_v51 = vld [vmem:[#allocation8 + $0xb20] sm:$0xff] }
 0x13c   :  { %3638 = vmatpush1.bf16.msra.mxu1 %v5302_v3  ;;  %3598 = vmatprep.subr.bf16.mxu0 %v5167_v4  ;;  %v870_v52 = vld [vmem:[#allocation8 + $0xf00] sm:$0xff]  ;;  %v5255_v56 = vcombine.high %v742_v50, %v746_v51  ;;  %v5254_v2 = vcombine.low %v742_v50, %v746_v51  ;;  %v579_v50 = vld [vmem:[#allocation8 + $0x5e8] sm:$0xff] }
 0x13d   :  { %3639 = vmatprep.subr.bf16.mxu1 %v5295_v7  ;;  %v874_v53 = vld [vmem:[#allocation8 + $0xf20] sm:$0xff] }
 0x13e   :  { %v5383_v57 = vcombine.high %v870_v52, %v874_v53  ;;  %v734_v59 = vld [vmem:[#allocation8 + $0xac0] sm:$0xff]  ;;  %v5382_v3 = vcombine.low %v870_v52, %v874_v53 }
 0x13f   :  { %3599 = vmatpush1.bf16.msra.mxu0 %v5166_v12  ;;  %v738_v60 = vld [vmem:[#allocation8 + $0xae0] sm:$0xff]  ;;  %v147_v12 = vsub.s32 6, %v5925_v28 }
 0x140   :  { %3640 = vmatpush1.bf16.msra.mxu1 %v5294_v13  ;;  %3600 = vmatprep.subr.bf16.mxu0 %v5159_v14  ;;  %v862_v63 = vld [vmem:[#allocation8 + $0xec0] sm:$0xff]  ;;  %v5247_v4 = vcombine.high %v734_v59, %v738_v60  ;;  %v5246_v13 = vcombine.low %v734_v59, %v738_v60  ;;  %v567_v59 = vld [vmem:[#allocation8 + $0x588] sm:$0xff] }
 0x141   :  { %3641 = vmatprep.subr.bf16.mxu1 %v5287_v15  ;;  %v866_v0 = vld [vmem:[#allocation8 + $0xee0] sm:$0xff]  ;;  %v139_v15 = vsub.s32 4, %v5925_v28  ;;  %v571_v60 = vld [vmem:[#allocation8 + $0x5a8] sm:$0xff] }
 0x142   :  { %v5375_v7 = vcombine.high %v862_v63, %v866_v0  ;;  %v726_v8 = vld [vmem:[#allocation8 + $0xa80] sm:$0xff]  ;;  %v5374_v14 = vcombine.low %v862_v63, %v866_v0 }
 0x143   :  { %3601 = vmatpush1.bf16.msra.mxu0 %v5158_v20  ;;  %v730_v9 = vld [vmem:[#allocation8 + $0xaa0] sm:$0xff]  ;;  %v140_v27 = vrot.slane %v5929_v31, %v139_v15 }
 0x144   :  { %3642 = vmatpush1.bf16.msra.mxu1 %v5286_v21  ;;  %3602 = vmatprep.subr.bf16.mxu0 %v5279_v22  ;;  %v854_v10 = vld [vmem:[#allocation8 + $0xe80] sm:$0xff]  ;;  %v5239_v16 = vcombine.high %v726_v8, %v730_v9  ;;  %v148_v22 = vrot.slane %v5929_v31, %v147_v12 }
 0x145   :  { %3643 = vmatprep.subr.bf16.mxu1 %v5407_v23  ;;  %v858_v11 = vld [vmem:[#allocation8 + $0xea0] sm:$0xff]  ;;  %v5238_v23 = vcombine.low %v726_v8, %v730_v9  ;;  %v327_v43 = vadd.f32 %v5961_v5, %v140_v27  ;;  %v435_v8 = vld [vmem:[#allocation8 + $0x168] sm:$0xff] }
 0x146   :  { %v5367_v17 = vcombine.high %v854_v10, %v858_v11  ;;  %v718_v18 = vld [vmem:[#allocation8 + $0xa40] sm:$0xff]  ;;  %v5366_v26 = vcombine.low %v854_v10, %v858_v11  ;;  %v368_v40 = vadd.f32 %v5963_v6, %v148_v22  ;;  %v559_v9 = vld [vmem:[#allocation8 + $0x548] sm:$0xff] }
 0x147   :  { %3603 = vmatpush2.bf16.msra.mxu0 %v5278_v36  ;;  %v722_v19 = vld [vmem:[#allocation8 + $0xa60] sm:$0xff]  ;;  %v378_v6 = vmax.f32 %v327_v43, 0.0  ;;  %v563_v10 = vld [vmem:[#allocation8 + $0x568] sm:$0xff] }
 0x148   :  { %3644 = vmatpush2.bf16.msra.mxu1 %v5406_v24  ;;  %3604 = vmatprep.subr.bf16.mxu0 %v5271_v38  ;;  %v846_v20 = vld [vmem:[#allocation8 + $0xe40] sm:$0xff]  ;;  %v5231_v34 = vcombine.high %v718_v18, %v722_v19  ;;  %v5230_v41 = vcombine.low %v718_v18, %v722_v19  ;;  %v380_v51 = vmax.f32 %v368_v40, 0.0  ;;  %v427_v18 = vld [vmem:[#allocation8 + $0x128] sm:$0xff]  ;;  %v5072_v22 = vcombine.low %v559_v9, %v563_v10 }
 0x149   :  { %3645 = vmatprep.subr.bf16.mxu1 %v5399_v39  ;;  %v850_v21 = vld [vmem:[#allocation8 + $0xe60] sm:$0xff]  ;;  %v5987_v0 = vpack.c.bf16 %v378_v6, %v378_v6  ;;  %v551_v19 = vld [vmem:[#allocation8 + $0x508] sm:$0xff] }
 0x14a   :  { %v5359_v35 = vcombine.high %v846_v20, %v850_v21  ;;  %v710_v36 = vld [vmem:[#allocation8 + $0xa00] sm:$0xff]  ;;  %v5358_v42 = vcombine.low %v846_v20, %v850_v21  ;;  %v5985_v5 = vpack.c.bf16 %v380_v51, %v380_v51  ;;  %v555_v20 = vld [vmem:[#allocation8 + $0x528] sm:$0xff] }
 0x14b   :  { %3605 = vmatpush2.bf16.msra.mxu0 %v5270_v45  ;;  %v714_v24 = vld [vmem:[#allocation8 + $0xa20] sm:$0xff]  ;;  %v415_v27 = vld [vmem:[#allocation8 + $0xc8] sm:$0xff] }
 0x14c   :  { %3646 = vmatpush2.bf16.msra.mxu1 %v5398_v46  ;;  %3606 = vmatprep.subr.bf16.mxu0 %v5263_v47  ;;  %v838_v38 = vld [vmem:[#allocation8 + $0xe00] sm:$0xff]  ;;  %v5223_v45 = vcombine.high %v710_v36, %v714_v24  ;;  %v447_v46 = vld [vmem:[#allocation8 + $0x1c8] sm:$0xff]  ;;  %v5222_v52 = vcombine.low %v710_v36, %v714_v24 }
 0x14d   :  { %3647 = vmatprep.subr.bf16.mxu1 %v5391_v49  ;;  %v842_v39 = vld [vmem:[#allocation8 + $0xe20] sm:$0xff]  ;;  %v451_v47 = vld [vmem:[#allocation8 + $0x1e8] sm:$0xff] }
 0x14e   :  { %v5351_v31 = vcombine.high %v838_v38, %v842_v39  ;;  %v575_v49 = vld [vmem:[#allocation8 + $0x5c8] sm:$0xff]  ;;  %v5350_v53 = vcombine.low %v838_v38, %v842_v39  ;;  %v4960_v63 = vcombine.low %v447_v46, %v451_v47  ;;  %v5064_v38 = vcombine.low %v551_v19, %v555_v20 }
 0x14f   :  { %3607 = vmatpush2.bf16.msra.mxu0 %v5262_v54  ;;  %v4961_v54 = vcombine.high %v447_v46, %v451_v47  ;;  %v547_v36 = vld [vmem:[#allocation8 + $0x4e8] sm:$0xff] }
 0x150   :  { %3648 = vmatpush2.bf16.msra.mxu1 %v5390_v55  ;;  %3608 = vmatprep.subr.bf16.mxu0 %v5255_v56  ;;  %v5089_v55 = vcombine.high %v575_v49, %v579_v50  ;;  %v439_v56 = vld [vmem:[#allocation8 + $0x188] sm:$0xff] }
 0x151   :  { %3649 = vmatprep.subr.bf16.mxu1 %v5383_v57  ;;  %v443_v57 = vld [vmem:[#allocation8 + $0x1a8] sm:$0xff] }
 0x152   :  { %v4952_v11 = vcombine.low %v439_v56, %v443_v57  ;;  %v535_v43 = vld [vmem:[#allocation8 + $0x488] sm:$0xff] }
 0x153   :  { %3609 = vmatpush2.bf16.msra.mxu0 %v5254_v2  ;;  %v5088_v2 = vcombine.low %v575_v49, %v579_v50  ;;  %v399_v50 = vld [vmem:[#allocation8 + $0x48] sm:$0xff] }
 0x154   :  { %3650 = vmatpush2.bf16.msra.mxu1 %v5382_v3  ;;  %3610 = vmatprep.subr.bf16.mxu0 %v5247_v4  ;;  %v4953_v3 = vcombine.high %v439_v56, %v443_v57  ;;  %v5081_v4 = vcombine.high %v567_v59, %v571_v60  ;;  %v403_v51 = vld [vmem:[#allocation8 + $0x68] sm:$0xff] }
 0x155   :  { %3651 = vmatprep.subr.bf16.mxu1 %v5375_v7  ;;  %v431_v7 = vld [vmem:[#allocation8 + $0x148] sm:$0xff] }
 0x156   :  { %v4944_v21 = vcombine.low %v431_v7, %v435_v8  ;;  %v391_v57 = vld [vmem:[#allocation8 + $0x8] sm:$0xff] }
 0x157   :  { %3611 = vmatpush2.bf16.msra.mxu0 %v5246_v13  ;;  %v5080_v13 = vcombine.low %v567_v59, %v571_v60  ;;  %v395_v59 = vld [vmem:[#allocation8 + $0x28] sm:$0xff] }
 0x158   :  { %3652 = vmatpush2.bf16.msra.mxu1 %v5374_v14  ;;  %3612 = vmatprep.subr.bf16.mxu0 %v5239_v16  ;;  %v4945_v14 = vcombine.high %v431_v7, %v435_v8  ;;  %v5073_v16 = vcombine.high %v559_v9, %v563_v10  ;;  %v519_v60 = vld [vmem:[#allocation8 + $0x408] sm:$0xff] }
 0x159   :  { %3653 = vmatprep.subr.bf16.mxu1 %v5367_v17  ;;  %v423_v17 = vld [vmem:[#allocation8 + $0x108] sm:$0xff] }
 0x15a   :  { %v4936_v24 = vcombine.low %v423_v17, %v427_v18  ;;  %v511_v8 = vld [vmem:[#allocation8 + $0x3c8] sm:$0xff] }
 0x15b   :  { %3613 = vmatpush2.bf16.msra.mxu0 %v5238_v23  ;;  %v4937_v23 = vcombine.high %v423_v17, %v427_v18  ;;  %v515_v9 = vld [vmem:[#allocation8 + $0x3e8] sm:$0xff] }
 0x15c   :  { %3654 = vmatpush2.bf16.msra.mxu1 %v5366_v26  ;;  %3614 = vmatprep.subr.bf16.mxu0 %v5231_v34  ;;  %v5065_v26 = vcombine.high %v551_v19, %v555_v20  ;;  %v419_v34 = vld [vmem:[#allocation8 + $0xe8] sm:$0xff] }
 0x15d   :  { %3655 = vmatprep.subr.bf16.mxu1 %v5359_v35  ;;  %v543_v35 = vld [vmem:[#allocation8 + $0x4c8] sm:$0xff]  ;;  %v4929_v39 = vcombine.high %v415_v27, %v419_v34 }
 0x15e   :  { %v5057_v40 = vcombine.high %v543_v35, %v547_v36  ;;  %v5056_v46 = vcombine.low %v543_v35, %v547_v36  ;;  %v639_v10 = vld [vmem:[#allocation8 + $0x7c8] sm:$0xff] }
 0x15f   :  { %3615 = vmatpush2.bf16.msra.mxu0 %v5230_v41  ;;  %v407_v41 = vld [vmem:[#allocation8 + $0x88] sm:$0xff] }
 0x160   :  { %3656 = vmatpush2.bf16.msra.mxu1 %v5358_v42  ;;  %3616 = vmatprep.subr.bf16.mxu0 %v5223_v45  ;;  %v411_v42 = vld [vmem:[#allocation8 + $0xa8] sm:$0xff] }
 0x161   :  { %3657 = vmatprep.subr.bf16.mxu1 %v5351_v31  ;;  %v539_v45 = vld [vmem:[#allocation8 + $0x4a8] sm:$0xff]  ;;  %v4928_v31 = vcombine.low %v415_v27, %v419_v34  ;;  %v4921_v47 = vcombine.high %v407_v41, %v411_v42  ;;  %v4920_v6 = vcombine.low %v407_v41, %v411_v42 }
 0x162   :  { %v5049_v49 = vcombine.high %v535_v43, %v539_v45  ;;  %v503_v18 = vld [vmem:[#allocation8 + $0x388] sm:$0xff] }
 0x163   :  { %3617 = vmatpush2.bf16.msra.mxu0 %v5222_v52  ;;  %v527_v52 = vld [vmem:[#allocation8 + $0x448] sm:$0xff] }
 0x164   :  { %3658 = vmatpush2.bf16.msra.mxu1 %v5350_v53  ;;  %3668 = vmatprep.subr.bf16.mxu0 %v4961_v54  ;;  %v531_v53 = vld [vmem:[#allocation8 + $0x468] sm:$0xff]  ;;  %v5048_v54 = vcombine.low %v535_v43, %v539_v45 }
 0x165   :  { %3709 = vmatprep.subr.bf16.mxu1 %v5089_v55  ;;  %v4913_v55 = vcombine.high %v399_v50, %v403_v51  ;;  %v5041_v56 = vcombine.high %v527_v52, %v531_v53  ;;  %v507_v19 = vld [vmem:[#allocation8 + $0x3a8] sm:$0xff] }
 0x166   :  { %3619 = vmatmul.mubr.bf16.vlgmr.msra.gmra.mxu0 %v5987_v0  ;;  %v631_v20 = vld [vmem:[#allocation8 + $0x788] sm:$0xff] }
 0x167   :  { %3660 = vmatmul.mubr.bf16.vlgmr.msra.gmra.mxu1 %v5985_v5  ;;  %3669 = vmatpush1.bf16.msra.mxu0 %v4960_v63  ;;  %v523_v63 = vld [vmem:[#allocation8 + $0x428] sm:$0xff] }
 0x168   :  { %3700 = vmatprep.mubr.bf16.mxu0 %v5949_v61  ;;  %3710 = vmatpush1.bf16.msra.mxu1 %v5088_v2  ;;  %v4912_v2 = vcombine.low %v399_v50, %v403_v51  ;;  %v5033_v7 = vcombine.high %v519_v60, %v523_v63  ;;  %v495_v34 = vld [vmem:[#allocation8 + $0x348] sm:$0xff] }
 0x169   :  { %3741 = vmatprep.mubr.bf16.mxu1 %v5951_v62  ;;  %3670 = vmatprep.subr.bf16.mxu0 %v4953_v3  ;;  %v5040_v3 = vcombine.low %v527_v52, %v531_v53  ;;  %v499_v35 = vld [vmem:[#allocation8 + $0x368] sm:$0xff] }
 0x16a   :  { %3711 = vmatprep.subr.bf16.mxu1 %v5081_v4  ;;  %v4905_v4 = vcombine.high %v391_v57, %v395_v59  ;;  %v623_v36 = vld [vmem:[#allocation8 + $0x748] sm:$0xff] }
 0x16b   :  { %3671 = vmatpush1.bf16.msra.mxu0 %v4952_v11  ;;  %v643_v11 = vld [vmem:[#allocation8 + $0x7e8] sm:$0xff] }
 0x16c   :  { %3712 = vmatpush1.bf16.msra.mxu1 %v5080_v13  ;;  %3672 = vmatprep.subr.bf16.mxu0 %v4945_v14  ;;  %v4904_v13 = vcombine.low %v391_v57, %v395_v59  ;;  %v5032_v14 = vcombine.low %v519_v60, %v523_v63  ;;  %v5153_v17 = vcombine.high %v639_v10, %v643_v11  ;;  %v487_v42 = vld [vmem:[#allocation8 + $0x308] sm:$0xff] }
 0x16d   :  { %3713 = vmatprep.subr.bf16.mxu1 %v5073_v16  ;;  %v5025_v16 = vcombine.high %v511_v8, %v515_v9  ;;  %v491_v43 = vld [vmem:[#allocation8 + $0x328] sm:$0xff] }
 0x16e   :  { %v615_v45 = vld [vmem:[#allocation8 + $0x708] sm:$0xff] }
 0x16f   :  { %3673 = vmatpush1.bf16.msra.mxu0 %v4944_v21  ;;  %v635_v21 = vld [vmem:[#allocation8 + $0x7a8] sm:$0xff] }
 0x170   :  { %3714 = vmatpush1.bf16.msra.mxu1 %v5072_v22  ;;  %3674 = vmatprep.subr.bf16.mxu0 %v4937_v23  ;;  %v5024_v22 = vcombine.low %v511_v8, %v515_v9  ;;  %v5152_v23 = vcombine.low %v639_v10, %v643_v11  ;;  %v5145_v27 = vcombine.high %v631_v20, %v635_v21  ;;  %v479_v51 = vld [vmem:[#allocation8 + $0x2c8] sm:$0xff] }
 0x171   :  { %3715 = vmatprep.subr.bf16.mxu1 %v5065_v26  ;;  %v5017_v26 = vcombine.high %v503_v18, %v507_v19  ;;  %v483_v52 = vld [vmem:[#allocation8 + $0x2e8] sm:$0xff] }
 0x172   :  { %v607_v53 = vld [vmem:[#allocation8 + $0x6c8] sm:$0xff] }
 0x173   :  { %3675 = vmatpush1.bf16.msra.mxu0 %v4936_v24  ;;  %v627_v24 = vld [vmem:[#allocation8 + $0x768] sm:$0xff] }
 0x174   :  { %3716 = vmatpush1.bf16.msra.mxu1 %v5064_v38  ;;  %3676 = vmatprep.subr.bf16.mxu0 %v4929_v39  ;;  %v5016_v38 = vcombine.low %v503_v18, %v507_v19  ;;  %v5144_v39 = vcombine.low %v631_v20, %v635_v21  ;;  %v5137_v41 = vcombine.high %v623_v36, %v627_v24  ;;  %v471_v59 = vld [vmem:[#allocation8 + $0x288] sm:$0xff] }
 0x175   :  { %3717 = vmatprep.subr.bf16.mxu1 %v5057_v40  ;;  %v5009_v40 = vcombine.high %v495_v34, %v499_v35  ;;  %v475_v60 = vld [vmem:[#allocation8 + $0x2a8] sm:$0xff] }
 0x176   :  { %v599_v63 = vld [vmem:[#allocation8 + $0x688] sm:$0xff] }
 0x177   :  { %3677 = vmatpush1.bf16.msra.mxu0 %v4928_v31  ;;  %v619_v31 = vld [vmem:[#allocation8 + $0x728] sm:$0xff] }
 0x178   :  { %3718 = vmatpush1.bf16.msra.mxu1 %v5056_v46  ;;  %3678 = vmatprep.subr.bf16.mxu0 %v4921_v47  ;;  %v5008_v46 = vcombine.low %v495_v34, %v499_v35  ;;  %v5136_v47 = vcombine.low %v623_v36, %v627_v24  ;;  %v5129_v50 = vcombine.high %v615_v45, %v619_v31  ;;  %v463_v9 = vld [vmem:[#allocation8 + $0x248] sm:$0xff] }
 0x179   :  { %3719 = vmatprep.subr.bf16.mxu1 %v5049_v49  ;;  %v5001_v49 = vcombine.high %v487_v42, %v491_v43  ;;  %v467_v10 = vld [vmem:[#allocation8 + $0x268] sm:$0xff] }
 0x17a   :  { %v591_v11 = vld [vmem:[#allocation8 + $0x648] sm:$0xff] }
 0x17b   :  { %3679 = vmatpush1.bf16.msra.mxu0 %v4920_v6  ;;  %v611_v6 = vld [vmem:[#allocation8 + $0x6e8] sm:$0xff] }
 0x17c   :  { %3720 = vmatpush1.bf16.msra.mxu1 %v5048_v54  ;;  %3680 = vmatprep.subr.bf16.mxu0 %v4913_v55  ;;  %v5000_v54 = vcombine.low %v487_v42, %v491_v43  ;;  %v5128_v55 = vcombine.low %v615_v45, %v619_v31  ;;  %v5121_v57 = vcombine.high %v607_v53, %v611_v6  ;;  %v455_v19 = vld [vmem:[#allocation8 + $0x208] sm:$0xff] }
 0x17d   :  { %3721 = vmatprep.subr.bf16.mxu1 %v5041_v56  ;;  %v4993_v56 = vcombine.high %v479_v51, %v483_v52  ;;  %v459_v20 = vld [vmem:[#allocation8 + $0x228] sm:$0xff] }
 0x17e   :  { %v583_v21 = vld [vmem:[#allocation8 + $0x608] sm:$0xff] }
 0x17f   :  { %3681 = vmatpush1.bf16.msra.mxu0 %v4912_v2  ;;  %v603_v2 = vld [vmem:[#allocation8 + $0x6a8] sm:$0xff] }
 0x180   :  { %3722 = vmatpush1.bf16.msra.mxu1 %v5040_v3  ;;  %3682 = vmatprep.subr.bf16.mxu0 %v4905_v4  ;;  %v4992_v3 = vcombine.low %v479_v51, %v483_v52  ;;  %v5120_v4 = vcombine.low %v607_v53, %v611_v6  ;;  %v5113_v8 = vcombine.high %v599_v63, %v603_v2  ;;  %v703_v35 = vld [vmem:[#allocation8 + $0x9c8] sm:$0xff] }
 0x181   :  { %3723 = vmatprep.subr.bf16.mxu1 %v5033_v7  ;;  %v4985_v7 = vcombine.high %v471_v59, %v475_v60  ;;  %v707_v36 = vld [vmem:[#allocation8 + $0x9e8] sm:$0xff] }
 0x182   :  { %v831_v24 = vld [vmem:[#allocation8 + $0xdc8] sm:$0xff]  ;;  %v5216_v31 = vcombine.low %v703_v35, %v707_v36 }
 0x183   :  { %3683 = vmatpush1.bf16.msra.mxu0 %v4904_v13  ;;  %v595_v13 = vld [vmem:[#allocation8 + $0x668] sm:$0xff] }
 0x184   :  { %3724 = vmatpush1.bf16.msra.mxu1 %v5032_v14  ;;  %3684 = vmatprep.subr.bf16.mxu0 %v5025_v16  ;;  %v4984_v14 = vcombine.low %v471_v59, %v475_v60  ;;  %v5112_v16 = vcombine.low %v599_v63, %v603_v2  ;;  %v5105_v18 = vcombine.high %v591_v11, %v595_v13  ;;  %v695_v43 = vld [vmem:[#allocation8 + $0x988] sm:$0xff] }
 0x185   :  { %3725 = vmatprep.subr.bf16.mxu1 %v5153_v17  ;;  %v4977_v17 = vcombine.high %v463_v9, %v467_v10  ;;  %v699_v45 = vld [vmem:[#allocation8 + $0x9a8] sm:$0xff] }
 0x186   :  { %v687_v51 = vld [vmem:[#allocation8 + $0x948] sm:$0xff] }
 0x187   :  { %3685 = vmatpush2.bf16.msra.mxu0 %v5024_v22  ;;  %v587_v22 = vld [vmem:[#allocation8 + $0x628] sm:$0xff] }
 0x188   :  { %3726 = vmatpush2.bf16.msra.mxu1 %v5152_v23  ;;  %3686 = vmatprep.subr.bf16.mxu0 %v5017_v26  ;;  %v4976_v23 = vcombine.low %v463_v9, %v467_v10  ;;  %v5104_v26 = vcombine.low %v591_v11, %v595_v13  ;;  %v5097_v34 = vcombine.high %v583_v21, %v587_v22  ;;  %v691_v52 = vld [vmem:[#allocation8 + $0x968] sm:$0xff] }
 0x189   :  { %3727 = vmatprep.subr.bf16.mxu1 %v5145_v27  ;;  %v4969_v27 = vcombine.high %v455_v19, %v459_v20  ;;  %v815_v6 = vld [vmem:[#allocation8 + $0xd48] sm:$0xff] }
 0x18a   :  { %v679_v60 = vld [vmem:[#allocation8 + $0x908] sm:$0xff] }
 0x18b   :  { %3687 = vmatpush2.bf16.msra.mxu0 %v5016_v38  ;;  %v835_v38 = vld [vmem:[#allocation8 + $0xde8] sm:$0xff] }
 0x18c   :  { %3728 = vmatpush2.bf16.msra.mxu1 %v5144_v39  ;;  %3688 = vmatprep.subr.bf16.mxu0 %v5009_v40  ;;  %v4968_v39 = vcombine.low %v455_v19, %v459_v20  ;;  %v5096_v40 = vcombine.low %v583_v21, %v587_v22  ;;  %v5345_v42 = vcombine.high %v831_v24, %v835_v38  ;;  %v683_v63 = vld [vmem:[#allocation8 + $0x928] sm:$0xff] }
 0x18d   :  { %3729 = vmatprep.subr.bf16.mxu1 %v5137_v41  ;;  %v5217_v41 = vcombine.high %v703_v35, %v707_v36  ;;  %v807_v2 = vld [vmem:[#allocation8 + $0xd08] sm:$0xff] }
 0x18e   :  { %v671_v10 = vld [vmem:[#allocation8 + $0x8c8] sm:$0xff] }
 0x18f   :  { %3689 = vmatpush2.bf16.msra.mxu0 %v5008_v46  ;;  %v823_v46 = vld [vmem:[#allocation8 + $0xd88] sm:$0xff] }
 0x190   :  { %3730 = vmatpush2.bf16.msra.mxu1 %v5136_v47  ;;  %3690 = vmatprep.subr.bf16.mxu0 %v5001_v49  ;;  %v827_v47 = vld [vmem:[#allocation8 + $0xda8] sm:$0xff]  ;;  %v5344_v49 = vcombine.low %v831_v24, %v835_v38 }
 0x191   :  { %3731 = vmatprep.subr.bf16.mxu1 %v5129_v50  ;;  %v5209_v50 = vcombine.high %v695_v43, %v699_v45  ;;  %v5337_v53 = vcombine.high %v823_v46, %v827_v47  ;;  %v675_v11 = vld [vmem:[#allocation8 + $0x8e8] sm:$0xff] }
 0x192   :  { %v799_v13 = vld [vmem:[#allocation8 + $0xcc8] sm:$0xff] }
 0x193   :  { %3691 = vmatpush2.bf16.msra.mxu0 %v5000_v54  ;;  %v819_v54 = vld [vmem:[#allocation8 + $0xd68] sm:$0xff] }
 0x194   :  { %3732 = vmatpush2.bf16.msra.mxu1 %v5128_v55  ;;  %3692 = vmatprep.subr.bf16.mxu0 %v4993_v56  ;;  %v5208_v55 = vcombine.low %v695_v43, %v699_v45  ;;  %v5336_v56 = vcombine.low %v823_v46, %v827_v47  ;;  %v5329_v59 = vcombine.high %v815_v6, %v819_v54  ;;  %v663_v20 = vld [vmem:[#allocation8 + $0x888] sm:$0xff] }
 0x195   :  { %3733 = vmatprep.subr.bf16.mxu1 %v5121_v57  ;;  %v5201_v57 = vcombine.high %v687_v51, %v691_v52  ;;  %v667_v21 = vld [vmem:[#allocation8 + $0x8a8] sm:$0xff] }
 0x196   :  { %v791_v22 = vld [vmem:[#allocation8 + $0xc88] sm:$0xff] }
 0x197   :  { %3693 = vmatpush2.bf16.msra.mxu0 %v4992_v3  ;;  %v811_v3 = vld [vmem:[#allocation8 + $0xd28] sm:$0xff] }
 0x198   :  { %3734 = vmatpush2.bf16.msra.mxu1 %v5120_v4  ;;  %3694 = vmatprep.subr.bf16.mxu0 %v4985_v7  ;;  %v5200_v4 = vcombine.low %v687_v51, %v691_v52  ;;  %v5328_v7 = vcombine.low %v815_v6, %v819_v54  ;;  %v5321_v9 = vcombine.high %v807_v2, %v811_v3  ;;  %v655_v36 = vld [vmem:[#allocation8 + $0x848] sm:$0xff] }
 0x199   :  { %3735 = vmatprep.subr.bf16.mxu1 %v5113_v8  ;;  %v5193_v8 = vcombine.high %v679_v60, %v683_v63  ;;  %v659_v24 = vld [vmem:[#allocation8 + $0x868] sm:$0xff] }
 0x19a   :  { %v783_v38 = vld [vmem:[#allocation8 + $0xc48] sm:$0xff] }
 0x19b   :  { %3695 = vmatpush2.bf16.msra.mxu0 %v4984_v14  ;;  %v803_v14 = vld [vmem:[#allocation8 + $0xce8] sm:$0xff] }
 0x19c   :  { %3736 = vmatpush2.bf16.msra.mxu1 %v5112_v16  ;;  %3696 = vmatprep.subr.bf16.mxu0 %v4977_v17  ;;  %v5192_v16 = vcombine.low %v679_v60, %v683_v63  ;;  %v5320_v17 = vcombine.low %v807_v2, %v811_v3  ;;  %v5313_v19 = vcombine.high %v799_v13, %v803_v14  ;;  %v647_v45 = vld [vmem:[#allocation8 + $0x808] sm:$0xff] }
 0x19d   :  { %3737 = vmatprep.subr.bf16.mxu1 %v5105_v18  ;;  %v5185_v18 = vcombine.high %v671_v10, %v675_v11  ;;  %v775_v46 = vld [vmem:[#allocation8 + $0xc08] sm:$0xff] }
 0x19e   :  { %v779_v47 = vld [vmem:[#allocation8 + $0xc28] sm:$0xff] }
 0x19f   :  { %3697 = vmatpush2.bf16.msra.mxu0 %v4976_v23  ;;  %v795_v23 = vld [vmem:[#allocation8 + $0xca8] sm:$0xff]  ;;  %v5289_v52 = vcombine.high %v775_v46, %v779_v47 }
 0x1a0   :  { %3738 = vmatpush2.bf16.msra.mxu1 %v5104_v26  ;;  %3698 = vmatprep.subr.bf16.mxu0 %v4969_v27  ;;  %v5184_v26 = vcombine.low %v671_v10, %v675_v11  ;;  %v5312_v27 = vcombine.low %v799_v13, %v803_v14  ;;  %v5305_v35 = vcombine.high %v791_v22, %v795_v23  ;;  %v771_v6 = vld [vmem:[#allocation8 + $0xbe8] sm:$0xff] }
 0x1a1   :  { %3739 = vmatprep.subr.bf16.mxu1 %v5097_v34  ;;  %v5177_v34 = vcombine.high %v663_v20, %v667_v21  ;;  %v895_v54 = vld [vmem:[#allocation8 + $0xfc8] sm:$0xff] }
 0x1a2   :  { %v759_v63 = vld [vmem:[#allocation8 + $0xb88] sm:$0xff] }
 0x1a3   :  { %3699 = vmatpush2.bf16.msra.mxu0 %v4968_v39  ;;  %v787_v39 = vld [vmem:[#allocation8 + $0xc68] sm:$0xff] }
 0x1a4   :  { %3740 = vmatpush2.bf16.msra.mxu1 %v5096_v40  ;;  %3750 = vmatprep.subr.bf16.mxu0 %v5217_v41  ;;  %v5176_v40 = vcombine.low %v663_v20, %v667_v21  ;;  %v5304_v41 = vcombine.low %v791_v22, %v795_v23  ;;  %v5297_v43 = vcombine.high %v783_v38, %v787_v39  ;;  %v763_v2 = vld [vmem:[#allocation8 + $0xba8] sm:$0xff] }
 0x1a5   :  { %3791 = vmatprep.subr.bf16.mxu1 %v5345_v42  ;;  %v5169_v42 = vcombine.high %v655_v36, %v659_v24  ;;  %v887_v3 = vld [vmem:[#allocation8 + $0xf88] sm:$0xff] }
 0x1a6   :  { %3701 = vmatmul.mubr.bf16.vlgmr.msra.gmra.mxu0 %v5959_v1  ;;  %v751_v11 = vld [vmem:[#allocation8 + $0xb48] sm:$0xff] }
 0x1a7   :  { %3742 = vmatmul.mubr.bf16.vlgmr.msra.gmra.mxu1 %v5947_v58  ;;  %3751 = vmatpush1.bf16.msra.mxu0 %v5216_v31  ;;  %v651_v31 = vld [vmem:[#allocation8 + $0x828] sm:$0xff] }
 0x1a8   :  { %3782 = vmatprep.mubr.bf16.mxu0 %v5969_v25  ;;  %3792 = vmatpush1.bf16.msra.mxu1 %v5344_v49  ;;  %v5168_v49 = vcombine.low %v655_v36, %v659_v24  ;;  %v5161_v51 = vcombine.high %v647_v45, %v651_v31  ;;  %v755_v13 = vld [vmem:[#allocation8 + $0xb68] sm:$0xff] }
 0x1a9   :  { %3823 = vmatprep.mubr.bf16.mxu1 %v5971_v37  ;;  %3752 = vmatprep.subr.bf16.mxu0 %v5209_v50  ;;  %v5296_v50 = vcombine.low %v783_v38, %v787_v39  ;;  %v879_v14 = vld [vmem:[#allocation8 + $0xf48] sm:$0xff] }
 0x1aa   :  { %3793 = vmatprep.subr.bf16.mxu1 %v5337_v53  ;;  %v767_v53 = vld [vmem:[#allocation8 + $0xbc8] sm:$0xff] }
 0x1ab   :  { %3753 = vmatpush1.bf16.msra.mxu0 %v5208_v55  ;;  %v899_v55 = vld [vmem:[#allocation8 + $0xfe8] sm:$0xff] }
 0x1ac   :  { %3794 = vmatpush1.bf16.msra.mxu1 %v5336_v56  ;;  %3754 = vmatprep.subr.bf16.mxu0 %v5201_v57  ;;  %v5160_v56 = vcombine.low %v647_v45, %v651_v31  ;;  %v5288_v57 = vcombine.low %v775_v46, %v779_v47  ;;  %v5409_v60 = vcombine.high %v895_v54, %v899_v55  ;;  %v743_v21 = vld [vmem:[#allocation8 + $0xb08] sm:$0xff] }
 0x1ad   :  { %3795 = vmatprep.subr.bf16.mxu1 %v5329_v59  ;;  %v5281_v59 = vcombine.high %v767_v53, %v771_v6  ;;  %v747_v22 = vld [vmem:[#allocation8 + $0xb28] sm:$0xff] }
 0x1ae   :  { %v871_v23 = vld [vmem:[#allocation8 + $0xf08] sm:$0xff] }
 0x1af   :  { %3755 = vmatpush1.bf16.msra.mxu0 %v5200_v4  ;;  %v891_v4 = vld [vmem:[#allocation8 + $0xfa8] sm:$0xff] }
 0x1b0   :  { %3796 = vmatpush1.bf16.msra.mxu1 %v5328_v7  ;;  %3756 = vmatprep.subr.bf16.mxu0 %v5193_v8  ;;  %v5280_v7 = vcombine.low %v767_v53, %v771_v6  ;;  %v5408_v8 = vcombine.low %v895_v54, %v899_v55  ;;  %v5401_v10 = vcombine.high %v887_v3, %v891_v4  ;;  %v735_v24 = vld [vmem:[#allocation8 + $0xac8] sm:$0xff] }
 0x1b1   :  { %3797 = vmatprep.subr.bf16.mxu1 %v5321_v9  ;;  %v5273_v9 = vcombine.high %v759_v63, %v763_v2  ;;  %v739_v38 = vld [vmem:[#allocation8 + $0xae8] sm:$0xff] }
 0x1b2   :  { %v863_v39 = vld [vmem:[#allocation8 + $0xec8] sm:$0xff] }
 0x1b3   :  { %3757 = vmatpush1.bf16.msra.mxu0 %v5192_v16  ;;  %v883_v16 = vld [vmem:[#allocation8 + $0xf68] sm:$0xff] }
 0x1b4   :  { %3798 = vmatpush1.bf16.msra.mxu1 %v5320_v17  ;;  %3758 = vmatprep.subr.bf16.mxu0 %v5185_v18  ;;  %v5272_v17 = vcombine.low %v759_v63, %v763_v2  ;;  %v5400_v18 = vcombine.low %v887_v3, %v891_v4  ;;  %v5393_v20 = vcombine.high %v879_v14, %v883_v16  ;;  %v727_v31 = vld [vmem:[#allocation8 + $0xa88] sm:$0xff] }
 0x1b5   :  { %3799 = vmatprep.subr.bf16.mxu1 %v5313_v19  ;;  %v5265_v19 = vcombine.high %v751_v11, %v755_v13  ;;  %v731_v46 = vld [vmem:[#allocation8 + $0xaa8] sm:$0xff] }
 0x1b6   :  { %v855_v47 = vld [vmem:[#allocation8 + $0xe88] sm:$0xff] }
 0x1b7   :  { %3759 = vmatpush1.bf16.msra.mxu0 %v5184_v26  ;;  %v875_v26 = vld [vmem:[#allocation8 + $0xf28] sm:$0xff] }
 0x1b8   :  { %3800 = vmatpush1.bf16.msra.mxu1 %v5312_v27  ;;  %3760 = vmatprep.subr.bf16.mxu0 %v5177_v34  ;;  %v5264_v27 = vcombine.low %v751_v11, %v755_v13  ;;  %v5392_v34 = vcombine.low %v879_v14, %v883_v16  ;;  %v5385_v36 = vcombine.high %v871_v23, %v875_v26  ;;  %v719_v6 = vld [vmem:[#allocation8 + $0xa48] sm:$0xff]  ;;  %v448_v13 = vld [vmem:[#allocation8 + $0x1d0] sm:$0xff] }
 0x1b9   :  { %3801 = vmatprep.subr.bf16.mxu1 %v5305_v35  ;;  %v5257_v35 = vcombine.high %v743_v21, %v747_v22  ;;  %v723_v54 = vld [vmem:[#allocation8 + $0xa68] sm:$0xff]  ;;  %v452_v14 = vld [vmem:[#allocation8 + $0x1f0] sm:$0xff] }
 0x1ba   :  { %v847_v55 = vld [vmem:[#allocation8 + $0xe48] sm:$0xff]  ;;  %v576_v16 = vld [vmem:[#allocation8 + $0x5d0] sm:$0xff] }
 0x1bb   :  { %3761 = vmatpush1.bf16.msra.mxu0 %v5176_v40  ;;  %v867_v40 = vld [vmem:[#allocation8 + $0xee8] sm:$0xff] }
 0x1bc   :  { %3802 = vmatpush1.bf16.msra.mxu1 %v5304_v41  ;;  %3762 = vmatprep.subr.bf16.mxu0 %v5169_v42  ;;  %v5256_v41 = vcombine.low %v743_v21, %v747_v22  ;;  %v5384_v42 = vcombine.low %v871_v23, %v875_v26  ;;  %v5377_v45 = vcombine.high %v863_v39, %v867_v40  ;;  %v711_v2 = vld [vmem:[#allocation8 + $0xa08] sm:$0xff]  ;;  %v5997_v21 = vld [vmem:[#allocation10] sm:$0xff]  ;;  %v440_v23 = vld [vmem:[#allocation8 + $0x190] sm:$0xff] }
 0x1bd   :  { %3803 = vmatprep.subr.bf16.mxu1 %v5297_v43  ;;  %v5249_v43 = vcombine.high %v735_v24, %v739_v38  ;;  %v715_v3 = vld [vmem:[#allocation8 + $0xa28] sm:$0xff]  ;;  %v444_v26 = vld [vmem:[#allocation8 + $0x1b0] sm:$0xff] }
 0x1be   :  { %v839_v4 = vld [vmem:[#allocation8 + $0xe08] sm:$0xff] }
 0x1bf   :  { %3763 = vmatpush1.bf16.msra.mxu0 %v5168_v49  ;;  %v859_v49 = vld [vmem:[#allocation8 + $0xea8] sm:$0xff] }
 0x1c0   :  { %3804 = vmatpush1.bf16.msra.mxu1 %v5296_v50  ;;  %3764 = vmatprep.subr.bf16.mxu0 %v5161_v51  ;;  %v5248_v50 = vcombine.low %v735_v24, %v739_v38  ;;  %v5376_v51 = vcombine.low %v863_v39, %v867_v40  ;;  %v5369_v53 = vcombine.high %v855_v47, %v859_v49  ;;  %v432_v40 = vld [vmem:[#allocation8 + $0x150] sm:$0xff] }
 0x1c1   :  { %3805 = vmatprep.subr.bf16.mxu1 %v5289_v52  ;;  %v5241_v52 = vcombine.high %v727_v31, %v731_v46  ;;  %v911_v38 = vrot.slane %v5997_v21, %v127_v32  ;;  %v4955_v39 = vcombine.high %v440_v23, %v444_v26 }
 0x1c3   :  { %3765 = vmatpush1.bf16.msra.mxu0 %v5160_v56  ;;  %v851_v56 = vld [vmem:[#allocation8 + $0xe68] sm:$0xff] }
 0x1c4   :  { %3806 = vmatpush1.bf16.msra.mxu1 %v5288_v57  ;;  %3766 = vmatprep.subr.bf16.mxu0 %v5281_v59  ;;  %v5240_v57 = vcombine.low %v727_v31, %v731_v46  ;;  %v5368_v59 = vcombine.low %v855_v47, %v859_v49  ;;  %v5361_v63 = vcombine.high %v847_v55, %v851_v56  ;;  %v560_v31 = vld [vmem:[#allocation8 + $0x550] sm:$0xff] }
 0x1c5   :  { %3807 = vmatprep.subr.bf16.mxu1 %v5409_v60  ;;  %v5233_v60 = vcombine.high %v719_v6, %v723_v54  ;;  %v4954_v47 = vcombine.low %v440_v23, %v444_v26  ;;  %v536_v23 = vld [vmem:[#allocation8 + $0x490] sm:$0xff] }
 0x1c6   :  { %v540_v26 = vld [vmem:[#allocation8 + $0x4b0] sm:$0xff] }
 0x1c7   :  { %3767 = vmatpush2.bf16.msra.mxu0 %v5280_v7  ;;  %v843_v7 = vld [vmem:[#allocation8 + $0xe28] sm:$0xff] }
 0x1c8   :  { %3808 = vmatpush2.bf16.msra.mxu1 %v5408_v8  ;;  %3768 = vmatprep.subr.bf16.mxu0 %v5273_v9  ;;  %v5232_v8 = vcombine.low %v719_v6, %v723_v54  ;;  %v5360_v9 = vcombine.low %v847_v55, %v851_v56  ;;  %v5353_v11 = vcombine.high %v839_v4, %v843_v7  ;;  %v424_v54 = vld [vmem:[#allocation8 + $0x110] sm:$0xff] }
 0x1c9   :  { %3809 = vmatprep.subr.bf16.mxu1 %v5401_v10  ;;  %v5225_v10 = vcombine.high %v711_v2, %v715_v3  ;;  %v428_v55 = vld [vmem:[#allocation8 + $0x130] sm:$0xff] }
 0x1cb   :  { %3769 = vmatpush2.bf16.msra.mxu0 %v5272_v17  ;;  %v580_v17 = vld [vmem:[#allocation8 + $0x5f0] sm:$0xff] }
 0x1cc   :  { %3810 = vmatpush2.bf16.msra.mxu1 %v5400_v18  ;;  %3770 = vmatprep.subr.bf16.mxu0 %v5265_v19  ;;  %v5224_v18 = vcombine.low %v711_v2, %v715_v3  ;;  %v5352_v19 = vcombine.low %v839_v4, %v843_v7  ;;  %v5091_v22 = vcombine.high %v576_v16, %v580_v17 }
 0x1cd   :  { %3811 = vmatprep.subr.bf16.mxu1 %v5393_v20  ;;  %v4963_v20 = vcombine.high %v448_v13, %v452_v14  ;;  %v5090_v24 = vcombine.low %v576_v16, %v580_v17  ;;  %v4938_v16 = vcombine.low %v424_v54, %v428_v55 }
 0x1cf   :  { %3771 = vmatpush2.bf16.msra.mxu0 %v5264_v27  ;;  %v4962_v27 = vcombine.low %v448_v13, %v452_v14  ;;  %v544_v13 = vld [vmem:[#allocation8 + $0x4d0] sm:$0xff] }
 0x1d0   :  { %3812 = vmatpush2.bf16.msra.mxu1 %v5392_v34  ;;  %3772 = vmatprep.subr.bf16.mxu0 %v5257_v35  ;;  %v907_v34 = vrot.slane %v5997_v21, %v123_v29  ;;  %v568_v35 = vld [vmem:[#allocation8 + $0x590] sm:$0xff] }
 0x1d1   :  { %3813 = vmatprep.subr.bf16.mxu1 %v5385_v36  ;;  %v572_v36 = vld [vmem:[#allocation8 + $0x5b0] sm:$0xff] }
 0x1d2   :  { %v564_v29 = vld [vmem:[#allocation8 + $0x570] sm:$0xff] }
 0x1d3   :  { %3773 = vmatpush2.bf16.msra.mxu0 %v5256_v41  ;;  %v436_v41 = vld [vmem:[#allocation8 + $0x170] sm:$0xff]  ;;  %v5075_v6 = vcombine.high %v560_v31, %v564_v29  ;;  %v5074_v7 = vcombine.low %v560_v31, %v564_v29 }
 0x1d4   :  { %3814 = vmatpush2.bf16.msra.mxu1 %v5384_v42  ;;  %3774 = vmatprep.subr.bf16.mxu0 %v5249_v43  ;;  %v4946_v2 = vcombine.low %v432_v40, %v436_v41  ;;  %v548_v14 = vld [vmem:[#allocation8 + $0x4f0] sm:$0xff] }
 0x1d5   :  { %3815 = vmatprep.subr.bf16.mxu1 %v5377_v45  ;;  %v5083_v45 = vcombine.high %v568_v35, %v572_v36  ;;  %v392_v31 = vld [vmem:[#allocation8 + $0x10] sm:$0xff] }
 0x1d6   :  { %v396_v29 = vld [vmem:[#allocation8 + $0x30] sm:$0xff] }
 0x1d7   :  { %3775 = vmatpush2.bf16.msra.mxu0 %v5248_v50  ;;  %v5082_v50 = vcombine.low %v568_v35, %v572_v36  ;;  %v5051_v36 = vcombine.high %v536_v23, %v540_v26 }
 0x1d8   :  { %3816 = vmatpush2.bf16.msra.mxu1 %v5376_v51  ;;  %3776 = vmatprep.subr.bf16.mxu0 %v5241_v52  ;;  %v4947_v51 = vcombine.high %v432_v40, %v436_v41  ;;  %v532_v40 = vld [vmem:[#allocation8 + $0x470] sm:$0xff] }
 0x1d9   :  { %3817 = vmatprep.subr.bf16.mxu1 %v5369_v53 }
 0x1db   :  { %3777 = vmatpush2.bf16.msra.mxu0 %v5240_v57 }
 0x1dc   :  { %3818 = vmatpush2.bf16.msra.mxu1 %v5368_v59  ;;  %3778 = vmatprep.subr.bf16.mxu0 %v5233_v60  ;;  %v552_v59 = vld [vmem:[#allocation8 + $0x510] sm:$0xff] }
 0x1dd   :  { %3819 = vmatprep.subr.bf16.mxu1 %v5361_v63  ;;  %v556_v60 = vld [vmem:[#allocation8 + $0x530] sm:$0xff] }
 0x1de   :  { %v5066_v17 = vcombine.low %v552_v59, %v556_v60 }
 0x1df   :  { %3779 = vmatpush2.bf16.msra.mxu0 %v5232_v8  ;;  %v4939_v8 = vcombine.high %v424_v54, %v428_v55  ;;  %v640_v54 = vld [vmem:[#allocation8 + $0x7d0] sm:$0xff] }
 0x1e0   :  { %3820 = vmatpush2.bf16.msra.mxu1 %v5360_v9  ;;  %3780 = vmatprep.subr.bf16.mxu0 %v5225_v10  ;;  %v5067_v9 = vcombine.high %v552_v59, %v556_v60  ;;  %v416_v10 = vld [vmem:[#allocation8 + $0xd0] sm:$0xff] }
 0x1e1   :  { %3821 = vmatprep.subr.bf16.mxu1 %v5353_v11  ;;  %v420_v11 = vld [vmem:[#allocation8 + $0xf0] sm:$0xff] }
 0x1e2   :  { %v644_v55 = vld [vmem:[#allocation8 + $0x7f0] sm:$0xff] }
 0x1e3   :  { %3781 = vmatpush2.bf16.msra.mxu0 %v5224_v18  ;;  %v4931_v18 = vcombine.high %v416_v10, %v420_v11  ;;  %v5155_v60 = vcombine.high %v640_v54, %v644_v55 }
 0x1e4   :  { %3822 = vmatpush2.bf16.msra.mxu1 %v5352_v19  ;;  %3832 = vmatprep.subr.bf16.mxu0 %v4963_v20  ;;  %v5059_v19 = vcombine.high %v544_v13, %v548_v14  ;;  %v408_v20 = vld [vmem:[#allocation8 + $0x90] sm:$0xff] }
 0x1e5   :  { %3873 = vmatprep.subr.bf16.mxu1 %v5091_v22  ;;  %v412_v22 = vld [vmem:[#allocation8 + $0xb0] sm:$0xff] }
 0x1e6   :  { %3783 = vmatmul.mubr.bf16.vlgmr.msra.gmra.mxu0 %v5987_v0  ;;  %v3538_v42 = vpop.f32.mrf.mxu0  ;;  %v4923_v35 = vcombine.high %v408_v20, %v412_v22  ;;  %v4922_v41 = vcombine.low %v408_v20, %v412_v22 }
 0x1e7   :  { %v3579_v43 = vpop.f32.mrf.mxu1  ;;  %3824 = vmatmul.mubr.bf16.vlgmr.msra.gmra.mxu1 %v5985_v5  ;;  %v3539_v46 = vadd.f32 %v3538_v42, %v907_v34  ;;  %3833 = vmatpush1.bf16.msra.mxu0 %v4962_v27  ;;  %v4930_v27 = vcombine.low %v416_v10, %v420_v11  ;;  %v5058_v34 = vcombine.low %v544_v13, %v548_v14  ;;  %v496_v13 = vld [vmem:[#allocation8 + $0x350] sm:$0xff] }
 0x1e8   :  { %3864 = vmatprep.mubr.bf16.mxu0 %v5949_v61  ;;  %3874 = vmatpush1.bf16.msra.mxu1 %v5090_v24  ;;  %v3540_v49 = vpop.f32.mrf.mxu0  ;;  %v400_v24 = vld [vmem:[#allocation8 + $0x50] sm:$0xff]  ;;  %v5050_v42 = vcombine.low %v536_v23, %v540_v26 }
 0x1e9   :  { %v3581_v32 = vpop.f32.mrf.mxu1  ;;  %v6008_v52 = vadd.f32 %v3579_v43, %v3539_v46  ;;  %3905 = vmatprep.mubr.bf16.mxu1 %v5951_v62  ;;  %v3541_v53 = vadd.f32 %v3540_v49, %v911_v38  ;;  %3834 = vmatprep.subr.bf16.mxu0 %v4955_v39  ;;  %v404_v38 = vld [vmem:[#allocation8 + $0x70] sm:$0xff] }
 0x1ea   :  { %3875 = vmatprep.subr.bf16.mxu1 %v5083_v45  ;;  %v3542_v56 = vpop.f32.mrf.mxu0  ;;  %v528_v39 = vld [vmem:[#allocation8 + $0x450] sm:$0xff]  ;;  %v4915_v43 = vcombine.high %v400_v24, %v404_v38  ;;  %v4914_v49 = vcombine.low %v400_v24, %v404_v38 }
 0x1eb   :  { %v3583_v57 = vpop.f32.mrf.mxu1  ;;  %v6011_v63 = vadd.f32 %v3581_v32, %v3541_v53  ;;  %3835 = vmatpush1.bf16.msra.mxu0 %v4954_v47  ;;  %v5043_v45 = vcombine.high %v528_v39, %v532_v40  ;;  %v520_v46 = vld [vmem:[#allocation8 + $0x410] sm:$0xff]  ;;  %v5042_v32 = vcombine.low %v528_v39, %v532_v40  ;;  %v4906_v56 = vcombine.low %v392_v31, %v396_v29 }
 0x1ec   :  { %3876 = vmatpush1.bf16.msra.mxu1 %v5082_v50  ;;  %v3543_v3 = vpop.f32.mrf.mxu0  ;;  %3836 = vmatprep.subr.bf16.mxu0 %v4947_v51  ;;  %v524_v47 = vld [vmem:[#allocation8 + $0x430] sm:$0xff]  ;;  %v4907_v50 = vcombine.high %v392_v31, %v396_v29 }
 0x1ed   :  { %v3584_v4 = vpop.f32.mrf.mxu1  ;;  %3877 = vmatprep.subr.bf16.mxu1 %v5075_v6  ;;  %v5035_v51 = vcombine.high %v520_v46, %v524_v47  ;;  %v512_v53 = vld [vmem:[#allocation8 + $0x3d0] sm:$0xff]  ;;  %v5034_v57 = vcombine.low %v520_v46, %v524_v47 }
 0x1ee   :  { %v516_v6 = vld [vmem:[#allocation8 + $0x3f0] sm:$0xff] }
 0x1ef   :  { %3837 = vmatpush1.bf16.msra.mxu0 %v4946_v2  ;;  %v5027_v59 = vcombine.high %v512_v53, %v516_v6  ;;  %v504_v2 = vld [vmem:[#allocation8 + $0x390] sm:$0xff] }
 0x1f0   :  { %3878 = vmatpush1.bf16.msra.mxu1 %v5074_v7  ;;  %3838 = vmatprep.subr.bf16.mxu0 %v4939_v8  ;;  %v508_v3 = vld [vmem:[#allocation8 + $0x3b0] sm:$0xff]  ;;  %v5026_v8 = vcombine.low %v512_v53, %v516_v6 }
 0x1f1   :  { %3879 = vmatprep.subr.bf16.mxu1 %v5067_v9  ;;  %v632_v4 = vld [vmem:[#allocation8 + $0x790] sm:$0xff]  ;;  %v5154_v9 = vcombine.low %v640_v54, %v644_v55  ;;  %v5019_v10 = vcombine.high %v504_v2, %v508_v3 }
 0x1f2   :  { %v636_v7 = vld [vmem:[#allocation8 + $0x7b0] sm:$0xff] }
 0x1f3   :  { %3839 = vmatpush1.bf16.msra.mxu0 %v4938_v16  ;;  %v5147_v11 = vcombine.high %v632_v4, %v636_v7  ;;  %v500_v14 = vld [vmem:[#allocation8 + $0x370] sm:$0xff] }
 0x1f4   :  { %3880 = vmatpush1.bf16.msra.mxu1 %v5066_v17  ;;  %3840 = vmatprep.subr.bf16.mxu0 %v4931_v18  ;;  %v624_v16 = vld [vmem:[#allocation8 + $0x750] sm:$0xff]  ;;  %v5018_v18 = vcombine.low %v504_v2, %v508_v3  ;;  %v5011_v20 = vcombine.high %v496_v13, %v500_v14 }
 0x1f5   :  { %3881 = vmatprep.subr.bf16.mxu1 %v5059_v19  ;;  %v628_v17 = vld [vmem:[#allocation8 + $0x770] sm:$0xff]  ;;  %v5146_v19 = vcombine.low %v632_v4, %v636_v7 }
 0x1f6   :  { %v5139_v22 = vcombine.high %v624_v16, %v628_v17  ;;  %v488_v23 = vld [vmem:[#allocation8 + $0x310] sm:$0xff] }
 0x1f7   :  { %3841 = vmatpush1.bf16.msra.mxu0 %v4930_v27  ;;  %v492_v26 = vld [vmem:[#allocation8 + $0x330] sm:$0xff] }
 0x1f8   :  { %3882 = vmatpush1.bf16.msra.mxu1 %v5058_v34  ;;  %3842 = vmatprep.subr.bf16.mxu0 %v4923_v35  ;;  %v616_v27 = vld [vmem:[#allocation8 + $0x710] sm:$0xff]  ;;  %v5010_v35 = vcombine.low %v496_v13, %v500_v14  ;;  %v5003_v24 = vcombine.high %v488_v23, %v492_v26 }
 0x1f9   :  { %3883 = vmatprep.subr.bf16.mxu1 %v5051_v36  ;;  %v620_v34 = vld [vmem:[#allocation8 + $0x730] sm:$0xff]  ;;  %v5138_v36 = vcombine.low %v624_v16, %v628_v17 }
 0x1fa   :  { %v5131_v38 = vcombine.high %v616_v27, %v620_v34  ;;  %v480_v39 = vld [vmem:[#allocation8 + $0x2d0] sm:$0xff] }
 0x1fb   :  { %3843 = vmatpush1.bf16.msra.mxu0 %v4922_v41  ;;  %v484_v40 = vld [vmem:[#allocation8 + $0x2f0] sm:$0xff] }
 0x1fc   :  { %3884 = vmatpush1.bf16.msra.mxu1 %v5050_v42  ;;  %3844 = vmatprep.subr.bf16.mxu0 %v4915_v43  ;;  %v608_v41 = vld [vmem:[#allocation8 + $0x6d0] sm:$0xff]  ;;  %v5002_v43 = vcombine.low %v488_v23, %v492_v26  ;;  %v4995_v31 = vcombine.high %v480_v39, %v484_v40 }
 0x1fd   :  { %3885 = vmatprep.subr.bf16.mxu1 %v5043_v45  ;;  %v612_v42 = vld [vmem:[#allocation8 + $0x6f0] sm:$0xff]  ;;  %v5130_v45 = vcombine.low %v616_v27, %v620_v34 }
 0x1fe   :  { %v5123_v29 = vcombine.high %v608_v41, %v612_v42  ;;  %v472_v46 = vld [vmem:[#allocation8 + $0x290] sm:$0xff] }
 0x1ff   :  { %3845 = vmatpush1.bf16.msra.mxu0 %v4914_v49  ;;  %v476_v47 = vld [vmem:[#allocation8 + $0x2b0] sm:$0xff] }
 0x200   :  { %3886 = vmatpush1.bf16.msra.mxu1 %v5042_v32  ;;  %3846 = vmatprep.subr.bf16.mxu0 %v4907_v50  ;;  %v600_v49 = vld [vmem:[#allocation8 + $0x690] sm:$0xff]  ;;  %v4994_v50 = vcombine.low %v480_v39, %v484_v40  ;;  %v4987_v53 = vcombine.high %v472_v46, %v476_v47 }
 0x201   :  { %3887 = vmatprep.subr.bf16.mxu1 %v5035_v51  ;;  %v604_v32 = vld [vmem:[#allocation8 + $0x6b0] sm:$0xff]  ;;  %v5122_v51 = vcombine.low %v608_v41, %v612_v42 }
 0x202   :  { %v5115_v6 = vcombine.high %v600_v49, %v604_v32  ;;  %v464_v54 = vld [vmem:[#allocation8 + $0x250] sm:$0xff] }
 0x203   :  { %3847 = vmatpush1.bf16.msra.mxu0 %v4906_v56  ;;  %v468_v55 = vld [vmem:[#allocation8 + $0x270] sm:$0xff] }
 0x204   :  { %3888 = vmatpush1.bf16.msra.mxu1 %v5034_v57  ;;  %3848 = vmatprep.subr.bf16.mxu0 %v5027_v59  ;;  %v592_v56 = vld [vmem:[#allocation8 + $0x650] sm:$0xff]  ;;  %v4986_v59 = vcombine.low %v472_v46, %v476_v47  ;;  %v4979_v2 = vcombine.high %v464_v54, %v468_v55 }
 0x205   :  { %3889 = vmatprep.subr.bf16.mxu1 %v5155_v60  ;;  %v596_v57 = vld [vmem:[#allocation8 + $0x670] sm:$0xff]  ;;  %v5114_v60 = vcombine.low %v600_v49, %v604_v32 }
 0x206   :  { %v5107_v3 = vcombine.high %v592_v56, %v596_v57  ;;  %v456_v4 = vld [vmem:[#allocation8 + $0x210] sm:$0xff] }
 0x207   :  { %3849 = vmatpush2.bf16.msra.mxu0 %v5026_v8  ;;  %v460_v7 = vld [vmem:[#allocation8 + $0x230] sm:$0xff] }
 0x208   :  { %3890 = vmatpush2.bf16.msra.mxu1 %v5154_v9  ;;  %3850 = vmatprep.subr.bf16.mxu0 %v5019_v10  ;;  %v584_v8 = vld [vmem:[#allocation8 + $0x610] sm:$0xff]  ;;  %v4978_v10 = vcombine.low %v464_v54, %v468_v55  ;;  %v4971_v13 = vcombine.high %v456_v4, %v460_v7 }
 0x209   :  { %3891 = vmatprep.subr.bf16.mxu1 %v5147_v11  ;;  %v588_v9 = vld [vmem:[#allocation8 + $0x630] sm:$0xff]  ;;  %v5106_v11 = vcombine.low %v592_v56, %v596_v57 }
 0x20a   :  { %v5099_v14 = vcombine.high %v584_v8, %v588_v9  ;;  %v704_v16 = vld [vmem:[#allocation8 + $0x9d0] sm:$0xff] }
 0x20b   :  { %3851 = vmatpush2.bf16.msra.mxu0 %v5018_v18  ;;  %v708_v17 = vld [vmem:[#allocation8 + $0x9f0] sm:$0xff] }
 0x20c   :  { %3892 = vmatpush2.bf16.msra.mxu1 %v5146_v19  ;;  %3852 = vmatprep.subr.bf16.mxu0 %v5011_v20  ;;  %v832_v18 = vld [vmem:[#allocation8 + $0xdd0] sm:$0xff]  ;;  %v4970_v20 = vcombine.low %v456_v4, %v460_v7  ;;  %v5219_v23 = vcombine.high %v704_v16, %v708_v17 }
 0x20d   :  { %3893 = vmatprep.subr.bf16.mxu1 %v5139_v22  ;;  %v836_v19 = vld [vmem:[#allocation8 + $0xdf0] sm:$0xff]  ;;  %v5098_v22 = vcombine.low %v584_v8, %v588_v9 }
 0x20e   :  { %v5347_v26 = vcombine.high %v832_v18, %v836_v19  ;;  %v696_v27 = vld [vmem:[#allocation8 + $0x990] sm:$0xff] }
 0x20f   :  { %3853 = vmatpush2.bf16.msra.mxu0 %v5010_v35  ;;  %v700_v34 = vld [vmem:[#allocation8 + $0x9b0] sm:$0xff]  ;;  %v5218_v35 = vcombine.low %v704_v16, %v708_v17 }
 0x210   :  { %3894 = vmatpush2.bf16.msra.mxu1 %v5138_v36  ;;  %3854 = vmatprep.subr.bf16.mxu0 %v5003_v24  ;;  %v824_v36 = vld [vmem:[#allocation8 + $0xd90] sm:$0xff]  ;;  %v5211_v39 = vcombine.high %v696_v27, %v700_v34  ;;  %v5210_v47 = vcombine.low %v696_v27, %v700_v34 }
 0x211   :  { %3895 = vmatprep.subr.bf16.mxu1 %v5131_v38  ;;  %v828_v24 = vld [vmem:[#allocation8 + $0xdb0] sm:$0xff]  ;;  %v5346_v38 = vcombine.low %v832_v18, %v836_v19 }
 0x212   :  { %v688_v40 = vld [vmem:[#allocation8 + $0x950] sm:$0xff] }
 0x213   :  { %3855 = vmatpush2.bf16.msra.mxu0 %v5002_v43  ;;  %v692_v41 = vld [vmem:[#allocation8 + $0x970] sm:$0xff] }
 0x214   :  { %3896 = vmatpush2.bf16.msra.mxu1 %v5130_v45  ;;  %3856 = vmatprep.subr.bf16.mxu0 %v4995_v31  ;;  %v5339_v45 = vcombine.high %v824_v36, %v828_v24  ;;  %v816_v31 = vld [vmem:[#allocation8 + $0xd50] sm:$0xff] }
 0x215   :  { %3897 = vmatprep.subr.bf16.mxu1 %v5123_v29  ;;  %v820_v29 = vld [vmem:[#allocation8 + $0xd70] sm:$0xff] }
 0x216   :  { %v5331_v54 = vcombine.high %v816_v31, %v820_v29  ;;  %v684_v55 = vld [vmem:[#allocation8 + $0x930] sm:$0xff]  ;;  %v5330_v8 = vcombine.low %v816_v31, %v820_v29 }
 0x217   :  { %3857 = vmatpush2.bf16.msra.mxu0 %v4994_v50  ;;  %v5338_v50 = vcombine.low %v824_v36, %v828_v24  ;;  %v656_v24 = vld [vmem:[#allocation8 + $0x850] sm:$0xff] }
 0x218   :  { %3898 = vmatpush2.bf16.msra.mxu1 %v5122_v51  ;;  %3858 = vmatprep.subr.bf16.mxu0 %v4987_v53  ;;  %v5203_v51 = vcombine.high %v688_v40, %v692_v41  ;;  %v648_v31 = vld [vmem:[#allocation8 + $0x810] sm:$0xff] }
 0x219   :  { %3899 = vmatprep.subr.bf16.mxu1 %v5115_v6  ;;  %v652_v29 = vld [vmem:[#allocation8 + $0x830] sm:$0xff] }
 0x21b   :  { %3859 = vmatpush2.bf16.msra.mxu0 %v4986_v59  ;;  %v808_v59 = vld [vmem:[#allocation8 + $0xd10] sm:$0xff] }
 0x21c   :  { %3900 = vmatpush2.bf16.msra.mxu1 %v5114_v60  ;;  %3860 = vmatprep.subr.bf16.mxu0 %v4979_v2  ;;  %v812_v60 = vld [vmem:[#allocation8 + $0xd30] sm:$0xff] }
 0x21d   :  { %3901 = vmatprep.subr.bf16.mxu1 %v5107_v3  ;;  %v5202_v3 = vcombine.low %v688_v40, %v692_v41  ;;  %v5322_v17 = vcombine.low %v808_v59, %v812_v60  ;;  %v788_v40 = vld [vmem:[#allocation8 + $0xc70] sm:$0xff] }
 0x21f   :  { %3861 = vmatpush2.bf16.msra.mxu0 %v4978_v10  ;;  %v672_v10 = vld [vmem:[#allocation8 + $0x8d0] sm:$0xff] }
 0x220   :  { %3902 = vmatpush2.bf16.msra.mxu1 %v5106_v11  ;;  %3862 = vmatprep.subr.bf16.mxu0 %v4971_v13  ;;  %v676_v11 = vld [vmem:[#allocation8 + $0x8f0] sm:$0xff] }
 0x221   :  { %3903 = vmatprep.subr.bf16.mxu1 %v5099_v14  ;;  %v800_v13 = vld [vmem:[#allocation8 + $0xcd0] sm:$0xff]  ;;  %v5187_v18 = vcombine.high %v672_v10, %v676_v11  ;;  %v5186_v27 = vcombine.low %v672_v10, %v676_v11 }
 0x222   :  { %v804_v14 = vld [vmem:[#allocation8 + $0xcf0] sm:$0xff] }
 0x223   :  { %3863 = vmatpush2.bf16.msra.mxu0 %v4970_v20  ;;  %v5315_v19 = vcombine.high %v800_v13, %v804_v14  ;;  %v664_v20 = vld [vmem:[#allocation8 + $0x890] sm:$0xff]  ;;  %v5314_v34 = vcombine.low %v800_v13, %v804_v14 }
 0x224   :  { %3904 = vmatpush2.bf16.msra.mxu1 %v5098_v22  ;;  %3914 = vmatprep.subr.bf16.mxu0 %v5219_v23  ;;  %v668_v22 = vld [vmem:[#allocation8 + $0x8b0] sm:$0xff] }
 0x225   :  { %3955 = vmatprep.subr.bf16.mxu1 %v5347_v26  ;;  %v792_v23 = vld [vmem:[#allocation8 + $0xc90] sm:$0xff]  ;;  %v5178_v41 = vcombine.low %v664_v20, %v668_v22 }
 0x226   :  { %v3620_v42 = vpop.f32.mrf.mxu0  ;;  %3865 = vmatmul.mubr.bf16.vlgmr.msra.gmra.mxu0 %v5959_v1  ;;  %v796_v26 = vld [vmem:[#allocation8 + $0xcb0] sm:$0xff] }
 0x227   :  { %v3661_v43 = vpop.f32.mrf.mxu1  ;;  %v3621_v46 = vadd.f32 %v3620_v42, %v6008_v52  ;;  %3906 = vmatmul.mubr.bf16.vlgmr.msra.gmra.mxu1 %v5947_v58  ;;  %3915 = vmatpush1.bf16.msra.mxu0 %v5218_v35  ;;  %v680_v52 = vld [vmem:[#allocation8 + $0x910] sm:$0xff]  ;;  %v5179_v35 = vcombine.high %v664_v20, %v668_v22  ;;  %v5307_v36 = vcombine.high %v792_v23, %v796_v26 }
 0x228   :  { %3946 = vmatprep.mubr.bf16.mxu0 %v5969_v25  ;;  %3956 = vmatpush1.bf16.msra.mxu1 %v5346_v38  ;;  %v3622_v49 = vpop.f32.mrf.mxu0  ;;  %v5195_v9 = vcombine.high %v680_v52, %v684_v55  ;;  %v5194_v16 = vcombine.low %v680_v52, %v684_v55  ;;  %v660_v38 = vld [vmem:[#allocation8 + $0x870] sm:$0xff]  ;;  %v5306_v42 = vcombine.low %v792_v23, %v796_v26 }
 0x229   :  { %v3663_v32 = vpop.f32.mrf.mxu1  ;;  %v6017_v53 = vadd.f32 %v3661_v43, %v3621_v46  ;;  %3987 = vmatprep.mubr.bf16.mxu1 %v5971_v37  ;;  %v3623_v6 = vadd.f32 %v3622_v49, %v6011_v63  ;;  %3916 = vmatprep.subr.bf16.mxu0 %v5211_v39  ;;  %v5323_v63 = vcombine.high %v808_v59, %v812_v60  ;;  %v784_v39 = vld [vmem:[#allocation8 + $0xc50] sm:$0xff] }
 0x22a   :  { %v3624_v56 = vpop.f32.mrf.mxu0  ;;  %3957 = vmatprep.subr.bf16.mxu1 %v5339_v45  ;;  %v5171_v43 = vcombine.high %v656_v24, %v660_v38  ;;  %v5299_v45 = vcombine.high %v784_v39, %v788_v40  ;;  %v776_v46 = vld [vmem:[#allocation8 + $0xc10] sm:$0xff]  ;;  %v5170_v49 = vcombine.low %v656_v24, %v660_v38 }
 0x22b   :  { %v3665_v57 = vpop.f32.mrf.mxu1  ;;  %v6021_v2 = vadd.f32 %v3663_v32, %v3623_v6  ;;  %3917 = vmatpush1.bf16.msra.mxu0 %v5210_v47  ;;  %v780_v47 = vld [vmem:[#allocation8 + $0xc30] sm:$0xff]  ;;  %v5298_v32 = vcombine.low %v784_v39, %v788_v40  ;;  %v5162_v56 = vcombine.low %v648_v31, %v652_v29 }
 0x22c   :  { %3958 = vmatpush1.bf16.msra.mxu1 %v5338_v50  ;;  %v3625_v4 = vpop.f32.mrf.mxu0  ;;  %3918 = vmatprep.subr.bf16.mxu0 %v5203_v51  ;;  %v5163_v50 = vcombine.high %v648_v31, %v652_v29  ;;  %v5291_v51 = vcombine.high %v776_v46, %v780_v47  ;;  %v768_v6 = vld [vmem:[#allocation8 + $0xbd0] sm:$0xff]  ;;  %v5290_v57 = vcombine.low %v776_v46, %v780_v47 }
 0x22d   :  { %v3666_v7 = vpop.f32.mrf.mxu1  ;;  %3959 = vmatprep.subr.bf16.mxu1 %v5331_v54  ;;  %v772_v54 = vld [vmem:[#allocation8 + $0xbf0] sm:$0xff] }
 0x22e   :  { %v896_v52 = vld [vmem:[#allocation8 + $0xfd0] sm:$0xff]  ;;  %v5283_v59 = vcombine.high %v768_v6, %v772_v54 }
 0x22f   :  { %3919 = vmatpush1.bf16.msra.mxu0 %v5202_v3  ;;  %v900_v55 = vld [vmem:[#allocation8 + $0xff0] sm:$0xff] }
 0x230   :  { %3960 = vmatpush1.bf16.msra.mxu1 %v5330_v8  ;;  %3920 = vmatprep.subr.bf16.mxu0 %v5195_v9  ;;  %v5411_v60 = vcombine.high %v896_v52, %v900_v55  ;;  %v760_v3 = vld [vmem:[#allocation8 + $0xb90] sm:$0xff]  ;;  %v5282_v9 = vcombine.low %v768_v6, %v772_v54 }
 0x231   :  { %3961 = vmatprep.subr.bf16.mxu1 %v5323_v63  ;;  %v764_v4 = vld [vmem:[#allocation8 + $0xbb0] sm:$0xff]  ;;  %v5410_v63 = vcombine.low %v896_v52, %v900_v55 }
 0x232   :  { %v888_v7 = vld [vmem:[#allocation8 + $0xf90] sm:$0xff]  ;;  %v5275_v10 = vcombine.high %v760_v3, %v764_v4 }
 0x233   :  { %3921 = vmatpush1.bf16.msra.mxu0 %v5194_v16  ;;  %v892_v8 = vld [vmem:[#allocation8 + $0xfb0] sm:$0xff] }
 0x234   :  { %3962 = vmatpush1.bf16.msra.mxu1 %v5322_v17  ;;  %3922 = vmatprep.subr.bf16.mxu0 %v5187_v18  ;;  %v5403_v11 = vcombine.high %v888_v7, %v892_v8  ;;  %v752_v13 = vld [vmem:[#allocation8 + $0xb50] sm:$0xff]  ;;  %v5274_v18 = vcombine.low %v760_v3, %v764_v4 }
 0x235   :  { %3963 = vmatprep.subr.bf16.mxu1 %v5315_v19  ;;  %v756_v14 = vld [vmem:[#allocation8 + $0xb70] sm:$0xff]  ;;  %v5402_v19 = vcombine.low %v888_v7, %v892_v8 }
 0x236   :  { %v880_v16 = vld [vmem:[#allocation8 + $0xf50] sm:$0xff]  ;;  %v5267_v20 = vcombine.high %v752_v13, %v756_v14 }
 0x237   :  { %3923 = vmatpush1.bf16.msra.mxu0 %v5186_v27  ;;  %v884_v17 = vld [vmem:[#allocation8 + $0xf70] sm:$0xff] }
 0x238   :  { %3964 = vmatpush1.bf16.msra.mxu1 %v5314_v34  ;;  %3924 = vmatprep.subr.bf16.mxu0 %v5179_v35  ;;  %v5395_v22 = vcombine.high %v880_v16, %v884_v17  ;;  %v744_v23 = vld [vmem:[#allocation8 + $0xb10] sm:$0xff]  ;;  %v5266_v35 = vcombine.low %v752_v13, %v756_v14 }
 0x239   :  { %3965 = vmatprep.subr.bf16.mxu1 %v5307_v36  ;;  %v748_v26 = vld [vmem:[#allocation8 + $0xb30] sm:$0xff]  ;;  %v5394_v36 = vcombine.low %v880_v16, %v884_v17  ;;  %v449_v16 = vld [vmem:[#allocation8 + $0x1d8] sm:$0xff] }
 0x23a   :  { %v872_v27 = vld [vmem:[#allocation8 + $0xf10] sm:$0xff]  ;;  %v5259_v24 = vcombine.high %v744_v23, %v748_v26  ;;  %v453_v17 = vld [vmem:[#allocation8 + $0x1f8] sm:$0xff] }
 0x23b   :  { %3925 = vmatpush1.bf16.msra.mxu0 %v5178_v41  ;;  %v876_v34 = vld [vmem:[#allocation8 + $0xf30] sm:$0xff] }
 0x23c   :  { %3966 = vmatpush1.bf16.msra.mxu1 %v5306_v42  ;;  %3926 = vmatprep.subr.bf16.mxu0 %v5171_v43  ;;  %v5387_v38 = vcombine.high %v872_v27, %v876_v34  ;;  %v736_v39 = vld [vmem:[#allocation8 + $0xad0] sm:$0xff]  ;;  %v5258_v43 = vcombine.low %v744_v23, %v748_v26  ;;  %v4965_v23 = vcombine.high %v449_v16, %v453_v17 }
 0x23d   :  { %3967 = vmatprep.subr.bf16.mxu1 %v5299_v45  ;;  %v740_v40 = vld [vmem:[#allocation8 + $0xaf0] sm:$0xff]  ;;  %v5386_v45 = vcombine.low %v872_v27, %v876_v34  ;;  %v441_v27 = vld [vmem:[#allocation8 + $0x198] sm:$0xff] }
 0x23e   :  { %v864_v41 = vld [vmem:[#allocation8 + $0xed0] sm:$0xff]  ;;  %v5251_v31 = vcombine.high %v736_v39, %v740_v40  ;;  %v445_v34 = vld [vmem:[#allocation8 + $0x1b8] sm:$0xff] }
 0x23f   :  { %3927 = vmatpush1.bf16.msra.mxu0 %v5170_v49  ;;  %v868_v42 = vld [vmem:[#allocation8 + $0xef0] sm:$0xff] }
 0x240   :  { %3968 = vmatpush1.bf16.msra.mxu1 %v5298_v32  ;;  %3928 = vmatprep.subr.bf16.mxu0 %v5163_v50  ;;  %v5379_v29 = vcombine.high %v864_v41, %v868_v42  ;;  %v728_v46 = vld [vmem:[#allocation8 + $0xa90] sm:$0xff]  ;;  %v5250_v50 = vcombine.low %v736_v39, %v740_v40  ;;  %v919_v40 = vrot.slane %v5997_v21, %v135_v33 }
 0x241   :  { %3969 = vmatprep.subr.bf16.mxu1 %v5291_v51  ;;  %v732_v47 = vld [vmem:[#allocation8 + $0xab0] sm:$0xff]  ;;  %v5378_v51 = vcombine.low %v864_v41, %v868_v42  ;;  %v4957_v41 = vcombine.high %v441_v27, %v445_v34  ;;  %v433_v42 = vld [vmem:[#allocation8 + $0x158] sm:$0xff] }
 0x242   :  { %v856_v49 = vld [vmem:[#allocation8 + $0xe90] sm:$0xff]  ;;  %v5243_v6 = vcombine.high %v728_v46, %v732_v47 }
 0x243   :  { %3929 = vmatpush1.bf16.msra.mxu0 %v5162_v56  ;;  %v860_v32 = vld [vmem:[#allocation8 + $0xeb0] sm:$0xff] }
 0x244   :  { %3970 = vmatpush1.bf16.msra.mxu1 %v5290_v57  ;;  %3930 = vmatprep.subr.bf16.mxu0 %v5283_v59  ;;  %v5371_v54 = vcombine.high %v856_v49, %v860_v32  ;;  %v720_v52 = vld [vmem:[#allocation8 + $0xa50] sm:$0xff]  ;;  %v5242_v59 = vcombine.low %v728_v46, %v732_v47 }
 0x245   :  { %3971 = vmatprep.subr.bf16.mxu1 %v5411_v60  ;;  %v724_v55 = vld [vmem:[#allocation8 + $0xa70] sm:$0xff]  ;;  %v5370_v60 = vcombine.low %v856_v49, %v860_v32  ;;  %v4956_v49 = vcombine.low %v441_v27, %v445_v34 }
 0x246   :  { %v848_v56 = vld [vmem:[#allocation8 + $0xe50] sm:$0xff]  ;;  %v5235_v3 = vcombine.high %v720_v52, %v724_v55 }
 0x247   :  { %3931 = vmatpush2.bf16.msra.mxu0 %v5282_v9  ;;  %v852_v57 = vld [vmem:[#allocation8 + $0xe70] sm:$0xff] }
 0x248   :  { %3972 = vmatpush2.bf16.msra.mxu1 %v5410_v63  ;;  %3932 = vmatprep.subr.bf16.mxu0 %v5275_v10  ;;  %v5363_v4 = vcombine.high %v848_v56, %v852_v57  ;;  %v712_v7 = vld [vmem:[#allocation8 + $0xa10] sm:$0xff]  ;;  %v5234_v10 = vcombine.low %v720_v52, %v724_v55  ;;  %v425_v52 = vld [vmem:[#allocation8 + $0x118] sm:$0xff] }
 0x249   :  { %3973 = vmatprep.subr.bf16.mxu1 %v5403_v11  ;;  %v716_v8 = vld [vmem:[#allocation8 + $0xa30] sm:$0xff]  ;;  %v5362_v11 = vcombine.low %v848_v56, %v852_v57  ;;  %v429_v55 = vld [vmem:[#allocation8 + $0x138] sm:$0xff] }
 0x24a   :  { %v840_v9 = vld [vmem:[#allocation8 + $0xe10] sm:$0xff]  ;;  %v5227_v13 = vcombine.high %v712_v7, %v716_v8  ;;  %v553_v57 = vld [vmem:[#allocation8 + $0x518] sm:$0xff] }
 0x24b   :  { %3933 = vmatpush2.bf16.msra.mxu0 %v5274_v18  ;;  %v844_v63 = vld [vmem:[#allocation8 + $0xe30] sm:$0xff]  ;;  %v577_v18 = vld [vmem:[#allocation8 + $0x5d8] sm:$0xff] }
 0x24c   :  { %3974 = vmatpush2.bf16.msra.mxu1 %v5402_v19  ;;  %3934 = vmatprep.subr.bf16.mxu0 %v5267_v20  ;;  %v5355_v14 = vcombine.high %v840_v9, %v844_v63  ;;  %v581_v19 = vld [vmem:[#allocation8 + $0x5f8] sm:$0xff]  ;;  %v5226_v20 = vcombine.low %v712_v7, %v716_v8 }
 0x24d   :  { %3975 = vmatprep.subr.bf16.mxu1 %v5395_v22  ;;  %v5354_v22 = vcombine.low %v840_v9, %v844_v63  ;;  %v5093_v26 = vcombine.high %v577_v18, %v581_v19  ;;  %v5092_v39 = vcombine.low %v577_v18, %v581_v19  ;;  %v417_v63 = vld [vmem:[#allocation8 + $0xd8] sm:$0xff] }
 0x24e   :  { %v409_v19 = vld [vmem:[#allocation8 + $0x98] sm:$0xff] }
 0x24f   :  { %3935 = vmatpush2.bf16.msra.mxu0 %v5266_v35  ;;  %v915_v35 = vrot.slane %v5997_v21, %v131_v30  ;;  %v565_v30 = vld [vmem:[#allocation8 + $0x578] sm:$0xff] }
 0x250   :  { %3976 = vmatpush2.bf16.msra.mxu1 %v5394_v36  ;;  %3936 = vmatprep.subr.bf16.mxu0 %v5259_v24  ;;  %v4964_v36 = vcombine.low %v449_v16, %v453_v17  ;;  %v569_v24 = vld [vmem:[#allocation8 + $0x598] sm:$0xff] }
 0x251   :  { %3977 = vmatprep.subr.bf16.mxu1 %v5387_v38  ;;  %v573_v38 = vld [vmem:[#allocation8 + $0x5b8] sm:$0xff] }
 0x252   :  { %v5084_v33 = vcombine.low %v569_v24, %v573_v38 }
 0x253   :  { %3937 = vmatpush2.bf16.msra.mxu0 %v5258_v43  ;;  %v437_v43 = vld [vmem:[#allocation8 + $0x178] sm:$0xff] }
 0x254   :  { %3978 = vmatpush2.bf16.msra.mxu1 %v5386_v45  ;;  %3938 = vmatprep.subr.bf16.mxu0 %v5251_v31  ;;  %v5085_v31 = vcombine.high %v569_v24, %v573_v38  ;;  %v4949_v21 = vcombine.high %v433_v42, %v437_v43  ;;  %v405_v24 = vld [vmem:[#allocation8 + $0x78] sm:$0xff] }
 0x255   :  { %3979 = vmatprep.subr.bf16.mxu1 %v5379_v29  ;;  %v561_v29 = vld [vmem:[#allocation8 + $0x558] sm:$0xff] }
 0x256   :  { %v5076_v7 = vcombine.low %v561_v29, %v565_v30  ;;  %v529_v38 = vld [vmem:[#allocation8 + $0x458] sm:$0xff] }
 0x257   :  { %3939 = vmatpush2.bf16.msra.mxu0 %v5250_v50 }
 0x258   :  { %3980 = vmatpush2.bf16.msra.mxu1 %v5378_v51  ;;  %3940 = vmatprep.subr.bf16.mxu0 %v5243_v6 }
 0x259   :  { %3981 = vmatprep.subr.bf16.mxu1 %v5371_v54  ;;  %v5077_v54 = vcombine.high %v561_v29, %v565_v30  ;;  %v521_v29 = vld [vmem:[#allocation8 + $0x418] sm:$0xff] }
 0x25a   :  { %v525_v30 = vld [vmem:[#allocation8 + $0x438] sm:$0xff] }
 0x25b   :  { %3941 = vmatpush2.bf16.msra.mxu0 %v5242_v59  ;;  %v557_v59 = vld [vmem:[#allocation8 + $0x538] sm:$0xff] }
 0x25c   :  { %3982 = vmatpush2.bf16.msra.mxu1 %v5370_v60  ;;  %3942 = vmatprep.subr.bf16.mxu0 %v5235_v3  ;;  %v4948_v3 = vcombine.low %v433_v42, %v437_v43  ;;  %v5069_v9 = vcombine.high %v553_v57, %v557_v59  ;;  %v5068_v16 = vcombine.low %v553_v57, %v557_v59  ;;  %v505_v57 = vld [vmem:[#allocation8 + $0x398] sm:$0xff] }
 0x25d   :  { %3983 = vmatprep.subr.bf16.mxu1 %v5363_v4  ;;  %v509_v59 = vld [vmem:[#allocation8 + $0x3b8] sm:$0xff] }
 0x25f   :  { %3943 = vmatpush2.bf16.msra.mxu0 %v5234_v10  ;;  %v421_v10 = vld [vmem:[#allocation8 + $0xf8] sm:$0xff] }
 0x260   :  { %3984 = vmatpush2.bf16.msra.mxu1 %v5362_v11  ;;  %3944 = vmatprep.subr.bf16.mxu0 %v5227_v13  ;;  %v545_v11 = vld [vmem:[#allocation8 + $0x4d8] sm:$0xff]  ;;  %v4933_v17 = vcombine.high %v417_v63, %v421_v10 }
 0x261   :  { %3985 = vmatprep.subr.bf16.mxu1 %v5355_v14  ;;  %v549_v13 = vld [vmem:[#allocation8 + $0x4f8] sm:$0xff]  ;;  %v4940_v14 = vcombine.low %v425_v52, %v429_v55 }
 0x262   :  { %v5061_v18 = vcombine.high %v545_v11, %v549_v13  ;;  %v5060_v27 = vcombine.low %v545_v11, %v549_v13  ;;  %v629_v11 = vld [vmem:[#allocation8 + $0x778] sm:$0xff]  ;;  %v5020_v13 = vcombine.low %v505_v57, %v509_v59 }
 0x263   :  { %3945 = vmatpush2.bf16.msra.mxu0 %v5226_v20  ;;  %v413_v20 = vld [vmem:[#allocation8 + $0xb8] sm:$0xff] }
 0x264   :  { %3986 = vmatpush2.bf16.msra.mxu1 %v5354_v22  ;;  %3996 = vmatprep.subr.bf16.mxu0 %v4965_v23  ;;  %v537_v22 = vld [vmem:[#allocation8 + $0x498] sm:$0xff]  ;;  %v4925_v34 = vcombine.high %v409_v19, %v413_v20 }
 0x265   :  { %4037 = vmatprep.subr.bf16.mxu1 %v5093_v26  ;;  %v541_v23 = vld [vmem:[#allocation8 + $0x4b8] sm:$0xff]  ;;  %v4932_v26 = vcombine.low %v417_v63, %v421_v10 }
 0x266   :  { %v3702_v45 = vpop.f32.mrf.mxu0  ;;  %3947 = vmatmul.mubr.bf16.vlgmr.msra.gmra.mxu0 %v5987_v0  ;;  %v501_v63 = vld [vmem:[#allocation8 + $0x378] sm:$0xff] }
 0x267   :  { %v3703_v46 = vadd.f32 %v3702_v45, %v915_v35  ;;  %v3743_v47 = vpop.f32.mrf.mxu1  ;;  %3988 = vmatmul.mubr.bf16.vlgmr.msra.gmra.mxu1 %v5985_v5  ;;  %3997 = vmatpush1.bf16.msra.mxu0 %v4964_v36  ;;  %v5053_v35 = vcombine.high %v537_v22, %v541_v23  ;;  %v401_v36 = vld [vmem:[#allocation8 + $0x58] sm:$0xff] }
 0x268   :  { %4028 = vmatprep.mubr.bf16.mxu0 %v5949_v61  ;;  %4038 = vmatpush1.bf16.msra.mxu1 %v5092_v39  ;;  %v3704_v32 = vpop.f32.mrf.mxu0  ;;  %v533_v39 = vld [vmem:[#allocation8 + $0x478] sm:$0xff]  ;;  %v4917_v42 = vcombine.high %v401_v36, %v405_v24 }
 0x269   :  { %v6032_v50 = vadd.f32 %v3743_v47, %v3703_v46  ;;  %4069 = vmatprep.mubr.bf16.mxu1 %v5951_v62  ;;  %v3705_v51 = vadd.f32 %v3704_v32, %v919_v40  ;;  %v3745_v6 = vpop.f32.mrf.mxu1  ;;  %3998 = vmatprep.subr.bf16.mxu0 %v4957_v41  ;;  %v4941_v62 = vcombine.high %v425_v52, %v429_v55  ;;  %v393_v45 = vld [vmem:[#allocation8 + $0x18] sm:$0xff] }
 0x26a   :  { %v3706_v56 = vpop.f32.mrf.mxu0  ;;  %4039 = vmatprep.subr.bf16.mxu1 %v5085_v31  ;;  %v4924_v40 = vcombine.low %v409_v19, %v413_v20  ;;  %v5052_v41 = vcombine.low %v537_v22, %v541_v23  ;;  %v5045_v43 = vcombine.high %v529_v38, %v533_v39  ;;  %v397_v31 = vld [vmem:[#allocation8 + $0x38] sm:$0xff]  ;;  %v4916_v46 = vcombine.low %v401_v36, %v405_v24 }
 0x26b   :  { %v6035_v60 = vadd.f32 %v3745_v6, %v3705_v51  ;;  %v3747_v61 = vpop.f32.mrf.mxu1  ;;  %3999 = vmatpush1.bf16.msra.mxu0 %v4956_v49  ;;  %v5044_v47 = vcombine.low %v529_v38, %v533_v39  ;;  %v4909_v49 = vcombine.high %v393_v45, %v397_v31  ;;  %v5037_v32 = vcombine.high %v521_v29, %v525_v30  ;;  %v641_v51 = vld [vmem:[#allocation8 + $0x7d8] sm:$0xff] }
 0x26c   :  { %4040 = vmatpush1.bf16.msra.mxu1 %v5084_v33  ;;  %v3707_v4 = vpop.f32.mrf.mxu0  ;;  %4000 = vmatprep.subr.bf16.mxu0 %v4949_v21  ;;  %v513_v33 = vld [vmem:[#allocation8 + $0x3d8] sm:$0xff]  ;;  %v5036_v52 = vcombine.low %v521_v29, %v525_v30 }
 0x26d   :  { %v3748_v8 = vpop.f32.mrf.mxu1  ;;  %4041 = vmatprep.subr.bf16.mxu1 %v5077_v54  ;;  %v517_v21 = vld [vmem:[#allocation8 + $0x3f8] sm:$0xff]  ;;  %v4908_v54 = vcombine.low %v393_v45, %v397_v31 }
 0x26e   :  { %v645_v6 = vld [vmem:[#allocation8 + $0x7f8] sm:$0xff]  ;;  %v5029_v55 = vcombine.high %v513_v33, %v517_v21  ;;  %v5028_v4 = vcombine.low %v513_v33, %v517_v21 }
 0x26f   :  { %4001 = vmatpush1.bf16.msra.mxu0 %v4948_v3  ;;  %v5157_v56 = vcombine.high %v641_v51, %v645_v6  ;;  %v633_v61 = vld [vmem:[#allocation8 + $0x798] sm:$0xff] }
 0x270   :  { %4042 = vmatpush1.bf16.msra.mxu1 %v5076_v7  ;;  %4002 = vmatprep.subr.bf16.mxu0 %v4941_v62  ;;  %v637_v3 = vld [vmem:[#allocation8 + $0x7b8] sm:$0xff]  ;;  %v5156_v7 = vcombine.low %v641_v51, %v645_v6  ;;  %v5021_v62 = vcombine.high %v505_v57, %v509_v59 }
 0x271   :  { %4043 = vmatprep.subr.bf16.mxu1 %v5069_v9  ;;  %v5149_v8 = vcombine.high %v633_v61, %v637_v3  ;;  %v497_v9 = vld [vmem:[#allocation8 + $0x358] sm:$0xff] }
 0x272   :  { %v625_v10 = vld [vmem:[#allocation8 + $0x758] sm:$0xff]  ;;  %v5012_v23 = vcombine.low %v497_v9, %v501_v63 }
 0x273   :  { %4003 = vmatpush1.bf16.msra.mxu0 %v4940_v14  ;;  %v5148_v14 = vcombine.low %v633_v61, %v637_v3  ;;  %v493_v19 = vld [vmem:[#allocation8 + $0x338] sm:$0xff] }
 0x274   :  { %4044 = vmatpush1.bf16.msra.mxu1 %v5068_v16  ;;  %4004 = vmatprep.subr.bf16.mxu0 %v4933_v17  ;;  %v5013_v16 = vcombine.high %v497_v9, %v501_v63  ;;  %v5141_v17 = vcombine.high %v625_v10, %v629_v11  ;;  %v617_v20 = vld [vmem:[#allocation8 + $0x718] sm:$0xff] }
 0x275   :  { %4045 = vmatprep.subr.bf16.mxu1 %v5061_v18  ;;  %v489_v18 = vld [vmem:[#allocation8 + $0x318] sm:$0xff] }
 0x276   :  { %v621_v22 = vld [vmem:[#allocation8 + $0x738] sm:$0xff]  ;;  %v5004_v39 = vcombine.low %v489_v18, %v493_v19 }
 0x277   :  { %4005 = vmatpush1.bf16.msra.mxu0 %v4932_v26  ;;  %v5140_v26 = vcombine.low %v625_v10, %v629_v11  ;;  %v485_v36 = vld [vmem:[#allocation8 + $0x2f8] sm:$0xff] }
 0x278   :  { %4046 = vmatpush1.bf16.msra.mxu1 %v5060_v27  ;;  %4006 = vmatprep.subr.bf16.mxu0 %v4925_v34  ;;  %v5005_v27 = vcombine.high %v489_v18, %v493_v19  ;;  %v5133_v34 = vcombine.high %v617_v20, %v621_v22  ;;  %v609_v24 = vld [vmem:[#allocation8 + $0x6d8] sm:$0xff] }
 0x279   :  { %4047 = vmatprep.subr.bf16.mxu1 %v5053_v35  ;;  %v481_v35 = vld [vmem:[#allocation8 + $0x2d8] sm:$0xff] }
 0x27a   :  { %v613_v38 = vld [vmem:[#allocation8 + $0x6f8] sm:$0xff]  ;;  %v4996_v30 = vcombine.low %v481_v35, %v485_v36 }
 0x27b   :  { %4007 = vmatpush1.bf16.msra.mxu0 %v4924_v40  ;;  %v5132_v40 = vcombine.low %v617_v20, %v621_v22  ;;  %v477_v45 = vld [vmem:[#allocation8 + $0x2b8] sm:$0xff] }
 0x27c   :  { %4048 = vmatpush1.bf16.msra.mxu1 %v5052_v41  ;;  %4008 = vmatprep.subr.bf16.mxu0 %v4917_v42  ;;  %v4997_v41 = vcombine.high %v481_v35, %v485_v36  ;;  %v5125_v42 = vcombine.high %v609_v24, %v613_v38  ;;  %v601_v31 = vld [vmem:[#allocation8 + $0x698] sm:$0xff] }
 0x27d   :  { %4049 = vmatprep.subr.bf16.mxu1 %v5045_v43  ;;  %v473_v43 = vld [vmem:[#allocation8 + $0x298] sm:$0xff] }
 0x27e   :  { %v605_v29 = vld [vmem:[#allocation8 + $0x6b8] sm:$0xff]  ;;  %v4988_v6 = vcombine.low %v473_v43, %v477_v45 }
 0x27f   :  { %4009 = vmatpush1.bf16.msra.mxu0 %v4916_v46  ;;  %v5124_v46 = vcombine.low %v609_v24, %v613_v38  ;;  %v469_v33 = vld [vmem:[#allocation8 + $0x278] sm:$0xff] }
 0x280   :  { %4050 = vmatpush1.bf16.msra.mxu1 %v5044_v47  ;;  %4010 = vmatprep.subr.bf16.mxu0 %v4909_v49  ;;  %v4989_v47 = vcombine.high %v473_v43, %v477_v45  ;;  %v5117_v49 = vcombine.high %v601_v31, %v605_v29  ;;  %v593_v21 = vld [vmem:[#allocation8 + $0x658] sm:$0xff] }
 0x281   :  { %4051 = vmatprep.subr.bf16.mxu1 %v5037_v32  ;;  %v465_v32 = vld [vmem:[#allocation8 + $0x258] sm:$0xff] }
 0x282   :  { %v597_v51 = vld [vmem:[#allocation8 + $0x678] sm:$0xff]  ;;  %v4980_v3 = vcombine.low %v465_v32, %v469_v33 }
 0x283   :  { %4011 = vmatpush1.bf16.msra.mxu0 %v4908_v54  ;;  %v5116_v54 = vcombine.low %v601_v31, %v605_v29  ;;  %v461_v57 = vld [vmem:[#allocation8 + $0x238] sm:$0xff] }
 0x284   :  { %4052 = vmatpush1.bf16.msra.mxu1 %v5036_v52  ;;  %4012 = vmatprep.subr.bf16.mxu0 %v5029_v55  ;;  %v4981_v52 = vcombine.high %v465_v32, %v469_v33  ;;  %v5109_v55 = vcombine.high %v593_v21, %v597_v51  ;;  %v585_v59 = vld [vmem:[#allocation8 + $0x618] sm:$0xff] }
 0x285   :  { %4053 = vmatprep.subr.bf16.mxu1 %v5157_v56  ;;  %v457_v56 = vld [vmem:[#allocation8 + $0x218] sm:$0xff] }
 0x286   :  { %v589_v61 = vld [vmem:[#allocation8 + $0x638] sm:$0xff]  ;;  %v4972_v11 = vcombine.low %v457_v56, %v461_v57 }
 0x287   :  { %4013 = vmatpush2.bf16.msra.mxu0 %v5028_v4  ;;  %v5108_v4 = vcombine.low %v593_v21, %v597_v51  ;;  %v709_v9 = vld [vmem:[#allocation8 + $0x9f8] sm:$0xff] }
 0x288   :  { %4054 = vmatpush2.bf16.msra.mxu1 %v5156_v7  ;;  %4014 = vmatprep.subr.bf16.mxu0 %v5021_v62  ;;  %v4973_v7 = vcombine.high %v457_v56, %v461_v57  ;;  %v5101_v62 = vcombine.high %v585_v59, %v589_v61  ;;  %v833_v63 = vld [vmem:[#allocation8 + $0xdd8] sm:$0xff] }
 0x289   :  { %4055 = vmatprep.subr.bf16.mxu1 %v5149_v8  ;;  %v705_v8 = vld [vmem:[#allocation8 + $0x9d8] sm:$0xff] }
 0x28a   :  { %v837_v10 = vld [vmem:[#allocation8 + $0xdf8] sm:$0xff]  ;;  %v5220_v19 = vcombine.low %v705_v8, %v709_v9 }
 0x28b   :  { %4015 = vmatpush2.bf16.msra.mxu0 %v5020_v13  ;;  %v5100_v13 = vcombine.low %v585_v59, %v589_v61  ;;  %v701_v18 = vld [vmem:[#allocation8 + $0x9b8] sm:$0xff] }
 0x28c   :  { %4056 = vmatpush2.bf16.msra.mxu1 %v5148_v14  ;;  %4016 = vmatprep.subr.bf16.mxu0 %v5013_v16  ;;  %v5221_v14 = vcombine.high %v705_v8, %v709_v9  ;;  %v5349_v16 = vcombine.high %v833_v63, %v837_v10  ;;  %v825_v20 = vld [vmem:[#allocation8 + $0xd98] sm:$0xff] }
 0x28d   :  { %4057 = vmatprep.subr.bf16.mxu1 %v5141_v17  ;;  %v697_v17 = vld [vmem:[#allocation8 + $0x998] sm:$0xff] }
 0x28e   :  { %v829_v22 = vld [vmem:[#allocation8 + $0xdb8] sm:$0xff] }
 0x28f   :  { %4017 = vmatpush2.bf16.msra.mxu0 %v5012_v23  ;;  %v5348_v23 = vcombine.low %v833_v63, %v837_v10  ;;  %v5341_v36 = vcombine.high %v825_v20, %v829_v22  ;;  %v817_v24 = vld [vmem:[#allocation8 + $0xd58] sm:$0xff]  ;;  %v5340_v43 = vcombine.low %v825_v20, %v829_v22 }
 0x290   :  { %4058 = vmatpush2.bf16.msra.mxu1 %v5140_v26  ;;  %4018 = vmatprep.subr.bf16.mxu0 %v5005_v27  ;;  %v5213_v26 = vcombine.high %v697_v17, %v701_v18  ;;  %v689_v27 = vld [vmem:[#allocation8 + $0x958] sm:$0xff] }
 0x291   :  { %4059 = vmatprep.subr.bf16.mxu1 %v5133_v34  ;;  %v693_v34 = vld [vmem:[#allocation8 + $0x978] sm:$0xff] }
 0x292   :  { %v821_v38 = vld [vmem:[#allocation8 + $0xd78] sm:$0xff]  ;;  %v5205_v45 = vcombine.high %v689_v27, %v693_v34 }
 0x293   :  { %4019 = vmatpush2.bf16.msra.mxu0 %v5004_v39  ;;  %v681_v29 = vld [vmem:[#allocation8 + $0x918] sm:$0xff]  ;;  %v5332_v33 = vcombine.low %v817_v24, %v821_v38 }
 0x294   :  { %4060 = vmatpush2.bf16.msra.mxu1 %v5132_v40  ;;  %4020 = vmatprep.subr.bf16.mxu0 %v4997_v41  ;;  %v5212_v41 = vcombine.low %v697_v17, %v701_v18  ;;  %v649_v22 = vld [vmem:[#allocation8 + $0x818] sm:$0xff] }
 0x295   :  { %4061 = vmatprep.subr.bf16.mxu1 %v5125_v42 }
 0x297   :  { %4021 = vmatpush2.bf16.msra.mxu0 %v4996_v30  ;;  %v685_v30 = vld [vmem:[#allocation8 + $0x938] sm:$0xff] }
 0x298   :  { %4062 = vmatpush2.bf16.msra.mxu1 %v5124_v46  ;;  %4022 = vmatprep.subr.bf16.mxu0 %v4989_v47  ;;  %v809_v46 = vld [vmem:[#allocation8 + $0xd18] sm:$0xff]  ;;  %v5197_v21 = vcombine.high %v681_v29, %v685_v30  ;;  %v5196_v56 = vcombine.low %v681_v29, %v685_v30 }
 0x299   :  { %4063 = vmatprep.subr.bf16.mxu1 %v5117_v49  ;;  %v813_v47 = vld [vmem:[#allocation8 + $0xd38] sm:$0xff]  ;;  %v5204_v49 = vcombine.low %v689_v27, %v693_v34 }
 0x29a   :  { %v5324_v57 = vcombine.low %v809_v46, %v813_v47  ;;  %v781_v27 = vld [vmem:[#allocation8 + $0xc38] sm:$0xff] }
 0x29b   :  { %4023 = vmatpush2.bf16.msra.mxu0 %v4988_v6  ;;  %v673_v6 = vld [vmem:[#allocation8 + $0x8d8] sm:$0xff] }
 0x29c   :  { %4064 = vmatpush2.bf16.msra.mxu1 %v5116_v54  ;;  %4024 = vmatprep.subr.bf16.mxu0 %v4981_v52  ;;  %v677_v54 = vld [vmem:[#allocation8 + $0x8f8] sm:$0xff] }
 0x29d   :  { %4065 = vmatprep.subr.bf16.mxu1 %v5109_v55  ;;  %v801_v52 = vld [vmem:[#allocation8 + $0xcd8] sm:$0xff]  ;;  %v5189_v59 = vcombine.high %v673_v6, %v677_v54  ;;  %v5188_v8 = vcombine.low %v673_v6, %v677_v54 }
 0x29e   :  { %v805_v55 = vld [vmem:[#allocation8 + $0xcf8] sm:$0xff] }
 0x29f   :  { %4025 = vmatpush2.bf16.msra.mxu0 %v4980_v3  ;;  %v5317_v61 = vcombine.high %v801_v52, %v805_v55  ;;  %v665_v3 = vld [vmem:[#allocation8 + $0x898] sm:$0xff]  ;;  %v5316_v9 = vcombine.low %v801_v52, %v805_v55 }
 0x2a0   :  { %4066 = vmatpush2.bf16.msra.mxu1 %v5108_v4  ;;  %4026 = vmatprep.subr.bf16.mxu0 %v4973_v7  ;;  %v669_v4 = vld [vmem:[#allocation8 + $0x8b8] sm:$0xff] }
 0x2a1   :  { %4067 = vmatprep.subr.bf16.mxu1 %v5101_v62  ;;  %v793_v7 = vld [vmem:[#allocation8 + $0xc98] sm:$0xff]  ;;  %v5181_v63 = vcombine.high %v665_v3, %v669_v4  ;;  %v5180_v17 = vcombine.low %v665_v3, %v669_v4 }
 0x2a2   :  { %v797_v62 = vld [vmem:[#allocation8 + $0xcb8] sm:$0xff] }
 0x2a3   :  { %4027 = vmatpush2.bf16.msra.mxu0 %v4972_v11  ;;  %v5309_v10 = vcombine.high %v793_v7, %v797_v62  ;;  %v657_v11 = vld [vmem:[#allocation8 + $0x858] sm:$0xff]  ;;  %v5308_v18 = vcombine.low %v793_v7, %v797_v62 }
 0x2a4   :  { %4068 = vmatpush2.bf16.msra.mxu1 %v5100_v13  ;;  %4078 = vmatprep.subr.bf16.mxu0 %v5221_v14  ;;  %v661_v13 = vld [vmem:[#allocation8 + $0x878] sm:$0xff] }
 0x2a5   :  { %4119 = vmatprep.subr.bf16.mxu1 %v5349_v16  ;;  %v785_v14 = vld [vmem:[#allocation8 + $0xc58] sm:$0xff]  ;;  %v5172_v34 = vcombine.low %v657_v11, %v661_v13 }
 0x2a6   :  { %v3784_v35 = vpop.f32.mrf.mxu0  ;;  %4029 = vmatmul.mubr.bf16.vlgmr.msra.gmra.mxu0 %v5959_v1  ;;  %v789_v16 = vld [vmem:[#allocation8 + $0xc78] sm:$0xff] }
 0x2a7   :  { %v3785_v39 = vadd.f32 %v3784_v35, %v6032_v50  ;;  %v3825_v40 = vpop.f32.mrf.mxu1  ;;  %4070 = vmatmul.mubr.bf16.vlgmr.msra.gmra.mxu1 %v5947_v58  ;;  %4079 = vmatpush1.bf16.msra.mxu0 %v5220_v19  ;;  %v5333_v50 = vcombine.high %v817_v24, %v821_v38  ;;  %v5173_v19 = vcombine.high %v657_v11, %v661_v13  ;;  %v769_v38 = vld [vmem:[#allocation8 + $0xbd8] sm:$0xff] }
 0x2a8   :  { %4110 = vmatprep.mubr.bf16.mxu0 %v5969_v25  ;;  %4120 = vmatpush1.bf16.msra.mxu1 %v5348_v23  ;;  %v6041_v42 = vpop.f32.mrf.mxu0  ;;  %v5301_v20 = vcombine.high %v785_v14, %v789_v16  ;;  %v653_v23 = vld [vmem:[#allocation8 + $0x838] sm:$0xff]  ;;  %v5300_v35 = vcombine.low %v785_v14, %v789_v16 }
 0x2a9   :  { %v6043_v31 = vadd.f32 %v3825_v40, %v3785_v39  ;;  %4151 = vmatprep.mubr.bf16.mxu1 %v5971_v37  ;;  %v6046_v1 = vpop.f32.mrf.mxu1  ;;  %4080 = vmatprep.subr.bf16.mxu0 %v5213_v26  ;;  %v5325_v37 = vcombine.high %v809_v46, %v813_v47  ;;  %v777_v26 = vld [vmem:[#allocation8 + $0xc18] sm:$0xff] }
 0x2aa   :  { %v3788_v58 = vpop.f32.mrf.mxu0  ;;  %4121 = vmatprep.subr.bf16.mxu1 %v5341_v36  ;;  %v5165_v36 = vcombine.high %v649_v22, %v653_v23  ;;  %v5293_v24 = vcombine.high %v777_v26, %v781_v27  ;;  %v773_v39 = vld [vmem:[#allocation8 + $0xbf8] sm:$0xff] }
 0x2ab   :  { %v3829_v25 = vpop.f32.mrf.mxu1  ;;  %4081 = vmatpush1.bf16.msra.mxu0 %v5212_v41  ;;  %v897_v40 = vld [vmem:[#allocation8 + $0xfd8] sm:$0xff] }
 0x2ac   :  { %4122 = vmatpush1.bf16.msra.mxu1 %v5340_v43  ;;  %v3789_v32 = vpop.f32.mrf.mxu0  ;;  %4082 = vmatprep.subr.bf16.mxu0 %v5205_v45  ;;  %v901_v41 = vld [vmem:[#allocation8 + $0xff8] sm:$0xff]  ;;  %v5164_v43 = vcombine.low %v649_v22, %v653_v23  ;;  %v5292_v45 = vcombine.low %v777_v26, %v781_v27  ;;  %v5284_v25 = vcombine.low %v769_v38, %v773_v39 }
 0x2ad   :  { %v3830_v51 = vpop.f32.mrf.mxu1  ;;  %4123 = vmatprep.subr.bf16.mxu1 %v5333_v50  ;;  %v5285_v50 = vcombine.high %v769_v38, %v773_v39  ;;  %v5413_v29 = vcombine.high %v897_v40, %v901_v41  ;;  %v761_v30 = vld [vmem:[#allocation8 + $0xb98] sm:$0xff] }
 0x2ae   :  { %v765_v58 = vld [vmem:[#allocation8 + $0xbb8] sm:$0xff] }
 0x2af   :  { %4083 = vmatpush1.bf16.msra.mxu0 %v5204_v49  ;;  %v889_v46 = vld [vmem:[#allocation8 + $0xf98] sm:$0xff]  ;;  %v5412_v49 = vcombine.low %v897_v40, %v901_v41  ;;  %v5277_v32 = vcombine.high %v761_v30, %v765_v58  ;;  %v5276_v54 = vcombine.low %v761_v30, %v765_v58  ;;  %v3787_v58 = vadd.f32 %v6041_v42, %v6035_v60 }
 0x2b0   :  { %4124 = vmatpush1.bf16.msra.mxu1 %v5332_v33  ;;  %4084 = vmatprep.subr.bf16.mxu0 %v5197_v21  ;;  %v893_v47 = vld [vmem:[#allocation8 + $0xfb8] sm:$0xff]  ;;  %v4161_v60 = vmax.f32 %v6021_v2, 0.0 }
 0x2b1   :  { %4125 = vmatprep.subr.bf16.mxu1 %v5325_v37  ;;  %v5405_v33 = vcombine.high %v889_v46, %v893_v47  ;;  %v753_v21 = vld [vmem:[#allocation8 + $0xb58] sm:$0xff]  ;;  %v5404_v52 = vcombine.low %v889_v46, %v893_v47 }
 0x2b2   :  { %v757_v51 = vld [vmem:[#allocation8 + $0xb78] sm:$0xff] }
 0x2b3   :  { %4085 = vmatpush1.bf16.msra.mxu0 %v5196_v56  ;;  %v881_v37 = vld [vmem:[#allocation8 + $0xf58] sm:$0xff]  ;;  %v5269_v55 = vcombine.high %v753_v21, %v757_v51  ;;  %v5268_v4 = vcombine.low %v753_v21, %v757_v51  ;;  %v5588_v51 = vld [vmem:[#allocation11 + $0x78] sm:$0xff]  }
 0x2b4   :  { %4126 = vmatpush1.bf16.msra.mxu1 %v5324_v57  ;;  %4086 = vmatprep.subr.bf16.mxu0 %v5189_v59  ;;  %v885_v6 = vld [vmem:[#allocation8 + $0xf78] sm:$0xff] }
 0x2b5   :  { %4127 = vmatprep.subr.bf16.mxu1 %v5317_v61  ;;  %v5397_v56 = vcombine.high %v881_v37, %v885_v6  ;;  %v745_v57 = vld [vmem:[#allocation8 + $0xb18] sm:$0xff]  ;;  %v5396_v7 = vcombine.low %v881_v37, %v885_v6  ;;  %v5589_v37 = vld [vmem:[#allocation11 + $0xf8] sm:$0xff]  }
 0x2b6   :  { %v749_v59 = vld [vmem:[#allocation8 + $0xb38] sm:$0xff]  ;;  %v5590_v6 = vld [vmem:[#allocation11 + $0x38] sm:$0xff]  }
 0x2b7   :  { %4087 = vmatpush1.bf16.msra.mxu0 %v5188_v8  ;;  %v873_v61 = vld [vmem:[#allocation8 + $0xf18] sm:$0xff]  ;;  %v5261_v62 = vcombine.high %v745_v57, %v749_v59  ;;  %v5260_v13 = vcombine.low %v745_v57, %v749_v59 }
 0x2b8   :  { %4128 = vmatpush1.bf16.msra.mxu1 %v5316_v9  ;;  %4088 = vmatprep.subr.bf16.mxu0 %v5181_v63  ;;  %v877_v3 = vld [vmem:[#allocation8 + $0xf38] sm:$0xff] }
 0x2b9   :  { %4129 = vmatprep.subr.bf16.mxu1 %v5309_v10  ;;  %v5389_v8 = vcombine.high %v873_v61, %v877_v3  ;;  %v737_v9 = vld [vmem:[#allocation8 + $0xad8] sm:$0xff]  ;;  %v5388_v14 = vcombine.low %v873_v61, %v877_v3 }
 0x2ba   :  { %v741_v63 = vld [vmem:[#allocation8 + $0xaf8] sm:$0xff] }
 0x2bb   :  { %4089 = vmatpush1.bf16.msra.mxu0 %v5180_v17  ;;  %v865_v10 = vld [vmem:[#allocation8 + $0xed8] sm:$0xff]  ;;  %v5253_v16 = vcombine.high %v737_v9, %v741_v63  ;;  %v5252_v23 = vcombine.low %v737_v9, %v741_v63  ;;  %v5598_v9 = vld [vmem:[#allocation11 + $0x28] sm:$0xff]  }
 0x2bc   :  { %4130 = vmatpush1.bf16.msra.mxu1 %v5308_v18  ;;  %4090 = vmatprep.subr.bf16.mxu0 %v5173_v19  ;;  %v869_v11 = vld [vmem:[#allocation8 + $0xef8] sm:$0xff]  ;;  %v5599_v63 = vld [vmem:[#allocation11 + $0xa8] sm:$0xff]  }
 0x2bd   :  { %4131 = vmatprep.subr.bf16.mxu1 %v5301_v20  ;;  %v5381_v17 = vcombine.high %v865_v10, %v869_v11  ;;  %v729_v18 = vld [vmem:[#allocation8 + $0xa98] sm:$0xff]  ;;  %v5380_v26 = vcombine.low %v865_v10, %v869_v11  ;;  %v5600_v10 = vld [vmem:[#allocation11 + $0x60] sm:$0xff]  }
 0x2be   :  { %v733_v19 = vld [vmem:[#allocation8 + $0xab8] sm:$0xff] }
 0x2bf   :  { %4091 = vmatpush1.bf16.msra.mxu0 %v5172_v34  ;;  %v857_v20 = vld [vmem:[#allocation8 + $0xe98] sm:$0xff]  ;;  %v5245_v27 = vcombine.high %v729_v18, %v733_v19  ;;  %v5244_v39 = vcombine.low %v729_v18, %v733_v19  ;;  %v5605_v18 = vld [vmem:[#allocation11 + $0xd8] sm:$0xff]  }
 0x2c0   :  { %4132 = vmatpush1.bf16.msra.mxu1 %v5300_v35  ;;  %4092 = vmatprep.subr.bf16.mxu0 %v5165_v36  ;;  %v861_v22 = vld [vmem:[#allocation8 + $0xeb8] sm:$0xff]  ;;  %v5606_v19 = vld [vmem:[#allocation11 + $0x18] sm:$0xff]  }
 0x2c1   :  { %4133 = vmatprep.subr.bf16.mxu1 %v5293_v24  ;;  %v5373_v34 = vcombine.high %v857_v20, %v861_v22  ;;  %v721_v35 = vld [vmem:[#allocation8 + $0xa58] sm:$0xff]  ;;  %v5372_v40 = vcombine.low %v857_v20, %v861_v22  ;;  %v5607_v20 = vld [vmem:[#allocation11 + $0x98] sm:$0xff]  }
 0x2c2   :  { %v725_v36 = vld [vmem:[#allocation8 + $0xa78] sm:$0xff] }
 0x2c3   :  { %4093 = vmatpush1.bf16.msra.mxu0 %v5164_v43  ;;  %v849_v24 = vld [vmem:[#allocation8 + $0xe58] sm:$0xff]  ;;  %v5237_v41 = vcombine.high %v721_v35, %v725_v36  ;;  %v5236_v46 = vcombine.low %v721_v35, %v725_v36  ;;  %v5613_v35 = vld [vmem:[#allocation11 + $0xc8] sm:$0xff]  }
 0x2c4   :  { %4134 = vmatpush1.bf16.msra.mxu1 %v5292_v45  ;;  %4094 = vmatprep.subr.bf16.mxu0 %v5285_v50  ;;  %v853_v38 = vld [vmem:[#allocation8 + $0xe78] sm:$0xff]  ;;  %v5614_v36 = vld [vmem:[#allocation11 + $0x8] sm:$0xff]  }
 0x2c5   :  { %4135 = vmatprep.subr.bf16.mxu1 %v5413_v29  ;;  %v5365_v43 = vcombine.high %v849_v24, %v853_v38  ;;  %v713_v45 = vld [vmem:[#allocation8 + $0xa18] sm:$0xff]  ;;  %v5364_v47 = vcombine.low %v849_v24, %v853_v38  ;;  %v5615_v24 = vld [vmem:[#allocation11 + $0x88] sm:$0xff]   ;;  %v5616_v38 = vld [vmem:[#allocation11 + $0x40] sm:$0xff]  }
 0x2c6   :  { %v717_v50 = vld [vmem:[#allocation8 + $0xa38] sm:$0xff] }
 0x2c7   :  { %4095 = vmatpush2.bf16.msra.mxu0 %v5284_v25  ;;  %v841_v29 = vld [vmem:[#allocation8 + $0xe18] sm:$0xff]  ;;  %v5229_v25 = vcombine.high %v713_v45, %v717_v50 }
 0x2c8   :  { %4136 = vmatpush2.bf16.msra.mxu1 %v5412_v49  ;;  %4096 = vmatprep.subr.bf16.mxu0 %v5277_v32  ;;  %v845_v30 = vld [vmem:[#allocation8 + $0xe38] sm:$0xff]  ;;  %v3828_v32 = vadd.f32 %v6046_v1, %v3787_v58 }
 0x2c9   :  { %4137 = vmatprep.subr.bf16.mxu1 %v5405_v33  ;;  %v5357_v49 = vcombine.high %v841_v29, %v845_v30  ;;  %v5228_v33 = vcombine.low %v713_v45, %v717_v50  ;;  %v5356_v21 = vcombine.low %v841_v29, %v845_v30  ;;  %v5594_v2 = vld [vmem:[#allocation11 + $0x30] sm:$0xff]   ;;  %v5620_v45 = vld [vmem:[#allocation11 + $0x178] sm:$0xff]   ;;  %v4162_v50 = vmax.f32 %v6043_v31, 0.0 }
 0x2ca   :  { %v4163_v42 = vmax.f32 %v3828_v32, 0.0  ;;  %v5595_v3 = vld [vmem:[#allocation11 + $0xb0] sm:$0xff]   ;;  %v5636_v29 = vld [vmem:[#allocation11 + $0x1f8] sm:$0xff]   ;;  %v5624_v32 = vld [vmem:[#allocation11 + $0x168] sm:$0xff]  }
 0x2cb   :  { %4097 = vmatpush2.bf16.msra.mxu0 %v5276_v54  ;;  %v5591_v54 = vld [vmem:[#allocation11 + $0xb8] sm:$0xff]   ;;  %v5608_v22 = vld [vmem:[#allocation11 + $0x50] sm:$0xff]  }
 0x2cc   :  { %4138 = vmatpush2.bf16.msra.mxu1 %v5404_v52  ;;  %4098 = vmatprep.subr.bf16.mxu0 %v5269_v55  ;;  %v5592_v52 = vld [vmem:[#allocation11 + $0x70] sm:$0xff]   ;;  %v4169_v55 = vpack.c.bf16 %v4161_v60, %v4161_v60  ;;  %v4171_v57 = vpack.c.bf16 %v4163_v42, %v4163_v42  ;;  %v5621_v30 = vld [vmem:[#allocation11 + $0x138] sm:$0xff]   ;;  %v5642_v60 = vld [vmem:[#allocation11 + $0x1e0] sm:$0xff]  }
 0x2cd   :  { %4139 = vmatprep.subr.bf16.mxu1 %v5397_v56  ;;  %v5593_v56 = vld [vmem:[#allocation11 + $0xf0] sm:$0xff]   ;;  %v5627_v42 = vld [vmem:[#allocation11 + $0x120] sm:$0xff]  }
 0x2ce   :  { %v5639_v31 = vld [vmem:[#allocation11 + $0x1b0] sm:$0xff]  }
 0x2cf   :  { %4099 = vmatpush2.bf16.msra.mxu0 %v5268_v4  ;;  %v5596_v4 = vld [vmem:[#allocation11 + $0x68] sm:$0xff]  }
 0x2d0   :  { %4140 = vmatpush2.bf16.msra.mxu1 %v5396_v7  ;;  %4100 = vmatprep.subr.bf16.mxu0 %v5261_v62  ;;  %v5597_v62 = vld [vmem:[#allocation11 + $0xe8] sm:$0xff]  }
 0x2d1   :  { %4141 = vmatprep.subr.bf16.mxu1 %v5389_v8 }
 0x2d3   :  { %4101 = vmatpush2.bf16.msra.mxu0 %v5260_v13  ;;  %v5601_v13 = vld [vmem:[#allocation11 + $0xe0] sm:$0xff]  }
 0x2d4   :  { %4142 = vmatpush2.bf16.msra.mxu1 %v5388_v14  ;;  %4102 = vmatprep.subr.bf16.mxu0 %v5253_v16  ;;  %v5602_v14 = vld [vmem:[#allocation11 + $0x20] sm:$0xff]  }
 0x2d5   :  { %4143 = vmatprep.subr.bf16.mxu1 %v5381_v17  ;;  %v5603_v16 = vld [vmem:[#allocation11 + $0xa0] sm:$0xff]   ;;  %v5604_v17 = vld [vmem:[#allocation11 + $0x58] sm:$0xff]  }
 0x2d7   :  { %4103 = vmatpush2.bf16.msra.mxu0 %v5252_v23  ;;  %v5609_v23 = vld [vmem:[#allocation11 + $0xd0] sm:$0xff]  }
 0x2d8   :  { %4144 = vmatpush2.bf16.msra.mxu1 %v5380_v26  ;;  %4104 = vmatprep.subr.bf16.mxu0 %v5245_v27  ;;  %v5610_v26 = vld [vmem:[#allocation11 + $0x10] sm:$0xff]  }
 0x2d9   :  { %4145 = vmatprep.subr.bf16.mxu1 %v5373_v34  ;;  %v5611_v27 = vld [vmem:[#allocation11 + $0x90] sm:$0xff]   ;;  %v5612_v34 = vld [vmem:[#allocation11 + $0x48] sm:$0xff]  }
 0x2db   :  { %4105 = vmatpush2.bf16.msra.mxu0 %v5244_v39  ;;  %v5617_v39 = vld [vmem:[#allocation11 + $0xc0] sm:$0xff]  }
 0x2dc   :  { %4146 = vmatpush2.bf16.msra.mxu1 %v5372_v40  ;;  %4106 = vmatprep.subr.bf16.mxu0 %v5237_v41  ;;  %v5618_v40 = vld [vmem:[#allocation11] sm:$0xff]   ;;  %v4160_v41 = vmax.f32 %v6017_v53, 0.0  ;;  %v5623_v53 = vld [vmem:[#allocation11 + $0x130] sm:$0xff]  }
 0x2dd   :  { %4147 = vmatprep.subr.bf16.mxu1 %v5365_v43  ;;  %v5619_v43 = vld [vmem:[#allocation11 + $0x80] sm:$0xff]  }
 0x2de   :  { %v4168_v58 = vpack.c.bf16 %v4160_v41, %v4160_v41 }
 0x2df   :  { %4107 = vmatpush2.bf16.msra.mxu0 %v5236_v46  ;;  %v5622_v46 = vld [vmem:[#allocation11 + $0x170] sm:$0xff]  }
 0x2e0   :  { %4148 = vmatpush2.bf16.msra.mxu1 %v5364_v47  ;;  %4108 = vmatprep.subr.bf16.mxu0 %v5229_v25  ;;  %v5637_v47 = vld [vmem:[#allocation11 + $0x1b8] sm:$0xff]   ;;  %v4170_v25 = vpack.c.bf16 %v4162_v50, %v4162_v50 }
 0x2e1   :  { %4149 = vmatprep.subr.bf16.mxu1 %v5357_v49  ;;  %v5638_v49 = vld [vmem:[#allocation11 + $0x1f0] sm:$0xff]  }
 0x2e3   :  { %4109 = vmatpush2.bf16.msra.mxu0 %v5228_v33  ;;  %v5640_v33 = vld [vmem:[#allocation11 + $0x1e8] sm:$0xff]  }
 0x2e4   :  { %4150 = vmatpush2.bf16.msra.mxu1 %v5356_v21  ;;  %5479 = vmatprep.subr.bf16.mxu0 %v5588_v51  ;;  %v5625_v21 = vld [vmem:[#allocation11 + $0x128] sm:$0xff]   ;;  %v5626_v51 = vld [vmem:[#allocation11 + $0x160] sm:$0xff]  }
 0x2e5   :  { %5501 = vmatprep.subr.bf16.mxu1 %v5589_v37  ;;  %v5641_v37 = vld [vmem:[#allocation11 + $0x1a8] sm:$0xff]  }
 0x2e6   :  { %v6052_v1 = vpop.f32.mrf.mxu0  ;;  %4111 = vmatmul.mubr.bf16.vlgmr.msra.gmra.mxu0 %v5987_v0 }
 0x2e7   :  { %v6055_v59 = vpop.f32.mrf.mxu1  ;;  %4152 = vmatmul.mubr.bf16.vlgmr.msra.gmra.mxu1 %v5985_v5  ;;  %5480 = vmatpush3.bf16.msra.mxu0 %v5590_v6  ;;  %v5628_v6 = vld [vmem:[#allocation11 + $0x158] sm:$0xff]  }
 0x2e8   :  { %4727 = vmatprep.mubr.bf16.mxu0 %v4169_v55  ;;  %5502 = vmatpush3.bf16.msra.mxu1 %v5591_v54  ;;  %v6058_v61 = vpop.f32.mrf.mxu0  ;;  %v5643_v54 = vld [vmem:[#allocation11 + $0x1a0] sm:$0xff]   ;;  %v5629_v55 = vld [vmem:[#allocation11 + $0x118] sm:$0xff]  }
 0x2e9   :  { %4767 = vmatprep.mubr.bf16.mxu1 %v4171_v57  ;;  %v6060_v7 = vpop.f32.mrf.mxu1  ;;  %5481 = vmatprep.subr.bf16.mxu0 %v5592_v52  ;;  %v5644_v52 = vld [vmem:[#allocation11 + $0x1d8] sm:$0xff]  }
 0x2ea   :  { %v3870_v0 = vpop.f32.mrf.mxu0  ;;  %5503 = vmatprep.subr.bf16.mxu1 %v5593_v56  ;;  %v5630_v56 = vld [vmem:[#allocation11 + $0x150] sm:$0xff]   ;;  %v5645_v57 = vld [vmem:[#allocation11 + $0x198] sm:$0xff]  }
 0x2eb   :  { %v3911_v8 = vpop.f32.mrf.mxu1  ;;  %5482 = vmatpush3.bf16.msra.mxu0 %v5594_v2  ;;  %v5631_v2 = vld [vmem:[#allocation11 + $0x110] sm:$0xff]   ;;  %v5656_v0 = vld [vmem:[#allocation10] sm:$0xff] }
 0x2ec   :  { %5504 = vmatpush3.bf16.msra.mxu1 %v5595_v3  ;;  %v3871_v5 = vpop.f32.mrf.mxu0  ;;  %5483 = vmatprep.subr.bf16.mxu0 %v5596_v4  ;;  %v5632_v3 = vld [vmem:[#allocation11 + $0x148] sm:$0xff]   ;;  %v923_v8 = vrot.slane %v5656_v0, %v139_v15  ;;  %v5647_v15 = vld [vmem:[#allocation11 + $0x190] sm:$0xff]  }
 0x2ed   :  { %v3912_v11 = vpop.f32.mrf.mxu1  ;;  %5505 = vmatprep.subr.bf16.mxu1 %v5597_v62  ;;  %v5633_v4 = vld [vmem:[#allocation11 + $0x108] sm:$0xff]   ;;  %v5634_v62 = vld [vmem:[#allocation11 + $0x140] sm:$0xff]  }
 0x2ee   :  { %v5635_v5 = vld [vmem:[#allocation11 + $0x100] sm:$0xff]  }
 0x2ef   :  { %5484 = vmatpush3.bf16.msra.mxu0 %v5598_v9  ;;  %v927_v9 = vrot.slane %v5656_v0, %v143_v44 }
 0x2f0   :  { %5506 = vmatpush3.bf16.msra.mxu1 %v5599_v63  ;;  %5485 = vmatprep.subr.bf16.mxu0 %v5600_v10  ;;  %v3867_v63 = vadd.f32 %v6052_v1, %v923_v8  ;;  %v5648_v1 = vld [vmem:[#allocation11 + $0x1c8] sm:$0xff]  }
 0x2f1   :  { %5507 = vmatprep.subr.bf16.mxu1 %v5601_v13  ;;  %v3869_v10 = vadd.f32 %v6058_v61, %v927_v9 }
 0x2f2   :  { %v3908_v11 = vadd.f32 %v6055_v59, %v3867_v63 }
 0x2f3   :  { %5486 = vmatpush3.bf16.msra.mxu0 %v5602_v14  ;;  %v5646_v14 = vld [vmem:[#allocation11 + $0x1d0] sm:$0xff]  }
 0x2f4   :  { %5508 = vmatpush3.bf16.msra.mxu1 %v5603_v16  ;;  %5487 = vmatprep.subr.bf16.mxu0 %v5604_v17  ;;  %v3910_v16 = vadd.f32 %v6060_v7, %v3869_v10  ;;  %v5650_v7 = vld [vmem:[#allocation11 + $0x1c0] sm:$0xff]  }
 0x2f5   :  { %5509 = vmatprep.subr.bf16.mxu1 %v5605_v18 }
 0x2f7   :  { %5488 = vmatpush3.bf16.msra.mxu0 %v5606_v19 }
 0x2f8   :  { %5510 = vmatpush3.bf16.msra.mxu1 %v5607_v20  ;;  %5489 = vmatprep.subr.bf16.mxu0 %v5608_v22 }
 0x2f9   :  { %5511 = vmatprep.subr.bf16.mxu1 %v5609_v23 }
 0x2fb   :  { %5490 = vmatpush3.bf16.msra.mxu0 %v5610_v26 }
 0x2fc   :  { %5512 = vmatpush3.bf16.msra.mxu1 %v5611_v27  ;;  %5491 = vmatprep.subr.bf16.mxu0 %v5612_v34  ;;  %v5649_v27 = vld [vmem:[#allocation11 + $0x188] sm:$0xff]  }
 0x2fd   :  { %5513 = vmatprep.subr.bf16.mxu1 %v5613_v35 }
 0x2ff   :  { %5492 = vmatpush3.bf16.msra.mxu0 %v5614_v36 }
 0x300   :  { %5514 = vmatpush3.bf16.msra.mxu1 %v5615_v24  ;;  %5493 = vmatprep.subr.bf16.mxu0 %v5616_v38  ;;  %v5651_v38 = vld [vmem:[#allocation11 + $0x180] sm:$0xff]  }
 0x301   :  { %5515 = vmatprep.subr.bf16.mxu1 %v5617_v39 }
 0x303   :  { %5494 = vmatpush3.bf16.msra.mxu0 %v5618_v40 }
 0x304   :  { %5516 = vmatpush3.bf16.msra.mxu1 %v5619_v43  ;;  %5523 = vmatprep.subr.bf16.mxu0 %v5620_v45 }
 0x305   :  { %5545 = vmatprep.subr.bf16.mxu1 %v5636_v29 }
 0x306   :  { %4728 = vmatmul.mubr.bf16.vlgmr.msra.gmra.mxu0 %v4168_v58 }
 0x307   :  { %4768 = vmatmul.mubr.bf16.vlgmr.msra.gmra.mxu1 %v4170_v25  ;;  %5524 = vmatpush3.bf16.msra.mxu0 %v5621_v30 }
 0x308   :  { %5525 = vmatprep.subr.bf16.mxu0 %v5622_v46  ;;  %5546 = vmatpush3.bf16.msra.mxu1 %v5637_v47  ;;  %v931_v46 = vrot.slane %v5656_v0, %v147_v12  ;;  %v935_v47 = vrot.slane %v5656_v0, %v151_v48 }
 0x309   :  { %5547 = vmatprep.subr.bf16.mxu1 %v5638_v49 }
 0x30b   :  { %5526 = vmatpush3.bf16.msra.mxu0 %v5623_v53 }
 0x30c   :  { %5527 = vmatprep.subr.bf16.mxu0 %v5624_v32  ;;  %5548 = vmatpush3.bf16.msra.mxu1 %v5639_v31 }
 0x30d   :  { %5549 = vmatprep.subr.bf16.mxu1 %v5640_v33 }
 0x30f   :  { %5528 = vmatpush3.bf16.msra.mxu0 %v5625_v21 }
 0x310   :  { %5529 = vmatprep.subr.bf16.mxu0 %v5626_v51  ;;  %5550 = vmatpush3.bf16.msra.mxu1 %v5641_v37 }
 0x311   :  { %5551 = vmatprep.subr.bf16.mxu1 %v5642_v60 }
 0x313   :  { %5530 = vmatpush3.bf16.msra.mxu0 %v5627_v42 }
 0x314   :  { %5531 = vmatprep.subr.bf16.mxu0 %v5628_v6  ;;  %5552 = vmatpush3.bf16.msra.mxu1 %v5643_v54 }
 0x315   :  { %5553 = vmatprep.subr.bf16.mxu1 %v5644_v52 }
 0x317   :  { %5532 = vmatpush3.bf16.msra.mxu0 %v5629_v55 }
 0x318   :  { %5533 = vmatprep.subr.bf16.mxu0 %v5630_v56  ;;  %5554 = vmatpush3.bf16.msra.mxu1 %v5645_v57 }
 0x319   :  { %5555 = vmatprep.subr.bf16.mxu1 %v5646_v14 }
 0x31b   :  { %5534 = vmatpush3.bf16.msra.mxu0 %v5631_v2 }
 0x31c   :  { %5535 = vmatprep.subr.bf16.mxu0 %v5632_v3  ;;  %5556 = vmatpush3.bf16.msra.mxu1 %v5647_v15 }
 0x31d   :  { %5557 = vmatprep.subr.bf16.mxu1 %v5648_v1 }
 0x31f   :  { %5536 = vmatpush3.bf16.msra.mxu0 %v5633_v4  ;;  %v5414_v4 = vld [vmem:[#allocation13] ss:$0 sm:$0xff] }
 0x320   :  { %5537 = vmatprep.subr.bf16.mxu0 %v5634_v62  ;;  %5558 = vmatpush3.bf16.msra.mxu1 %v5649_v27 }
 0x321   :  { %5559 = vmatprep.subr.bf16.mxu1 %v5650_v7 }
 0x323   :  { %5538 = vmatpush3.bf16.msra.mxu0 %v5635_v5 }
 0x324   :  { %5560 = vmatpush3.bf16.msra.mxu1 %v5651_v38 }
 0x326   :  { %v3948_v13 = vpop.f32.mrf.mxu0 }
 0x327   :  { %v3949_v17 = vadd.f32 %v3948_v13, %v3908_v11  ;;  %v3989_v18 = vpop.f32.mrf.mxu1 }
 0x328   :  { %v3950_v19 = vpop.f32.mrf.mxu0 }
 0x329   :  { %v3990_v44 = vadd.f32 %v3989_v18, %v3949_v17  ;;  %v3951_v20 = vadd.f32 %v3950_v19, %v3910_v16  ;;  %v3991_v22 = vpop.f32.mrf.mxu1 }
 0x32a   :  { %v3952_v23 = vpop.f32.mrf.mxu0 }
 0x32b   :  { %v3992_v26 = vadd.f32 %v3991_v22, %v3951_v20  ;;  %v3993_v61 = vpop.f32.mrf.mxu1  ;;  %v4164_v34 = vmax.f32 %v3990_v44, 0.0 }
 0x32c   :  { %v3953_v59 = vpop.f32.mrf.mxu0 }
 0x32d   :  { %v4165_v35 = vmax.f32 %v3992_v26, 0.0  ;;  %v3994_v36 = vpop.f32.mrf.mxu1  ;;  %v4172_v39 = vpack.c.bf16 %v4164_v34, %v4164_v34 }
 0x32f   :  { %v4173_v24 = vpack.c.bf16 %v4165_v35, %v4165_v35 }
 0x331   :  { %4807 = vmatprep.mubr.bf16.mxu0 %v4173_v24 }
 0x332   :  { %4808 = vmatmul.mubr.bf16.vlgmr.msra.gmra.mxu0 %v4172_v39 }
 0x366   :  { %v4030_v40 = vpop.f32.mrf.mxu0 }
 0x367   :  { %v4071_v41 = vpop.f32.mrf.mxu1  ;;  %v4031_v25 = vadd.f32 %v4030_v40, %v931_v46 }
 0x368   :  { %v4032_v43 = vpop.f32.mrf.mxu0 }
 0x369   :  { %v4073_v45 = vpop.f32.mrf.mxu1  ;;  %v4033_v49 = vadd.f32 %v4032_v43, %v935_v47  ;;  %v4072_v53 = vadd.f32 %v4071_v41, %v4031_v25 }
 0x36a   :  { %v4034_v50 = vpop.f32.mrf.mxu0 }
 0x36b   :  { %v4075_v29 = vpop.f32.mrf.mxu1  ;;  %v4074_v31 = vadd.f32 %v4073_v45, %v4033_v49 }
 0x36c   :  { %v4035_v30 = vpop.f32.mrf.mxu0 }
 0x36d   :  { %v4076_v58 = vpop.f32.mrf.mxu1 }
 0x3a6   :  { %v4112_v32 = vpop.f32.mrf.mxu0 }
 0x3a7   :  { %v4113_v33 = vadd.f32 %v4112_v32, %v4072_v53  ;;  %v4153_v21 = vpop.f32.mrf.mxu1 }
 0x3a8   :  { %v4114_v51 = vpop.f32.mrf.mxu0 }
 0x3a9   :  { %v4154_v37 = vadd.f32 %v4153_v21, %v4113_v33  ;;  %v4115_v60 = vadd.f32 %v4114_v51, %v4074_v31  ;;  %v4155_v42 = vpop.f32.mrf.mxu1 }
 0x3aa   :  { %v4116_v6 = vpop.f32.mrf.mxu0 }
 0x3ab   :  { %v4156_v54 = vadd.f32 %v4155_v42, %v4115_v60  ;;  %v4157_v52 = vpop.f32.mrf.mxu1  ;;  %v4166_v55 = vmax.f32 %v4154_v37, 0.0 }
 0x3ac   :  { %v4117_v56 = vpop.f32.mrf.mxu0 }
 0x3ad   :  { %v4167_v12 = vmax.f32 %v4156_v54, 0.0  ;;  %v4158_v57 = vpop.f32.mrf.mxu1  ;;  %v4174_v48 = vpack.c.bf16 %v4166_v55, %v4166_v55 }
 0x3af   :  { %v4175_v28 = vpack.c.bf16 %v4167_v12, %v4167_v12 }
 0x3b1   :  { %4847 = vmatprep.mubr.bf16.mxu1 %v4175_v28 }
 0x3b2   :  { %4848 = vmatmul.mubr.bf16.vlgmr.msra.gmra.mxu1 %v4174_v48 }
 0x3c6   :  { %v5495_v2 = vpop.f32.mrf.mxu0 }
 0x3c7   :  { %v5517_v3 = vpop.f32.mrf.mxu1 }
 0x3c8   :  { %v5496_v62 = vpop.f32.mrf.mxu0 }
 0x3c9   :  { %v5497_v0 = vadd.f32 %v5496_v62, %v5495_v2  ;;  %v5518_v8 = vpop.f32.mrf.mxu1 }
 0x3ca   :  { %v5519_v9 = vadd.f32 %v5518_v8, %v5517_v3  ;;  %v5498_v5 = vpop.f32.mrf.mxu0 }
 0x3cb   :  { %v4730_v63 = vadd.f32 %v5497_v0, %v5414_v4  ;;  %v5520_v10 = vpop.f32.mrf.mxu1 }
 0x3cc   :  { %v5499_v11 = vpop.f32.mrf.mxu0 }
 0x3cd   :  { %v4770_v13 = vadd.f32 %v5519_v9, %v4730_v63  ;;  %v5521_v14 = vpop.f32.mrf.mxu1 }
 0x3f2   :  { %v5539_v16 = vpop.f32.mrf.mxu0 }
 0x3f4   :  { %v5540_v17 = vpop.f32.mrf.mxu0 }
 0x3f5   :  { %v5541_v18 = vadd.f32 %v5540_v17, %v5539_v16 }
 0x3f6   :  { %v5542_v15 = vpop.f32.mrf.mxu0 }
 0x3f7   :  { %v4810_v19 = vadd.f32 %v5541_v18, %v4770_v13 }
 0x3f8   :  { %v5543_v44 = vpop.f32.mrf.mxu0 }
 0x472   :  { %v5561_v20 = vpop.f32.mrf.mxu1 }
 0x474   :  { %v5562_v22 = vpop.f32.mrf.mxu1 }
 0x475   :  { %v5563_v23 = vadd.f32 %v5562_v22, %v5561_v20 }
 0x476   :  { %v5564_v1 = vpop.f32.mrf.mxu1 }
 0x477   :  { %v4850_v26 = vadd.f32 %v5563_v23, %v4810_v19 }
 0x478   :  { %v5565_v61 = vpop.f32.mrf.mxu1 }
 0x479   :  { %v4856_v27 = vsel %vm4855_vm2, %v4850_v26, -inf }
 0x47a   :  { %4857 = vmax.xlane.f32.xlu0 %v4856_v27 }
 0x503   :  { %v4858_v34 = vpop.xlane.xlu0 %4857 }
 0x504   :  { %v4859_v59 = vsub.f32 %v4850_v26, %v4858_v34 }
 0x506   :  { %v4860_v35 = vmul.f32 1.442695, %v4859_v59 }
 0x508   :  { %5652 = vpow2.f32 %v4860_v35 }
 0x515   :  { %v5653_v36 = vpop.eup %5652 }
 0x516   :  { %v4862_v7 = vsel %vm4855_vm2, %v5653_v36, 0.0 }
 0x517   :  { %4863 = vadd.xlane.f32.xlu0 %v4862_v7 }
 0x5a0   :  { %v4864_v24 = vpop.xlane.xlu0 %4863 }
 0x5a1   :  { %5654 = vrcp.f32 %v4864_v24 }
 0x5ae   :  { %v5655_v38 = vpop.eup %5654 }
 0x5af   :  { %v4866_v39 = vmul.f32 %v5655_v38, %v5653_v36 }
 0x5b1   :  { %4867 = vst [vmem:[#allocation14] sm:$0x3] %v4866_v39 }
 0x5b2   :  { %5808 = shalt.err (!%p5805_p11)
}
 0x5b3   :  { %4877 = dma.vmem_to_hbm [thread:$0]  %s4875_s6, 32, %s6086_s7, [#allocation4]  }
 0x5b4   :  { %5825 = dma.done.wait [#allocation4], 32  }
 0x5b5   :  { %5826 = vsyncadd [#allocation4], 4294967264 }
 0x5b6   :  { %4881 = vsyncpa [#allocation3], 1 }
 0x5b7   :  { %4882 = vsyncpa [#allocation6], 1 }
 0x5b8   :  { %4883 = vsyncpa [#allocation9], 1 }
 0x5b9   :  { %4884 = vsyncpa [#allocation12], 1 }
 0x5ba   :  { %4885 = vsyncpa [#allocation4], 1 }

// kernel: tpu_custom_call.1
= control target key start
LH: loop header
LB: loop body
LE: loop exit
PB: predicated region body
PF: predicated region fallthrough
CT: control target
= control target key end

     0   :  { %12 = vsyncpa [#allocation3], 0  ;;  %s6079_s0 = inlined_call_operand.hbm [shape: f32[2,8], index: 0, kind: input, shape index: {}]   ;;  %s6080_s1 = inlined_call_operand.hbm [shape: bf16[8,1024], index: 1, kind: input, shape index: {}]   ;;  %s6081_s2 = inlined_call_operand.hbm [shape: f32[1,1024], index: 2, kind: input, shape index: {}]   ;;  %s6082_s3 = inlined_call_operand.hbm [shape: bf16[1024,1024], index: 3, kind: input, shape index: {}]   ;;  %s6083_s4 = inlined_call_operand.hbm [shape: f32[1,1024], index: 4, kind: input, shape index: {}]   ;;  %s6084_s5 = inlined_call_operand.hbm [shape: bf16[1024,128], index: 5, kind: input, shape index: {}]   ;;  %s6085_s6 = inlined_call_operand.hbm [shape: f32[1,128], index: 6, kind: input, shape index: {}]   ;;  %s6086_s7 = inlined_call_operand.hbm [shape: f32[2,128], index: 7, kind: output, shape index: {}]  }
   0x1   :  { %13 = vsyncpa [#allocation6], 0 }
   0x2   :  { %14 = vsyncpa [#allocation9], 0 }
   0x3   :  { %15 = vsyncpa [#allocation12], 0 }
   0x4   :  { %16 = vsyncpa [#allocation4], 0  ;;  %s5827_s24 = smov [#allocation5]   ;;  %s5828_s26 = smov [#allocation8]  }
   0x5   :  { %s33_s25 = sshll.u32 %s5827_s24, 4  ;;  %s52_s27 = sshll.u32 %s5828_s26, 4  ;;  %s34_s25 = int_to_ptr.vmem [resolvable:$true] %s33_s25  ;;  %s53_s27 = int_to_ptr.vmem [resolvable:$true] %s52_s27 }
   0x6   :  { %s5665_s28 = scalar_lea.vmem %s34_s25, 512  ;;  %p5670_p1 = scmp.lt.s32.totalorder %s34_s25, %s34_s25 }
   0x7   :  { %p5666_p0 = scmp.ne.s32.totalorder %s34_s25, %s5665_s28  ;;  %p5671_p2 = scmp.lt.s32.totalorder %s5665_s28, %s5665_s28 }
   0x9   :  { %p5672_p3 = por %p5671_p2, %p5670_p1 }
   0xb   :  { %p5673_p4 = pnand %p5672_p3, %p5666_p0 }
   0xd   :  { %5676 = shalt.err (!%p5673_p4)
}
   0xe   :  { %36 = dma.hbm_to_vmem [thread:$0]  %s6080_s1, 512, %s34_s25, [#allocation6]  }
   0xf   :  { %s5685_s8 = scalar_lea.vmem %s53_s27, 65536  ;;  %p5690_p6 = scmp.lt.s32.totalorder %s53_s27, %s53_s27 }
  0x10   :  { %p5686_p5 = scmp.ne.s32.totalorder %s53_s27, %s5685_s8  ;;  %p5691_p7 = scmp.lt.s32.totalorder %s5685_s8, %s5685_s8 }
  0x12   :  { %p5692_p8 = por %p5691_p7, %p5690_p6 }
  0x14   :  { %p5693_p9 = pnand %p5692_p8, %p5686_p5 }
  0x16   :  { %5696 = shalt.err (!%p5693_p9)
}
  0x17   :  { %s5829_s9 = smov 512   ;;  %s5830_s10 = smov 32  }
  0x18   :  { %58 = dma.hbm_to_vmem [thread:$0]  %s6082_s3, 65536, %s53_s27, [#allocation9], %s5829_s9, %s5829_s9, %s5830_s10  }
  0x19   :  { %s5831_s13 = smov [#allocation11]  }
  0x1a   :  { %s74_s14 = sshll.u32 %s5831_s13, 4  ;;  %s75_s14 = int_to_ptr.vmem [resolvable:$true] %s74_s14 }
  0x1b   :  { %s5705_s15 = scalar_lea.vmem %s75_s14, 8192  ;;  %p5710_p11 = scmp.lt.s32.totalorder %s75_s14, %s75_s14 }
  0x1c   :  { %p5706_p10 = scmp.ne.s32.totalorder %s75_s14, %s5705_s15  ;;  %p5711_p12 = scmp.lt.s32.totalorder %s5705_s15, %s5705_s15 }
  0x1e   :  { %p5712_p13 = por %p5711_p12, %p5710_p11 }
  0x20   :  { %p5713_p0 = pnand %p5712_p13, %p5706_p10 }
  0x22   :  { %5716 = shalt.err (!%p5713_p0)
}
  0x23   :  { %s5832_s1 = smov 64   ;;  %s5833_s16 = smov 4  }
  0x24   :  { %80 = dma.hbm_to_vmem [thread:$0]  %s6084_s5, 8192, %s75_s14, [#allocation12], %s5832_s1, %s5832_s1, %s5833_s16  }
  0x25   :  { %s5834_s19 = smov [#allocation2]   ;;  %s5835_s3 = smov [#allocation7]  }
  0x26   :  { %s23_s20 = sshll.u32 %s5834_s19, 4  ;;  %s43_s21 = sshll.u32 %s5835_s3, 4  ;;  %s24_s20 = int_to_ptr.vmem [resolvable:$true] %s23_s20  ;;  %s44_s21 = int_to_ptr.vmem [resolvable:$true] %s43_s21 }
  0x27   :  { %s5725_s22 = scalar_lea.vmem %s24_s20, 32  ;;  %p5730_p2 = scmp.lt.s32.totalorder %s24_s20, %s24_s20 }
  0x28   :  { %p5726_p1 = scmp.ne.s32.totalorder %s24_s20, %s5725_s22  ;;  %p5731_p3 = scmp.lt.s32.totalorder %s5725_s22, %s5725_s22 }
  0x2a   :  { %p5732_p4 = por %p5731_p3, %p5730_p2 }
  0x2c   :  { %p5733_p5 = pnand %p5732_p4, %p5726_p1 }
  0x2e   :  { %5736 = shalt.err (!%p5733_p5)
}
  0x2f   :  { %26 = dma.hbm_to_vmem [thread:$0]  %s6079_s0, 32, %s24_s20, [#allocation3]  }
  0x30   :  { %s5745_s25 = scalar_lea.vmem %s44_s21, 128  ;;  %p5750_p7 = scmp.lt.s32.totalorder %s44_s21, %s44_s21 }
  0x31   :  { %p5746_p6 = scmp.ne.s32.totalorder %s44_s21, %s5745_s25  ;;  %p5751_p8 = scmp.lt.s32.totalorder %s5745_s25, %s5745_s25 }
  0x33   :  { %p5752_p9 = por %p5751_p8, %p5750_p7 }
  0x35   :  { %p5753_p10 = pnand %p5752_p9, %p5746_p6 }
  0x37   :  { %5756 = shalt.err (!%p5753_p10)
}
  0x38   :  { %46 = dma.hbm_to_vmem [thread:$0]  %s6081_s2, 128, %s44_s21, [#allocation6]  }
  0x39   :  { %s5836_s27 = smov [#allocation10]   ;;  %s5837_s29 = smov [#allocation13]  }
  0x3a   :  { %s65_s28 = sshll.u32 %s5836_s27, 4  ;;  %s87_s30 = sshll.u32 %s5837_s29, 4  ;;  %s66_s28 = int_to_ptr.vmem [resolvable:$true] %s65_s28  ;;  %s88_s30 = int_to_ptr.vmem [resolvable:$true] %s87_s30 }
  0x3b   :  { %s5765_s8 = scalar_lea.vmem %s66_s28, 128  ;;  %p5770_p12 = scmp.lt.s32.totalorder %s66_s28, %s66_s28 }
  0x3c   :  { %p5766_p11 = scmp.ne.s32.totalorder %s66_s28, %s5765_s8  ;;  %p5771_p13 = scmp.lt.s32.totalorder %s5765_s8, %s5765_s8 }
  0x3e   :  { %p5772_p0 = por %p5771_p13, %p5770_p12 }
  0x40   :  { %p5773_p1 = pnand %p5772_p0, %p5766_p11 }
  0x42   :  { %5776 = shalt.err (!%p5773_p1)
}
  0x43   :  { %68 = dma.hbm_to_vmem [thread:$0]  %s6083_s4, 128, %s66_s28, [#allocation9]  }
  0x44   :  { %s5785_s10 = scalar_lea.vmem %s88_s30, 16  ;;  %s5789_s2 = scalar_lea.vmem %s88_s30, 32 }
  0x45   :  { %p5786_p2 = scmp.ne.s32.totalorder %s88_s30, %s5785_s10  ;;  %p5790_p3 = scmp.lt.s32.totalorder %s88_s30, %s88_s30 }
  0x46   :  { %p5791_p4 = scmp.lt.s32.totalorder %s5789_s2, %s5785_s10 }
  0x48   :  { %p5792_p5 = por %p5791_p4, %p5790_p3 }
  0x4a   :  { %p5793_p6 = pnand %p5792_p5, %p5786_p2 }
  0x4c   :  { %5796 = shalt.err (!%p5793_p6)
}
  0x4d   :  { %90 = dma.hbm_to_vmem [thread:$0]  %s6085_s6, 16, %s88_s30, [#allocation12]  }
  0x4e   :  { %5817 = dma.done.wait [#allocation3], 32  }
  0x4f   :  { %5818 = vsyncadd [#allocation3], 4294967264 }
  0x50   :  { %5819 = dma.done.wait [#allocation6], 640  }
  0x51   :  { %5820 = vsyncadd [#allocation6], 4294966656 }
  0x52   :  { %5821 = dma.done.wait [#allocation9], 65664  }
  0x53   :  { %5822 = vsyncadd [#allocation9], 4294901632 }
  0x54   :  { %5823 = dma.done.wait [#allocation12], 8208  }
  0x55   :  { %5824 = vsyncadd [#allocation12], 4294959088  ;;  %v5838_v0 = vmov 0   ;;  %v115_v1 = vld [vmem:[#allocation5] sm:$0xff]  ;;  %vm185_vm0 = vcmask 1043456   ;;  %v116_v2 = vld [vmem:[#allocation5 + $0x8] sm:$0xff] }
  0x56   :  { %242 = vmatprep.mubr.bf16.mxu0 %v5838_v0  ;;  %283 = vmatprep.mubr.bf16.mxu1 %v5838_v0  ;;  %v113_v3 = vld [vmem:[#allocation2] sm:$0x3]  ;;  %v4887_v4 = vcombine.high %v115_v1, %v115_v1  ;;  %v4889_v5 = vcombine.high %v116_v2, %v116_v2  ;;  %v4886_v6 = vcombine.low %v115_v1, %v115_v1  ;;  %v117_v8 = vld [vmem:[#allocation5 + $0x10] sm:$0xff]  ;;  %v446_v13 = vld [vmem:[#allocation8 + $0x1c0] sm:$0xff]  ;;  %vm181_vm1 = vcmask 64512   ;;  %s5839_s4 = smov [#allocation14]  }
  0x57   :  { %v4888_v7 = vcombine.low %v116_v2, %v116_v2  ;;  %v118_v9 = vld [vmem:[#allocation5 + $0x18] sm:$0xff]  ;;  %v4891_v10 = vcombine.high %v117_v8, %v117_v8  ;;  %v4890_v11 = vcombine.low %v117_v8, %v117_v8  ;;  %v114_v16 = vpack.c.bf16 %v113_v3, %v113_v3  ;;  %v450_v18 = vld [vmem:[#allocation8 + $0x1e0] sm:$0xff]  ;;  %s4874_s6 = sshll.u32 %s5839_s4, 4  ;;  %s4875_s6 = int_to_ptr.vmem [resolvable:$true] %s4874_s6 }
  0x58   :  { %v4893_v12 = vcombine.high %v118_v9, %v118_v9  ;;  %4894 = vmatprep.subr.msk.bf16.mxu0 %vm185_vm0, %v4887_v4  ;;  %4896 = vmatprep.subr.msk.bf16.mxu1 %vm185_vm0, %v4889_v5  ;;  %v187_v14 = vsel %vm185_vm0, %v4886_v6, 0  ;;  %v4892_v17 = vcombine.low %v118_v9, %v118_v9  ;;  %v574_v19 = vld [vmem:[#allocation8 + $0x5c0] sm:$0xff]  ;;  %v4959_v23 = vcombine.high %v446_v13, %v450_v18  ;;  %s5797_s13 = scalar_lea.vmem %s4875_s6, 32  ;;  %p5802_p8 = scmp.lt.s32.totalorder %s4875_s6, %s4875_s6 }
  0x59   :  { %v193_v15 = vsel %vm185_vm0, %v4888_v7, 0  ;;  %v578_v20 = vld [vmem:[#allocation8 + $0x5e0] sm:$0xff]  ;;  %225 = vmatpush1.bf16.msra.mxu0 %v187_v14  ;;  %v199_v21 = vsel %vm185_vm0, %v4890_v11, 0  ;;  %v4958_v29 = vcombine.low %v446_v13, %v450_v18  ;;  %vm4855_vm2 = vcmask 1041408   ;;  %p5798_p7 = scmp.ne.s32.totalorder %s4875_s6, %s5797_s13  ;;  %p5803_p9 = scmp.lt.s32.totalorder %s5797_s13, %s5797_s13 }
  0x5a   :  { %266 = vmatpush1.bf16.msra.mxu1 %v193_v15  ;;  %4898 = vmatprep.subr.msk.bf16.mxu0 %vm185_vm0, %v4891_v10  ;;  %v205_v22 = vsel %vm185_vm0, %v4892_v17, 0  ;;  %v5087_v24 = vcombine.high %v574_v19, %v578_v20  ;;  %v438_v25 = vld [vmem:[#allocation8 + $0x180] sm:$0xff]  ;;  %v5086_v30 = vcombine.low %v574_v19, %v578_v20 }
  0x5b   :  { %4900 = vmatprep.subr.msk.bf16.mxu1 %vm185_vm0, %v4893_v12  ;;  %v442_v26 = vld [vmem:[#allocation8 + $0x1a0] sm:$0xff]  ;;  %p5804_p10 = por %p5803_p9, %p5802_p8 }
  0x5c   :  { %4895 = vmatmul.mubr.msk.bf16.vlgmr.msra.gmra.mxu0 %vm181_vm1, %v114_v16  ;;  %v566_v27 = vld [vmem:[#allocation8 + $0x580] sm:$0xff]  ;;  %v4951_v31 = vcombine.high %v438_v25, %v442_v26  ;;  %v4950_v37 = vcombine.low %v438_v25, %v442_v26 }
  0x5d   :  { %4897 = vmatmul.mubr.msk.bf16.vlgmr.msra.gmra.mxu1 %vm181_vm1, %v114_v16  ;;  %307 = vmatpush1.bf16.msra.mxu0 %v199_v21  ;;  %v570_v28 = vld [vmem:[#allocation8 + $0x5a0] sm:$0xff]  ;;  %p5805_p11 = pnand %p5804_p10, %p5798_p7 }
  0x5e   :  { %324 = vmatprep.mubr.bf16.mxu0 %v5838_v0  ;;  %348 = vmatpush1.bf16.msra.mxu1 %v205_v22  ;;  %v5079_v32 = vcombine.high %v566_v27, %v570_v28  ;;  %v430_v33 = vld [vmem:[#allocation8 + $0x140] sm:$0xff]  ;;  %v5078_v38 = vcombine.low %v566_v27, %v570_v28 }
  0x5f   :  { %365 = vmatprep.mubr.bf16.mxu1 %v5838_v0  ;;  %3504 = vmatprep.subr.bf16.mxu0 %v4959_v23  ;;  %v434_v34 = vld [vmem:[#allocation8 + $0x160] sm:$0xff] }
  0x60   :  { %3545 = vmatprep.subr.bf16.mxu1 %v5087_v24  ;;  %v558_v35 = vld [vmem:[#allocation8 + $0x540] sm:$0xff]  ;;  %v4943_v39 = vcombine.high %v430_v33, %v434_v34  ;;  %v4942_v45 = vcombine.low %v430_v33, %v434_v34 }
  0x61   :  { %v562_v36 = vld [vmem:[#allocation8 + $0x560] sm:$0xff] }
  0x62   :  { %v5071_v40 = vcombine.high %v558_v35, %v562_v36  ;;  %v422_v41 = vld [vmem:[#allocation8 + $0x100] sm:$0xff]  ;;  %v5070_v46 = vcombine.low %v558_v35, %v562_v36 }
  0x63   :  { %v426_v42 = vld [vmem:[#allocation8 + $0x120] sm:$0xff] }
  0x64   :  { %4899 = vmatmul.mubr.msk.bf16.vlgmr.msra.gmra.mxu0 %vm181_vm1, %v114_v16  ;;  %v550_v43 = vld [vmem:[#allocation8 + $0x500] sm:$0xff]  ;;  %v4935_v51 = vcombine.high %v422_v41, %v426_v42  ;;  %v4934_v53 = vcombine.low %v422_v41, %v426_v42 }
  0x65   :  { %4901 = vmatmul.mubr.msk.bf16.vlgmr.msra.gmra.mxu1 %vm181_vm1, %v114_v16  ;;  %3505 = vmatpush1.bf16.msra.mxu0 %v4958_v29  ;;  %v554_v44 = vld [vmem:[#allocation8 + $0x520] sm:$0xff] }
  0x66   :  { %3546 = vmatpush1.bf16.msra.mxu1 %v5086_v30  ;;  %3506 = vmatprep.subr.bf16.mxu0 %v4951_v31  ;;  %v414_v47 = vld [vmem:[#allocation8 + $0xc0] sm:$0xff]  ;;  %v5063_v52 = vcombine.high %v550_v43, %v554_v44  ;;  %v5062_v54 = vcombine.low %v550_v43, %v554_v44 }
  0x67   :  { %3547 = vmatprep.subr.bf16.mxu1 %v5079_v32  ;;  %v418_v48 = vld [vmem:[#allocation8 + $0xe0] sm:$0xff] }
  0x68   :  { %v542_v49 = vld [vmem:[#allocation8 + $0x4c0] sm:$0xff]  ;;  %v4927_v59 = vcombine.high %v414_v47, %v418_v48  ;;  %v4926_v61 = vcombine.low %v414_v47, %v418_v48 }
  0x69   :  { %3507 = vmatpush1.bf16.msra.mxu0 %v4950_v37  ;;  %v546_v50 = vld [vmem:[#allocation8 + $0x4e0] sm:$0xff] }
  0x6a   :  { %3548 = vmatpush1.bf16.msra.mxu1 %v5078_v38  ;;  %3508 = vmatprep.subr.bf16.mxu0 %v4943_v39  ;;  %v406_v55 = vld [vmem:[#allocation8 + $0x80] sm:$0xff]  ;;  %v5055_v60 = vcombine.high %v542_v49, %v546_v50  ;;  %v5054_v62 = vcombine.low %v542_v49, %v546_v50 }
  0x6b   :  { %3549 = vmatprep.subr.bf16.mxu1 %v5071_v40  ;;  %v410_v56 = vld [vmem:[#allocation8 + $0xa0] sm:$0xff] }
  0x6c   :  { %v534_v57 = vld [vmem:[#allocation8 + $0x480] sm:$0xff]  ;;  %v4919_v3 = vcombine.high %v406_v55, %v410_v56  ;;  %v4918_v5 = vcombine.low %v406_v55, %v410_v56 }
  0x6d   :  { %3509 = vmatpush1.bf16.msra.mxu0 %v4942_v45  ;;  %v538_v58 = vld [vmem:[#allocation8 + $0x4a0] sm:$0xff] }
  0x6e   :  { %3550 = vmatpush1.bf16.msra.mxu1 %v5070_v46  ;;  %3510 = vmatprep.subr.bf16.mxu0 %v4935_v51  ;;  %v398_v63 = vld [vmem:[#allocation8 + $0x40] sm:$0xff]  ;;  %v5047_v4 = vcombine.high %v534_v57, %v538_v58  ;;  %v5046_v6 = vcombine.low %v534_v57, %v538_v58 }
  0x6f   :  { %3551 = vmatprep.subr.bf16.mxu1 %v5063_v52  ;;  %v402_v0 = vld [vmem:[#allocation8 + $0x60] sm:$0xff] }
  0x70   :  { %v526_v1 = vld [vmem:[#allocation8 + $0x440] sm:$0xff]  ;;  %v4911_v11 = vcombine.high %v398_v63, %v402_v0  ;;  %v4910_v13 = vcombine.low %v398_v63, %v402_v0 }
  0x71   :  { %3511 = vmatpush1.bf16.msra.mxu0 %v4934_v53  ;;  %v530_v2 = vld [vmem:[#allocation8 + $0x460] sm:$0xff] }
  0x72   :  { %3552 = vmatpush1.bf16.msra.mxu1 %v5062_v54  ;;  %3512 = vmatprep.subr.bf16.mxu0 %v4927_v59  ;;  %v390_v7 = vld [vmem:[#allocation8] sm:$0xff]  ;;  %v5039_v12 = vcombine.high %v526_v1, %v530_v2  ;;  %v5038_v14 = vcombine.low %v526_v1, %v530_v2 }
  0x73   :  { %3553 = vmatprep.subr.bf16.mxu1 %v5055_v60  ;;  %v394_v8 = vld [vmem:[#allocation8 + $0x20] sm:$0xff] }
  0x74   :  { %v518_v9 = vld [vmem:[#allocation8 + $0x400] sm:$0xff]  ;;  %v4903_v19 = vcombine.high %v390_v7, %v394_v8  ;;  %v4902_v21 = vcombine.low %v390_v7, %v394_v8 }
  0x75   :  { %3513 = vmatpush1.bf16.msra.mxu0 %v4926_v61  ;;  %v522_v10 = vld [vmem:[#allocation8 + $0x420] sm:$0xff] }
  0x76   :  { %3554 = vmatpush1.bf16.msra.mxu1 %v5054_v62  ;;  %3514 = vmatprep.subr.bf16.mxu0 %v4919_v3  ;;  %v510_v15 = vld [vmem:[#allocation8 + $0x3c0] sm:$0xff]  ;;  %v5031_v20 = vcombine.high %v518_v9, %v522_v10  ;;  %v5030_v22 = vcombine.low %v518_v9, %v522_v10 }
  0x77   :  { %3555 = vmatprep.subr.bf16.mxu1 %v5047_v4  ;;  %v514_v16 = vld [vmem:[#allocation8 + $0x3e0] sm:$0xff] }
  0x78   :  { %v638_v17 = vld [vmem:[#allocation8 + $0x7c0] sm:$0xff]  ;;  %v5023_v27 = vcombine.high %v510_v15, %v514_v16  ;;  %v5022_v29 = vcombine.low %v510_v15, %v514_v16 }
  0x79   :  { %3515 = vmatpush1.bf16.msra.mxu0 %v4918_v5  ;;  %v642_v18 = vld [vmem:[#allocation8 + $0x7e0] sm:$0xff] }
  0x7a   :  { %3556 = vmatpush1.bf16.msra.mxu1 %v5046_v6  ;;  %3516 = vmatprep.subr.bf16.mxu0 %v4911_v11  ;;  %v502_v23 = vld [vmem:[#allocation8 + $0x380] sm:$0xff]  ;;  %v5151_v28 = vcombine.high %v638_v17, %v642_v18  ;;  %v5150_v30 = vcombine.low %v638_v17, %v642_v18 }
  0x7b   :  { %3557 = vmatprep.subr.bf16.mxu1 %v5039_v12  ;;  %v506_v24 = vld [vmem:[#allocation8 + $0x3a0] sm:$0xff] }
  0x7c   :  { %v630_v25 = vld [vmem:[#allocation8 + $0x780] sm:$0xff]  ;;  %v5015_v35 = vcombine.high %v502_v23, %v506_v24  ;;  %v5014_v37 = vcombine.low %v502_v23, %v506_v24 }
  0x7d   :  { %3517 = vmatpush1.bf16.msra.mxu0 %v4910_v13  ;;  %v634_v26 = vld [vmem:[#allocation8 + $0x7a0] sm:$0xff] }
  0x7e   :  { %3558 = vmatpush1.bf16.msra.mxu1 %v5038_v14  ;;  %3518 = vmatprep.subr.bf16.mxu0 %v4903_v19  ;;  %v494_v31 = vld [vmem:[#allocation8 + $0x340] sm:$0xff]  ;;  %v5143_v36 = vcombine.high %v630_v25, %v634_v26  ;;  %v5142_v38 = vcombine.low %v630_v25, %v634_v26 }
  0x7f   :  { %3559 = vmatprep.subr.bf16.mxu1 %v5031_v20  ;;  %v498_v32 = vld [vmem:[#allocation8 + $0x360] sm:$0xff] }
  0x80   :  { %v622_v33 = vld [vmem:[#allocation8 + $0x740] sm:$0xff]  ;;  %v5007_v43 = vcombine.high %v494_v31, %v498_v32  ;;  %v5006_v45 = vcombine.low %v494_v31, %v498_v32  ;;  %v5929_v31 = vld [vmem:[#allocation7] sm:$0xff] }
  0x81   :  { %3519 = vmatpush1.bf16.msra.mxu0 %v4902_v21  ;;  %v626_v34 = vld [vmem:[#allocation8 + $0x760] sm:$0xff] }
  0x82   :  { %3560 = vmatpush1.bf16.msra.mxu1 %v5030_v22  ;;  %3520 = vmatprep.subr.bf16.mxu0 %v5023_v27  ;;  %v486_v39 = vld [vmem:[#allocation8 + $0x300] sm:$0xff]  ;;  %v5135_v44 = vcombine.high %v622_v33, %v626_v34  ;;  %v5134_v46 = vcombine.low %v622_v33, %v626_v34  ;;  %v121_v27 = vlaneseq }
  0x83   :  { %3561 = vmatprep.subr.bf16.mxu1 %v5151_v28  ;;  %v490_v40 = vld [vmem:[#allocation8 + $0x320] sm:$0xff] }
  0x84   :  { %v614_v41 = vld [vmem:[#allocation8 + $0x700] sm:$0xff]  ;;  %v4999_v51 = vcombine.high %v486_v39, %v490_v40  ;;  %v4998_v53 = vcombine.low %v486_v39, %v490_v40  ;;  %v5925_v28 = vshrl.u32 %v121_v27, 7 }
  0x85   :  { %3521 = vmatpush2.bf16.msra.mxu0 %v5022_v29  ;;  %v618_v42 = vld [vmem:[#allocation8 + $0x720] sm:$0xff] }
  0x86   :  { %3562 = vmatpush2.bf16.msra.mxu1 %v5150_v30  ;;  %3522 = vmatprep.subr.bf16.mxu0 %v5015_v35  ;;  %v478_v47 = vld [vmem:[#allocation8 + $0x2c0] sm:$0xff]  ;;  %v5127_v52 = vcombine.high %v614_v41, %v618_v42  ;;  %v5126_v54 = vcombine.low %v614_v41, %v618_v42  ;;  %v123_v29 = vsub.s32 0, %v5925_v28  ;;  %v131_v30 = vsub.s32 2, %v5925_v28 }
  0x87   :  { %3563 = vmatprep.subr.bf16.mxu1 %v5143_v36  ;;  %v482_v48 = vld [vmem:[#allocation8 + $0x2e0] sm:$0xff]  ;;  %v127_v32 = vsub.s32 1, %v5925_v28  ;;  %v135_v33 = vsub.s32 3, %v5925_v28 }
  0x88   :  { %v606_v49 = vld [vmem:[#allocation8 + $0x6c0] sm:$0xff]  ;;  %v4991_v59 = vcombine.high %v478_v47, %v482_v48  ;;  %v4990_v61 = vcombine.low %v478_v47, %v482_v48  ;;  %v124_v34 = vrot.slane %v5929_v31, %v123_v29  ;;  %v132_v35 = vrot.slane %v5929_v31, %v131_v30 }
  0x89   :  { %3523 = vmatpush2.bf16.msra.mxu0 %v5014_v37  ;;  %v610_v50 = vld [vmem:[#allocation8 + $0x6e0] sm:$0xff]  ;;  %v128_v36 = vrot.slane %v5929_v31, %v127_v32  ;;  %v136_v37 = vrot.slane %v5929_v31, %v135_v33  ;;  %v151_v48 = vsub.s32 7, %v5925_v28 }
  0x8a   :  { %3564 = vmatpush2.bf16.msra.mxu1 %v5142_v38  ;;  %3524 = vmatprep.subr.bf16.mxu0 %v5007_v43  ;;  %v470_v55 = vld [vmem:[#allocation8 + $0x280] sm:$0xff]  ;;  %v5119_v60 = vcombine.high %v606_v49, %v610_v50  ;;  %v5118_v62 = vcombine.low %v606_v49, %v610_v50 }
  0x8b   :  { %3565 = vmatprep.subr.bf16.mxu1 %v5135_v44  ;;  %v474_v56 = vld [vmem:[#allocation8 + $0x2a0] sm:$0xff]  ;;  %v143_v44 = vsub.s32 5, %v5925_v28 }
  0x8c   :  { %v598_v57 = vld [vmem:[#allocation8 + $0x680] sm:$0xff]  ;;  %v4983_v63 = vcombine.high %v470_v55, %v474_v56  ;;  %v4982_v1 = vcombine.low %v470_v55, %v474_v56 }
  0x8d   :  { %3525 = vmatpush2.bf16.msra.mxu0 %v5006_v45  ;;  %v602_v58 = vld [vmem:[#allocation8 + $0x6a0] sm:$0xff] }
  0x8e   :  { %3566 = vmatpush2.bf16.msra.mxu1 %v5134_v46  ;;  %3526 = vmatprep.subr.bf16.mxu0 %v4999_v51  ;;  %v5111_v0 = vcombine.high %v598_v57, %v602_v58  ;;  %v5110_v2 = vcombine.low %v598_v57, %v602_v58  ;;  %v462_v3 = vld [vmem:[#allocation8 + $0x240] sm:$0xff] }
  0x8f   :  { %3567 = vmatprep.subr.bf16.mxu1 %v5127_v52  ;;  %v466_v4 = vld [vmem:[#allocation8 + $0x260] sm:$0xff] }
  0x90   :  { %v590_v5 = vld [vmem:[#allocation8 + $0x640] sm:$0xff]  ;;  %v4975_v6 = vcombine.high %v462_v3, %v466_v4  ;;  %v4974_v8 = vcombine.low %v462_v3, %v466_v4 }
  0x91   :  { %3527 = vmatpush2.bf16.msra.mxu0 %v4998_v53  ;;  %v594_v7 = vld [vmem:[#allocation8 + $0x660] sm:$0xff] }
  0x92   :  { %3568 = vmatpush2.bf16.msra.mxu1 %v5126_v54  ;;  %3528 = vmatprep.subr.bf16.mxu0 %v4991_v59  ;;  %v5102_v9 = vcombine.low %v590_v5, %v594_v7  ;;  %v5103_v10 = vcombine.high %v590_v5, %v594_v7  ;;  %v454_v11 = vld [vmem:[#allocation8 + $0x200] sm:$0xff] }
  0x93   :  { %3569 = vmatprep.subr.bf16.mxu1 %v5119_v60  ;;  %v458_v12 = vld [vmem:[#allocation8 + $0x220] sm:$0xff] }
  0x94   :  { %v582_v13 = vld [vmem:[#allocation8 + $0x600] sm:$0xff]  ;;  %v4967_v14 = vcombine.high %v454_v11, %v458_v12  ;;  %v4966_v16 = vcombine.low %v454_v11, %v458_v12 }
  0x95   :  { %3529 = vmatpush2.bf16.msra.mxu0 %v4990_v61  ;;  %v586_v15 = vld [vmem:[#allocation8 + $0x620] sm:$0xff] }
  0x96   :  { %3570 = vmatpush2.bf16.msra.mxu1 %v5118_v62  ;;  %3530 = vmatprep.subr.bf16.mxu0 %v4983_v63  ;;  %v5094_v17 = vcombine.low %v582_v13, %v586_v15  ;;  %v5095_v18 = vcombine.high %v582_v13, %v586_v15  ;;  %v5913_v19 = vld [vmem:[#allocation8 + $0x9c0] sm:$0xff]  ;;  %v144_v63 = vrot.slane %v5929_v31, %v143_v44 }
  0x97   :  { %3571 = vmatprep.subr.bf16.mxu1 %v5111_v0  ;;  %v5915_v20 = vld [vmem:[#allocation8 + $0x9e0] sm:$0xff]  ;;  %v152_v0 = vrot.slane %v5929_v31, %v151_v48 }
  0x98   :  { %v5917_v21 = vld [vmem:[#allocation8 + $0xdc0] sm:$0xff]  ;;  %v5215_v22 = vcombine.high %v5913_v19, %v5915_v20  ;;  %v5214_v24 = vcombine.low %v5913_v19, %v5915_v20 }
  0x99   :  { %3531 = vmatpush2.bf16.msra.mxu0 %v4982_v1  ;;  %v834_v23 = vld [vmem:[#allocation8 + $0xde0] sm:$0xff] }
  0x9a   :  { %3572 = vmatpush2.bf16.msra.mxu1 %v5110_v2  ;;  %3532 = vmatprep.subr.bf16.mxu0 %v4975_v6  ;;  %v5342_v25 = vcombine.low %v5917_v21, %v834_v23  ;;  %v5343_v26 = vcombine.high %v5917_v21, %v834_v23  ;;  %v694_v52 = vld [vmem:[#allocation8 + $0x980] sm:$0xff] }
  0x9b   :  { %3573 = vmatprep.subr.bf16.mxu1 %v5103_v10  ;;  %v698_v55 = vld [vmem:[#allocation8 + $0x9a0] sm:$0xff] }
  0x9c   :  { %v822_v56 = vld [vmem:[#allocation8 + $0xd80] sm:$0xff]  ;;  %v5207_v2 = vcombine.high %v694_v52, %v698_v55  ;;  %v5206_v10 = vcombine.low %v694_v52, %v698_v55 }
  0x9d   :  { %3533 = vmatpush2.bf16.msra.mxu0 %v4974_v8  ;;  %v826_v57 = vld [vmem:[#allocation8 + $0xda0] sm:$0xff] }
  0x9e   :  { %3574 = vmatpush2.bf16.msra.mxu1 %v5102_v9  ;;  %3534 = vmatprep.subr.bf16.mxu0 %v4967_v14  ;;  %v5335_v3 = vcombine.high %v822_v56, %v826_v57  ;;  %v686_v4 = vld [vmem:[#allocation8 + $0x940] sm:$0xff]  ;;  %v5334_v13 = vcombine.low %v822_v56, %v826_v57 }
  0x9f   :  { %3575 = vmatprep.subr.bf16.mxu1 %v5095_v18  ;;  %v690_v7 = vld [vmem:[#allocation8 + $0x960] sm:$0xff] }
  0xa0   :  { %v814_v8 = vld [vmem:[#allocation8 + $0xd40] sm:$0xff] }
  0xa1   :  { %3535 = vmatpush2.bf16.msra.mxu0 %v4966_v16  ;;  %v818_v9 = vld [vmem:[#allocation8 + $0xd60] sm:$0xff]  ;;  %v5199_v16 = vcombine.high %v686_v4, %v690_v7 }
  0xa2   :  { %3576 = vmatpush2.bf16.msra.mxu1 %v5094_v17  ;;  %3586 = vmatprep.subr.bf16.mxu0 %v5215_v22  ;;  %v5327_v17 = vcombine.high %v814_v8, %v818_v9  ;;  %v678_v18 = vld [vmem:[#allocation8 + $0x900] sm:$0xff] }
  0xa3   :  { %3627 = vmatprep.subr.bf16.mxu1 %v5343_v26  ;;  %v682_v21 = vld [vmem:[#allocation8 + $0x920] sm:$0xff] }
  0xa4   :  { %v806_v22 = vld [vmem:[#allocation8 + $0xd00] sm:$0xff] }
  0xa5   :  { %v810_v23 = vld [vmem:[#allocation8 + $0xd20] sm:$0xff] }
  0xa6   :  { %v790_v52 = vld [vmem:[#allocation8 + $0xc80] sm:$0xff] }
 0x11c   :  { %v244_v38 = vpop.f32.mrf.mxu0 }
 0x11d   :  { %v285_v39 = vpop.f32.mrf.mxu1  ;;  %v245_v40 = vadd.f32 %v244_v38, %v124_v34  ;;  %v5198_v34 = vcombine.low %v686_v4, %v690_v7  ;;  %v5191_v38 = vcombine.high %v678_v18, %v682_v21 }
 0x11e   :  { %v286_v41 = vadd.f32 %v285_v39, %v132_v35  ;;  %v246_v42 = vpop.f32.mrf.mxu0  ;;  %v5319_v39 = vcombine.high %v806_v22, %v810_v23 }
 0x11f   :  { %v287_v43 = vpop.f32.mrf.mxu1  ;;  %v247_v46 = vadd.f32 %v246_v42, %v128_v36  ;;  %v374_v49 = vmax.f32 %v245_v40, 0.0  ;;  %v670_v40 = vld [vmem:[#allocation8 + $0x8c0] sm:$0xff] }
 0x120   :  { %v376_v45 = vmax.f32 %v286_v41, 0.0  ;;  %v288_v47 = vadd.f32 %v287_v43, %v136_v37  ;;  %v248_v50 = vpop.f32.mrf.mxu0  ;;  %v674_v41 = vld [vmem:[#allocation8 + $0x8e0] sm:$0xff] }
 0x121   :  { %v289_v51 = vpop.f32.mrf.mxu1  ;;  %v375_v53 = vmax.f32 %v247_v46, 0.0  ;;  %v5959_v1 = vpack.c.bf16 %v374_v49, %v374_v49  ;;  %v798_v42 = vld [vmem:[#allocation8 + $0xcc0] sm:$0xff]  ;;  %v5318_v46 = vcombine.low %v806_v22, %v810_v23 }
 0x122   :  { %v377_v54 = vmax.f32 %v288_v47, 0.0  ;;  %v5947_v58 = vpack.c.bf16 %v376_v45, %v376_v45  ;;  %v249_v59 = vpop.f32.mrf.mxu0  ;;  %v802_v43 = vld [vmem:[#allocation8 + $0xce0] sm:$0xff]  ;;  %v5190_v45 = vcombine.low %v678_v18, %v682_v21  ;;  %v5183_v47 = vcombine.high %v670_v40, %v674_v41 }
 0x123   :  { %v290_v60 = vpop.f32.mrf.mxu1  ;;  %v5949_v61 = vpack.c.bf16 %v375_v53, %v375_v53  ;;  %v5311_v49 = vcombine.high %v798_v42, %v802_v43  ;;  %v662_v50 = vld [vmem:[#allocation8 + $0x880] sm:$0xff]  ;;  %v5310_v55 = vcombine.low %v798_v42, %v802_v43 }
 0x124   :  { %v5951_v62 = vpack.c.bf16 %v377_v54, %v377_v54  ;;  %v5961_v5 = vpop.f32.mrf.mxu0  ;;  %v666_v51 = vld [vmem:[#allocation8 + $0x8a0] sm:$0xff]  ;;  %v5182_v54 = vcombine.low %v670_v40, %v674_v41 }
 0x125   :  { %v5963_v6 = vpop.f32.mrf.mxu1  ;;  %3536 = vmatprep.mubr.bf16.mxu0 %v5949_v61  ;;  %v794_v53 = vld [vmem:[#allocation8 + $0xca0] sm:$0xff]  ;;  %v5175_v56 = vcombine.high %v662_v50, %v666_v51 }
 0x126   :  { %3577 = vmatprep.mubr.bf16.mxu1 %v5951_v62  ;;  %3537 = vmatmul.mubr.bf16.vlgmr.msra.gmra.mxu0 %v5959_v1  ;;  %v328_v11 = vpop.f32.mrf.mxu0  ;;  %v5303_v57 = vcombine.high %v790_v52, %v794_v53  ;;  %v654_v59 = vld [vmem:[#allocation8 + $0x840] sm:$0xff] }
 0x127   :  { %3578 = vmatmul.mubr.bf16.vlgmr.msra.gmra.mxu1 %v5947_v58  ;;  %v369_v12 = vpop.f32.mrf.mxu1  ;;  %3587 = vmatpush1.bf16.msra.mxu0 %v5214_v24  ;;  %v329_v14 = vadd.f32 %v328_v11, %v144_v63  ;;  %v5326_v24 = vcombine.low %v814_v8, %v818_v9  ;;  %v658_v60 = vld [vmem:[#allocation8 + $0x860] sm:$0xff] }
 0x128   :  { %3628 = vmatpush1.bf16.msra.mxu1 %v5342_v25  ;;  %v370_v15 = vadd.f32 %v369_v12, %v152_v0  ;;  %3588 = vmatprep.subr.bf16.mxu0 %v5207_v2  ;;  %v330_v19 = vpop.f32.mrf.mxu0  ;;  %v782_v63 = vld [vmem:[#allocation8 + $0xc40] sm:$0xff]  ;;  %v5174_v2 = vcombine.low %v662_v50, %v666_v51  ;;  %v5167_v4 = vcombine.high %v654_v59, %v658_v60 }
 0x129   :  { %3629 = vmatprep.subr.bf16.mxu1 %v5335_v3  ;;  %v371_v20 = vpop.f32.mrf.mxu1  ;;  %v379_v26 = vmax.f32 %v329_v14, 0.0  ;;  %v786_v0 = vld [vmem:[#allocation8 + $0xc60] sm:$0xff]  ;;  %v5302_v3 = vcombine.low %v790_v52, %v794_v53  ;;  %v5166_v12 = vcombine.low %v654_v59, %v658_v60 }
 0x12a   :  { %v381_v27 = vmax.f32 %v370_v15, 0.0  ;;  %v331_v35 = vpop.f32.mrf.mxu0  ;;  %v5295_v7 = vcombine.high %v782_v63, %v786_v0  ;;  %v646_v8 = vld [vmem:[#allocation8 + $0x800] sm:$0xff] }
 0x12b   :  { %v372_v36 = vpop.f32.mrf.mxu1  ;;  %3589 = vmatpush1.bf16.msra.mxu0 %v5206_v10  ;;  %v5969_v25 = vpack.c.bf16 %v379_v26, %v379_v26  ;;  %v650_v9 = vld [vmem:[#allocation8 + $0x820] sm:$0xff] }
 0x12c   :  { %3630 = vmatpush1.bf16.msra.mxu1 %v5334_v13  ;;  %v5971_v37 = vpack.c.bf16 %v381_v27, %v381_v27  ;;  %3590 = vmatprep.subr.bf16.mxu0 %v5199_v16  ;;  %v774_v10 = vld [vmem:[#allocation8 + $0xc00] sm:$0xff]  ;;  %v5294_v13 = vcombine.low %v782_v63, %v786_v0  ;;  %v5159_v14 = vcombine.high %v646_v8, %v650_v9 }
 0x12d   :  { %3631 = vmatprep.subr.bf16.mxu1 %v5327_v17  ;;  %3618 = vmatprep.mubr.bf16.mxu0 %v5969_v25  ;;  %v778_v11 = vld [vmem:[#allocation8 + $0xc20] sm:$0xff]  ;;  %v5158_v20 = vcombine.low %v646_v8, %v650_v9 }
 0x12e   :  { %3659 = vmatprep.mubr.bf16.mxu1 %v5971_v37  ;;  %v5287_v15 = vcombine.high %v774_v10, %v778_v11  ;;  %v766_v16 = vld [vmem:[#allocation8 + $0xbc0] sm:$0xff]  ;;  %v5286_v21 = vcombine.low %v774_v10, %v778_v11 }
 0x12f   :  { %3591 = vmatpush1.bf16.msra.mxu0 %v5198_v34  ;;  %v770_v17 = vld [vmem:[#allocation8 + $0xbe0] sm:$0xff] }
 0x130   :  { %3632 = vmatpush1.bf16.msra.mxu1 %v5326_v24  ;;  %3592 = vmatprep.subr.bf16.mxu0 %v5191_v38  ;;  %v894_v18 = vld [vmem:[#allocation8 + $0xfc0] sm:$0xff]  ;;  %v5279_v22 = vcombine.high %v766_v16, %v770_v17  ;;  %v5278_v36 = vcombine.low %v766_v16, %v770_v17 }
 0x131   :  { %3633 = vmatprep.subr.bf16.mxu1 %v5319_v39  ;;  %v898_v19 = vld [vmem:[#allocation8 + $0xfe0] sm:$0xff] }
 0x132   :  { %v5407_v23 = vcombine.high %v894_v18, %v898_v19  ;;  %v758_v26 = vld [vmem:[#allocation8 + $0xb80] sm:$0xff]  ;;  %v5406_v24 = vcombine.low %v894_v18, %v898_v19 }
 0x133   :  { %3593 = vmatpush1.bf16.msra.mxu0 %v5190_v45  ;;  %v762_v27 = vld [vmem:[#allocation8 + $0xba0] sm:$0xff] }
 0x134   :  { %3634 = vmatpush1.bf16.msra.mxu1 %v5318_v46  ;;  %3594 = vmatprep.subr.bf16.mxu0 %v5183_v47  ;;  %v886_v34 = vld [vmem:[#allocation8 + $0xf80] sm:$0xff]  ;;  %v5271_v38 = vcombine.high %v758_v26, %v762_v27  ;;  %v5270_v45 = vcombine.low %v758_v26, %v762_v27 }
 0x135   :  { %3635 = vmatprep.subr.bf16.mxu1 %v5311_v49  ;;  %v890_v35 = vld [vmem:[#allocation8 + $0xfa0] sm:$0xff] }
 0x136   :  { %v5399_v39 = vcombine.high %v886_v34, %v890_v35  ;;  %v750_v40 = vld [vmem:[#allocation8 + $0xb40] sm:$0xff]  ;;  %v5398_v46 = vcombine.low %v886_v34, %v890_v35 }
 0x137   :  { %3595 = vmatpush1.bf16.msra.mxu0 %v5182_v54  ;;  %v754_v41 = vld [vmem:[#allocation8 + $0xb60] sm:$0xff] }
 0x138   :  { %3636 = vmatpush1.bf16.msra.mxu1 %v5310_v55  ;;  %3596 = vmatprep.subr.bf16.mxu0 %v5175_v56  ;;  %v878_v42 = vld [vmem:[#allocation8 + $0xf40] sm:$0xff]  ;;  %v5263_v47 = vcombine.high %v750_v40, %v754_v41  ;;  %v5262_v54 = vcombine.low %v750_v40, %v754_v41 }
 0x139   :  { %3637 = vmatprep.subr.bf16.mxu1 %v5303_v57  ;;  %v882_v43 = vld [vmem:[#allocation8 + $0xf60] sm:$0xff] }
 0x13a   :  { %v5391_v49 = vcombine.high %v878_v42, %v882_v43  ;;  %v742_v50 = vld [vmem:[#allocation8 + $0xb00] sm:$0xff]  ;;  %v5390_v55 = vcombine.low %v878_v42, %v882_v43 }
 0x13b   :  { %3597 = vmatpush1.bf16.msra.mxu0 %v5174_v2  ;;  %v746_v51 = vld [vmem:[#allocation8 + $0xb20] sm:$0xff] }
 0x13c   :  { %3638 = vmatpush1.bf16.msra.mxu1 %v5302_v3  ;;  %3598 = vmatprep.subr.bf16.mxu0 %v5167_v4  ;;  %v870_v52 = vld [vmem:[#allocation8 + $0xf00] sm:$0xff]  ;;  %v5255_v56 = vcombine.high %v742_v50, %v746_v51  ;;  %v5254_v2 = vcombine.low %v742_v50, %v746_v51  ;;  %v579_v50 = vld [vmem:[#allocation8 + $0x5e8] sm:$0xff] }
 0x13d   :  { %3639 = vmatprep.subr.bf16.mxu1 %v5295_v7  ;;  %v874_v53 = vld [vmem:[#allocation8 + $0xf20] sm:$0xff] }
 0x13e   :  { %v5383_v57 = vcombine.high %v870_v52, %v874_v53  ;;  %v734_v59 = vld [vmem:[#allocation8 + $0xac0] sm:$0xff]  ;;  %v5382_v3 = vcombine.low %v870_v52, %v874_v53 }
 0x13f   :  { %3599 = vmatpush1.bf16.msra.mxu0 %v5166_v12  ;;  %v738_v60 = vld [vmem:[#allocation8 + $0xae0] sm:$0xff]  ;;  %v147_v12 = vsub.s32 6, %v5925_v28 }
 0x140   :  { %3640 = vmatpush1.bf16.msra.mxu1 %v5294_v13  ;;  %3600 = vmatprep.subr.bf16.mxu0 %v5159_v14  ;;  %v862_v63 = vld [vmem:[#allocation8 + $0xec0] sm:$0xff]  ;;  %v5247_v4 = vcombine.high %v734_v59, %v738_v60  ;;  %v5246_v13 = vcombine.low %v734_v59, %v738_v60  ;;  %v567_v59 = vld [vmem:[#allocation8 + $0x588] sm:$0xff] }
 0x141   :  { %3641 = vmatprep.subr.bf16.mxu1 %v5287_v15  ;;  %v866_v0 = vld [vmem:[#allocation8 + $0xee0] sm:$0xff]  ;;  %v139_v15 = vsub.s32 4, %v5925_v28  ;;  %v571_v60 = vld [vmem:[#allocation8 + $0x5a8] sm:$0xff] }
 0x142   :  { %v5375_v7 = vcombine.high %v862_v63, %v866_v0  ;;  %v726_v8 = vld [vmem:[#allocation8 + $0xa80] sm:$0xff]  ;;  %v5374_v14 = vcombine.low %v862_v63, %v866_v0 }
 0x143   :  { %3601 = vmatpush1.bf16.msra.mxu0 %v5158_v20  ;;  %v730_v9 = vld [vmem:[#allocation8 + $0xaa0] sm:$0xff]  ;;  %v140_v27 = vrot.slane %v5929_v31, %v139_v15 }
 0x144   :  { %3642 = vmatpush1.bf16.msra.mxu1 %v5286_v21  ;;  %3602 = vmatprep.subr.bf16.mxu0 %v5279_v22  ;;  %v854_v10 = vld [vmem:[#allocation8 + $0xe80] sm:$0xff]  ;;  %v5239_v16 = vcombine.high %v726_v8, %v730_v9  ;;  %v148_v22 = vrot.slane %v5929_v31, %v147_v12 }
 0x145   :  { %3643 = vmatprep.subr.bf16.mxu1 %v5407_v23  ;;  %v858_v11 = vld [vmem:[#allocation8 + $0xea0] sm:$0xff]  ;;  %v5238_v23 = vcombine.low %v726_v8, %v730_v9  ;;  %v327_v43 = vadd.f32 %v5961_v5, %v140_v27  ;;  %v435_v8 = vld [vmem:[#allocation8 + $0x168] sm:$0xff] }
 0x146   :  { %v5367_v17 = vcombine.high %v854_v10, %v858_v11  ;;  %v718_v18 = vld [vmem:[#allocation8 + $0xa40] sm:$0xff]  ;;  %v5366_v26 = vcombine.low %v854_v10, %v858_v11  ;;  %v368_v40 = vadd.f32 %v5963_v6, %v148_v22  ;;  %v559_v9 = vld [vmem:[#allocation8 + $0x548] sm:$0xff] }
 0x147   :  { %3603 = vmatpush2.bf16.msra.mxu0 %v5278_v36  ;;  %v722_v19 = vld [vmem:[#allocation8 + $0xa60] sm:$0xff]  ;;  %v378_v6 = vmax.f32 %v327_v43, 0.0  ;;  %v563_v10 = vld [vmem:[#allocation8 + $0x568] sm:$0xff] }
 0x148   :  { %3644 = vmatpush2.bf16.msra.mxu1 %v5406_v24  ;;  %3604 = vmatprep.subr.bf16.mxu0 %v5271_v38  ;;  %v846_v20 = vld [vmem:[#allocation8 + $0xe40] sm:$0xff]  ;;  %v5231_v34 = vcombine.high %v718_v18, %v722_v19  ;;  %v5230_v41 = vcombine.low %v718_v18, %v722_v19  ;;  %v380_v51 = vmax.f32 %v368_v40, 0.0  ;;  %v427_v18 = vld [vmem:[#allocation8 + $0x128] sm:$0xff]  ;;  %v5072_v22 = vcombine.low %v559_v9, %v563_v10 }
 0x149   :  { %3645 = vmatprep.subr.bf16.mxu1 %v5399_v39  ;;  %v850_v21 = vld [vmem:[#allocation8 + $0xe60] sm:$0xff]  ;;  %v5987_v0 = vpack.c.bf16 %v378_v6, %v378_v6  ;;  %v551_v19 = vld [vmem:[#allocation8 + $0x508] sm:$0xff] }
 0x14a   :  { %v5359_v35 = vcombine.high %v846_v20, %v850_v21  ;;  %v710_v36 = vld [vmem:[#allocation8 + $0xa00] sm:$0xff]  ;;  %v5358_v42 = vcombine.low %v846_v20, %v850_v21  ;;  %v5985_v5 = vpack.c.bf16 %v380_v51, %v380_v51  ;;  %v555_v20 = vld [vmem:[#allocation8 + $0x528] sm:$0xff] }
 0x14b   :  { %3605 = vmatpush2.bf16.msra.mxu0 %v5270_v45  ;;  %v714_v24 = vld [vmem:[#allocation8 + $0xa20] sm:$0xff]  ;;  %v415_v27 = vld [vmem:[#allocation8 + $0xc8] sm:$0xff] }
 0x14c   :  { %3646 = vmatpush2.bf16.msra.mxu1 %v5398_v46  ;;  %3606 = vmatprep.subr.bf16.mxu0 %v5263_v47  ;;  %v838_v38 = vld [vmem:[#allocation8 + $0xe00] sm:$0xff]  ;;  %v5223_v45 = vcombine.high %v710_v36, %v714_v24  ;;  %v447_v46 = vld [vmem:[#allocation8 + $0x1c8] sm:$0xff]  ;;  %v5222_v52 = vcombine.low %v710_v36, %v714_v24 }
 0x14d   :  { %3647 = vmatprep.subr.bf16.mxu1 %v5391_v49  ;;  %v842_v39 = vld [vmem:[#allocation8 + $0xe20] sm:$0xff]  ;;  %v451_v47 = vld [vmem:[#allocation8 + $0x1e8] sm:$0xff] }
 0x14e   :  { %v5351_v31 = vcombine.high %v838_v38, %v842_v39  ;;  %v575_v49 = vld [vmem:[#allocation8 + $0x5c8] sm:$0xff]  ;;  %v5350_v53 = vcombine.low %v838_v38, %v842_v39  ;;  %v4960_v63 = vcombine.low %v447_v46, %v451_v47  ;;  %v5064_v38 = vcombine.low %v551_v19, %v555_v20 }
 0x14f   :  { %3607 = vmatpush2.bf16.msra.mxu0 %v5262_v54  ;;  %v4961_v54 = vcombine.high %v447_v46, %v451_v47  ;;  %v547_v36 = vld [vmem:[#allocation8 + $0x4e8] sm:$0xff] }
 0x150   :  { %3648 = vmatpush2.bf16.msra.mxu1 %v5390_v55  ;;  %3608 = vmatprep.subr.bf16.mxu0 %v5255_v56  ;;  %v5089_v55 = vcombine.high %v575_v49, %v579_v50  ;;  %v439_v56 = vld [vmem:[#allocation8 + $0x188] sm:$0xff] }
 0x151   :  { %3649 = vmatprep.subr.bf16.mxu1 %v5383_v57  ;;  %v443_v57 = vld [vmem:[#allocation8 + $0x1a8] sm:$0xff] }
 0x152   :  { %v4952_v11 = vcombine.low %v439_v56, %v443_v57  ;;  %v535_v43 = vld [vmem:[#allocation8 + $0x488] sm:$0xff] }
 0x153   :  { %3609 = vmatpush2.bf16.msra.mxu0 %v5254_v2  ;;  %v5088_v2 = vcombine.low %v575_v49, %v579_v50  ;;  %v399_v50 = vld [vmem:[#allocation8 + $0x48] sm:$0xff] }
 0x154   :  { %3650 = vmatpush2.bf16.msra.mxu1 %v5382_v3  ;;  %3610 = vmatprep.subr.bf16.mxu0 %v5247_v4  ;;  %v4953_v3 = vcombine.high %v439_v56, %v443_v57  ;;  %v5081_v4 = vcombine.high %v567_v59, %v571_v60  ;;  %v403_v51 = vld [vmem:[#allocation8 + $0x68] sm:$0xff] }
 0x155   :  { %3651 = vmatprep.subr.bf16.mxu1 %v5375_v7  ;;  %v431_v7 = vld [vmem:[#allocation8 + $0x148] sm:$0xff] }
 0x156   :  { %v4944_v21 = vcombine.low %v431_v7, %v435_v8  ;;  %v391_v57 = vld [vmem:[#allocation8 + $0x8] sm:$0xff] }
 0x157   :  { %3611 = vmatpush2.bf16.msra.mxu0 %v5246_v13  ;;  %v5080_v13 = vcombine.low %v567_v59, %v571_v60  ;;  %v395_v59 = vld [vmem:[#allocation8 + $0x28] sm:$0xff] }
 0x158   :  { %3652 = vmatpush2.bf16.msra.mxu1 %v5374_v14  ;;  %3612 = vmatprep.subr.bf16.mxu0 %v5239_v16  ;;  %v4945_v14 = vcombine.high %v431_v7, %v435_v8  ;;  %v5073_v16 = vcombine.high %v559_v9, %v563_v10  ;;  %v519_v60 = vld [vmem:[#allocation8 + $0x408] sm:$0xff] }
 0x159   :  { %3653 = vmatprep.subr.bf16.mxu1 %v5367_v17  ;;  %v423_v17 = vld [vmem:[#allocation8 + $0x108] sm:$0xff] }
 0x15a   :  { %v4936_v24 = vcombine.low %v423_v17, %v427_v18  ;;  %v511_v8 = vld [vmem:[#allocation8 + $0x3c8] sm:$0xff] }
 0x15b   :  { %3613 = vmatpush2.bf16.msra.mxu0 %v5238_v23  ;;  %v4937_v23 = vcombine.high %v423_v17, %v427_v18  ;;  %v515_v9 = vld [vmem:[#allocation8 + $0x3e8] sm:$0xff] }
 0x15c   :  { %3654 = vmatpush2.bf16.msra.mxu1 %v5366_v26  ;;  %3614 = vmatprep.subr.bf16.mxu0 %v5231_v34  ;;  %v5065_v26 = vcombine.high %v551_v19, %v555_v20  ;;  %v419_v34 = vld [vmem:[#allocation8 + $0xe8] sm:$0xff] }
 0x15d   :  { %3655 = vmatprep.subr.bf16.mxu1 %v5359_v35  ;;  %v543_v35 = vld [vmem:[#allocation8 + $0x4c8] sm:$0xff]  ;;  %v4929_v39 = vcombine.high %v415_v27, %v419_v34 }
 0x15e   :  { %v5057_v40 = vcombine.high %v543_v35, %v547_v36  ;;  %v5056_v46 = vcombine.low %v543_v35, %v547_v36  ;;  %v639_v10 = vld [vmem:[#allocation8 + $0x7c8] sm:$0xff] }
 0x15f   :  { %3615 = vmatpush2.bf16.msra.mxu0 %v5230_v41  ;;  %v407_v41 = vld [vmem:[#allocation8 + $0x88] sm:$0xff] }
 0x160   :  { %3656 = vmatpush2.bf16.msra.mxu1 %v5358_v42  ;;  %3616 = vmatprep.subr.bf16.mxu0 %v5223_v45  ;;  %v411_v42 = vld [vmem:[#allocation8 + $0xa8] sm:$0xff] }
 0x161   :  { %3657 = vmatprep.subr.bf16.mxu1 %v5351_v31  ;;  %v539_v45 = vld [vmem:[#allocation8 + $0x4a8] sm:$0xff]  ;;  %v4928_v31 = vcombine.low %v415_v27, %v419_v34  ;;  %v4921_v47 = vcombine.high %v407_v41, %v411_v42  ;;  %v4920_v6 = vcombine.low %v407_v41, %v411_v42 }
 0x162   :  { %v5049_v49 = vcombine.high %v535_v43, %v539_v45  ;;  %v503_v18 = vld [vmem:[#allocation8 + $0x388] sm:$0xff] }
 0x163   :  { %3617 = vmatpush2.bf16.msra.mxu0 %v5222_v52  ;;  %v527_v52 = vld [vmem:[#allocation8 + $0x448] sm:$0xff] }
 0x164   :  { %3658 = vmatpush2.bf16.msra.mxu1 %v5350_v53  ;;  %3668 = vmatprep.subr.bf16.mxu0 %v4961_v54  ;;  %v531_v53 = vld [vmem:[#allocation8 + $0x468] sm:$0xff]  ;;  %v5048_v54 = vcombine.low %v535_v43, %v539_v45 }
 0x165   :  { %3709 = vmatprep.subr.bf16.mxu1 %v5089_v55  ;;  %v4913_v55 = vcombine.high %v399_v50, %v403_v51  ;;  %v5041_v56 = vcombine.high %v527_v52, %v531_v53  ;;  %v507_v19 = vld [vmem:[#allocation8 + $0x3a8] sm:$0xff] }
 0x166   :  { %3619 = vmatmul.mubr.bf16.vlgmr.msra.gmra.mxu0 %v5987_v0  ;;  %v631_v20 = vld [vmem:[#allocation8 + $0x788] sm:$0xff] }
 0x167   :  { %3660 = vmatmul.mubr.bf16.vlgmr.msra.gmra.mxu1 %v5985_v5  ;;  %3669 = vmatpush1.bf16.msra.mxu0 %v4960_v63  ;;  %v523_v63 = vld [vmem:[#allocation8 + $0x428] sm:$0xff] }
 0x168   :  { %3700 = vmatprep.mubr.bf16.mxu0 %v5949_v61  ;;  %3710 = vmatpush1.bf16.msra.mxu1 %v5088_v2  ;;  %v4912_v2 = vcombine.low %v399_v50, %v403_v51  ;;  %v5033_v7 = vcombine.high %v519_v60, %v523_v63  ;;  %v495_v34 = vld [vmem:[#allocation8 + $0x348] sm:$0xff] }
 0x169   :  { %3741 = vmatprep.mubr.bf16.mxu1 %v5951_v62  ;;  %3670 = vmatprep.subr.bf16.mxu0 %v4953_v3  ;;  %v5040_v3 = vcombine.low %v527_v52, %v531_v53  ;;  %v499_v35 = vld [vmem:[#allocation8 + $0x368] sm:$0xff] }
 0x16a   :  { %3711 = vmatprep.subr.bf16.mxu1 %v5081_v4  ;;  %v4905_v4 = vcombine.high %v391_v57, %v395_v59  ;;  %v623_v36 = vld [vmem:[#allocation8 + $0x748] sm:$0xff] }
 0x16b   :  { %3671 = vmatpush1.bf16.msra.mxu0 %v4952_v11  ;;  %v643_v11 = vld [vmem:[#allocation8 + $0x7e8] sm:$0xff] }
 0x16c   :  { %3712 = vmatpush1.bf16.msra.mxu1 %v5080_v13  ;;  %3672 = vmatprep.subr.bf16.mxu0 %v4945_v14  ;;  %v4904_v13 = vcombine.low %v391_v57, %v395_v59  ;;  %v5032_v14 = vcombine.low %v519_v60, %v523_v63  ;;  %v5153_v17 = vcombine.high %v639_v10, %v643_v11  ;;  %v487_v42 = vld [vmem:[#allocation8 + $0x308] sm:$0xff] }
 0x16d   :  { %3713 = vmatprep.subr.bf16.mxu1 %v5073_v16  ;;  %v5025_v16 = vcombine.high %v511_v8, %v515_v9  ;;  %v491_v43 = vld [vmem:[#allocation8 + $0x328] sm:$0xff] }
 0x16e   :  { %v615_v45 = vld [vmem:[#allocation8 + $0x708] sm:$0xff] }
 0x16f   :  { %3673 = vmatpush1.bf16.msra.mxu0 %v4944_v21  ;;  %v635_v21 = vld [vmem:[#allocation8 + $0x7a8] sm:$0xff] }
 0x170   :  { %3714 = vmatpush1.bf16.msra.mxu1 %v5072_v22  ;;  %3674 = vmatprep.subr.bf16.mxu0 %v4937_v23  ;;  %v5024_v22 = vcombine.low %v511_v8, %v515_v9  ;;  %v5152_v23 = vcombine.low %v639_v10, %v643_v11  ;;  %v5145_v27 = vcombine.high %v631_v20, %v635_v21  ;;  %v479_v51 = vld [vmem:[#allocation8 + $0x2c8] sm:$0xff] }
 0x171   :  { %3715 = vmatprep.subr.bf16.mxu1 %v5065_v26  ;;  %v5017_v26 = vcombine.high %v503_v18, %v507_v19  ;;  %v483_v52 = vld [vmem:[#allocation8 + $0x2e8] sm:$0xff] }
 0x172   :  { %v607_v53 = vld [vmem:[#allocation8 + $0x6c8] sm:$0xff] }
 0x173   :  { %3675 = vmatpush1.bf16.msra.mxu0 %v4936_v24  ;;  %v627_v24 = vld [vmem:[#allocation8 + $0x768] sm:$0xff] }
 0x174   :  { %3716 = vmatpush1.bf16.msra.mxu1 %v5064_v38  ;;  %3676 = vmatprep.subr.bf16.mxu0 %v4929_v39  ;;  %v5016_v38 = vcombine.low %v503_v18, %v507_v19  ;;  %v5144_v39 = vcombine.low %v631_v20, %v635_v21  ;;  %v5137_v41 = vcombine.high %v623_v36, %v627_v24  ;;  %v471_v59 = vld [vmem:[#allocation8 + $0x288] sm:$0xff] }
 0x175   :  { %3717 = vmatprep.subr.bf16.mxu1 %v5057_v40  ;;  %v5009_v40 = vcombine.high %v495_v34, %v499_v35  ;;  %v475_v60 = vld [vmem:[#allocation8 + $0x2a8] sm:$0xff] }
 0x176   :  { %v599_v63 = vld [vmem:[#allocation8 + $0x688] sm:$0xff] }
 0x177   :  { %3677 = vmatpush1.bf16.msra.mxu0 %v4928_v31  ;;  %v619_v31 = vld [vmem:[#allocation8 + $0x728] sm:$0xff] }
 0x178   :  { %3718 = vmatpush1.bf16.msra.mxu1 %v5056_v46  ;;  %3678 = vmatprep.subr.bf16.mxu0 %v4921_v47  ;;  %v5008_v46 = vcombine.low %v495_v34, %v499_v35  ;;  %v5136_v47 = vcombine.low %v623_v36, %v627_v24  ;;  %v5129_v50 = vcombine.high %v615_v45, %v619_v31  ;;  %v463_v9 = vld [vmem:[#allocation8 + $0x248] sm:$0xff] }
 0x179   :  { %3719 = vmatprep.subr.bf16.mxu1 %v5049_v49  ;;  %v5001_v49 = vcombine.high %v487_v42, %v491_v43  ;;  %v467_v10 = vld [vmem:[#allocation8 + $0x268] sm:$0xff] }
 0x17a   :  { %v591_v11 = vld [vmem:[#allocation8 + $0x648] sm:$0xff] }
 0x17b   :  { %3679 = vmatpush1.bf16.msra.mxu0 %v4920_v6  ;;  %v611_v6 = vld [vmem:[#allocation8 + $0x6e8] sm:$0xff] }
 0x17c   :  { %3720 = vmatpush1.bf16.msra.mxu1 %v5048_v54  ;;  %3680 = vmatprep.subr.bf16.mxu0 %v4913_v55  ;;  %v5000_v54 = vcombine.low %v487_v42, %v491_v43  ;;  %v5128_v55 = vcombine.low %v615_v45, %v619_v31  ;;  %v5121_v57 = vcombine.high %v607_v53, %v611_v6  ;;  %v455_v19 = vld [vmem:[#allocation8 + $0x208] sm:$0xff] }
 0x17d   :  { %3721 = vmatprep.subr.bf16.mxu1 %v5041_v56  ;;  %v4993_v56 = vcombine.high %v479_v51, %v483_v52  ;;  %v459_v20 = vld [vmem:[#allocation8 + $0x228] sm:$0xff] }
 0x17e   :  { %v583_v21 = vld [vmem:[#allocation8 + $0x608] sm:$0xff] }
 0x17f   :  { %3681 = vmatpush1.bf16.msra.mxu0 %v4912_v2  ;;  %v603_v2 = vld [vmem:[#allocation8 + $0x6a8] sm:$0xff] }
 0x180   :  { %3722 = vmatpush1.bf16.msra.mxu1 %v5040_v3  ;;  %3682 = vmatprep.subr.bf16.mxu0 %v4905_v4  ;;  %v4992_v3 = vcombine.low %v479_v51, %v483_v52  ;;  %v5120_v4 = vcombine.low %v607_v53, %v611_v6  ;;  %v5113_v8 = vcombine.high %v599_v63, %v603_v2  ;;  %v703_v35 = vld [vmem:[#allocation8 + $0x9c8] sm:$0xff] }
 0x181   :  { %3723 = vmatprep.subr.bf16.mxu1 %v5033_v7  ;;  %v4985_v7 = vcombine.high %v471_v59, %v475_v60  ;;  %v707_v36 = vld [vmem:[#allocation8 + $0x9e8] sm:$0xff] }
 0x182   :  { %v831_v24 = vld [vmem:[#allocation8 + $0xdc8] sm:$0xff]  ;;  %v5216_v31 = vcombine.low %v703_v35, %v707_v36 }
 0x183   :  { %3683 = vmatpush1.bf16.msra.mxu0 %v4904_v13  ;;  %v595_v13 = vld [vmem:[#allocation8 + $0x668] sm:$0xff] }
 0x184   :  { %3724 = vmatpush1.bf16.msra.mxu1 %v5032_v14  ;;  %3684 = vmatprep.subr.bf16.mxu0 %v5025_v16  ;;  %v4984_v14 = vcombine.low %v471_v59, %v475_v60  ;;  %v5112_v16 = vcombine.low %v599_v63, %v603_v2  ;;  %v5105_v18 = vcombine.high %v591_v11, %v595_v13  ;;  %v695_v43 = vld [vmem:[#allocation8 + $0x988] sm:$0xff] }
 0x185   :  { %3725 = vmatprep.subr.bf16.mxu1 %v5153_v17  ;;  %v4977_v17 = vcombine.high %v463_v9, %v467_v10  ;;  %v699_v45 = vld [vmem:[#allocation8 + $0x9a8] sm:$0xff] }
 0x186   :  { %v687_v51 = vld [vmem:[#allocation8 + $0x948] sm:$0xff] }
 0x187   :  { %3685 = vmatpush2.bf16.msra.mxu0 %v5024_v22  ;;  %v587_v22 = vld [vmem:[#allocation8 + $0x628] sm:$0xff] }
 0x188   :  { %3726 = vmatpush2.bf16.msra.mxu1 %v5152_v23  ;;  %3686 = vmatprep.subr.bf16.mxu0 %v5017_v26  ;;  %v4976_v23 = vcombine.low %v463_v9, %v467_v10  ;;  %v5104_v26 = vcombine.low %v591_v11, %v595_v13  ;;  %v5097_v34 = vcombine.high %v583_v21, %v587_v22  ;;  %v691_v52 = vld [vmem:[#allocation8 + $0x968] sm:$0xff] }
 0x189   :  { %3727 = vmatprep.subr.bf16.mxu1 %v5145_v27  ;;  %v4969_v27 = vcombine.high %v455_v19, %v459_v20  ;;  %v815_v6 = vld [vmem:[#allocation8 + $0xd48] sm:$0xff] }
 0x18a   :  { %v679_v60 = vld [vmem:[#allocation8 + $0x908] sm:$0xff] }
 0x18b   :  { %3687 = vmatpush2.bf16.msra.mxu0 %v5016_v38  ;;  %v835_v38 = vld [vmem:[#allocation8 + $0xde8] sm:$0xff] }
 0x18c   :  { %3728 = vmatpush2.bf16.msra.mxu1 %v5144_v39  ;;  %3688 = vmatprep.subr.bf16.mxu0 %v5009_v40  ;;  %v4968_v39 = vcombine.low %v455_v19, %v459_v20  ;;  %v5096_v40 = vcombine.low %v583_v21, %v587_v22  ;;  %v5345_v42 = vcombine.high %v831_v24, %v835_v38  ;;  %v683_v63 = vld [vmem:[#allocation8 + $0x928] sm:$0xff] }
 0x18d   :  { %3729 = vmatprep.subr.bf16.mxu1 %v5137_v41  ;;  %v5217_v41 = vcombine.high %v703_v35, %v707_v36  ;;  %v807_v2 = vld [vmem:[#allocation8 + $0xd08] sm:$0xff] }
 0x18e   :  { %v671_v10 = vld [vmem:[#allocation8 + $0x8c8] sm:$0xff] }
 0x18f   :  { %3689 = vmatpush2.bf16.msra.mxu0 %v5008_v46  ;;  %v823_v46 = vld [vmem:[#allocation8 + $0xd88] sm:$0xff] }
 0x190   :  { %3730 = vmatpush2.bf16.msra.mxu1 %v5136_v47  ;;  %3690 = vmatprep.subr.bf16.mxu0 %v5001_v49  ;;  %v827_v47 = vld [vmem:[#allocation8 + $0xda8] sm:$0xff]  ;;  %v5344_v49 = vcombine.low %v831_v24, %v835_v38 }
 0x191   :  { %3731 = vmatprep.subr.bf16.mxu1 %v5129_v50  ;;  %v5209_v50 = vcombine.high %v695_v43, %v699_v45  ;;  %v5337_v53 = vcombine.high %v823_v46, %v827_v47  ;;  %v675_v11 = vld [vmem:[#allocation8 + $0x8e8] sm:$0xff] }
 0x192   :  { %v799_v13 = vld [vmem:[#allocation8 + $0xcc8] sm:$0xff] }
 0x193   :  { %3691 = vmatpush2.bf16.msra.mxu0 %v5000_v54  ;;  %v819_v54 = vld [vmem:[#allocation8 + $0xd68] sm:$0xff] }
 0x194   :  { %3732 = vmatpush2.bf16.msra.mxu1 %v5128_v55  ;;  %3692 = vmatprep.subr.bf16.mxu0 %v4993_v56  ;;  %v5208_v55 = vcombine.low %v695_v43, %v699_v45  ;;  %v5336_v56 = vcombine.low %v823_v46, %v827_v47  ;;  %v5329_v59 = vcombine.high %v815_v6, %v819_v54  ;;  %v663_v20 = vld [vmem:[#allocation8 + $0x888] sm:$0xff] }
 0x195   :  { %3733 = vmatprep.subr.bf16.mxu1 %v5121_v57  ;;  %v5201_v57 = vcombine.high %v687_v51, %v691_v52  ;;  %v667_v21 = vld [vmem:[#allocation8 + $0x8a8] sm:$0xff] }
 0x196   :  { %v791_v22 = vld [vmem:[#allocation8 + $0xc88] sm:$0xff] }
 0x197   :  { %3693 = vmatpush2.bf16.msra.mxu0 %v4992_v3  ;;  %v811_v3 = vld [vmem:[#allocation8 + $0xd28] sm:$0xff] }
 0x198   :  { %3734 = vmatpush2.bf16.msra.mxu1 %v5120_v4  ;;  %3694 = vmatprep.subr.bf16.mxu0 %v4985_v7  ;;  %v5200_v4 = vcombine.low %v687_v51, %v691_v52  ;;  %v5328_v7 = vcombine.low %v815_v6, %v819_v54  ;;  %v5321_v9 = vcombine.high %v807_v2, %v811_v3  ;;  %v655_v36 = vld [vmem:[#allocation8 + $0x848] sm:$0xff] }
 0x199   :  { %3735 = vmatprep.subr.bf16.mxu1 %v5113_v8  ;;  %v5193_v8 = vcombine.high %v679_v60, %v683_v63  ;;  %v659_v24 = vld [vmem:[#allocation8 + $0x868] sm:$0xff] }
 0x19a   :  { %v783_v38 = vld [vmem:[#allocation8 + $0xc48] sm:$0xff] }
 0x19b   :  { %3695 = vmatpush2.bf16.msra.mxu0 %v4984_v14  ;;  %v803_v14 = vld [vmem:[#allocation8 + $0xce8] sm:$0xff] }
 0x19c   :  { %3736 = vmatpush2.bf16.msra.mxu1 %v5112_v16  ;;  %3696 = vmatprep.subr.bf16.mxu0 %v4977_v17  ;;  %v5192_v16 = vcombine.low %v679_v60, %v683_v63  ;;  %v5320_v17 = vcombine.low %v807_v2, %v811_v3  ;;  %v5313_v19 = vcombine.high %v799_v13, %v803_v14  ;;  %v647_v45 = vld [vmem:[#allocation8 + $0x808] sm:$0xff] }
 0x19d   :  { %3737 = vmatprep.subr.bf16.mxu1 %v5105_v18  ;;  %v5185_v18 = vcombine.high %v671_v10, %v675_v11  ;;  %v775_v46 = vld [vmem:[#allocation8 + $0xc08] sm:$0xff] }
 0x19e   :  { %v779_v47 = vld [vmem:[#allocation8 + $0xc28] sm:$0xff] }
 0x19f   :  { %3697 = vmatpush2.bf16.msra.mxu0 %v4976_v23  ;;  %v795_v23 = vld [vmem:[#allocation8 + $0xca8] sm:$0xff]  ;;  %v5289_v52 = vcombine.high %v775_v46, %v779_v47 }
 0x1a0   :  { %3738 = vmatpush2.bf16.msra.mxu1 %v5104_v26  ;;  %3698 = vmatprep.subr.bf16.mxu0 %v4969_v27  ;;  %v5184_v26 = vcombine.low %v671_v10, %v675_v11  ;;  %v5312_v27 = vcombine.low %v799_v13, %v803_v14  ;;  %v5305_v35 = vcombine.high %v791_v22, %v795_v23  ;;  %v771_v6 = vld [vmem:[#allocation8 + $0xbe8] sm:$0xff] }
 0x1a1   :  { %3739 = vmatprep.subr.bf16.mxu1 %v5097_v34  ;;  %v5177_v34 = vcombine.high %v663_v20, %v667_v21  ;;  %v895_v54 = vld [vmem:[#allocation8 + $0xfc8] sm:$0xff] }
 0x1a2   :  { %v759_v63 = vld [vmem:[#allocation8 + $0xb88] sm:$0xff] }
 0x1a3   :  { %3699 = vmatpush2.bf16.msra.mxu0 %v4968_v39  ;;  %v787_v39 = vld [vmem:[#allocation8 + $0xc68] sm:$0xff] }
 0x1a4   :  { %3740 = vmatpush2.bf16.msra.mxu1 %v5096_v40  ;;  %3750 = vmatprep.subr.bf16.mxu0 %v5217_v41  ;;  %v5176_v40 = vcombine.low %v663_v20, %v667_v21  ;;  %v5304_v41 = vcombine.low %v791_v22, %v795_v23  ;;  %v5297_v43 = vcombine.high %v783_v38, %v787_v39  ;;  %v763_v2 = vld [vmem:[#allocation8 + $0xba8] sm:$0xff] }
 0x1a5   :  { %3791 = vmatprep.subr.bf16.mxu1 %v5345_v42  ;;  %v5169_v42 = vcombine.high %v655_v36, %v659_v24  ;;  %v887_v3 = vld [vmem:[#allocation8 + $0xf88] sm:$0xff] }
 0x1a6   :  { %3701 = vmatmul.mubr.bf16.vlgmr.msra.gmra.mxu0 %v5959_v1  ;;  %v751_v11 = vld [vmem:[#allocation8 + $0xb48] sm:$0xff] }
 0x1a7   :  { %3742 = vmatmul.mubr.bf16.vlgmr.msra.gmra.mxu1 %v5947_v58  ;;  %3751 = vmatpush1.bf16.msra.mxu0 %v5216_v31  ;;  %v651_v31 = vld [vmem:[#allocation8 + $0x828] sm:$0xff] }
 0x1a8   :  { %3782 = vmatprep.mubr.bf16.mxu0 %v5969_v25  ;;  %3792 = vmatpush1.bf16.msra.mxu1 %v5344_v49  ;;  %v5168_v49 = vcombine.low %v655_v36, %v659_v24  ;;  %v5161_v51 = vcombine.high %v647_v45, %v651_v31  ;;  %v755_v13 = vld [vmem:[#allocation8 + $0xb68] sm:$0xff] }
 0x1a9   :  { %3823 = vmatprep.mubr.bf16.mxu1 %v5971_v37  ;;  %3752 = vmatprep.subr.bf16.mxu0 %v5209_v50  ;;  %v5296_v50 = vcombine.low %v783_v38, %v787_v39  ;;  %v879_v14 = vld [vmem:[#allocation8 + $0xf48] sm:$0xff] }
 0x1aa   :  { %3793 = vmatprep.subr.bf16.mxu1 %v5337_v53  ;;  %v767_v53 = vld [vmem:[#allocation8 + $0xbc8] sm:$0xff] }
 0x1ab   :  { %3753 = vmatpush1.bf16.msra.mxu0 %v5208_v55  ;;  %v899_v55 = vld [vmem:[#allocation8 + $0xfe8] sm:$0xff] }
 0x1ac   :  { %3794 = vmatpush1.bf16.msra.mxu1 %v5336_v56  ;;  %3754 = vmatprep.subr.bf16.mxu0 %v5201_v57  ;;  %v5160_v56 = vcombine.low %v647_v45, %v651_v31  ;;  %v5288_v57 = vcombine.low %v775_v46, %v779_v47  ;;  %v5409_v60 = vcombine.high %v895_v54, %v899_v55  ;;  %v743_v21 = vld [vmem:[#allocation8 + $0xb08] sm:$0xff] }
 0x1ad   :  { %3795 = vmatprep.subr.bf16.mxu1 %v5329_v59  ;;  %v5281_v59 = vcombine.high %v767_v53, %v771_v6  ;;  %v747_v22 = vld [vmem:[#allocation8 + $0xb28] sm:$0xff] }
 0x1ae   :  { %v871_v23 = vld [vmem:[#allocation8 + $0xf08] sm:$0xff] }
 0x1af   :  { %3755 = vmatpush1.bf16.msra.mxu0 %v5200_v4  ;;  %v891_v4 = vld [vmem:[#allocation8 + $0xfa8] sm:$0xff] }
 0x1b0   :  { %3796 = vmatpush1.bf16.msra.mxu1 %v5328_v7  ;;  %3756 = vmatprep.subr.bf16.mxu0 %v5193_v8  ;;  %v5280_v7 = vcombine.low %v767_v53, %v771_v6  ;;  %v5408_v8 = vcombine.low %v895_v54, %v899_v55  ;;  %v5401_v10 = vcombine.high %v887_v3, %v891_v4  ;;  %v735_v24 = vld [vmem:[#allocation8 + $0xac8] sm:$0xff] }
 0x1b1   :  { %3797 = vmatprep.subr.bf16.mxu1 %v5321_v9  ;;  %v5273_v9 = vcombine.high %v759_v63, %v763_v2  ;;  %v739_v38 = vld [vmem:[#allocation8 + $0xae8] sm:$0xff] }
 0x1b2   :  { %v863_v39 = vld [vmem:[#allocation8 + $0xec8] sm:$0xff] }
 0x1b3   :  { %3757 = vmatpush1.bf16.msra.mxu0 %v5192_v16  ;;  %v883_v16 = vld [vmem:[#allocation8 + $0xf68] sm:$0xff] }
 0x1b4   :  { %3798 = vmatpush1.bf16.msra.mxu1 %v5320_v17  ;;  %3758 = vmatprep.subr.bf16.mxu0 %v5185_v18  ;;  %v5272_v17 = vcombine.low %v759_v63, %v763_v2  ;;  %v5400_v18 = vcombine.low %v887_v3, %v891_v4  ;;  %v5393_v20 = vcombine.high %v879_v14, %v883_v16  ;;  %v727_v31 = vld [vmem:[#allocation8 + $0xa88] sm:$0xff] }
 0x1b5   :  { %3799 = vmatprep.subr.bf16.mxu1 %v5313_v19  ;;  %v5265_v19 = vcombine.high %v751_v11, %v755_v13  ;;  %v731_v46 = vld [vmem:[#allocation8 + $0xaa8] sm:$0xff] }
 0x1b6   :  { %v855_v47 = vld [vmem:[#allocation8 + $0xe88] sm:$0xff] }
 0x1b7   :  { %3759 = vmatpush1.bf16.msra.mxu0 %v5184_v26  ;;  %v875_v26 = vld [vmem:[#allocation8 + $0xf28] sm:$0xff] }
 0x1b8   :  { %3800 = vmatpush1.bf16.msra.mxu1 %v5312_v27  ;;  %3760 = vmatprep.subr.bf16.mxu0 %v5177_v34  ;;  %v5264_v27 = vcombine.low %v751_v11, %v755_v13  ;;  %v5392_v34 = vcombine.low %v879_v14, %v883_v16  ;;  %v5385_v36 = vcombine.high %v871_v23, %v875_v26  ;;  %v719_v6 = vld [vmem:[#allocation8 + $0xa48] sm:$0xff]  ;;  %v448_v13 = vld [vmem:[#allocation8 + $0x1d0] sm:$0xff] }
 0x1b9   :  { %3801 = vmatprep.subr.bf16.mxu1 %v5305_v35  ;;  %v5257_v35 = vcombine.high %v743_v21, %v747_v22  ;;  %v723_v54 = vld [vmem:[#allocation8 + $0xa68] sm:$0xff]  ;;  %v452_v14 = vld [vmem:[#allocation8 + $0x1f0] sm:$0xff] }
 0x1ba   :  { %v847_v55 = vld [vmem:[#allocation8 + $0xe48] sm:$0xff]  ;;  %v576_v16 = vld [vmem:[#allocation8 + $0x5d0] sm:$0xff] }
 0x1bb   :  { %3761 = vmatpush1.bf16.msra.mxu0 %v5176_v40  ;;  %v867_v40 = vld [vmem:[#allocation8 + $0xee8] sm:$0xff] }
 0x1bc   :  { %3802 = vmatpush1.bf16.msra.mxu1 %v5304_v41  ;;  %3762 = vmatprep.subr.bf16.mxu0 %v5169_v42  ;;  %v5256_v41 = vcombine.low %v743_v21, %v747_v22  ;;  %v5384_v42 = vcombine.low %v871_v23, %v875_v26  ;;  %v5377_v45 = vcombine.high %v863_v39, %v867_v40  ;;  %v711_v2 = vld [vmem:[#allocation8 + $0xa08] sm:$0xff]  ;;  %v5997_v21 = vld [vmem:[#allocation10] sm:$0xff]  ;;  %v440_v23 = vld [vmem:[#allocation8 + $0x190] sm:$0xff] }
 0x1bd   :  { %3803 = vmatprep.subr.bf16.mxu1 %v5297_v43  ;;  %v5249_v43 = vcombine.high %v735_v24, %v739_v38  ;;  %v715_v3 = vld [vmem:[#allocation8 + $0xa28] sm:$0xff]  ;;  %v444_v26 = vld [vmem:[#allocation8 + $0x1b0] sm:$0xff] }
 0x1be   :  { %v839_v4 = vld [vmem:[#allocation8 + $0xe08] sm:$0xff] }
 0x1bf   :  { %3763 = vmatpush1.bf16.msra.mxu0 %v5168_v49  ;;  %v859_v49 = vld [vmem:[#allocation8 + $0xea8] sm:$0xff] }
 0x1c0   :  { %3804 = vmatpush1.bf16.msra.mxu1 %v5296_v50  ;;  %3764 = vmatprep.subr.bf16.mxu0 %v5161_v51  ;;  %v5248_v50 = vcombine.low %v735_v24, %v739_v38  ;;  %v5376_v51 = vcombine.low %v863_v39, %v867_v40  ;;  %v5369_v53 = vcombine.high %v855_v47, %v859_v49  ;;  %v432_v40 = vld [vmem:[#allocation8 + $0x150] sm:$0xff] }
 0x1c1   :  { %3805 = vmatprep.subr.bf16.mxu1 %v5289_v52  ;;  %v5241_v52 = vcombine.high %v727_v31, %v731_v46  ;;  %v911_v38 = vrot.slane %v5997_v21, %v127_v32  ;;  %v4955_v39 = vcombine.high %v440_v23, %v444_v26 }
 0x1c3   :  { %3765 = vmatpush1.bf16.msra.mxu0 %v5160_v56  ;;  %v851_v56 = vld [vmem:[#allocation8 + $0xe68] sm:$0xff] }
 0x1c4   :  { %3806 = vmatpush1.bf16.msra.mxu1 %v5288_v57  ;;  %3766 = vmatprep.subr.bf16.mxu0 %v5281_v59  ;;  %v5240_v57 = vcombine.low %v727_v31, %v731_v46  ;;  %v5368_v59 = vcombine.low %v855_v47, %v859_v49  ;;  %v5361_v63 = vcombine.high %v847_v55, %v851_v56  ;;  %v560_v31 = vld [vmem:[#allocation8 + $0x550] sm:$0xff] }
 0x1c5   :  { %3807 = vmatprep.subr.bf16.mxu1 %v5409_v60  ;;  %v5233_v60 = vcombine.high %v719_v6, %v723_v54  ;;  %v4954_v47 = vcombine.low %v440_v23, %v444_v26  ;;  %v536_v23 = vld [vmem:[#allocation8 + $0x490] sm:$0xff] }
 0x1c6   :  { %v540_v26 = vld [vmem:[#allocation8 + $0x4b0] sm:$0xff] }
 0x1c7   :  { %3767 = vmatpush2.bf16.msra.mxu0 %v5280_v7  ;;  %v843_v7 = vld [vmem:[#allocation8 + $0xe28] sm:$0xff] }
 0x1c8   :  { %3808 = vmatpush2.bf16.msra.mxu1 %v5408_v8  ;;  %3768 = vmatprep.subr.bf16.mxu0 %v5273_v9  ;;  %v5232_v8 = vcombine.low %v719_v6, %v723_v54  ;;  %v5360_v9 = vcombine.low %v847_v55, %v851_v56  ;;  %v5353_v11 = vcombine.high %v839_v4, %v843_v7  ;;  %v424_v54 = vld [vmem:[#allocation8 + $0x110] sm:$0xff] }
 0x1c9   :  { %3809 = vmatprep.subr.bf16.mxu1 %v5401_v10  ;;  %v5225_v10 = vcombine.high %v711_v2, %v715_v3  ;;  %v428_v55 = vld [vmem:[#allocation8 + $0x130] sm:$0xff] }
 0x1cb   :  { %3769 = vmatpush2.bf16.msra.mxu0 %v5272_v17  ;;  %v580_v17 = vld [vmem:[#allocation8 + $0x5f0] sm:$0xff] }
 0x1cc   :  { %3810 = vmatpush2.bf16.msra.mxu1 %v5400_v18  ;;  %3770 = vmatprep.subr.bf16.mxu0 %v5265_v19  ;;  %v5224_v18 = vcombine.low %v711_v2, %v715_v3  ;;  %v5352_v19 = vcombine.low %v839_v4, %v843_v7  ;;  %v5091_v22 = vcombine.high %v576_v16, %v580_v17 }
 0x1cd   :  { %3811 = vmatprep.subr.bf16.mxu1 %v5393_v20  ;;  %v4963_v20 = vcombine.high %v448_v13, %v452_v14  ;;  %v5090_v24 = vcombine.low %v576_v16, %v580_v17  ;;  %v4938_v16 = vcombine.low %v424_v54, %v428_v55 }
 0x1cf   :  { %3771 = vmatpush2.bf16.msra.mxu0 %v5264_v27  ;;  %v4962_v27 = vcombine.low %v448_v13, %v452_v14  ;;  %v544_v13 = vld [vmem:[#allocation8 + $0x4d0] sm:$0xff] }
 0x1d0   :  { %3812 = vmatpush2.bf16.msra.mxu1 %v5392_v34  ;;  %3772 = vmatprep.subr.bf16.mxu0 %v5257_v35  ;;  %v907_v34 = vrot.slane %v5997_v21, %v123_v29  ;;  %v568_v35 = vld [vmem:[#allocation8 + $0x590] sm:$0xff] }
 0x1d1   :  { %3813 = vmatprep.subr.bf16.mxu1 %v5385_v36  ;;  %v572_v36 = vld [vmem:[#allocation8 + $0x5b0] sm:$0xff] }
 0x1d2   :  { %v564_v29 = vld [vmem:[#allocation8 + $0x570] sm:$0xff] }
 0x1d3   :  { %3773 = vmatpush2.bf16.msra.mxu0 %v5256_v41  ;;  %v436_v41 = vld [vmem:[#allocation8 + $0x170] sm:$0xff]  ;;  %v5075_v6 = vcombine.high %v560_v31, %v564_v29  ;;  %v5074_v7 = vcombine.low %v560_v31, %v564_v29 }
 0x1d4   :  { %3814 = vmatpush2.bf16.msra.mxu1 %v5384_v42  ;;  %3774 = vmatprep.subr.bf16.mxu0 %v5249_v43  ;;  %v4946_v2 = vcombine.low %v432_v40, %v436_v41  ;;  %v548_v14 = vld [vmem:[#allocation8 + $0x4f0] sm:$0xff] }
 0x1d5   :  { %3815 = vmatprep.subr.bf16.mxu1 %v5377_v45  ;;  %v5083_v45 = vcombine.high %v568_v35, %v572_v36  ;;  %v392_v31 = vld [vmem:[#allocation8 + $0x10] sm:$0xff] }
 0x1d6   :  { %v396_v29 = vld [vmem:[#allocation8 + $0x30] sm:$0xff] }
 0x1d7   :  { %3775 = vmatpush2.bf16.msra.mxu0 %v5248_v50  ;;  %v5082_v50 = vcombine.low %v568_v35, %v572_v36  ;;  %v5051_v36 = vcombine.high %v536_v23, %v540_v26 }
 0x1d8   :  { %3816 = vmatpush2.bf16.msra.mxu1 %v5376_v51  ;;  %3776 = vmatprep.subr.bf16.mxu0 %v5241_v52  ;;  %v4947_v51 = vcombine.high %v432_v40, %v436_v41  ;;  %v532_v40 = vld [vmem:[#allocation8 + $0x470] sm:$0xff] }
 0x1d9   :  { %3817 = vmatprep.subr.bf16.mxu1 %v5369_v53 }
 0x1db   :  { %3777 = vmatpush2.bf16.msra.mxu0 %v5240_v57 }
 0x1dc   :  { %3818 = vmatpush2.bf16.msra.mxu1 %v5368_v59  ;;  %3778 = vmatprep.subr.bf16.mxu0 %v5233_v60  ;;  %v552_v59 = vld [vmem:[#allocation8 + $0x510] sm:$0xff] }
 0x1dd   :  { %3819 = vmatprep.subr.bf16.mxu1 %v5361_v63  ;;  %v556_v60 = vld [vmem:[#allocation8 + $0x530] sm:$0xff] }
 0x1de   :  { %v5066_v17 = vcombine.low %v552_v59, %v556_v60 }
 0x1df   :  { %3779 = vmatpush2.bf16.msra.mxu0 %v5232_v8  ;;  %v4939_v8 = vcombine.high %v424_v54, %v428_v55  ;;  %v640_v54 = vld [vmem:[#allocation8 + $0x7d0] sm:$0xff] }
 0x1e0   :  { %3820 = vmatpush2.bf16.msra.mxu1 %v5360_v9  ;;  %3780 = vmatprep.subr.bf16.mxu0 %v5225_v10  ;;  %v5067_v9 = vcombine.high %v552_v59, %v556_v60  ;;  %v416_v10 = vld [vmem:[#allocation8 + $0xd0] sm:$0xff] }
 0x1e1   :  { %3821 = vmatprep.subr.bf16.mxu1 %v5353_v11  ;;  %v420_v11 = vld [vmem:[#allocation8 + $0xf0] sm:$0xff] }
 0x1e2   :  { %v644_v55 = vld [vmem:[#allocation8 + $0x7f0] sm:$0xff] }
 0x1e3   :  { %3781 = vmatpush2.bf16.msra.mxu0 %v5224_v18  ;;  %v4931_v18 = vcombine.high %v416_v10, %v420_v11  ;;  %v5155_v60 = vcombine.high %v640_v54, %v644_v55 }
 0x1e4   :  { %3822 = vmatpush2.bf16.msra.mxu1 %v5352_v19  ;;  %3832 = vmatprep.subr.bf16.mxu0 %v4963_v20  ;;  %v5059_v19 = vcombine.high %v544_v13, %v548_v14  ;;  %v408_v20 = vld [vmem:[#allocation8 + $0x90] sm:$0xff] }
 0x1e5   :  { %3873 = vmatprep.subr.bf16.mxu1 %v5091_v22  ;;  %v412_v22 = vld [vmem:[#allocation8 + $0xb0] sm:$0xff] }
 0x1e6   :  { %3783 = vmatmul.mubr.bf16.vlgmr.msra.gmra.mxu0 %v5987_v0  ;;  %v3538_v42 = vpop.f32.mrf.mxu0  ;;  %v4923_v35 = vcombine.high %v408_v20, %v412_v22  ;;  %v4922_v41 = vcombine.low %v408_v20, %v412_v22 }
 0x1e7   :  { %v3579_v43 = vpop.f32.mrf.mxu1  ;;  %3824 = vmatmul.mubr.bf16.vlgmr.msra.gmra.mxu1 %v5985_v5  ;;  %v3539_v46 = vadd.f32 %v3538_v42, %v907_v34  ;;  %3833 = vmatpush1.bf16.msra.mxu0 %v4962_v27  ;;  %v4930_v27 = vcombine.low %v416_v10, %v420_v11  ;;  %v5058_v34 = vcombine.low %v544_v13, %v548_v14  ;;  %v496_v13 = vld [vmem:[#allocation8 + $0x350] sm:$0xff] }
 0x1e8   :  { %3864 = vmatprep.mubr.bf16.mxu0 %v5949_v61  ;;  %3874 = vmatpush1.bf16.msra.mxu1 %v5090_v24  ;;  %v3540_v49 = vpop.f32.mrf.mxu0  ;;  %v400_v24 = vld [vmem:[#allocation8 + $0x50] sm:$0xff]  ;;  %v5050_v42 = vcombine.low %v536_v23, %v540_v26 }
 0x1e9   :  { %v3581_v32 = vpop.f32.mrf.mxu1  ;;  %v6008_v52 = vadd.f32 %v3579_v43, %v3539_v46  ;;  %3905 = vmatprep.mubr.bf16.mxu1 %v5951_v62  ;;  %v3541_v53 = vadd.f32 %v3540_v49, %v911_v38  ;;  %3834 = vmatprep.subr.bf16.mxu0 %v4955_v39  ;;  %v404_v38 = vld [vmem:[#allocation8 + $0x70] sm:$0xff] }
 0x1ea   :  { %3875 = vmatprep.subr.bf16.mxu1 %v5083_v45  ;;  %v3542_v56 = vpop.f32.mrf.mxu0  ;;  %v528_v39 = vld [vmem:[#allocation8 + $0x450] sm:$0xff]  ;;  %v4915_v43 = vcombine.high %v400_v24, %v404_v38  ;;  %v4914_v49 = vcombine.low %v400_v24, %v404_v38 }
 0x1eb   :  { %v3583_v57 = vpop.f32.mrf.mxu1  ;;  %v6011_v63 = vadd.f32 %v3581_v32, %v3541_v53  ;;  %3835 = vmatpush1.bf16.msra.mxu0 %v4954_v47  ;;  %v5043_v45 = vcombine.high %v528_v39, %v532_v40  ;;  %v520_v46 = vld [vmem:[#allocation8 + $0x410] sm:$0xff]  ;;  %v5042_v32 = vcombine.low %v528_v39, %v532_v40  ;;  %v4906_v56 = vcombine.low %v392_v31, %v396_v29 }
 0x1ec   :  { %3876 = vmatpush1.bf16.msra.mxu1 %v5082_v50  ;;  %v3543_v3 = vpop.f32.mrf.mxu0  ;;  %3836 = vmatprep.subr.bf16.mxu0 %v4947_v51  ;;  %v524_v47 = vld [vmem:[#allocation8 + $0x430] sm:$0xff]  ;;  %v4907_v50 = vcombine.high %v392_v31, %v396_v29 }
 0x1ed   :  { %v3584_v4 = vpop.f32.mrf.mxu1  ;;  %3877 = vmatprep.subr.bf16.mxu1 %v5075_v6  ;;  %v5035_v51 = vcombine.high %v520_v46, %v524_v47  ;;  %v512_v53 = vld [vmem:[#allocation8 + $0x3d0] sm:$0xff]  ;;  %v5034_v57 = vcombine.low %v520_v46, %v524_v47 }
 0x1ee   :  { %v516_v6 = vld [vmem:[#allocation8 + $0x3f0] sm:$0xff] }
 0x1ef   :  { %3837 = vmatpush1.bf16.msra.mxu0 %v4946_v2  ;;  %v5027_v59 = vcombine.high %v512_v53, %v516_v6  ;;  %v504_v2 = vld [vmem:[#allocation8 + $0x390] sm:$0xff] }
 0x1f0   :  { %3878 = vmatpush1.bf16.msra.mxu1 %v5074_v7  ;;  %3838 = vmatprep.subr.bf16.mxu0 %v4939_v8  ;;  %v508_v3 = vld [vmem:[#allocation8 + $0x3b0] sm:$0xff]  ;;  %v5026_v8 = vcombine.low %v512_v53, %v516_v6 }
 0x1f1   :  { %3879 = vmatprep.subr.bf16.mxu1 %v5067_v9  ;;  %v632_v4 = vld [vmem:[#allocation8 + $0x790] sm:$0xff]  ;;  %v5154_v9 = vcombine.low %v640_v54, %v644_v55  ;;  %v5019_v10 = vcombine.high %v504_v2, %v508_v3 }
 0x1f2   :  { %v636_v7 = vld [vmem:[#allocation8 + $0x7b0] sm:$0xff] }
 0x1f3   :  { %3839 = vmatpush1.bf16.msra.mxu0 %v4938_v16  ;;  %v5147_v11 = vcombine.high %v632_v4, %v636_v7  ;;  %v500_v14 = vld [vmem:[#allocation8 + $0x370] sm:$0xff] }
 0x1f4   :  { %3880 = vmatpush1.bf16.msra.mxu1 %v5066_v17  ;;  %3840 = vmatprep.subr.bf16.mxu0 %v4931_v18  ;;  %v624_v16 = vld [vmem:[#allocation8 + $0x750] sm:$0xff]  ;;  %v5018_v18 = vcombine.low %v504_v2, %v508_v3  ;;  %v5011_v20 = vcombine.high %v496_v13, %v500_v14 }
 0x1f5   :  { %3881 = vmatprep.subr.bf16.mxu1 %v5059_v19  ;;  %v628_v17 = vld [vmem:[#allocation8 + $0x770] sm:$0xff]  ;;  %v5146_v19 = vcombine.low %v632_v4, %v636_v7 }
 0x1f6   :  { %v5139_v22 = vcombine.high %v624_v16, %v628_v17  ;;  %v488_v23 = vld [vmem:[#allocation8 + $0x310] sm:$0xff] }
 0x1f7   :  { %3841 = vmatpush1.bf16.msra.mxu0 %v4930_v27  ;;  %v492_v26 = vld [vmem:[#allocation8 + $0x330] sm:$0xff] }
 0x1f8   :  { %3882 = vmatpush1.bf16.msra.mxu1 %v5058_v34  ;;  %3842 = vmatprep.subr.bf16.mxu0 %v4923_v35  ;;  %v616_v27 = vld [vmem:[#allocation8 + $0x710] sm:$0xff]  ;;  %v5010_v35 = vcombine.low %v496_v13, %v500_v14  ;;  %v5003_v24 = vcombine.high %v488_v23, %v492_v26 }
 0x1f9   :  { %3883 = vmatprep.subr.bf16.mxu1 %v5051_v36  ;;  %v620_v34 = vld [vmem:[#allocation8 + $0x730] sm:$0xff]  ;;  %v5138_v36 = vcombine.low %v624_v16, %v628_v17 }
 0x1fa   :  { %v5131_v38 = vcombine.high %v616_v27, %v620_v34  ;;  %v480_v39 = vld [vmem:[#allocation8 + $0x2d0] sm:$0xff] }
 0x1fb   :  { %3843 = vmatpush1.bf16.msra.mxu0 %v4922_v41  ;;  %v484_v40 = vld [vmem:[#allocation8 + $0x2f0] sm:$0xff] }
 0x1fc   :  { %3884 = vmatpush1.bf16.msra.mxu1 %v5050_v42  ;;  %3844 = vmatprep.subr.bf16.mxu0 %v4915_v43  ;;  %v608_v41 = vld [vmem:[#allocation8 + $0x6d0] sm:$0xff]  ;;  %v5002_v43 = vcombine.low %v488_v23, %v492_v26  ;;  %v4995_v31 = vcombine.high %v480_v39, %v484_v40 }
 0x1fd   :  { %3885 = vmatprep.subr.bf16.mxu1 %v5043_v45  ;;  %v612_v42 = vld [vmem:[#allocation8 + $0x6f0] sm:$0xff]  ;;  %v5130_v45 = vcombine.low %v616_v27, %v620_v34 }
 0x1fe   :  { %v5123_v29 = vcombine.high %v608_v41, %v612_v42  ;;  %v472_v46 = vld [vmem:[#allocation8 + $0x290] sm:$0xff] }
 0x1ff   :  { %3845 = vmatpush1.bf16.msra.mxu0 %v4914_v49  ;;  %v476_v47 = vld [vmem:[#allocation8 + $0x2b0] sm:$0xff] }
 0x200   :  { %3886 = vmatpush1.bf16.msra.mxu1 %v5042_v32  ;;  %3846 = vmatprep.subr.bf16.mxu0 %v4907_v50  ;;  %v600_v49 = vld [vmem:[#allocation8 + $0x690] sm:$0xff]  ;;  %v4994_v50 = vcombine.low %v480_v39, %v484_v40  ;;  %v4987_v53 = vcombine.high %v472_v46, %v476_v47 }
 0x201   :  { %3887 = vmatprep.subr.bf16.mxu1 %v5035_v51  ;;  %v604_v32 = vld [vmem:[#allocation8 + $0x6b0] sm:$0xff]  ;;  %v5122_v51 = vcombine.low %v608_v41, %v612_v42 }
 0x202   :  { %v5115_v6 = vcombine.high %v600_v49, %v604_v32  ;;  %v464_v54 = vld [vmem:[#allocation8 + $0x250] sm:$0xff] }
 0x203   :  { %3847 = vmatpush1.bf16.msra.mxu0 %v4906_v56  ;;  %v468_v55 = vld [vmem:[#allocation8 + $0x270] sm:$0xff] }
 0x204   :  { %3888 = vmatpush1.bf16.msra.mxu1 %v5034_v57  ;;  %3848 = vmatprep.subr.bf16.mxu0 %v5027_v59  ;;  %v592_v56 = vld [vmem:[#allocation8 + $0x650] sm:$0xff]  ;;  %v4986_v59 = vcombine.low %v472_v46, %v476_v47  ;;  %v4979_v2 = vcombine.high %v464_v54, %v468_v55 }
 0x205   :  { %3889 = vmatprep.subr.bf16.mxu1 %v5155_v60  ;;  %v596_v57 = vld [vmem:[#allocation8 + $0x670] sm:$0xff]  ;;  %v5114_v60 = vcombine.low %v600_v49, %v604_v32 }
 0x206   :  { %v5107_v3 = vcombine.high %v592_v56, %v596_v57  ;;  %v456_v4 = vld [vmem:[#allocation8 + $0x210] sm:$0xff] }
 0x207   :  { %3849 = vmatpush2.bf16.msra.mxu0 %v5026_v8  ;;  %v460_v7 = vld [vmem:[#allocation8 + $0x230] sm:$0xff] }
 0x208   :  { %3890 = vmatpush2.bf16.msra.mxu1 %v5154_v9  ;;  %3850 = vmatprep.subr.bf16.mxu0 %v5019_v10  ;;  %v584_v8 = vld [vmem:[#allocation8 + $0x610] sm:$0xff]  ;;  %v4978_v10 = vcombine.low %v464_v54, %v468_v55  ;;  %v4971_v13 = vcombine.high %v456_v4, %v460_v7 }
 0x209   :  { %3891 = vmatprep.subr.bf16.mxu1 %v5147_v11  ;;  %v588_v9 = vld [vmem:[#allocation8 + $0x630] sm:$0xff]  ;;  %v5106_v11 = vcombine.low %v592_v56, %v596_v57 }
 0x20a   :  { %v5099_v14 = vcombine.high %v584_v8, %v588_v9  ;;  %v704_v16 = vld [vmem:[#allocation8 + $0x9d0] sm:$0xff] }
 0x20b   :  { %3851 = vmatpush2.bf16.msra.mxu0 %v5018_v18  ;;  %v708_v17 = vld [vmem:[#allocation8 + $0x9f0] sm:$0xff] }
 0x20c   :  { %3892 = vmatpush2.bf16.msra.mxu1 %v5146_v19  ;;  %3852 = vmatprep.subr.bf16.mxu0 %v5011_v20  ;;  %v832_v18 = vld [vmem:[#allocation8 + $0xdd0] sm:$0xff]  ;;  %v4970_v20 = vcombine.low %v456_v4, %v460_v7  ;;  %v5219_v23 = vcombine.high %v704_v16, %v708_v17 }
 0x20d   :  { %3893 = vmatprep.subr.bf16.mxu1 %v5139_v22  ;;  %v836_v19 = vld [vmem:[#allocation8 + $0xdf0] sm:$0xff]  ;;  %v5098_v22 = vcombine.low %v584_v8, %v588_v9 }
 0x20e   :  { %v5347_v26 = vcombine.high %v832_v18, %v836_v19  ;;  %v696_v27 = vld [vmem:[#allocation8 + $0x990] sm:$0xff] }
 0x20f   :  { %3853 = vmatpush2.bf16.msra.mxu0 %v5010_v35  ;;  %v700_v34 = vld [vmem:[#allocation8 + $0x9b0] sm:$0xff]  ;;  %v5218_v35 = vcombine.low %v704_v16, %v708_v17 }
 0x210   :  { %3894 = vmatpush2.bf16.msra.mxu1 %v5138_v36  ;;  %3854 = vmatprep.subr.bf16.mxu0 %v5003_v24  ;;  %v824_v36 = vld [vmem:[#allocation8 + $0xd90] sm:$0xff]  ;;  %v5211_v39 = vcombine.high %v696_v27, %v700_v34  ;;  %v5210_v47 = vcombine.low %v696_v27, %v700_v34 }
 0x211   :  { %3895 = vmatprep.subr.bf16.mxu1 %v5131_v38  ;;  %v828_v24 = vld [vmem:[#allocation8 + $0xdb0] sm:$0xff]  ;;  %v5346_v38 = vcombine.low %v832_v18, %v836_v19 }
 0x212   :  { %v688_v40 = vld [vmem:[#allocation8 + $0x950] sm:$0xff] }
 0x213   :  { %3855 = vmatpush2.bf16.msra.mxu0 %v5002_v43  ;;  %v692_v41 = vld [vmem:[#allocation8 + $0x970] sm:$0xff] }
 0x214   :  { %3896 = vmatpush2.bf16.msra.mxu1 %v5130_v45  ;;  %3856 = vmatprep.subr.bf16.mxu0 %v4995_v31  ;;  %v5339_v45 = vcombine.high %v824_v36, %v828_v24  ;;  %v816_v31 = vld [vmem:[#allocation8 + $0xd50] sm:$0xff] }
 0x215   :  { %3897 = vmatprep.subr.bf16.mxu1 %v5123_v29  ;;  %v820_v29 = vld [vmem:[#allocation8 + $0xd70] sm:$0xff] }
 0x216   :  { %v5331_v54 = vcombine.high %v816_v31, %v820_v29  ;;  %v684_v55 = vld [vmem:[#allocation8 + $0x930] sm:$0xff]  ;;  %v5330_v8 = vcombine.low %v816_v31, %v820_v29 }
 0x217   :  { %3857 = vmatpush2.bf16.msra.mxu0 %v4994_v50  ;;  %v5338_v50 = vcombine.low %v824_v36, %v828_v24  ;;  %v656_v24 = vld [vmem:[#allocation8 + $0x850] sm:$0xff] }
 0x218   :  { %3898 = vmatpush2.bf16.msra.mxu1 %v5122_v51  ;;  %3858 = vmatprep.subr.bf16.mxu0 %v4987_v53  ;;  %v5203_v51 = vcombine.high %v688_v40, %v692_v41  ;;  %v648_v31 = vld [vmem:[#allocation8 + $0x810] sm:$0xff] }
 0x219   :  { %3899 = vmatprep.subr.bf16.mxu1 %v5115_v6  ;;  %v652_v29 = vld [vmem:[#allocation8 + $0x830] sm:$0xff] }
 0x21b   :  { %3859 = vmatpush2.bf16.msra.mxu0 %v4986_v59  ;;  %v808_v59 = vld [vmem:[#allocation8 + $0xd10] sm:$0xff] }
 0x21c   :  { %3900 = vmatpush2.bf16.msra.mxu1 %v5114_v60  ;;  %3860 = vmatprep.subr.bf16.mxu0 %v4979_v2  ;;  %v812_v60 = vld [vmem:[#allocation8 + $0xd30] sm:$0xff] }
 0x21d   :  { %3901 = vmatprep.subr.bf16.mxu1 %v5107_v3  ;;  %v5202_v3 = vcombine.low %v688_v40, %v692_v41  ;;  %v5322_v17 = vcombine.low %v808_v59, %v812_v60  ;;  %v788_v40 = vld [vmem:[#allocation8 + $0xc70] sm:$0xff] }
 0x21f   :  { %3861 = vmatpush2.bf16.msra.mxu0 %v4978_v10  ;;  %v672_v10 = vld [vmem:[#allocation8 + $0x8d0] sm:$0xff] }
 0x220   :  { %3902 = vmatpush2.bf16.msra.mxu1 %v5106_v11  ;;  %3862 = vmatprep.subr.bf16.mxu0 %v4971_v13  ;;  %v676_v11 = vld [vmem:[#allocation8 + $0x8f0] sm:$0xff] }
 0x221   :  { %3903 = vmatprep.subr.bf16.mxu1 %v5099_v14  ;;  %v800_v13 = vld [vmem:[#allocation8 + $0xcd0] sm:$0xff]  ;;  %v5187_v18 = vcombine.high %v672_v10, %v676_v11  ;;  %v5186_v27 = vcombine.low %v672_v10, %v676_v11 }
 0x222   :  { %v804_v14 = vld [vmem:[#allocation8 + $0xcf0] sm:$0xff] }
 0x223   :  { %3863 = vmatpush2.bf16.msra.mxu0 %v4970_v20  ;;  %v5315_v19 = vcombine.high %v800_v13, %v804_v14  ;;  %v664_v20 = vld [vmem:[#allocation8 + $0x890] sm:$0xff]  ;;  %v5314_v34 = vcombine.low %v800_v13, %v804_v14 }
 0x224   :  { %3904 = vmatpush2.bf16.msra.mxu1 %v5098_v22  ;;  %3914 = vmatprep.subr.bf16.mxu0 %v5219_v23  ;;  %v668_v22 = vld [vmem:[#allocation8 + $0x8b0] sm:$0xff] }
 0x225   :  { %3955 = vmatprep.subr.bf16.mxu1 %v5347_v26  ;;  %v792_v23 = vld [vmem:[#allocation8 + $0xc90] sm:$0xff]  ;;  %v5178_v41 = vcombine.low %v664_v20, %v668_v22 }
 0x226   :  { %v3620_v42 = vpop.f32.mrf.mxu0  ;;  %3865 = vmatmul.mubr.bf16.vlgmr.msra.gmra.mxu0 %v5959_v1  ;;  %v796_v26 = vld [vmem:[#allocation8 + $0xcb0] sm:$0xff] }
 0x227   :  { %v3661_v43 = vpop.f32.mrf.mxu1  ;;  %v3621_v46 = vadd.f32 %v3620_v42, %v6008_v52  ;;  %3906 = vmatmul.mubr.bf16.vlgmr.msra.gmra.mxu1 %v5947_v58  ;;  %3915 = vmatpush1.bf16.msra.mxu0 %v5218_v35  ;;  %v680_v52 = vld [vmem:[#allocation8 + $0x910] sm:$0xff]  ;;  %v5179_v35 = vcombine.high %v664_v20, %v668_v22  ;;  %v5307_v36 = vcombine.high %v792_v23, %v796_v26 }
 0x228   :  { %3946 = vmatprep.mubr.bf16.mxu0 %v5969_v25  ;;  %3956 = vmatpush1.bf16.msra.mxu1 %v5346_v38  ;;  %v3622_v49 = vpop.f32.mrf.mxu0  ;;  %v5195_v9 = vcombine.high %v680_v52, %v684_v55  ;;  %v5194_v16 = vcombine.low %v680_v52, %v684_v55  ;;  %v660_v38 = vld [vmem:[#allocation8 + $0x870] sm:$0xff]  ;;  %v5306_v42 = vcombine.low %v792_v23, %v796_v26 }
 0x229   :  { %v3663_v32 = vpop.f32.mrf.mxu1  ;;  %v6017_v53 = vadd.f32 %v3661_v43, %v3621_v46  ;;  %3987 = vmatprep.mubr.bf16.mxu1 %v5971_v37  ;;  %v3623_v6 = vadd.f32 %v3622_v49, %v6011_v63  ;;  %3916 = vmatprep.subr.bf16.mxu0 %v5211_v39  ;;  %v5323_v63 = vcombine.high %v808_v59, %v812_v60  ;;  %v784_v39 = vld [vmem:[#allocation8 + $0xc50] sm:$0xff] }
 0x22a   :  { %v3624_v56 = vpop.f32.mrf.mxu0  ;;  %3957 = vmatprep.subr.bf16.mxu1 %v5339_v45  ;;  %v5171_v43 = vcombine.high %v656_v24, %v660_v38  ;;  %v5299_v45 = vcombine.high %v784_v39, %v788_v40  ;;  %v776_v46 = vld [vmem:[#allocation8 + $0xc10] sm:$0xff]  ;;  %v5170_v49 = vcombine.low %v656_v24, %v660_v38 }
 0x22b   :  { %v3665_v57 = vpop.f32.mrf.mxu1  ;;  %v6021_v2 = vadd.f32 %v3663_v32, %v3623_v6  ;;  %3917 = vmatpush1.bf16.msra.mxu0 %v5210_v47  ;;  %v780_v47 = vld [vmem:[#allocation8 + $0xc30] sm:$0xff]  ;;  %v5298_v32 = vcombine.low %v784_v39, %v788_v40  ;;  %v5162_v56 = vcombine.low %v648_v31, %v652_v29 }
 0x22c   :  { %3958 = vmatpush1.bf16.msra.mxu1 %v5338_v50  ;;  %v3625_v4 = vpop.f32.mrf.mxu0  ;;  %3918 = vmatprep.subr.bf16.mxu0 %v5203_v51  ;;  %v5163_v50 = vcombine.high %v648_v31, %v652_v29  ;;  %v5291_v51 = vcombine.high %v776_v46, %v780_v47  ;;  %v768_v6 = vld [vmem:[#allocation8 + $0xbd0] sm:$0xff]  ;;  %v5290_v57 = vcombine.low %v776_v46, %v780_v47 }
 0x22d   :  { %v3666_v7 = vpop.f32.mrf.mxu1  ;;  %3959 = vmatprep.subr.bf16.mxu1 %v5331_v54  ;;  %v772_v54 = vld [vmem:[#allocation8 + $0xbf0] sm:$0xff] }
 0x22e   :  { %v896_v52 = vld [vmem:[#allocation8 + $0xfd0] sm:$0xff]  ;;  %v5283_v59 = vcombine.high %v768_v6, %v772_v54 }
 0x22f   :  { %3919 = vmatpush1.bf16.msra.mxu0 %v5202_v3  ;;  %v900_v55 = vld [vmem:[#allocation8 + $0xff0] sm:$0xff] }
 0x230   :  { %3960 = vmatpush1.bf16.msra.mxu1 %v5330_v8  ;;  %3920 = vmatprep.subr.bf16.mxu0 %v5195_v9  ;;  %v5411_v60 = vcombine.high %v896_v52, %v900_v55  ;;  %v760_v3 = vld [vmem:[#allocation8 + $0xb90] sm:$0xff]  ;;  %v5282_v9 = vcombine.low %v768_v6, %v772_v54 }
 0x231   :  { %3961 = vmatprep.subr.bf16.mxu1 %v5323_v63  ;;  %v764_v4 = vld [vmem:[#allocation8 + $0xbb0] sm:$0xff]  ;;  %v5410_v63 = vcombine.low %v896_v52, %v900_v55 }
 0x232   :  { %v888_v7 = vld [vmem:[#allocation8 + $0xf90] sm:$0xff]  ;;  %v5275_v10 = vcombine.high %v760_v3, %v764_v4 }
 0x233   :  { %3921 = vmatpush1.bf16.msra.mxu0 %v5194_v16  ;;  %v892_v8 = vld [vmem:[#allocation8 + $0xfb0] sm:$0xff] }
 0x234   :  { %3962 = vmatpush1.bf16.msra.mxu1 %v5322_v17  ;;  %3922 = vmatprep.subr.bf16.mxu0 %v5187_v18  ;;  %v5403_v11 = vcombine.high %v888_v7, %v892_v8  ;;  %v752_v13 = vld [vmem:[#allocation8 + $0xb50] sm:$0xff]  ;;  %v5274_v18 = vcombine.low %v760_v3, %v764_v4 }
 0x235   :  { %3963 = vmatprep.subr.bf16.mxu1 %v5315_v19  ;;  %v756_v14 = vld [vmem:[#allocation8 + $0xb70] sm:$0xff]  ;;  %v5402_v19 = vcombine.low %v888_v7, %v892_v8 }
 0x236   :  { %v880_v16 = vld [vmem:[#allocation8 + $0xf50] sm:$0xff]  ;;  %v5267_v20 = vcombine.high %v752_v13, %v756_v14 }
 0x237   :  { %3923 = vmatpush1.bf16.msra.mxu0 %v5186_v27  ;;  %v884_v17 = vld [vmem:[#allocation8 + $0xf70] sm:$0xff] }
 0x238   :  { %3964 = vmatpush1.bf16.msra.mxu1 %v5314_v34  ;;  %3924 = vmatprep.subr.bf16.mxu0 %v5179_v35  ;;  %v5395_v22 = vcombine.high %v880_v16, %v884_v17  ;;  %v744_v23 = vld [vmem:[#allocation8 + $0xb10] sm:$0xff]  ;;  %v5266_v35 = vcombine.low %v752_v13, %v756_v14 }
 0x239   :  { %3965 = vmatprep.subr.bf16.mxu1 %v5307_v36  ;;  %v748_v26 = vld [vmem:[#allocation8 + $0xb30] sm:$0xff]  ;;  %v5394_v36 = vcombine.low %v880_v16, %v884_v17  ;;  %v449_v16 = vld [vmem:[#allocation8 + $0x1d8] sm:$0xff] }
 0x23a   :  { %v872_v27 = vld [vmem:[#allocation8 + $0xf10] sm:$0xff]  ;;  %v5259_v24 = vcombine.high %v744_v23, %v748_v26  ;;  %v453_v17 = vld [vmem:[#allocation8 + $0x1f8] sm:$0xff] }
 0x23b   :  { %3925 = vmatpush1.bf16.msra.mxu0 %v5178_v41  ;;  %v876_v34 = vld [vmem:[#allocation8 + $0xf30] sm:$0xff] }
 0x23c   :  { %3966 = vmatpush1.bf16.msra.mxu1 %v5306_v42  ;;  %3926 = vmatprep.subr.bf16.mxu0 %v5171_v43  ;;  %v5387_v38 = vcombine.high %v872_v27, %v876_v34  ;;  %v736_v39 = vld [vmem:[#allocation8 + $0xad0] sm:$0xff]  ;;  %v5258_v43 = vcombine.low %v744_v23, %v748_v26  ;;  %v4965_v23 = vcombine.high %v449_v16, %v453_v17 }
 0x23d   :  { %3967 = vmatprep.subr.bf16.mxu1 %v5299_v45  ;;  %v740_v40 = vld [vmem:[#allocation8 + $0xaf0] sm:$0xff]  ;;  %v5386_v45 = vcombine.low %v872_v27, %v876_v34  ;;  %v441_v27 = vld [vmem:[#allocation8 + $0x198] sm:$0xff] }
 0x23e   :  { %v864_v41 = vld [vmem:[#allocation8 + $0xed0] sm:$0xff]  ;;  %v5251_v31 = vcombine.high %v736_v39, %v740_v40  ;;  %v445_v34 = vld [vmem:[#allocation8 + $0x1b8] sm:$0xff] }
 0x23f   :  { %3927 = vmatpush1.bf16.msra.mxu0 %v5170_v49  ;;  %v868_v42 = vld [vmem:[#allocation8 + $0xef0] sm:$0xff] }
 0x240   :  { %3968 = vmatpush1.bf16.msra.mxu1 %v5298_v32  ;;  %3928 = vmatprep.subr.bf16.mxu0 %v5163_v50  ;;  %v5379_v29 = vcombine.high %v864_v41, %v868_v42  ;;  %v728_v46 = vld [vmem:[#allocation8 + $0xa90] sm:$0xff]  ;;  %v5250_v50 = vcombine.low %v736_v39, %v740_v40  ;;  %v919_v40 = vrot.slane %v5997_v21, %v135_v33 }
 0x241   :  { %3969 = vmatprep.subr.bf16.mxu1 %v5291_v51  ;;  %v732_v47 = vld [vmem:[#allocation8 + $0xab0] sm:$0xff]  ;;  %v5378_v51 = vcombine.low %v864_v41, %v868_v42  ;;  %v4957_v41 = vcombine.high %v441_v27, %v445_v34  ;;  %v433_v42 = vld [vmem:[#allocation8 + $0x158] sm:$0xff] }
 0x242   :  { %v856_v49 = vld [vmem:[#allocation8 + $0xe90] sm:$0xff]  ;;  %v5243_v6 = vcombine.high %v728_v46, %v732_v47 }
 0x243   :  { %3929 = vmatpush1.bf16.msra.mxu0 %v5162_v56  ;;  %v860_v32 = vld [vmem:[#allocation8 + $0xeb0] sm:$0xff] }
 0x244   :  { %3970 = vmatpush1.bf16.msra.mxu1 %v5290_v57  ;;  %3930 = vmatprep.subr.bf16.mxu0 %v5283_v59  ;;  %v5371_v54 = vcombine.high %v856_v49, %v860_v32  ;;  %v720_v52 = vld [vmem:[#allocation8 + $0xa50] sm:$0xff]  ;;  %v5242_v59 = vcombine.low %v728_v46, %v732_v47 }
 0x245   :  { %3971 = vmatprep.subr.bf16.mxu1 %v5411_v60  ;;  %v724_v55 = vld [vmem:[#allocation8 + $0xa70] sm:$0xff]  ;;  %v5370_v60 = vcombine.low %v856_v49, %v860_v32  ;;  %v4956_v49 = vcombine.low %v441_v27, %v445_v34 }
 0x246   :  { %v848_v56 = vld [vmem:[#allocation8 + $0xe50] sm:$0xff]  ;;  %v5235_v3 = vcombine.high %v720_v52, %v724_v55 }
 0x247   :  { %3931 = vmatpush2.bf16.msra.mxu0 %v5282_v9  ;;  %v852_v57 = vld [vmem:[#allocation8 + $0xe70] sm:$0xff] }
 0x248   :  { %3972 = vmatpush2.bf16.msra.mxu1 %v5410_v63  ;;  %3932 = vmatprep.subr.bf16.mxu0 %v5275_v10  ;;  %v5363_v4 = vcombine.high %v848_v56, %v852_v57  ;;  %v712_v7 = vld [vmem:[#allocation8 + $0xa10] sm:$0xff]  ;;  %v5234_v10 = vcombine.low %v720_v52, %v724_v55  ;;  %v425_v52 = vld [vmem:[#allocation8 + $0x118] sm:$0xff] }
 0x249   :  { %3973 = vmatprep.subr.bf16.mxu1 %v5403_v11  ;;  %v716_v8 = vld [vmem:[#allocation8 + $0xa30] sm:$0xff]  ;;  %v5362_v11 = vcombine.low %v848_v56, %v852_v57  ;;  %v429_v55 = vld [vmem:[#allocation8 + $0x138] sm:$0xff] }
 0x24a   :  { %v840_v9 = vld [vmem:[#allocation8 + $0xe10] sm:$0xff]  ;;  %v5227_v13 = vcombine.high %v712_v7, %v716_v8  ;;  %v553_v57 = vld [vmem:[#allocation8 + $0x518] sm:$0xff] }
 0x24b   :  { %3933 = vmatpush2.bf16.msra.mxu0 %v5274_v18  ;;  %v844_v63 = vld [vmem:[#allocation8 + $0xe30] sm:$0xff]  ;;  %v577_v18 = vld [vmem:[#allocation8 + $0x5d8] sm:$0xff] }
 0x24c   :  { %3974 = vmatpush2.bf16.msra.mxu1 %v5402_v19  ;;  %3934 = vmatprep.subr.bf16.mxu0 %v5267_v20  ;;  %v5355_v14 = vcombine.high %v840_v9, %v844_v63  ;;  %v581_v19 = vld [vmem:[#allocation8 + $0x5f8] sm:$0xff]  ;;  %v5226_v20 = vcombine.low %v712_v7, %v716_v8 }
 0x24d   :  { %3975 = vmatprep.subr.bf16.mxu1 %v5395_v22  ;;  %v5354_v22 = vcombine.low %v840_v9, %v844_v63  ;;  %v5093_v26 = vcombine.high %v577_v18, %v581_v19  ;;  %v5092_v39 = vcombine.low %v577_v18, %v581_v19  ;;  %v417_v63 = vld [vmem:[#allocation8 + $0xd8] sm:$0xff] }
 0x24e   :  { %v409_v19 = vld [vmem:[#allocation8 + $0x98] sm:$0xff] }
 0x24f   :  { %3935 = vmatpush2.bf16.msra.mxu0 %v5266_v35  ;;  %v915_v35 = vrot.slane %v5997_v21, %v131_v30  ;;  %v565_v30 = vld [vmem:[#allocation8 + $0x578] sm:$0xff] }
 0x250   :  { %3976 = vmatpush2.bf16.msra.mxu1 %v5394_v36  ;;  %3936 = vmatprep.subr.bf16.mxu0 %v5259_v24  ;;  %v4964_v36 = vcombine.low %v449_v16, %v453_v17  ;;  %v569_v24 = vld [vmem:[#allocation8 + $0x598] sm:$0xff] }
 0x251   :  { %3977 = vmatprep.subr.bf16.mxu1 %v5387_v38  ;;  %v573_v38 = vld [vmem:[#allocation8 + $0x5b8] sm:$0xff] }
 0x252   :  { %v5084_v33 = vcombine.low %v569_v24, %v573_v38 }
 0x253   :  { %3937 = vmatpush2.bf16.msra.mxu0 %v5258_v43  ;;  %v437_v43 = vld [vmem:[#allocation8 + $0x178] sm:$0xff] }
 0x254   :  { %3978 = vmatpush2.bf16.msra.mxu1 %v5386_v45  ;;  %3938 = vmatprep.subr.bf16.mxu0 %v5251_v31  ;;  %v5085_v31 = vcombine.high %v569_v24, %v573_v38  ;;  %v4949_v21 = vcombine.high %v433_v42, %v437_v43  ;;  %v405_v24 = vld [vmem:[#allocation8 + $0x78] sm:$0xff] }
 0x255   :  { %3979 = vmatprep.subr.bf16.mxu1 %v5379_v29  ;;  %v561_v29 = vld [vmem:[#allocation8 + $0x558] sm:$0xff] }
 0x256   :  { %v5076_v7 = vcombine.low %v561_v29, %v565_v30  ;;  %v529_v38 = vld [vmem:[#allocation8 + $0x458] sm:$0xff] }
 0x257   :  { %3939 = vmatpush2.bf16.msra.mxu0 %v5250_v50 }
 0x258   :  { %3980 = vmatpush2.bf16.msra.mxu1 %v5378_v51  ;;  %3940 = vmatprep.subr.bf16.mxu0 %v5243_v6 }
 0x259   :  { %3981 = vmatprep.subr.bf16.mxu1 %v5371_v54  ;;  %v5077_v54 = vcombine.high %v561_v29, %v565_v30  ;;  %v521_v29 = vld [vmem:[#allocation8 + $0x418] sm:$0xff] }
 0x25a   :  { %v525_v30 = vld [vmem:[#allocation8 + $0x438] sm:$0xff] }
 0x25b   :  { %3941 = vmatpush2.bf16.msra.mxu0 %v5242_v59  ;;  %v557_v59 = vld [vmem:[#allocation8 + $0x538] sm:$0xff] }
 0x25c   :  { %3982 = vmatpush2.bf16.msra.mxu1 %v5370_v60  ;;  %3942 = vmatprep.subr.bf16.mxu0 %v5235_v3  ;;  %v4948_v3 = vcombine.low %v433_v42, %v437_v43  ;;  %v5069_v9 = vcombine.high %v553_v57, %v557_v59  ;;  %v5068_v16 = vcombine.low %v553_v57, %v557_v59  ;;  %v505_v57 = vld [vmem:[#allocation8 + $0x398] sm:$0xff] }
 0x25d   :  { %3983 = vmatprep.subr.bf16.mxu1 %v5363_v4  ;;  %v509_v59 = vld [vmem:[#allocation8 + $0x3b8] sm:$0xff] }
 0x25f   :  { %3943 = vmatpush2.bf16.msra.mxu0 %v5234_v10  ;;  %v421_v10 = vld [vmem:[#allocation8 + $0xf8] sm:$0xff] }
 0x260   :  { %3984 = vmatpush2.bf16.msra.mxu1 %v5362_v11  ;;  %3944 = vmatprep.subr.bf16.mxu0 %v5227_v13  ;;  %v545_v11 = vld [vmem:[#allocation8 + $0x4d8] sm:$0xff]  ;;  %v4933_v17 = vcombine.high %v417_v63, %v421_v10 }
 0x261   :  { %3985 = vmatprep.subr.bf16.mxu1 %v5355_v14  ;;  %v549_v13 = vld [vmem:[#allocation8 + $0x4f8] sm:$0xff]  ;;  %v4940_v14 = vcombine.low %v425_v52, %v429_v55 }
 0x262   :  { %v5061_v18 = vcombine.high %v545_v11, %v549_v13  ;;  %v5060_v27 = vcombine.low %v545_v11, %v549_v13  ;;  %v629_v11 = vld [vmem:[#allocation8 + $0x778] sm:$0xff]  ;;  %v5020_v13 = vcombine.low %v505_v57, %v509_v59 }
 0x263   :  { %3945 = vmatpush2.bf16.msra.mxu0 %v5226_v20  ;;  %v413_v20 = vld [vmem:[#allocation8 + $0xb8] sm:$0xff] }
 0x264   :  { %3986 = vmatpush2.bf16.msra.mxu1 %v5354_v22  ;;  %3996 = vmatprep.subr.bf16.mxu0 %v4965_v23  ;;  %v537_v22 = vld [vmem:[#allocation8 + $0x498] sm:$0xff]  ;;  %v4925_v34 = vcombine.high %v409_v19, %v413_v20 }
 0x265   :  { %4037 = vmatprep.subr.bf16.mxu1 %v5093_v26  ;;  %v541_v23 = vld [vmem:[#allocation8 + $0x4b8] sm:$0xff]  ;;  %v4932_v26 = vcombine.low %v417_v63, %v421_v10 }
 0x266   :  { %v3702_v45 = vpop.f32.mrf.mxu0  ;;  %3947 = vmatmul.mubr.bf16.vlgmr.msra.gmra.mxu0 %v5987_v0  ;;  %v501_v63 = vld [vmem:[#allocation8 + $0x378] sm:$0xff] }
 0x267   :  { %v3703_v46 = vadd.f32 %v3702_v45, %v915_v35  ;;  %v3743_v47 = vpop.f32.mrf.mxu1  ;;  %3988 = vmatmul.mubr.bf16.vlgmr.msra.gmra.mxu1 %v5985_v5  ;;  %3997 = vmatpush1.bf16.msra.mxu0 %v4964_v36  ;;  %v5053_v35 = vcombine.high %v537_v22, %v541_v23  ;;  %v401_v36 = vld [vmem:[#allocation8 + $0x58] sm:$0xff] }
 0x268   :  { %4028 = vmatprep.mubr.bf16.mxu0 %v5949_v61  ;;  %4038 = vmatpush1.bf16.msra.mxu1 %v5092_v39  ;;  %v3704_v32 = vpop.f32.mrf.mxu0  ;;  %v533_v39 = vld [vmem:[#allocation8 + $0x478] sm:$0xff]  ;;  %v4917_v42 = vcombine.high %v401_v36, %v405_v24 }
 0x269   :  { %v6032_v50 = vadd.f32 %v3743_v47, %v3703_v46  ;;  %4069 = vmatprep.mubr.bf16.mxu1 %v5951_v62  ;;  %v3705_v51 = vadd.f32 %v3704_v32, %v919_v40  ;;  %v3745_v6 = vpop.f32.mrf.mxu1  ;;  %3998 = vmatprep.subr.bf16.mxu0 %v4957_v41  ;;  %v4941_v62 = vcombine.high %v425_v52, %v429_v55  ;;  %v393_v45 = vld [vmem:[#allocation8 + $0x18] sm:$0xff] }
 0x26a   :  { %v3706_v56 = vpop.f32.mrf.mxu0  ;;  %4039 = vmatprep.subr.bf16.mxu1 %v5085_v31  ;;  %v4924_v40 = vcombine.low %v409_v19, %v413_v20  ;;  %v5052_v41 = vcombine.low %v537_v22, %v541_v23  ;;  %v5045_v43 = vcombine.high %v529_v38, %v533_v39  ;;  %v397_v31 = vld [vmem:[#allocation8 + $0x38] sm:$0xff]  ;;  %v4916_v46 = vcombine.low %v401_v36, %v405_v24 }
 0x26b   :  { %v6035_v60 = vadd.f32 %v3745_v6, %v3705_v51  ;;  %v3747_v61 = vpop.f32.mrf.mxu1  ;;  %3999 = vmatpush1.bf16.msra.mxu0 %v4956_v49  ;;  %v5044_v47 = vcombine.low %v529_v38, %v533_v39  ;;  %v4909_v49 = vcombine.high %v393_v45, %v397_v31  ;;  %v5037_v32 = vcombine.high %v521_v29, %v525_v30  ;;  %v641_v51 = vld [vmem:[#allocation8 + $0x7d8] sm:$0xff] }
 0x26c   :  { %4040 = vmatpush1.bf16.msra.mxu1 %v5084_v33  ;;  %v3707_v4 = vpop.f32.mrf.mxu0  ;;  %4000 = vmatprep.subr.bf16.mxu0 %v4949_v21  ;;  %v513_v33 = vld [vmem:[#allocation8 + $0x3d8] sm:$0xff]  ;;  %v5036_v52 = vcombine.low %v521_v29, %v525_v30 }
 0x26d   :  { %v3748_v8 = vpop.f32.mrf.mxu1  ;;  %4041 = vmatprep.subr.bf16.mxu1 %v5077_v54  ;;  %v517_v21 = vld [vmem:[#allocation8 + $0x3f8] sm:$0xff]  ;;  %v4908_v54 = vcombine.low %v393_v45, %v397_v31 }
 0x26e   :  { %v645_v6 = vld [vmem:[#allocation8 + $0x7f8] sm:$0xff]  ;;  %v5029_v55 = vcombine.high %v513_v33, %v517_v21  ;;  %v5028_v4 = vcombine.low %v513_v33, %v517_v21 }
 0x26f   :  { %4001 = vmatpush1.bf16.msra.mxu0 %v4948_v3  ;;  %v5157_v56 = vcombine.high %v641_v51, %v645_v6  ;;  %v633_v61 = vld [vmem:[#allocation8 + $0x798] sm:$0xff] }
 0x270   :  { %4042 = vmatpush1.bf16.msra.mxu1 %v5076_v7  ;;  %4002 = vmatprep.subr.bf16.mxu0 %v4941_v62  ;;  %v637_v3 = vld [vmem:[#allocation8 + $0x7b8] sm:$0xff]  ;;  %v5156_v7 = vcombine.low %v641_v51, %v645_v6  ;;  %v5021_v62 = vcombine.high %v505_v57, %v509_v59 }
 0x271   :  { %4043 = vmatprep.subr.bf16.mxu1 %v5069_v9  ;;  %v5149_v8 = vcombine.high %v633_v61, %v637_v3  ;;  %v497_v9 = vld [vmem:[#allocation8 + $0x358] sm:$0xff] }
 0x272   :  { %v625_v10 = vld [vmem:[#allocation8 + $0x758] sm:$0xff]  ;;  %v5012_v23 = vcombine.low %v497_v9, %v501_v63 }
 0x273   :  { %4003 = vmatpush1.bf16.msra.mxu0 %v4940_v14  ;;  %v5148_v14 = vcombine.low %v633_v61, %v637_v3  ;;  %v493_v19 = vld [vmem:[#allocation8 + $0x338] sm:$0xff] }
 0x274   :  { %4044 = vmatpush1.bf16.msra.mxu1 %v5068_v16  ;;  %4004 = vmatprep.subr.bf16.mxu0 %v4933_v17  ;;  %v5013_v16 = vcombine.high %v497_v9, %v501_v63  ;;  %v5141_v17 = vcombine.high %v625_v10, %v629_v11  ;;  %v617_v20 = vld [vmem:[#allocation8 + $0x718] sm:$0xff] }
 0x275   :  { %4045 = vmatprep.subr.bf16.mxu1 %v5061_v18  ;;  %v489_v18 = vld [vmem:[#allocation8 + $0x318] sm:$0xff] }
 0x276   :  { %v621_v22 = vld [vmem:[#allocation8 + $0x738] sm:$0xff]  ;;  %v5004_v39 = vcombine.low %v489_v18, %v493_v19 }
 0x277   :  { %4005 = vmatpush1.bf16.msra.mxu0 %v4932_v26  ;;  %v5140_v26 = vcombine.low %v625_v10, %v629_v11  ;;  %v485_v36 = vld [vmem:[#allocation8 + $0x2f8] sm:$0xff] }
 0x278   :  { %4046 = vmatpush1.bf16.msra.mxu1 %v5060_v27  ;;  %4006 = vmatprep.subr.bf16.mxu0 %v4925_v34  ;;  %v5005_v27 = vcombine.high %v489_v18, %v493_v19  ;;  %v5133_v34 = vcombine.high %v617_v20, %v621_v22  ;;  %v609_v24 = vld [vmem:[#allocation8 + $0x6d8] sm:$0xff] }
 0x279   :  { %4047 = vmatprep.subr.bf16.mxu1 %v5053_v35  ;;  %v481_v35 = vld [vmem:[#allocation8 + $0x2d8] sm:$0xff] }
 0x27a   :  { %v613_v38 = vld [vmem:[#allocation8 + $0x6f8] sm:$0xff]  ;;  %v4996_v30 = vcombine.low %v481_v35, %v485_v36 }
 0x27b   :  { %4007 = vmatpush1.bf16.msra.mxu0 %v4924_v40  ;;  %v5132_v40 = vcombine.low %v617_v20, %v621_v22  ;;  %v477_v45 = vld [vmem:[#allocation8 + $0x2b8] sm:$0xff] }
 0x27c   :  { %4048 = vmatpush1.bf16.msra.mxu1 %v5052_v41  ;;  %4008 = vmatprep.subr.bf16.mxu0 %v4917_v42  ;;  %v4997_v41 = vcombine.high %v481_v35, %v485_v36  ;;  %v5125_v42 = vcombine.high %v609_v24, %v613_v38  ;;  %v601_v31 = vld [vmem:[#allocation8 + $0x698] sm:$0xff] }
 0x27d   :  { %4049 = vmatprep.subr.bf16.mxu1 %v5045_v43  ;;  %v473_v43 = vld [vmem:[#allocation8 + $0x298] sm:$0xff] }
 0x27e   :  { %v605_v29 = vld [vmem:[#allocation8 + $0x6b8] sm:$0xff]  ;;  %v4988_v6 = vcombine.low %v473_v43, %v477_v45 }
 0x27f   :  { %4009 = vmatpush1.bf16.msra.mxu0 %v4916_v46  ;;  %v5124_v46 = vcombine.low %v609_v24, %v613_v38  ;;  %v469_v33 = vld [vmem:[#allocation8 + $0x278] sm:$0xff] }
 0x280   :  { %4050 = vmatpush1.bf16.msra.mxu1 %v5044_v47  ;;  %4010 = vmatprep.subr.bf16.mxu0 %v4909_v49  ;;  %v4989_v47 = vcombine.high %v473_v43, %v477_v45  ;;  %v5117_v49 = vcombine.high %v601_v31, %v605_v29  ;;  %v593_v21 = vld [vmem:[#allocation8 + $0x658] sm:$0xff] }
 0x281   :  { %4051 = vmatprep.subr.bf16.mxu1 %v5037_v32  ;;  %v465_v32 = vld [vmem:[#allocation8 + $0x258] sm:$0xff] }
 0x282   :  { %v597_v51 = vld [vmem:[#allocation8 + $0x678] sm:$0xff]  ;;  %v4980_v3 = vcombine.low %v465_v32, %v469_v33 }
 0x283   :  { %4011 = vmatpush1.bf16.msra.mxu0 %v4908_v54  ;;  %v5116_v54 = vcombine.low %v601_v31, %v605_v29  ;;  %v461_v57 = vld [vmem:[#allocation8 + $0x238] sm:$0xff] }
 0x284   :  { %4052 = vmatpush1.bf16.msra.mxu1 %v5036_v52  ;;  %4012 = vmatprep.subr.bf16.mxu0 %v5029_v55  ;;  %v4981_v52 = vcombine.high %v465_v32, %v469_v33  ;;  %v5109_v55 = vcombine.high %v593_v21, %v597_v51  ;;  %v585_v59 = vld [vmem:[#allocation8 + $0x618] sm:$0xff] }
 0x285   :  { %4053 = vmatprep.subr.bf16.mxu1 %v5157_v56  ;;  %v457_v56 = vld [vmem:[#allocation8 + $0x218] sm:$0xff] }
 0x286   :  { %v589_v61 = vld [vmem:[#allocation8 + $0x638] sm:$0xff]  ;;  %v4972_v11 = vcombine.low %v457_v56, %v461_v57 }
 0x287   :  { %4013 = vmatpush2.bf16.msra.mxu0 %v5028_v4  ;;  %v5108_v4 = vcombine.low %v593_v21, %v597_v51  ;;  %v709_v9 = vld [vmem:[#allocation8 + $0x9f8] sm:$0xff] }
 0x288   :  { %4054 = vmatpush2.bf16.msra.mxu1 %v5156_v7  ;;  %4014 = vmatprep.subr.bf16.mxu0 %v5021_v62  ;;  %v4973_v7 = vcombine.high %v457_v56, %v461_v57  ;;  %v5101_v62 = vcombine.high %v585_v59, %v589_v61  ;;  %v833_v63 = vld [vmem:[#allocation8 + $0xdd8] sm:$0xff] }
 0x289   :  { %4055 = vmatprep.subr.bf16.mxu1 %v5149_v8  ;;  %v705_v8 = vld [vmem:[#allocation8 + $0x9d8] sm:$0xff] }
 0x28a   :  { %v837_v10 = vld [vmem:[#allocation8 + $0xdf8] sm:$0xff]  ;;  %v5220_v19 = vcombine.low %v705_v8, %v709_v9 }
 0x28b   :  { %4015 = vmatpush2.bf16.msra.mxu0 %v5020_v13  ;;  %v5100_v13 = vcombine.low %v585_v59, %v589_v61  ;;  %v701_v18 = vld [vmem:[#allocation8 + $0x9b8] sm:$0xff] }
 0x28c   :  { %4056 = vmatpush2.bf16.msra.mxu1 %v5148_v14  ;;  %4016 = vmatprep.subr.bf16.mxu0 %v5013_v16  ;;  %v5221_v14 = vcombine.high %v705_v8, %v709_v9  ;;  %v5349_v16 = vcombine.high %v833_v63, %v837_v10  ;;  %v825_v20 = vld [vmem:[#allocation8 + $0xd98] sm:$0xff] }
 0x28d   :  { %4057 = vmatprep.subr.bf16.mxu1 %v5141_v17  ;;  %v697_v17 = vld [vmem:[#allocation8 + $0x998] sm:$0xff] }
 0x28e   :  { %v829_v22 = vld [vmem:[#allocation8 + $0xdb8] sm:$0xff] }
 0x28f   :  { %4017 = vmatpush2.bf16.msra.mxu0 %v5012_v23  ;;  %v5348_v23 = vcombine.low %v833_v63, %v837_v10  ;;  %v5341_v36 = vcombine.high %v825_v20, %v829_v22  ;;  %v817_v24 = vld [vmem:[#allocation8 + $0xd58] sm:$0xff]  ;;  %v5340_v43 = vcombine.low %v825_v20, %v829_v22 }
 0x290   :  { %4058 = vmatpush2.bf16.msra.mxu1 %v5140_v26  ;;  %4018 = vmatprep.subr.bf16.mxu0 %v5005_v27  ;;  %v5213_v26 = vcombine.high %v697_v17, %v701_v18  ;;  %v689_v27 = vld [vmem:[#allocation8 + $0x958] sm:$0xff] }
 0x291   :  { %4059 = vmatprep.subr.bf16.mxu1 %v5133_v34  ;;  %v693_v34 = vld [vmem:[#allocation8 + $0x978] sm:$0xff] }
 0x292   :  { %v821_v38 = vld [vmem:[#allocation8 + $0xd78] sm:$0xff]  ;;  %v5205_v45 = vcombine.high %v689_v27, %v693_v34 }
 0x293   :  { %4019 = vmatpush2.bf16.msra.mxu0 %v5004_v39  ;;  %v681_v29 = vld [vmem:[#allocation8 + $0x918] sm:$0xff]  ;;  %v5332_v33 = vcombine.low %v817_v24, %v821_v38 }
 0x294   :  { %4060 = vmatpush2.bf16.msra.mxu1 %v5132_v40  ;;  %4020 = vmatprep.subr.bf16.mxu0 %v4997_v41  ;;  %v5212_v41 = vcombine.low %v697_v17, %v701_v18  ;;  %v649_v22 = vld [vmem:[#allocation8 + $0x818] sm:$0xff] }
 0x295   :  { %4061 = vmatprep.subr.bf16.mxu1 %v5125_v42 }
 0x297   :  { %4021 = vmatpush2.bf16.msra.mxu0 %v4996_v30  ;;  %v685_v30 = vld [vmem:[#allocation8 + $0x938] sm:$0xff] }
 0x298   :  { %4062 = vmatpush2.bf16.msra.mxu1 %v5124_v46  ;;  %4022 = vmatprep.subr.bf16.mxu0 %v4989_v47  ;;  %v809_v46 = vld [vmem:[#allocation8 + $0xd18] sm:$0xff]  ;;  %v5197_v21 = vcombine.high %v681_v29, %v685_v30  ;;  %v5196_v56 = vcombine.low %v681_v29, %v685_v30 }
 0x299   :  { %4063 = vmatprep.subr.bf16.mxu1 %v5117_v49  ;;  %v813_v47 = vld [vmem:[#allocation8 + $0xd38] sm:$0xff]  ;;  %v5204_v49 = vcombine.low %v689_v27, %v693_v34 }
 0x29a   :  { %v5324_v57 = vcombine.low %v809_v46, %v813_v47  ;;  %v781_v27 = vld [vmem:[#allocation8 + $0xc38] sm:$0xff] }
 0x29b   :  { %4023 = vmatpush2.bf16.msra.mxu0 %v4988_v6  ;;  %v673_v6 = vld [vmem:[#allocation8 + $0x8d8] sm:$0xff] }
 0x29c   :  { %4064 = vmatpush2.bf16.msra.mxu1 %v5116_v54  ;;  %4024 = vmatprep.subr.bf16.mxu0 %v4981_v52  ;;  %v677_v54 = vld [vmem:[#allocation8 + $0x8f8] sm:$0xff] }
 0x29d   :  { %4065 = vmatprep.subr.bf16.mxu1 %v5109_v55  ;;  %v801_v52 = vld [vmem:[#allocation8 + $0xcd8] sm:$0xff]  ;;  %v5189_v59 = vcombine.high %v673_v6, %v677_v54  ;;  %v5188_v8 = vcombine.low %v673_v6, %v677_v54 }
 0x29e   :  { %v805_v55 = vld [vmem:[#allocation8 + $0xcf8] sm:$0xff] }
 0x29f   :  { %4025 = vmatpush2.bf16.msra.mxu0 %v4980_v3  ;;  %v5317_v61 = vcombine.high %v801_v52, %v805_v55  ;;  %v665_v3 = vld [vmem:[#allocation8 + $0x898] sm:$0xff]  ;;  %v5316_v9 = vcombine.low %v801_v52, %v805_v55 }
 0x2a0   :  { %4066 = vmatpush2.bf16.msra.mxu1 %v5108_v4  ;;  %4026 = vmatprep.subr.bf16.mxu0 %v4973_v7  ;;  %v669_v4 = vld [vmem:[#allocation8 + $0x8b8] sm:$0xff] }
 0x2a1   :  { %4067 = vmatprep.subr.bf16.mxu1 %v5101_v62  ;;  %v793_v7 = vld [vmem:[#allocation8 + $0xc98] sm:$0xff]  ;;  %v5181_v63 = vcombine.high %v665_v3, %v669_v4  ;;  %v5180_v17 = vcombine.low %v665_v3, %v669_v4 }
 0x2a2   :  { %v797_v62 = vld [vmem:[#allocation8 + $0xcb8] sm:$0xff] }
 0x2a3   :  { %4027 = vmatpush2.bf16.msra.mxu0 %v4972_v11  ;;  %v5309_v10 = vcombine.high %v793_v7, %v797_v62  ;;  %v657_v11 = vld [vmem:[#allocation8 + $0x858] sm:$0xff]  ;;  %v5308_v18 = vcombine.low %v793_v7, %v797_v62 }
 0x2a4   :  { %4068 = vmatpush2.bf16.msra.mxu1 %v5100_v13  ;;  %4078 = vmatprep.subr.bf16.mxu0 %v5221_v14  ;;  %v661_v13 = vld [vmem:[#allocation8 + $0x878] sm:$0xff] }
 0x2a5   :  { %4119 = vmatprep.subr.bf16.mxu1 %v5349_v16  ;;  %v785_v14 = vld [vmem:[#allocation8 + $0xc58] sm:$0xff]  ;;  %v5172_v34 = vcombine.low %v657_v11, %v661_v13 }
 0x2a6   :  { %v3784_v35 = vpop.f32.mrf.mxu0  ;;  %4029 = vmatmul.mubr.bf16.vlgmr.msra.gmra.mxu0 %v5959_v1  ;;  %v789_v16 = vld [vmem:[#allocation8 + $0xc78] sm:$0xff] }
 0x2a7   :  { %v3785_v39 = vadd.f32 %v3784_v35, %v6032_v50  ;;  %v3825_v40 = vpop.f32.mrf.mxu1  ;;  %4070 = vmatmul.mubr.bf16.vlgmr.msra.gmra.mxu1 %v5947_v58  ;;  %4079 = vmatpush1.bf16.msra.mxu0 %v5220_v19  ;;  %v5333_v50 = vcombine.high %v817_v24, %v821_v38  ;;  %v5173_v19 = vcombine.high %v657_v11, %v661_v13  ;;  %v769_v38 = vld [vmem:[#allocation8 + $0xbd8] sm:$0xff] }
 0x2a8   :  { %4110 = vmatprep.mubr.bf16.mxu0 %v5969_v25  ;;  %4120 = vmatpush1.bf16.msra.mxu1 %v5348_v23  ;;  %v6041_v42 = vpop.f32.mrf.mxu0  ;;  %v5301_v20 = vcombine.high %v785_v14, %v789_v16  ;;  %v653_v23 = vld [vmem:[#allocation8 + $0x838] sm:$0xff]  ;;  %v5300_v35 = vcombine.low %v785_v14, %v789_v16 }
 0x2a9   :  { %v6043_v31 = vadd.f32 %v3825_v40, %v3785_v39  ;;  %4151 = vmatprep.mubr.bf16.mxu1 %v5971_v37  ;;  %v6046_v1 = vpop.f32.mrf.mxu1  ;;  %4080 = vmatprep.subr.bf16.mxu0 %v5213_v26  ;;  %v5325_v37 = vcombine.high %v809_v46, %v813_v47  ;;  %v777_v26 = vld [vmem:[#allocation8 + $0xc18] sm:$0xff] }
 0x2aa   :  { %v3788_v58 = vpop.f32.mrf.mxu0  ;;  %4121 = vmatprep.subr.bf16.mxu1 %v5341_v36  ;;  %v5165_v36 = vcombine.high %v649_v22, %v653_v23  ;;  %v5293_v24 = vcombine.high %v777_v26, %v781_v27  ;;  %v773_v39 = vld [vmem:[#allocation8 + $0xbf8] sm:$0xff] }
 0x2ab   :  { %v3829_v25 = vpop.f32.mrf.mxu1  ;;  %4081 = vmatpush1.bf16.msra.mxu0 %v5212_v41  ;;  %v897_v40 = vld [vmem:[#allocation8 + $0xfd8] sm:$0xff] }
 0x2ac   :  { %4122 = vmatpush1.bf16.msra.mxu1 %v5340_v43  ;;  %v3789_v32 = vpop.f32.mrf.mxu0  ;;  %4082 = vmatprep.subr.bf16.mxu0 %v5205_v45  ;;  %v901_v41 = vld [vmem:[#allocation8 + $0xff8] sm:$0xff]  ;;  %v5164_v43 = vcombine.low %v649_v22, %v653_v23  ;;  %v5292_v45 = vcombine.low %v777_v26, %v781_v27  ;;  %v5284_v25 = vcombine.low %v769_v38, %v773_v39 }
 0x2ad   :  { %v3830_v51 = vpop.f32.mrf.mxu1  ;;  %4123 = vmatprep.subr.bf16.mxu1 %v5333_v50  ;;  %v5285_v50 = vcombine.high %v769_v38, %v773_v39  ;;  %v5413_v29 = vcombine.high %v897_v40, %v901_v41  ;;  %v761_v30 = vld [vmem:[#allocation8 + $0xb98] sm:$0xff] }
 0x2ae   :  { %v765_v58 = vld [vmem:[#allocation8 + $0xbb8] sm:$0xff] }
 0x2af   :  { %4083 = vmatpush1.bf16.msra.mxu0 %v5204_v49  ;;  %v889_v46 = vld [vmem:[#allocation8 + $0xf98] sm:$0xff]  ;;  %v5412_v49 = vcombine.low %v897_v40, %v901_v41  ;;  %v5277_v32 = vcombine.high %v761_v30, %v765_v58  ;;  %v5276_v54 = vcombine.low %v761_v30, %v765_v58  ;;  %v3787_v58 = vadd.f32 %v6041_v42, %v6035_v60 }
 0x2b0   :  { %4124 = vmatpush1.bf16.msra.mxu1 %v5332_v33  ;;  %4084 = vmatprep.subr.bf16.mxu0 %v5197_v21  ;;  %v893_v47 = vld [vmem:[#allocation8 + $0xfb8] sm:$0xff]  ;;  %v4161_v60 = vmax.f32 %v6021_v2, 0.0 }
 0x2b1   :  { %4125 = vmatprep.subr.bf16.mxu1 %v5325_v37  ;;  %v5405_v33 = vcombine.high %v889_v46, %v893_v47  ;;  %v753_v21 = vld [vmem:[#allocation8 + $0xb58] sm:$0xff]  ;;  %v5404_v52 = vcombine.low %v889_v46, %v893_v47 }
 0x2b2   :  { %v757_v51 = vld [vmem:[#allocation8 + $0xb78] sm:$0xff] }
 0x2b3   :  { %4085 = vmatpush1.bf16.msra.mxu0 %v5196_v56  ;;  %v881_v37 = vld [vmem:[#allocation8 + $0xf58] sm:$0xff]  ;;  %v5269_v55 = vcombine.high %v753_v21, %v757_v51  ;;  %v5268_v4 = vcombine.low %v753_v21, %v757_v51  ;;  %v5588_v51 = vld [vmem:[#allocation11 + $0x78] sm:$0xff]  }
 0x2b4   :  { %4126 = vmatpush1.bf16.msra.mxu1 %v5324_v57  ;;  %4086 = vmatprep.subr.bf16.mxu0 %v5189_v59  ;;  %v885_v6 = vld [vmem:[#allocation8 + $0xf78] sm:$0xff] }
 0x2b5   :  { %4127 = vmatprep.subr.bf16.mxu1 %v5317_v61  ;;  %v5397_v56 = vcombine.high %v881_v37, %v885_v6  ;;  %v745_v57 = vld [vmem:[#allocation8 + $0xb18] sm:$0xff]  ;;  %v5396_v7 = vcombine.low %v881_v37, %v885_v6  ;;  %v5589_v37 = vld [vmem:[#allocation11 + $0xf8] sm:$0xff]  }
 0x2b6   :  { %v749_v59 = vld [vmem:[#allocation8 + $0xb38] sm:$0xff]  ;;  %v5590_v6 = vld [vmem:[#allocation11 + $0x38] sm:$0xff]  }
 0x2b7   :  { %4087 = vmatpush1.bf16.msra.mxu0 %v5188_v8  ;;  %v873_v61 = vld [vmem:[#allocation8 + $0xf18] sm:$0xff]  ;;  %v5261_v62 = vcombine.high %v745_v57, %v749_v59  ;;  %v5260_v13 = vcombine.low %v745_v57, %v749_v59 }
 0x2b8   :  { %4128 = vmatpush1.bf16.msra.mxu1 %v5316_v9  ;;  %4088 = vmatprep.subr.bf16.mxu0 %v5181_v63  ;;  %v877_v3 = vld [vmem:[#allocation8 + $0xf38] sm:$0xff] }
 0x2b9   :  { %4129 = vmatprep.subr.bf16.mxu1 %v5309_v10  ;;  %v5389_v8 = vcombine.high %v873_v61, %v877_v3  ;;  %v737_v9 = vld [vmem:[#allocation8 + $0xad8] sm:$0xff]  ;;  %v5388_v14 = vcombine.low %v873_v61, %v877_v3 }
 0x2ba   :  { %v741_v63 = vld [vmem:[#allocation8 + $0xaf8] sm:$0xff] }
 0x2bb   :  { %4089 = vmatpush1.bf16.msra.mxu0 %v5180_v17  ;;  %v865_v10 = vld [vmem:[#allocation8 + $0xed8] sm:$0xff]  ;;  %v5253_v16 = vcombine.high %v737_v9, %v741_v63  ;;  %v5252_v23 = vcombine.low %v737_v9, %v741_v63  ;;  %v5598_v9 = vld [vmem:[#allocation11 + $0x28] sm:$0xff]  }
 0x2bc   :  { %4130 = vmatpush1.bf16.msra.mxu1 %v5308_v18  ;;  %4090 = vmatprep.subr.bf16.mxu0 %v5173_v19  ;;  %v869_v11 = vld [vmem:[#allocation8 + $0xef8] sm:$0xff]  ;;  %v5599_v63 = vld [vmem:[#allocation11 + $0xa8] sm:$0xff]  }
 0x2bd   :  { %4131 = vmatprep.subr.bf16.mxu1 %v5301_v20  ;;  %v5381_v17 = vcombine.high %v865_v10, %v869_v11  ;;  %v729_v18 = vld [vmem:[#allocation8 + $0xa98] sm:$0xff]  ;;  %v5380_v26 = vcombine.low %v865_v10, %v869_v11  ;;  %v5600_v10 = vld [vmem:[#allocation11 + $0x60] sm:$0xff]  }
 0x2be   :  { %v733_v19 = vld [vmem:[#allocation8 + $0xab8] sm:$0xff] }
 0x2bf   :  { %4091 = vmatpush1.bf16.msra.mxu0 %v5172_v34  ;;  %v857_v20 = vld [vmem:[#allocation8 + $0xe98] sm:$0xff]  ;;  %v5245_v27 = vcombine.high %v729_v18, %v733_v19  ;;  %v5244_v39 = vcombine.low %v729_v18, %v733_v19  ;;  %v5605_v18 = vld [vmem:[#allocation11 + $0xd8] sm:$0xff]  }
 0x2c0   :  { %4132 = vmatpush1.bf16.msra.mxu1 %v5300_v35  ;;  %4092 = vmatprep.subr.bf16.mxu0 %v5165_v36  ;;  %v861_v22 = vld [vmem:[#allocation8 + $0xeb8] sm:$0xff]  ;;  %v5606_v19 = vld [vmem:[#allocation11 + $0x18] sm:$0xff]  }
 0x2c1   :  { %4133 = vmatprep.subr.bf16.mxu1 %v5293_v24  ;;  %v5373_v34 = vcombine.high %v857_v20, %v861_v22  ;;  %v721_v35 = vld [vmem:[#allocation8 + $0xa58] sm:$0xff]  ;;  %v5372_v40 = vcombine.low %v857_v20, %v861_v22  ;;  %v5607_v20 = vld [vmem:[#allocation11 + $0x98] sm:$0xff]  }
 0x2c2   :  { %v725_v36 = vld [vmem:[#allocation8 + $0xa78] sm:$0xff] }
 0x2c3   :  { %4093 = vmatpush1.bf16.msra.mxu0 %v5164_v43  ;;  %v849_v24 = vld [vmem:[#allocation8 + $0xe58] sm:$0xff]  ;;  %v5237_v41 = vcombine.high %v721_v35, %v725_v36  ;;  %v5236_v46 = vcombine.low %v721_v35, %v725_v36  ;;  %v5613_v35 = vld [vmem:[#allocation11 + $0xc8] sm:$0xff]  }
 0x2c4   :  { %4134 = vmatpush1.bf16.msra.mxu1 %v5292_v45  ;;  %4094 = vmatprep.subr.bf16.mxu0 %v5285_v50  ;;  %v853_v38 = vld [vmem:[#allocation8 + $0xe78] sm:$0xff]  ;;  %v5614_v36 = vld [vmem:[#allocation11 + $0x8] sm:$0xff]  }
 0x2c5   :  { %4135 = vmatprep.subr.bf16.mxu1 %v5413_v29  ;;  %v5365_v43 = vcombine.high %v849_v24, %v853_v38  ;;  %v713_v45 = vld [vmem:[#allocation8 + $0xa18] sm:$0xff]  ;;  %v5364_v47 = vcombine.low %v849_v24, %v853_v38  ;;  %v5615_v24 = vld [vmem:[#allocation11 + $0x88] sm:$0xff]   ;;  %v5616_v38 = vld [vmem:[#allocation11 + $0x40] sm:$0xff]  }
 0x2c6   :  { %v717_v50 = vld [vmem:[#allocation8 + $0xa38] sm:$0xff] }
 0x2c7   :  { %4095 = vmatpush2.bf16.msra.mxu0 %v5284_v25  ;;  %v841_v29 = vld [vmem:[#allocation8 + $0xe18] sm:$0xff]  ;;  %v5229_v25 = vcombine.high %v713_v45, %v717_v50 }
 0x2c8   :  { %4136 = vmatpush2.bf16.msra.mxu1 %v5412_v49  ;;  %4096 = vmatprep.subr.bf16.mxu0 %v5277_v32  ;;  %v845_v30 = vld [vmem:[#allocation8 + $0xe38] sm:$0xff]  ;;  %v3828_v32 = vadd.f32 %v6046_v1, %v3787_v58 }
 0x2c9   :  { %4137 = vmatprep.subr.bf16.mxu1 %v5405_v33  ;;  %v5357_v49 = vcombine.high %v841_v29, %v845_v30  ;;  %v5228_v33 = vcombine.low %v713_v45, %v717_v50  ;;  %v5356_v21 = vcombine.low %v841_v29, %v845_v30  ;;  %v5594_v2 = vld [vmem:[#allocation11 + $0x30] sm:$0xff]   ;;  %v5620_v45 = vld [vmem:[#allocation11 + $0x178] sm:$0xff]   ;;  %v4162_v50 = vmax.f32 %v6043_v31, 0.0 }
 0x2ca   :  { %v4163_v42 = vmax.f32 %v3828_v32, 0.0  ;;  %v5595_v3 = vld [vmem:[#allocation11 + $0xb0] sm:$0xff]   ;;  %v5636_v29 = vld [vmem:[#allocation11 + $0x1f8] sm:$0xff]   ;;  %v5624_v32 = vld [vmem:[#allocation11 + $0x168] sm:$0xff]  }
 0x2cb   :  { %4097 = vmatpush2.bf16.msra.mxu0 %v5276_v54  ;;  %v5591_v54 = vld [vmem:[#allocation11 + $0xb8] sm:$0xff]   ;;  %v5608_v22 = vld [vmem:[#allocation11 + $0x50] sm:$0xff]  }
 0x2cc   :  { %4138 = vmatpush2.bf16.msra.mxu1 %v5404_v52  ;;  %4098 = vmatprep.subr.bf16.mxu0 %v5269_v55  ;;  %v5592_v52 = vld [vmem:[#allocation11 + $0x70] sm:$0xff]   ;;  %v4169_v55 = vpack.c.bf16 %v4161_v60, %v4161_v60  ;;  %v4171_v57 = vpack.c.bf16 %v4163_v42, %v4163_v42  ;;  %v5621_v30 = vld [vmem:[#allocation11 + $0x138] sm:$0xff]   ;;  %v5642_v60 = vld [vmem:[#allocation11 + $0x1e0] sm:$0xff]  }
 0x2cd   :  { %4139 = vmatprep.subr.bf16.mxu1 %v5397_v56  ;;  %v5593_v56 = vld [vmem:[#allocation11 + $0xf0] sm:$0xff]   ;;  %v5627_v42 = vld [vmem:[#allocation11 + $0x120] sm:$0xff]  }
 0x2ce   :  { %v5639_v31 = vld [vmem:[#allocation11 + $0x1b0] sm:$0xff]  }
 0x2cf   :  { %4099 = vmatpush2.bf16.msra.mxu0 %v5268_v4  ;;  %v5596_v4 = vld [vmem:[#allocation11 + $0x68] sm:$0xff]  }
 0x2d0   :  { %4140 = vmatpush2.bf16.msra.mxu1 %v5396_v7  ;;  %4100 = vmatprep.subr.bf16.mxu0 %v5261_v62  ;;  %v5597_v62 = vld [vmem:[#allocation11 + $0xe8] sm:$0xff]  }
 0x2d1   :  { %4141 = vmatprep.subr.bf16.mxu1 %v5389_v8 }
 0x2d3   :  { %4101 = vmatpush2.bf16.msra.mxu0 %v5260_v13  ;;  %v5601_v13 = vld [vmem:[#allocation11 + $0xe0] sm:$0xff]  }
 0x2d4   :  { %4142 = vmatpush2.bf16.msra.mxu1 %v5388_v14  ;;  %4102 = vmatprep.subr.bf16.mxu0 %v5253_v16  ;;  %v5602_v14 = vld [vmem:[#allocation11 + $0x20] sm:$0xff]  }
 0x2d5   :  { %4143 = vmatprep.subr.bf16.mxu1 %v5381_v17  ;;  %v5603_v16 = vld [vmem:[#allocation11 + $0xa0] sm:$0xff]   ;;  %v5604_v17 = vld [vmem:[#allocation11 + $0x58] sm:$0xff]  }
 0x2d7   :  { %4103 = vmatpush2.bf16.msra.mxu0 %v5252_v23  ;;  %v5609_v23 = vld [vmem:[#allocation11 + $0xd0] sm:$0xff]  }
 0x2d8   :  { %4144 = vmatpush2.bf16.msra.mxu1 %v5380_v26  ;;  %4104 = vmatprep.subr.bf16.mxu0 %v5245_v27  ;;  %v5610_v26 = vld [vmem:[#allocation11 + $0x10] sm:$0xff]  }
 0x2d9   :  { %4145 = vmatprep.subr.bf16.mxu1 %v5373_v34  ;;  %v5611_v27 = vld [vmem:[#allocation11 + $0x90] sm:$0xff]   ;;  %v5612_v34 = vld [vmem:[#allocation11 + $0x48] sm:$0xff]  }
 0x2db   :  { %4105 = vmatpush2.bf16.msra.mxu0 %v5244_v39  ;;  %v5617_v39 = vld [vmem:[#allocation11 + $0xc0] sm:$0xff]  }
 0x2dc   :  { %4146 = vmatpush2.bf16.msra.mxu1 %v5372_v40  ;;  %4106 = vmatprep.subr.bf16.mxu0 %v5237_v41  ;;  %v5618_v40 = vld [vmem:[#allocation11] sm:$0xff]   ;;  %v4160_v41 = vmax.f32 %v6017_v53, 0.0  ;;  %v5623_v53 = vld [vmem:[#allocation11 + $0x130] sm:$0xff]  }
 0x2dd   :  { %4147 = vmatprep.subr.bf16.mxu1 %v5365_v43  ;;  %v5619_v43 = vld [vmem:[#allocation11 + $0x80] sm:$0xff]  }
 0x2de   :  { %v4168_v58 = vpack.c.bf16 %v4160_v41, %v4160_v41 }
 0x2df   :  { %4107 = vmatpush2.bf16.msra.mxu0 %v5236_v46  ;;  %v5622_v46 = vld [vmem:[#allocation11 + $0x170] sm:$0xff]  }
 0x2e0   :  { %4148 = vmatpush2.bf16.msra.mxu1 %v5364_v47  ;;  %4108 = vmatprep.subr.bf16.mxu0 %v5229_v25  ;;  %v5637_v47 = vld [vmem:[#allocation11 + $0x1b8] sm:$0xff]   ;;  %v4170_v25 = vpack.c.bf16 %v4162_v50, %v4162_v50 }
 0x2e1   :  { %4149 = vmatprep.subr.bf16.mxu1 %v5357_v49  ;;  %v5638_v49 = vld [vmem:[#allocation11 + $0x1f0] sm:$0xff]  }
 0x2e3   :  { %4109 = vmatpush2.bf16.msra.mxu0 %v5228_v33  ;;  %v5640_v33 = vld [vmem:[#allocation11 + $0x1e8] sm:$0xff]  }
 0x2e4   :  { %4150 = vmatpush2.bf16.msra.mxu1 %v5356_v21  ;;  %5479 = vmatprep.subr.bf16.mxu0 %v5588_v51  ;;  %v5625_v21 = vld [vmem:[#allocation11 + $0x128] sm:$0xff]   ;;  %v5626_v51 = vld [vmem:[#allocation11 + $0x160] sm:$0xff]  }
 0x2e5   :  { %5501 = vmatprep.subr.bf16.mxu1 %v5589_v37  ;;  %v5641_v37 = vld [vmem:[#allocation11 + $0x1a8] sm:$0xff]  }
 0x2e6   :  { %v6052_v1 = vpop.f32.mrf.mxu0  ;;  %4111 = vmatmul.mubr.bf16.vlgmr.msra.gmra.mxu0 %v5987_v0 }
 0x2e7   :  { %v6055_v59 = vpop.f32.mrf.mxu1  ;;  %4152 = vmatmul.mubr.bf16.vlgmr.msra.gmra.mxu1 %v5985_v5  ;;  %5480 = vmatpush3.bf16.msra.mxu0 %v5590_v6  ;;  %v5628_v6 = vld [vmem:[#allocation11 + $0x158] sm:$0xff]  }
 0x2e8   :  { %4727 = vmatprep.mubr.bf16.mxu0 %v4169_v55  ;;  %5502 = vmatpush3.bf16.msra.mxu1 %v5591_v54  ;;  %v6058_v61 = vpop.f32.mrf.mxu0  ;;  %v5643_v54 = vld [vmem:[#allocation11 + $0x1a0] sm:$0xff]   ;;  %v5629_v55 = vld [vmem:[#allocation11 + $0x118] sm:$0xff]  }
 0x2e9   :  { %4767 = vmatprep.mubr.bf16.mxu1 %v4171_v57  ;;  %v6060_v7 = vpop.f32.mrf.mxu1  ;;  %5481 = vmatprep.subr.bf16.mxu0 %v5592_v52  ;;  %v5644_v52 = vld [vmem:[#allocation11 + $0x1d8] sm:$0xff]  }
 0x2ea   :  { %v3870_v0 = vpop.f32.mrf.mxu0  ;;  %5503 = vmatprep.subr.bf16.mxu1 %v5593_v56  ;;  %v5630_v56 = vld [vmem:[#allocation11 + $0x150] sm:$0xff]   ;;  %v5645_v57 = vld [vmem:[#allocation11 + $0x198] sm:$0xff]  }
 0x2eb   :  { %v3911_v8 = vpop.f32.mrf.mxu1  ;;  %5482 = vmatpush3.bf16.msra.mxu0 %v5594_v2  ;;  %v5631_v2 = vld [vmem:[#allocation11 + $0x110] sm:$0xff]   ;;  %v5656_v0 = vld [vmem:[#allocation10] sm:$0xff] }
 0x2ec   :  { %5504 = vmatpush3.bf16.msra.mxu1 %v5595_v3  ;;  %v3871_v5 = vpop.f32.mrf.mxu0  ;;  %5483 = vmatprep.subr.bf16.mxu0 %v5596_v4  ;;  %v5632_v3 = vld [vmem:[#allocation11 + $0x148] sm:$0xff]   ;;  %v923_v8 = vrot.slane %v5656_v0, %v139_v15  ;;  %v5647_v15 = vld [vmem:[#allocation11 + $0x190] sm:$0xff]  }
 0x2ed   :  { %v3912_v11 = vpop.f32.mrf.mxu1  ;;  %5505 = vmatprep.subr.bf16.mxu1 %v5597_v62  ;;  %v5633_v4 = vld [vmem:[#allocation11 + $0x108] sm:$0xff]   ;;  %v5634_v62 = vld [vmem:[#allocation11 + $0x140] sm:$0xff]  }
 0x2ee   :  { %v5635_v5 = vld [vmem:[#allocation11 + $0x100] sm:$0xff]  }
 0x2ef   :  { %5484 = vmatpush3.bf16.msra.mxu0 %v5598_v9  ;;  %v927_v9 = vrot.slane %v5656_v0, %v143_v44 }
 0x2f0   :  { %5506 = vmatpush3.bf16.msra.mxu1 %v5599_v63  ;;  %5485 = vmatprep.subr.bf16.mxu0 %v5600_v10  ;;  %v3867_v63 = vadd.f32 %v6052_v1, %v923_v8  ;;  %v5648_v1 = vld [vmem:[#allocation11 + $0x1c8] sm:$0xff]  }
 0x2f1   :  { %5507 = vmatprep.subr.bf16.mxu1 %v5601_v13  ;;  %v3869_v10 = vadd.f32 %v6058_v61, %v927_v9 }
 0x2f2   :  { %v3908_v11 = vadd.f32 %v6055_v59, %v3867_v63 }
 0x2f3   :  { %5486 = vmatpush3.bf16.msra.mxu0 %v5602_v14  ;;  %v5646_v14 = vld [vmem:[#allocation11 + $0x1d0] sm:$0xff]  }
 0x2f4   :  { %5508 = vmatpush3.bf16.msra.mxu1 %v5603_v16  ;;  %5487 = vmatprep.subr.bf16.mxu0 %v5604_v17  ;;  %v3910_v16 = vadd.f32 %v6060_v7, %v3869_v10  ;;  %v5650_v7 = vld [vmem:[#allocation11 + $0x1c0] sm:$0xff]  }
 0x2f5   :  { %5509 = vmatprep.subr.bf16.mxu1 %v5605_v18 }
 0x2f7   :  { %5488 = vmatpush3.bf16.msra.mxu0 %v5606_v19 }
 0x2f8   :  { %5510 = vmatpush3.bf16.msra.mxu1 %v5607_v20  ;;  %5489 = vmatprep.subr.bf16.mxu0 %v5608_v22 }
 0x2f9   :  { %5511 = vmatprep.subr.bf16.mxu1 %v5609_v23 }
 0x2fb   :  { %5490 = vmatpush3.bf16.msra.mxu0 %v5610_v26 }
 0x2fc   :  { %5512 = vmatpush3.bf16.msra.mxu1 %v5611_v27  ;;  %5491 = vmatprep.subr.bf16.mxu0 %v5612_v34  ;;  %v5649_v27 = vld [vmem:[#allocation11 + $0x188] sm:$0xff]  }
 0x2fd   :  { %5513 = vmatprep.subr.bf16.mxu1 %v5613_v35 }
 0x2ff   :  { %5492 = vmatpush3.bf16.msra.mxu0 %v5614_v36 }
 0x300   :  { %5514 = vmatpush3.bf16.msra.mxu1 %v5615_v24  ;;  %5493 = vmatprep.subr.bf16.mxu0 %v5616_v38  ;;  %v5651_v38 = vld [vmem:[#allocation11 + $0x180] sm:$0xff]  }
 0x301   :  { %5515 = vmatprep.subr.bf16.mxu1 %v5617_v39 }
 0x303   :  { %5494 = vmatpush3.bf16.msra.mxu0 %v5618_v40 }
 0x304   :  { %5516 = vmatpush3.bf16.msra.mxu1 %v5619_v43  ;;  %5523 = vmatprep.subr.bf16.mxu0 %v5620_v45 }
 0x305   :  { %5545 = vmatprep.subr.bf16.mxu1 %v5636_v29 }
 0x306   :  { %4728 = vmatmul.mubr.bf16.vlgmr.msra.gmra.mxu0 %v4168_v58 }
 0x307   :  { %4768 = vmatmul.mubr.bf16.vlgmr.msra.gmra.mxu1 %v4170_v25  ;;  %5524 = vmatpush3.bf16.msra.mxu0 %v5621_v30 }
 0x308   :  { %5525 = vmatprep.subr.bf16.mxu0 %v5622_v46  ;;  %5546 = vmatpush3.bf16.msra.mxu1 %v5637_v47  ;;  %v931_v46 = vrot.slane %v5656_v0, %v147_v12  ;;  %v935_v47 = vrot.slane %v5656_v0, %v151_v48 }
 0x309   :  { %5547 = vmatprep.subr.bf16.mxu1 %v5638_v49 }
 0x30b   :  { %5526 = vmatpush3.bf16.msra.mxu0 %v5623_v53 }
 0x30c   :  { %5527 = vmatprep.subr.bf16.mxu0 %v5624_v32  ;;  %5548 = vmatpush3.bf16.msra.mxu1 %v5639_v31 }
 0x30d   :  { %5549 = vmatprep.subr.bf16.mxu1 %v5640_v33 }
 0x30f   :  { %5528 = vmatpush3.bf16.msra.mxu0 %v5625_v21 }
 0x310   :  { %5529 = vmatprep.subr.bf16.mxu0 %v5626_v51  ;;  %5550 = vmatpush3.bf16.msra.mxu1 %v5641_v37 }
 0x311   :  { %5551 = vmatprep.subr.bf16.mxu1 %v5642_v60 }
 0x313   :  { %5530 = vmatpush3.bf16.msra.mxu0 %v5627_v42 }
 0x314   :  { %5531 = vmatprep.subr.bf16.mxu0 %v5628_v6  ;;  %5552 = vmatpush3.bf16.msra.mxu1 %v5643_v54 }
 0x315   :  { %5553 = vmatprep.subr.bf16.mxu1 %v5644_v52 }
 0x317   :  { %5532 = vmatpush3.bf16.msra.mxu0 %v5629_v55 }
 0x318   :  { %5533 = vmatprep.subr.bf16.mxu0 %v5630_v56  ;;  %5554 = vmatpush3.bf16.msra.mxu1 %v5645_v57 }
 0x319   :  { %5555 = vmatprep.subr.bf16.mxu1 %v5646_v14 }
 0x31b   :  { %5534 = vmatpush3.bf16.msra.mxu0 %v5631_v2 }
 0x31c   :  { %5535 = vmatprep.subr.bf16.mxu0 %v5632_v3  ;;  %5556 = vmatpush3.bf16.msra.mxu1 %v5647_v15 }
 0x31d   :  { %5557 = vmatprep.subr.bf16.mxu1 %v5648_v1 }
 0x31f   :  { %5536 = vmatpush3.bf16.msra.mxu0 %v5633_v4  ;;  %v5414_v4 = vld [vmem:[#allocation13] ss:$0 sm:$0xff] }
 0x320   :  { %5537 = vmatprep.subr.bf16.mxu0 %v5634_v62  ;;  %5558 = vmatpush3.bf16.msra.mxu1 %v5649_v27 }
 0x321   :  { %5559 = vmatprep.subr.bf16.mxu1 %v5650_v7 }
 0x323   :  { %5538 = vmatpush3.bf16.msra.mxu0 %v5635_v5 }
 0x324   :  { %5560 = vmatpush3.bf16.msra.mxu1 %v5651_v38 }
 0x326   :  { %v3948_v13 = vpop.f32.mrf.mxu0 }
 0x327   :  { %v3949_v17 = vadd.f32 %v3948_v13, %v3908_v11  ;;  %v3989_v18 = vpop.f32.mrf.mxu1 }
 0x328   :  { %v3950_v19 = vpop.f32.mrf.mxu0 }
 0x329   :  { %v3990_v44 = vadd.f32 %v3989_v18, %v3949_v17  ;;  %v3951_v20 = vadd.f32 %v3950_v19, %v3910_v16  ;;  %v3991_v22 = vpop.f32.mrf.mxu1 }
 0x32a   :  { %v3952_v23 = vpop.f32.mrf.mxu0 }
 0x32b   :  { %v3992_v26 = vadd.f32 %v3991_v22, %v3951_v20  ;;  %v3993_v61 = vpop.f32.mrf.mxu1  ;;  %v4164_v34 = vmax.f32 %v3990_v44, 0.0 }
 0x32c   :  { %v3953_v59 = vpop.f32.mrf.mxu0 }
 0x32d   :  { %v4165_v35 = vmax.f32 %v3992_v26, 0.0  ;;  %v3994_v36 = vpop.f32.mrf.mxu1  ;;  %v4172_v39 = vpack.c.bf16 %v4164_v34, %v4164_v34 }
 0x32f   :  { %v4173_v24 = vpack.c.bf16 %v4165_v35, %v4165_v35 }
 0x331   :  { %4807 = vmatprep.mubr.bf16.mxu0 %v4173_v24 }
 0x332   :  { %4808 = vmatmul.mubr.bf16.vlgmr.msra.gmra.mxu0 %v4172_v39 }
 0x366   :  { %v4030_v40 = vpop.f32.mrf.mxu0 }
 0x367   :  { %v4071_v41 = vpop.f32.mrf.mxu1  ;;  %v4031_v25 = vadd.f32 %v4030_v40, %v931_v46 }
 0x368   :  { %v4032_v43 = vpop.f32.mrf.mxu0 }
 0x369   :  { %v4073_v45 = vpop.f32.mrf.mxu1  ;;  %v4033_v49 = vadd.f32 %v4032_v43, %v935_v47  ;;  %v4072_v53 = vadd.f32 %v4071_v41, %v4031_v25 }
 0x36a   :  { %v4034_v50 = vpop.f32.mrf.mxu0 }
 0x36b   :  { %v4075_v29 = vpop.f32.mrf.mxu1  ;;  %v4074_v31 = vadd.f32 %v4073_v45, %v4033_v49 }
 0x36c   :  { %v4035_v30 = vpop.f32.mrf.mxu0 }
 0x36d   :  { %v4076_v58 = vpop.f32.mrf.mxu1 }
 0x3a6   :  { %v4112_v32 = vpop.f32.mrf.mxu0 }
 0x3a7   :  { %v4113_v33 = vadd.f32 %v4112_v32, %v4072_v53  ;;  %v4153_v21 = vpop.f32.mrf.mxu1 }
 0x3a8   :  { %v4114_v51 = vpop.f32.mrf.mxu0 }
 0x3a9   :  { %v4154_v37 = vadd.f32 %v4153_v21, %v4113_v33  ;;  %v4115_v60 = vadd.f32 %v4114_v51, %v4074_v31  ;;  %v4155_v42 = vpop.f32.mrf.mxu1 }
 0x3aa   :  { %v4116_v6 = vpop.f32.mrf.mxu0 }
 0x3ab   :  { %v4156_v54 = vadd.f32 %v4155_v42, %v4115_v60  ;;  %v4157_v52 = vpop.f32.mrf.mxu1  ;;  %v4166_v55 = vmax.f32 %v4154_v37, 0.0 }
 0x3ac   :  { %v4117_v56 = vpop.f32.mrf.mxu0 }
 0x3ad   :  { %v4167_v12 = vmax.f32 %v4156_v54, 0.0  ;;  %v4158_v57 = vpop.f32.mrf.mxu1  ;;  %v4174_v48 = vpack.c.bf16 %v4166_v55, %v4166_v55 }
 0x3af   :  { %v4175_v28 = vpack.c.bf16 %v4167_v12, %v4167_v12 }
 0x3b1   :  { %4847 = vmatprep.mubr.bf16.mxu1 %v4175_v28 }
 0x3b2   :  { %4848 = vmatmul.mubr.bf16.vlgmr.msra.gmra.mxu1 %v4174_v48 }
 0x3c6   :  { %v5495_v2 = vpop.f32.mrf.mxu0 }
 0x3c7   :  { %v5517_v3 = vpop.f32.mrf.mxu1 }
 0x3c8   :  { %v5496_v62 = vpop.f32.mrf.mxu0 }
 0x3c9   :  { %v5497_v0 = vadd.f32 %v5496_v62, %v5495_v2  ;;  %v5518_v8 = vpop.f32.mrf.mxu1 }
 0x3ca   :  { %v5519_v9 = vadd.f32 %v5518_v8, %v5517_v3  ;;  %v5498_v5 = vpop.f32.mrf.mxu0 }
 0x3cb   :  { %v4730_v63 = vadd.f32 %v5497_v0, %v5414_v4  ;;  %v5520_v10 = vpop.f32.mrf.mxu1 }
 0x3cc   :  { %v5499_v11 = vpop.f32.mrf.mxu0 }
 0x3cd   :  { %v4770_v13 = vadd.f32 %v5519_v9, %v4730_v63  ;;  %v5521_v14 = vpop.f32.mrf.mxu1 }
 0x3f2   :  { %v5539_v16 = vpop.f32.mrf.mxu0 }
 0x3f4   :  { %v5540_v17 = vpop.f32.mrf.mxu0 }
 0x3f5   :  { %v5541_v18 = vadd.f32 %v5540_v17, %v5539_v16 }
 0x3f6   :  { %v5542_v15 = vpop.f32.mrf.mxu0 }
 0x3f7   :  { %v4810_v19 = vadd.f32 %v5541_v18, %v4770_v13 }
 0x3f8   :  { %v5543_v44 = vpop.f32.mrf.mxu0 }
 0x472   :  { %v5561_v20 = vpop.f32.mrf.mxu1 }
 0x474   :  { %v5562_v22 = vpop.f32.mrf.mxu1 }
 0x475   :  { %v5563_v23 = vadd.f32 %v5562_v22, %v5561_v20 }
 0x476   :  { %v5564_v1 = vpop.f32.mrf.mxu1 }
 0x477   :  { %v4850_v26 = vadd.f32 %v5563_v23, %v4810_v19 }
 0x478   :  { %v5565_v61 = vpop.f32.mrf.mxu1 }
 0x479   :  { %v4856_v27 = vsel %vm4855_vm2, %v4850_v26, -inf }
 0x47a   :  { %4857 = vmax.xlane.f32.xlu0 %v4856_v27 }
 0x503   :  { %v4858_v34 = vpop.xlane.xlu0 %4857 }
 0x504   :  { %v4859_v59 = vsub.f32 %v4850_v26, %v4858_v34 }
 0x506   :  { %v4860_v35 = vmul.f32 1.442695, %v4859_v59 }
 0x508   :  { %5652 = vpow2.f32 %v4860_v35 }
 0x515   :  { %v5653_v36 = vpop.eup %5652 }
 0x516   :  { %v4862_v7 = vsel %vm4855_vm2, %v5653_v36, 0.0 }
 0x517   :  { %4863 = vadd.xlane.f32.xlu0 %v4862_v7 }
 0x5a0   :  { %v4864_v24 = vpop.xlane.xlu0 %4863 }
 0x5a1   :  { %5654 = vrcp.f32 %v4864_v24 }
 0x5ae   :  { %v5655_v38 = vpop.eup %5654 }
 0x5af   :  { %v4866_v39 = vmul.f32 %v5655_v38, %v5653_v36 }
 0x5b1   :  { %4867 = vst [vmem:[#allocation14] sm:$0x3] %v4866_v39 }
 0x5b2   :  { %5808 = shalt.err (!%p5805_p11)
}
 0x5b3   :  { %4877 = dma.vmem_to_hbm [thread:$0]  %s4875_s6, 32, %s6086_s7, [#allocation4]  }
 0x5b4   :  { %5825 = dma.done.wait [#allocation4], 32  }
 0x5b5   :  { %5826 = vsyncadd [#allocation4], 4294967264 }
 0x5b6   :  { %4881 = vsyncpa [#allocation3], 1 }
 0x5b7   :  { %4882 = vsyncpa [#allocation6], 1 }
 0x5b8   :  { %4883 = vsyncpa [#allocation9], 1 }
 0x5b9   :  { %4884 = vsyncpa [#allocation12], 1 }
 0x5ba   :  { %4885 = vsyncpa [#allocation4], 1 }

</bundles_post_ra>
